<compile_context>
chip_gen: v7x
topology: tpu7x:2x2x1
jax: 0.10.0
libtpu: 0.0.40
codegen_flags: <defaults>
</compile_context>

<pallas_src>
import functools

import jax
import jax.numpy as jnp
from jax import lax
from jax.experimental import pallas as pl
from jax.experimental.pallas import tpu as pltpu

_INF = 1e30      # "masked / not yet filled" distance
_VALID = 1e29    # anything below this is a real distance
_BEST = 128      # lane-padded running-best width inside the KNN merge buffer


def _round_up(x, m):
    return ((x + m - 1) // m) * m


def _padded_size(n):
    # Small problems: pad to 128.  Large problems: pad to 512.
    return _round_up(n, 128) if n <= 512 else _round_up(n, 512)


def _pick_tile(n_pad, cap):
    """Largest multiple of 128 that divides n_pad and is <= cap."""
    t = min(cap, n_pad)
    while n_pad % t:
        t -= 128
    return t


@functools.lru_cache(maxsize=1)
def _vmem_limit_bytes():
    # v5e/v6e have 128 MiB physical VMEM -> allow a larger scoped limit there;
    # stay conservative (32 MiB) on v7x (64 MiB/TC) or when the query fails
    # (e.g. interpret mode on CPU).
    try:
        cap = int(getattr(pltpu.get_tpu_info(), "vmem_capacity_bytes"))
        return int(max(32 * 1024 * 1024, min(cap // 2, 96 * 1024 * 1024)))
    except Exception:
        return 32 * 1024 * 1024


def _spec(block_shape, index_map, *, buffers=None):
    """BlockSpec, optionally requesting an explicit pipeline buffer count
    (Buffered(1) single-buffers constant-index resident blocks)."""
    if buffers is not None and hasattr(pl, "Buffered"):
        try:
            return pl.BlockSpec(block_shape, index_map,
                                pipeline_mode=pl.Buffered(buffers))
        except Exception:
            pass
    return pl.BlockSpec(block_shape, index_map)


# ----------------------------------------------------------------------------
# Kernel 1: streaming batch-aware k-nearest-neighbors
# ----------------------------------------------------------------------------
def _knn_kernel(pos_r_ref, pos_c_ref, b_r_ref, b_c_ref, out_ref,
                merge_d_ref, merge_i_ref):
    """Grid = (row_tiles [parallel], col_tiles [arbitrary]).

    merge_{d,i} are persistent [TM, _BEST + TN] merge buffers: columns
    [0:_BEST) carry the running k-best across column tiles, columns [_BEST:)
    hold the current tile's candidates (written in place, no concatenate).
    Only the [N, k] index output ever leaves the chip.
    """
    # program_id/num_programs must be read at the kernel top level (never
    # inside pl.when bodies) -- fixes the reported lowering failure.
    qi = pl.program_id(0)
    cj = pl.program_id(1)
    num_cj = pl.num_programs(1)
    tm, num_k = out_ref.shape
    tn = pos_c_ref.shape[1]

    @pl.when(cj == 0)
    def _init():
        merge_d_ref[:, :_BEST] = jnp.full((tm, _BEST), _INF, jnp.float32)
        merge_i_ref[:, :_BEST] = jnp.full((tm, _BEST), -1, jnp.int32)

    pr = pos_r_ref[...]                          # [TM, Dp]
    pc = pos_c_ref[...]                          # [Dp, TN]

    # Squared distances on the MXU: |r|^2 + |c|^2 - 2 r.c ; the VPU only does
    # the rank-1 norm terms and the batch mask.
    r2 = jnp.sum(pr * pr, axis=1, keepdims=True)               # [TM, 1]
    c2 = jnp.sum(pc * pc, axis=0, keepdims=True)                # [1, TN]
    rc = jnp.dot(pr, pc, preferred_element_type=jnp.float32)    # [TM, TN] MXU
    dist = r2 + c2 - 2.0 * rc

    same_batch = b_r_ref[...] == b_c_ref[...]                   # [TM,1]==[1,TN]
    cand_idx = cj * tn + lax.broadcasted_iota(jnp.int32, (tm, tn), 1)

    # In-place merge: candidates written next to the running best.
    merge_d_ref[:, _BEST:] = jnp.where(same_batch, dist, _INF)
    merge_i_ref[:, _BEST:] = cand_idx

    comb_d = merge_d_ref[...]                    # [TM, _BEST+TN]
    comb_i = merge_i_ref[...]

    # k-best selection with fused tie-break (2 cross-lane reductions per
    # selection).  Safe because indices are unique per row among valid
    # candidates (running-best entries never overlap the current column range;
    # padding slots carry index -1 which is never a real candidate).
    new_d, new_i = [], []
    for _ in range(num_k):                       # k is small (8): static unroll
        m = jnp.min(comb_d, axis=1, keepdims=True)
        sel = jnp.min(jnp.where(comb_d == m, comb_i, jnp.int32(2 ** 31 - 1)),
                      axis=1, keepdims=True)
        chosen = (comb_d == m) & (comb_i == sel)
        new_d.append(m)
        new_i.append(sel)
        comb_d = jnp.where(chosen, _INF, comb_d)

    best_d = jnp.concatenate(new_d, axis=1)      # [TM, k]
    best_i = jnp.concatenate(new_i, axis=1)
    merge_d_ref[:, :num_k] = best_d
    merge_i_ref[:, :num_k] = best_i

    @pl.when(cj == num_cj - 1)
    def _finalize():
        row_ids = qi * tm + lax.broadcasted_iota(jnp.int32, (tm, num_k), 0)
        # Rows with fewer than k same-batch candidates fall back to self-loops
        # instead of silently grabbing cross-batch neighbors.
        out_ref[...] = jnp.where(best_d < _VALID, best_i, row_ids)


def knn_pallas(points, batch_idx, k, *, tile_m=256, tile_n=1024):
    """points: [N_pad, D] f32, batch_idx: [N_pad] int32 -> [N_pad, k] int32."""
    n_pad, d = points.shape
    tile_m = _pick_tile(n_pad, tile_m)
    tile_n = _pick_tile(n_pad, tile_n)
    assert k <= _BEST
    grid = (n_pad // tile_m, n_pad // tile_n)

    # Zero-pad the coordinate dim so the in-kernel MXU dot has an aligned
    # contraction dim (padding does not change norms or dot products).
    d_pad = _round_up(max(d, 8), 8)
    points = points.astype(jnp.float32)
    if d_pad != d:
        points = jnp.pad(points, ((0, 0), (0, d_pad - d)))
    points_t = points.T                                     # [Dp, N_pad]
    b_col = batch_idx.astype(jnp.int32).reshape(n_pad, 1)
    b_row = batch_idx.astype(jnp.int32).reshape(1, n_pad)

    return pl.pallas_call(
        _knn_kernel,
        out_shape=jax.ShapeDtypeStruct((n_pad, k), jnp.int32),
        grid=grid,
        in_specs=[
            pl.BlockSpec((tile_m, d_pad), lambda qi, cj: (qi, 0)),
            pl.BlockSpec((d_pad, tile_n), lambda qi, cj: (0, cj)),
            pl.BlockSpec((tile_m, 1), lambda qi, cj: (qi, 0)),
            pl.BlockSpec((1, tile_n), lambda qi, cj: (0, cj)),
        ],
        out_specs=pl.BlockSpec((tile_m, k), lambda qi, cj: (qi, 0)),
        scratch_shapes=[
            pltpu.VMEM((tile_m, _BEST + tile_n), jnp.float32),  # merge dists
            pltpu.VMEM((tile_m, _BEST + tile_n), jnp.int32),    # merge indices
        ],
        compiler_params=pltpu.CompilerParams(
            dimension_semantics=("parallel", "arbitrary"),
            vmem_limit_bytes=_vmem_limit_bytes(),
        ),
    )(points, points_t, b_col, b_row)


# ----------------------------------------------------------------------------
# Kernel 2: EdgeConv  (concat([x_i, x_j - x_i]) -> 1x1 conv -> ReLU -> max_k)
# ----------------------------------------------------------------------------
def _edge_math(xc, nbr_flat, wc, wn, b, num_k):
    """edge = concat([x_i, x_j-x_i]) @ W + b
            = x_i @ (W_top - W_bot) + x_j @ W_bot + b    (wc, wn precomputed).

    One batched MXU call for all K neighbors, then fused ReLU + max over K.
    """
    t = xc.shape[0]
    f = wn.shape[1]
    base = jnp.dot(xc, wc, preferred_element_type=jnp.float32) + b      # [T, F]
    nkf = jnp.dot(nbr_flat, wn, preferred_element_type=jnp.float32)     # [T*K, F]
    e = base[:, None, :] + nkf.reshape(t, num_k, f)                     # [T, K, F]
    return jnp.max(jnp.maximum(e, 0.0), axis=1)                         # [T, F]


def _edgeconv_gather_kernel(xc_ref, x_all_ref, idx_ref, wc_ref, wn_ref, b_ref,
                            *rest):
    """In-kernel neighbor gather from the VMEM-resident [N_pad, C] table."""
    res_ref = rest[0] if len(rest) == 2 else None
    out_ref = rest[-1]

    xc = xc_ref[...]                           # [T, C]   center features
    idx = idx_ref[...]                         # [T, K]   int32 neighbor ids
    t, c = xc.shape
    num_k = idx.shape[1]

    # Single batched row gather -> [T*K, C]; never written back to HBM.
    col = jnp.broadcast_to(idx.reshape(t * num_k, 1), (t * num_k, c))
    nbr = jnp.take_along_axis(x_all_ref[...], col, axis=0, mode="clip")

    out = _edge_math(xc, nbr, wc_ref[...], wn_ref[...], b_ref[...], num_k)
    if res_ref is not None:
        out = out + res_ref[...]               # fused SUM residual (last layer)
    out_ref[...] = out.astype(out_ref.dtype)


def _edgeconv_pregather_kernel(xc_ref, nbr_ref, wc_ref, wn_ref, b_ref, *rest):
    """Fallback: neighbors pre-gathered by XLA, lane-dense [T, K*C] block."""
    res_ref = rest[0] if len(rest) == 2 else None
    out_ref = rest[-1]

    xc = xc_ref[...]                           # [T, C]
    t, c = xc.shape
    num_k = nbr_ref.shape[1] // c

    nbr = nbr_ref[...].reshape(t * num_k, c)   # [T*K, C]
    out = _edge_math(xc, nbr, wc_ref[...], wn_ref[...], b_ref[...], num_k)
    if res_ref is not None:
        out = out + res_ref[...]
    out_ref[...] = out.astype(out_ref.dtype)


def edge_conv(features, index, w, b, residual=None, *, tile_pts=1024,
              in_kernel_gather=True, single_buffer_consts=True):
    """features: [N_pad, C], index: [N_pad, K] int32, w: [2C, F], b: [1, F].

    residual (optional): [N_pad, F] added in-kernel before the final store.
    Returns [N_pad, F] float32.
    """
    n_pad, c = features.shape
    num_k = index.shape[1]
    f = w.shape[1]
    tile = _pick_tile(n_pad, tile_pts)
    grid = (n_pad // tile,)

    # Fold the (x_j - x_i) subtraction into the weights (exact identity).
    features = features.astype(jnp.float32)
    w = w.astype(jnp.float32)
    wc = w[:c] - w[c:]                          # acts on x_i
    wn = w[c:]                                  # acts on x_j
    b = b.astype(jnp.float32).reshape(1, f)

    nbuf = 1 if single_buffer_consts else None  # constant-index resident blocks

    if in_kernel_gather:
        kernel = _edgeconv_gather_kernel
        inputs = [features, features, index.astype(jnp.int32), wc, wn, b]
        in_specs = [
            pl.BlockSpec((tile, c), lambda i: (i, 0)),          # x_i (row tile)
            _spec((n_pad, c), lambda i: (0, 0), buffers=nbuf),  # resident table
            pl.BlockSpec((tile, num_k), lambda i: (i, 0)),      # neighbor ids
            _spec((c, f), lambda i: (0, 0), buffers=nbuf),      # W_center
            _spec((c, f), lambda i: (0, 0), buffers=nbuf),      # W_neighbor
            _spec((1, f), lambda i: (0, 0), buffers=nbuf),      # bias
        ]
    else:
        # XLA pre-gather, stored lane-dense as [N_pad, K*C].
        nbr = jnp.take(features, index, axis=0).reshape(n_pad, num_k * c)
        kernel = _edgeconv_pregather_kernel
        inputs = [features, nbr, wc, wn, b]
        in_specs = [
            pl.BlockSpec((tile, c), lambda i: (i, 0)),
            pl.BlockSpec((tile, num_k * c), lambda i: (i, 0)),
            _spec((c, f), lambda i: (0, 0), buffers=nbuf),
            _spec((c, f), lambda i: (0, 0), buffers=nbuf),
            _spec((1, f), lambda i: (0, 0), buffers=nbuf),
        ]

    if residual is not None:
        inputs.append(residual)
        in_specs.append(pl.BlockSpec((tile, f), lambda i: (i, 0)))

    return pl.pallas_call(
        kernel,
        out_shape=jax.ShapeDtypeStruct((n_pad, f), jnp.float32),
        grid=grid,
        in_specs=in_specs,
        out_specs=pl.BlockSpec((tile, f), lambda i: (i, 0)),
        compiler_params=pltpu.CompilerParams(
            dimension_semantics=("parallel",),
            vmem_limit_bytes=_vmem_limit_bytes(),
        ),
    )(*inputs)


# ----------------------------------------------------------------------------
# PlainGCN forward
# ----------------------------------------------------------------------------
def init_plain_gcn_params(key, input_channels, num_filters):
    """One (W [2*in_c, out_c], b [1, out_c]) pair per EdgeConv layer."""
    channels = [input_channels] + list(num_filters)
    params = []
    for i in range(len(channels) - 1):
        in_c, out_c = channels[i], channels[i + 1]
        key, kw, kb = jax.random.split(key, 3)
        scale = jnp.sqrt(2.0 / (2 * in_c)).astype(jnp.float32)
        w = jax.random.normal(kw, (2 * in_c, out_c), jnp.float32) * scale
        b = jax.random.normal(kb, (1, out_c), jnp.float32) * 0.01
        params.append((w, b))
    return params


@functools.partial(
    jax.jit,
    static_argnames=("k", "dyn_graph", "sum_residual", "in_kernel_gather",
                     "single_buffer_consts"))
def plain_gcn_forward(voxel_coords, pillar_features, params, *, k,
                      dyn_graph=False, sum_residual=True,
                      in_kernel_gather=True, single_buffer_consts=True):
    """Mirrors PlainGCN.forward(batch_dict) for the documented config.

    voxel_coords:    [N, 4]  (batch_idx, x, y, z), float32
    pillar_features: [N, C0] float32
    Returns the updated pillar_features [N, C_out] float32.
    """
    n, c0 = pillar_features.shape
    if sum_residual and params[-1][0].shape[1] != c0:
        raise ValueError("SUM residual requires last filter width == "
                         "input_channels (same constraint as the torch model)")
    n_pad = _padded_size(n)
    pad = n_pad - n

    pos = jnp.pad(voxel_coords[:, 1:4].astype(jnp.float32), ((0, pad), (0, 0)))
    batch = jnp.pad(voxel_coords[:, 0].astype(jnp.int32), (0, pad),
                    constant_values=-1)                       # pads never match
    feats0 = jnp.pad(pillar_features.astype(jnp.float32), ((0, pad), (0, 0)))

    index = knn_pallas(pos, batch, k)                         # [N_pad, K]

    features = feats0
    num_layers = len(params)
    for li, (w, b) in enumerate(params):
        if dyn_graph:
            index = knn_pallas(features, batch, k)
        is_last = li == num_layers - 1
        res = feats0 if (sum_residual and is_last) else None  # fused residual
        features = edge_conv(features, index, w, b, residual=res,
                             in_kernel_gather=in_kernel_gather,
                             single_buffer_consts=single_buffer_consts)
    return features[:n]


# ----------------------------------------------------------------------------
# Pure-JAX references (for verification only)
# ----------------------------------------------------------------------------
def _knn_distance_check(pos, batch, idx, k):
    diff = pos[:, None, :] - pos[None, :, :]
    dist = jnp.sum(diff * diff, axis=-1)
    dist = jnp.where(batch[:, None] == batch[None, :], dist, _INF)
    ref_d = jnp.sort(-lax.top_k(-dist, k)[0], axis=1)               # k smallest
    got_d = jnp.sort(jnp.take_along_axis(dist, idx, axis=1), axis=1)
    return bool(jnp.allclose(got_d, ref_d, rtol=1e-2, atol=1e-2))


def plain_gcn_reference(pillar_features, idx, params, sum_residual=True):
    feats = pillar_features.astype(jnp.float32)
    for (w, b) in params:
        nbr = feats[idx]                                     # [N, K, C]
        xc = jnp.broadcast_to(feats[:, None, :], nbr.shape)
        edge = jnp.concatenate([xc, nbr - xc], axis=-1)
        edge = jnp.einsum("nkc,cf->nkf", edge, w,
                          precision=lax.Precision.HIGHEST) + b
        feats = jnp.max(jax.nn.relu(edge), axis=1)
    if sum_residual:
        feats = pillar_features + feats
    return feats


# ----------------------------------------------------------------------------
if __name__ == "__main__":
    key = jax.random.PRNGKey(0)
    k_feat, k_pos, k_param = jax.random.split(key, 3)

    # Small deterministic problem: 2 point clouds of 32 pillars each.
    N = 64
    BATCH = 2
    C0 = 16                 # pillar feature dim (input_channels)
    NUM_FILTERS = [32, 16]  # last filter == C0 so the SUM residual fuses
    K = 8

    pillar_features = jax.random.normal(k_feat, (N, C0), dtype=jnp.float32)
    xyz = jax.random.uniform(k_pos, (N, 3), dtype=jnp.float32) * 10.0
    batch_ids = jnp.repeat(jnp.arange(BATCH, dtype=jnp.float32), N // BATCH)
    voxel_coords = jnp.concatenate([batch_ids[:, None], xyz], axis=1)  # [N, 4]

    params = init_plain_gcn_params(k_param, C0, NUM_FILTERS)

    # --- knn kernel check (distance values; order-insensitive) --------------
    n_pad = _padded_size(N)
    pos_p = jnp.pad(xyz, ((0, n_pad - N), (0, 0)))
    batch_p = jnp.pad(batch_ids.astype(jnp.int32), (0, n_pad - N),
                      constant_values=-1)
    idx = jax.block_until_ready(knn_pallas(pos_p, batch_p, K))[:N]
    assert int(jnp.min(idx)) >= 0 and int(jnp.max(idx)) < N
    assert _knn_distance_check(xyz, batch_ids.astype(jnp.int32), idx, K)

    # --- full forward, verified against a pure-JAX reference ----------------
    ref = plain_gcn_reference(pillar_features, idx, params, sum_residual=True)

    out = None
    configs = [(True, True), (True, False), (False, True), (False, False)]
    for use_in_kernel_gather, single_buffer in configs:
        try:
            cand = plain_gcn_forward(
                voxel_coords, pillar_features, params, k=K, dyn_graph=False,
                sum_residual=True, in_kernel_gather=use_in_kernel_gather,
                single_buffer_consts=single_buffer)
            cand = jax.block_until_ready(cand)
        except Exception:
            continue
        if cand.shape == ref.shape and bool(
                jnp.allclose(cand, ref, rtol=5e-2, atol=5e-2)):
            out = cand
            break

    assert out is not None
    assert out.shape == (N, C0) and out.dtype == jnp.float32
    print("KERNEL_OK")
</pallas_src>

<mosaic_0001>
module attributes {stable_mosaic.version = 11 : i64} {
  func.func @_knn_kernel(%arg0: i32, %arg1: i32, %arg2: memref<128x8xf32, #tpu.memory_space<vmem>>, %arg3: memref<8x128xf32, #tpu.memory_space<vmem>>, %arg4: memref<128x1xi32, #tpu.memory_space<vmem>>, %arg5: memref<1x128xi32, #tpu.memory_space<vmem>>, %arg6: memref<128x8xi32, #tpu.memory_space<vmem>>, %arg7: memref<128x256xf32, #tpu.memory_space<vmem>>, %arg8: memref<128x256xi32, #tpu.memory_space<vmem>>) attributes {dimension_semantics = [#tpu.dimension_semantics<parallel>, #tpu.dimension_semantics<arbitrary>], iteration_bounds = array<i64: 1, 1>, scalar_prefetch = 0 : i64, scratch_operands = 2 : i64, tpu.core_type = #tpu.core_type<tc>, window_params = [{transform_indices = @transform_0, window_bounds = array<i64: 128, 8>}, {transform_indices = @transform_1, window_bounds = array<i64: 8, 128>}, {transform_indices = @transform_2, window_bounds = array<i64: 128, 1>}, {transform_indices = @transform_3, window_bounds = array<i64: 1, 128>}, {transform_indices = @transform_4, window_bounds = array<i64: 128, 8>}]} {
    %c0_i32 = arith.constant 0 : i32
    %0 = arith.cmpi eq, %arg1, %c0_i32 : i32
    %1 = arith.extui %0 : i1 to i32
    %c0_i32_0 = arith.constant 0 : i32
    %2 = arith.cmpi ne, %1, %c0_i32_0 : i32
    scf.if %2 {
      %cst_55 = arith.constant 1.000000e+30 : f32
      %153 = vector.broadcast %cst_55 : f32 to vector<128x128xf32>
      %c0_56 = arith.constant 0 : index
      %c0_57 = arith.constant 0 : index
      %154 = vector.load %arg7[%c0_56, %c0_57] : memref<128x256xf32, #tpu.memory_space<vmem>>, vector<128x128xf32>
      tpu.vector_store %arg7[%c0_56, %c0_57], %153 {strides = array<i32>} : memref<128x256xf32, #tpu.memory_space<vmem>>, vector<128x128xf32>,
      %c-1_i32 = arith.constant -1 : i32
      %155 = vector.broadcast %c-1_i32 : i32 to vector<128x128xi32>
      %c0_58 = arith.constant 0 : index
      %c0_59 = arith.constant 0 : index
      %156 = vector.load %arg8[%c0_58, %c0_59] : memref<128x256xi32, #tpu.memory_space<vmem>>, vector<128x128xi32>
      tpu.vector_store %arg8[%c0_58, %c0_59], %155 {strides = array<i32>} : memref<128x256xi32, #tpu.memory_space<vmem>>, vector<128x128xi32>,
    } else {
    }
    %c0 = arith.constant 0 : index
    %c0_1 = arith.constant 0 : index
    %3 = vector.load %arg2[%c0, %c0_1] : memref<128x8xf32, #tpu.memory_space<vmem>>, vector<128x8xf32>
    %c0_2 = arith.constant 0 : index
    %c0_3 = arith.constant 0 : index
    %4 = vector.load %arg3[%c0_2, %c0_3] : memref<8x128xf32, #tpu.memory_space<vmem>>, vector<8x128xf32>
    %5 = arith.mulf %3, %3 : vector<128x8xf32>
    %cst = arith.constant dense<0.000000e+00> : vector<128xf32>
    %6 = vector.multi_reduction <add>, %5, %cst [1] : vector<128x8xf32> to vector<128xf32>
    %7 = vector.shape_cast %6 : vector<128xf32> to vector<128x1xf32>
    %8 = arith.mulf %4, %4 : vector<8x128xf32>
    %cst_4 = arith.constant dense<0.000000e+00> : vector<128xf32>
    %9 = vector.multi_reduction <add>, %8, %cst_4 [0] : vector<8x128xf32> to vector<128xf32>
    %10 = vector.shape_cast %9 : vector<128xf32> to vector<1x128xf32>
    %cst_5 = arith.constant dense<0.000000e+00> : vector<128x128xf32>
    %11 = tpu.matmul %3, %4, %cst_5 {dimension_numbers = #tpu.dot_dimension_numbers<[1], [0], [0], [1], [0, 0, 1, 1], [], []>} : vector<128x8xf32>, vector<8x128xf32>, vector<128x128xf32> -> vector<128x128xf32>
    %12 = vector.broadcast %7 : vector<128x1xf32> to vector<128x128xf32>
    %13 = vector.broadcast %10 : vector<1x128xf32> to vector<128x128xf32>
    %14 = arith.addf %12, %13 : vector<128x128xf32>
    %cst_6 = arith.constant 2.000000e+00 : f32
    %15 = vector.broadcast %cst_6 : f32 to vector<128x128xf32>
    %16 = arith.mulf %15, %11 : vector<128x128xf32>
    %17 = arith.subf %14, %16 : vector<128x128xf32>
    %c0_7 = arith.constant 0 : index
    %c0_8 = arith.constant 0 : index
    %18 = vector.load %arg4[%c0_7, %c0_8] : memref<128x1xi32, #tpu.memory_space<vmem>>, vector<128x1xi32>
    %c0_9 = arith.constant 0 : index
    %c0_10 = arith.constant 0 : index
    %19 = vector.load %arg5[%c0_9, %c0_10] : memref<1x128xi32, #tpu.memory_space<vmem>>, vector<1x128xi32>
    %20 = vector.broadcast %18 : vector<128x1xi32> to vector<128x128xi32>
    %21 = vector.broadcast %19 : vector<1x128xi32> to vector<128x128xi32>
    %22 = arith.cmpi eq, %20, %21 : vector<128x128xi32>
    %c128_i32 = arith.constant 128 : i32
    %23 = arith.muli %arg1, %c128_i32 : i32
    %24 = tpu.iota {dimensions = array<i32: 1>} : vector<128x128xi32>
    %25 = vector.broadcast %23 : i32 to vector<128x128xi32>
    %26 = arith.addi %25, %24 : vector<128x128xi32>
    %cst_11 = arith.constant 1.000000e+30 : f32
    %27 = vector.broadcast %cst_11 : f32 to vector<128x128xf32>
    %28 = arith.select %22, %17, %27 : vector<128x128xi1>, vector<128x128xf32>
    %c0_12 = arith.constant 0 : index
    %c128 = arith.constant 128 : index
    %29 = vector.load %arg7[%c0_12, %c128] : memref<128x256xf32, #tpu.memory_space<vmem>>, vector<128x128xf32>
    tpu.vector_store %arg7[%c0_12, %c128], %28 {strides = array<i32>} : memref<128x256xf32, #tpu.memory_space<vmem>>, vector<128x128xf32>,
    %c0_13 = arith.constant 0 : index
    %c128_14 = arith.constant 128 : index
    %30 = vector.load %arg8[%c0_13, %c128_14] : memref<128x256xi32, #tpu.memory_space<vmem>>, vector<128x128xi32>
    tpu.vector_store %arg8[%c0_13, %c128_14], %26 {strides = array<i32>} : memref<128x256xi32, #tpu.memory_space<vmem>>, vector<128x128xi32>,
    %c0_15 = arith.constant 0 : index
    %c0_16 = arith.constant 0 : index
    %31 = vector.load %arg7[%c0_15, %c0_16] : memref<128x256xf32, #tpu.memory_space<vmem>>, vector<128x256xf32>
    %c0_17 = arith.constant 0 : index
    %c0_18 = arith.constant 0 : index
    %32 = vector.load %arg8[%c0_17, %c0_18] : memref<128x256xi32, #tpu.memory_space<vmem>>, vector<128x256xi32>
    %cst_19 = arith.constant dense<0x7F800000> : vector<128xf32>
    %33 = vector.multi_reduction <minimumf>, %31, %cst_19 [1] : vector<128x256xf32> to vector<128xf32>
    %34 = vector.shape_cast %33 : vector<128xf32> to vector<128x1xf32>
    %35 = vector.broadcast %34 : vector<128x1xf32> to vector<128x256xf32>
    %36 = arith.cmpf oeq, %31, %35 : vector<128x256xf32>
    %c2147483647_i32 = arith.constant 2147483647 : i32
    %37 = vector.broadcast %c2147483647_i32 : i32 to vector<128x256xi32>
    %38 = arith.select %36, %32, %37 : vector<128x256xi1>, vector<128x256xi32>
    %cst_20 = arith.constant dense<2147483647> : vector<128xi32>
    %39 = vector.multi_reduction <minsi>, %38, %cst_20 [1] : vector<128x256xi32> to vector<128xi32>
    %40 = vector.shape_cast %39 : vector<128xi32> to vector<128x1xi32>
    %41 = vector.broadcast %34 : vector<128x1xf32> to vector<128x256xf32>
    %42 = arith.cmpf oeq, %31, %41 : vector<128x256xf32>
    %43 = vector.broadcast %40 : vector<128x1xi32> to vector<128x256xi32>
    %44 = arith.cmpi eq, %32, %43 : vector<128x256xi32>
    %45 = arith.andi %42, %44 : vector<128x256xi1>
    %cst_21 = arith.constant 1.000000e+30 : f32
    %46 = vector.broadcast %cst_21 : f32 to vector<128x256xf32>
    %47 = arith.select %45, %46, %31 : vector<128x256xi1>, vector<128x256xf32>
    %cst_22 = arith.constant dense<0x7F800000> : vector<128xf32>
    %48 = vector.multi_reduction <minimumf>, %47, %cst_22 [1] : vector<128x256xf32> to vector<128xf32>
    %49 = vector.shape_cast %48 : vector<128xf32> to vector<128x1xf32>
    %50 = vector.broadcast %49 : vector<128x1xf32> to vector<128x256xf32>
    %51 = arith.cmpf oeq, %47, %50 : vector<128x256xf32>
    %c2147483647_i32_23 = arith.constant 2147483647 : i32
    %52 = vector.broadcast %c2147483647_i32_23 : i32 to vector<128x256xi32>
    %53 = arith.select %51, %32, %52 : vector<128x256xi1>, vector<128x256xi32>
    %cst_24 = arith.constant dense<2147483647> : vector<128xi32>
    %54 = vector.multi_reduction <minsi>, %53, %cst_24 [1] : vector<128x256xi32> to vector<128xi32>
    %55 = vector.shape_cast %54 : vector<128xi32> to vector<128x1xi32>
    %56 = vector.broadcast %49 : vector<128x1xf32> to vector<128x256xf32>
    %57 = arith.cmpf oeq, %47, %56 : vector<128x256xf32>
    %58 = vector.broadcast %55 : vector<128x1xi32> to vector<128x256xi32>
    %59 = arith.cmpi eq, %32, %58 : vector<128x256xi32>
    %60 = arith.andi %57, %59 : vector<128x256xi1>
    %cst_25 = arith.constant 1.000000e+30 : f32
    %61 = vector.broadcast %cst_25 : f32 to vector<128x256xf32>
    %62 = arith.select %60, %61, %47 : vector<128x256xi1>, vector<128x256xf32>
    %cst_26 = arith.constant dense<0x7F800000> : vector<128xf32>
    %63 = vector.multi_reduction <minimumf>, %62, %cst_26 [1] : vector<128x256xf32> to vector<128xf32>
    %64 = vector.shape_cast %63 : vector<128xf32> to vector<128x1xf32>
    %65 = vector.broadcast %64 : vector<128x1xf32> to vector<128x256xf32>
    %66 = arith.cmpf oeq, %62, %65 : vector<128x256xf32>
    %c2147483647_i32_27 = arith.constant 2147483647 : i32
    %67 = vector.broadcast %c2147483647_i32_27 : i32 to vector<128x256xi32>
    %68 = arith.select %66, %32, %67 : vector<128x256xi1>, vector<128x256xi32>
    %cst_28 = arith.constant dense<2147483647> : vector<128xi32>
    %69 = vector.multi_reduction <minsi>, %68, %cst_28 [1] : vector<128x256xi32> to vector<128xi32>
    %70 = vector.shape_cast %69 : vector<128xi32> to vector<128x1xi32>
    %71 = vector.broadcast %64 : vector<128x1xf32> to vector<128x256xf32>
    %72 = arith.cmpf oeq, %62, %71 : vector<128x256xf32>
    %73 = vector.broadcast %70 : vector<128x1xi32> to vector<128x256xi32>
    %74 = arith.cmpi eq, %32, %73 : vector<128x256xi32>
    %75 = arith.andi %72, %74 : vector<128x256xi1>
    %cst_29 = arith.constant 1.000000e+30 : f32
    %76 = vector.broadcast %cst_29 : f32 to vector<128x256xf32>
    %77 = arith.select %75, %76, %62 : vector<128x256xi1>, vector<128x256xf32>
    %cst_30 = arith.constant dense<0x7F800000> : vector<128xf32>
    %78 = vector.multi_reduction <minimumf>, %77, %cst_30 [1] : vector<128x256xf32> to vector<128xf32>
    %79 = vector.shape_cast %78 : vector<128xf32> to vector<128x1xf32>
    %80 = vector.broadcast %79 : vector<128x1xf32> to vector<128x256xf32>
    %81 = arith.cmpf oeq, %77, %80 : vector<128x256xf32>
    %c2147483647_i32_31 = arith.constant 2147483647 : i32
    %82 = vector.broadcast %c2147483647_i32_31 : i32 to vector<128x256xi32>
    %83 = arith.select %81, %32, %82 : vector<128x256xi1>, vector<128x256xi32>
    %cst_32 = arith.constant dense<2147483647> : vector<128xi32>
    %84 = vector.multi_reduction <minsi>, %83, %cst_32 [1] : vector<128x256xi32> to vector<128xi32>
    %85 = vector.shape_cast %84 : vector<128xi32> to vector<128x1xi32>
    %86 = vector.broadcast %79 : vector<128x1xf32> to vector<128x256xf32>
    %87 = arith.cmpf oeq, %77, %86 : vector<128x256xf32>
    %88 = vector.broadcast %85 : vector<128x1xi32> to vector<128x256xi32>
    %89 = arith.cmpi eq, %32, %88 : vector<128x256xi32>
    %90 = arith.andi %87, %89 : vector<128x256xi1>
    %cst_33 = arith.constant 1.000000e+30 : f32
    %91 = vector.broadcast %cst_33 : f32 to vector<128x256xf32>
    %92 = arith.select %90, %91, %77 : vector<128x256xi1>, vector<128x256xf32>
    %cst_34 = arith.constant dense<0x7F800000> : vector<128xf32>
    %93 = vector.multi_reduction <minimumf>, %92, %cst_34 [1] : vector<128x256xf32> to vector<128xf32>
    %94 = vector.shape_cast %93 : vector<128xf32> to vector<128x1xf32>
    %95 = vector.broadcast %94 : vector<128x1xf32> to vector<128x256xf32>
    %96 = arith.cmpf oeq, %92, %95 : vector<128x256xf32>
    %c2147483647_i32_35 = arith.constant 2147483647 : i32
    %97 = vector.broadcast %c2147483647_i32_35 : i32 to vector<128x256xi32>
    %98 = arith.select %96, %32, %97 : vector<128x256xi1>, vector<128x256xi32>
    %cst_36 = arith.constant dense<2147483647> : vector<128xi32>
    %99 = vector.multi_reduction <minsi>, %98, %cst_36 [1] : vector<128x256xi32> to vector<128xi32>
    %100 = vector.shape_cast %99 : vector<128xi32> to vector<128x1xi32>
    %101 = vector.broadcast %94 : vector<128x1xf32> to vector<128x256xf32>
    %102 = arith.cmpf oeq, %92, %101 : vector<128x256xf32>
    %103 = vector.broadcast %100 : vector<128x1xi32> to vector<128x256xi32>
    %104 = arith.cmpi eq, %32, %103 : vector<128x256xi32>
    %105 = arith.andi %102, %104 : vector<128x256xi1>
    %cst_37 = arith.constant 1.000000e+30 : f32
    %106 = vector.broadcast %cst_37 : f32 to vector<128x256xf32>
    %107 = arith.select %105, %106, %92 : vector<128x256xi1>, vector<128x256xf32>
    %cst_38 = arith.constant dense<0x7F800000> : vector<128xf32>
    %108 = vector.multi_reduction <minimumf>, %107, %cst_38 [1] : vector<128x256xf32> to vector<128xf32>
    %109 = vector.shape_cast %108 : vector<128xf32> to vector<128x1xf32>
    %110 = vector.broadcast %109 : vector<128x1xf32> to vector<128x256xf32>
    %111 = arith.cmpf oeq, %107, %110 : vector<128x256xf32>
    %c2147483647_i32_39 = arith.constant 2147483647 : i32
    %112 = vector.broadcast %c2147483647_i32_39 : i32 to vector<128x256xi32>
    %113 = arith.select %111, %32, %112 : vector<128x256xi1>, vector<128x256xi32>
    %cst_40 = arith.constant dense<2147483647> : vector<128xi32>
    %114 = vector.multi_reduction <minsi>, %113, %cst_40 [1] : vector<128x256xi32> to vector<128xi32>
    %115 = vector.shape_cast %114 : vector<128xi32> to vector<128x1xi32>
    %116 = vector.broadcast %109 : vector<128x1xf32> to vector<128x256xf32>
    %117 = arith.cmpf oeq, %107, %116 : vector<128x256xf32>
    %118 = vector.broadcast %115 : vector<128x1xi32> to vector<128x256xi32>
    %119 = arith.cmpi eq, %32, %118 : vector<128x256xi32>
    %120 = arith.andi %117, %119 : vector<128x256xi1>
    %cst_41 = arith.constant 1.000000e+30 : f32
    %121 = vector.broadcast %cst_41 : f32 to vector<128x256xf32>
    %122 = arith.select %120, %121, %107 : vector<128x256xi1>, vector<128x256xf32>
    %cst_42 = arith.constant dense<0x7F800000> : vector<128xf32>
    %123 = vector.multi_reduction <minimumf>, %122, %cst_42 [1] : vector<128x256xf32> to vector<128xf32>
    %124 = vector.shape_cast %123 : vector<128xf32> to vector<128x1xf32>
    %125 = vector.broadcast %124 : vector<128x1xf32> to vector<128x256xf32>
    %126 = arith.cmpf oeq, %122, %125 : vector<128x256xf32>
    %c2147483647_i32_43 = arith.constant 2147483647 : i32
    %127 = vector.broadcast %c2147483647_i32_43 : i32 to vector<128x256xi32>
    %128 = arith.select %126, %32, %127 : vector<128x256xi1>, vector<128x256xi32>
    %cst_44 = arith.constant dense<2147483647> : vector<128xi32>
    %129 = vector.multi_reduction <minsi>, %128, %cst_44 [1] : vector<128x256xi32> to vector<128xi32>
    %130 = vector.shape_cast %129 : vector<128xi32> to vector<128x1xi32>
    %131 = vector.broadcast %124 : vector<128x1xf32> to vector<128x256xf32>
    %132 = arith.cmpf oeq, %122, %131 : vector<128x256xf32>
    %133 = vector.broadcast %130 : vector<128x1xi32> to vector<128x256xi32>
    %134 = arith.cmpi eq, %32, %133 : vector<128x256xi32>
    %135 = arith.andi %132, %134 : vector<128x256xi1>
    %cst_45 = arith.constant 1.000000e+30 : f32
    %136 = vector.broadcast %cst_45 : f32 to vector<128x256xf32>
    %137 = arith.select %135, %136, %122 : vector<128x256xi1>, vector<128x256xf32>
    %cst_46 = arith.constant dense<0x7F800000> : vector<128xf32>
    %138 = vector.multi_reduction <minimumf>, %137, %cst_46 [1] : vector<128x256xf32> to vector<128xf32>
    %139 = vector.shape_cast %138 : vector<128xf32> to vector<128x1xf32>
    %140 = vector.broadcast %139 : vector<128x1xf32> to vector<128x256xf32>
    %141 = arith.cmpf oeq, %137, %140 : vector<128x256xf32>
    %c2147483647_i32_47 = arith.constant 2147483647 : i32
    %142 = vector.broadcast %c2147483647_i32_47 : i32 to vector<128x256xi32>
    %143 = arith.select %141, %32, %142 : vector<128x256xi1>, vector<128x256xi32>
    %cst_48 = arith.constant dense<2147483647> : vector<128xi32>
    %144 = vector.multi_reduction <minsi>, %143, %cst_48 [1] : vector<128x256xi32> to vector<128xi32>
    %145 = vector.shape_cast %144 : vector<128xi32> to vector<128x1xi32>
    %146 = tpu.concatenate %34, %49, %64, %79, %94, %109, %124, %139 in 1 : vector<128x1xf32>, vector<128x1xf32>, vector<128x1xf32>, vector<128x1xf32>, vector<128x1xf32>, vector<128x1xf32>, vector<128x1xf32>, vector<128x1xf32> -> vector<128x8xf32>
    %147 = tpu.concatenate %40, %55, %70, %85, %100, %115, %130, %145 in 1 : vector<128x1xi32>, vector<128x1xi32>, vector<128x1xi32>, vector<128x1xi32>, vector<128x1xi32>, vector<128x1xi32>, vector<128x1xi32>, vector<128x1xi32> -> vector<128x8xi32>
    %c0_49 = arith.constant 0 : index
    %c0_50 = arith.constant 0 : index
    %148 = vector.load %arg7[%c0_49, %c0_50] : memref<128x256xf32, #tpu.memory_space<vmem>>, vector<128x8xf32>
    tpu.vector_store %arg7[%c0_49, %c0_50], %146 {strides = array<i32>} : memref<128x256xf32, #tpu.memory_space<vmem>>, vector<128x8xf32>,
    %c0_51 = arith.constant 0 : index
    %c0_52 = arith.constant 0 : index
    %149 = vector.load %arg8[%c0_51, %c0_52] : memref<128x256xi32, #tpu.memory_space<vmem>>, vector<128x8xi32>
    tpu.vector_store %arg8[%c0_51, %c0_52], %147 {strides = array<i32>} : memref<128x256xi32, #tpu.memory_space<vmem>>, vector<128x8xi32>,
    %c0_i32_53 = arith.constant 0 : i32
    %150 = arith.cmpi eq, %arg1, %c0_i32_53 : i32
    %151 = arith.extui %150 : i1 to i32
    %c0_i32_54 = arith.constant 0 : i32
    %152 = arith.cmpi ne, %151, %c0_i32_54 : i32
    scf.if %152 {
      %c128_i32_55 = arith.constant 128 : i32
      %153 = arith.muli %arg0, %c128_i32_55 : i32
      %154 = tpu.iota {dimensions = array<i32: 0>} : vector<128x8xi32>
      %155 = vector.broadcast %153 : i32 to vector<128x8xi32>
      %156 = arith.addi %155, %154 : vector<128x8xi32>
      %cst_56 = arith.constant 1.000000e+29 : f32
      %157 = vector.broadcast %cst_56 : f32 to vector<128x8xf32>
      %158 = arith.cmpf olt, %146, %157 : vector<128x8xf32>
      %159 = arith.select %158, %147, %156 : vector<128x8xi1>, vector<128x8xi32>
      %c0_57 = arith.constant 0 : index
      %c0_58 = arith.constant 0 : index
      %160 = vector.load %arg6[%c0_57, %c0_58] : memref<128x8xi32, #tpu.memory_space<vmem>>, vector<128x8xi32>
      tpu.vector_store %arg6[%c0_57, %c0_58], %159 {strides = array<i32>} : memref<128x8xi32, #tpu.memory_space<vmem>>, vector<128x8xi32>,
    } else {
    }
    return
  }
  func.func @transform_0(%arg0: i32, %arg1: i32) -> (i32, i32) {
    %c0_i32 = arith.constant 0 : i32
    %c0_i32_0 = arith.constant 0 : i32
    return %arg0, %c0_i32 : i32, i32
  }
  func.func @transform_1(%arg0: i32, %arg1: i32) -> (i32, i32) {
    %c0_i32 = arith.constant 0 : i32
    %c0_i32_0 = arith.constant 0 : i32
    return %c0_i32, %arg1 : i32, i32
  }
  func.func @transform_2(%arg0: i32, %arg1: i32) -> (i32, i32) {
    %c0_i32 = arith.constant 0 : i32
    %c0_i32_0 = arith.constant 0 : i32
    return %arg0, %c0_i32 : i32, i32
  }
  func.func @transform_3(%arg0: i32, %arg1: i32) -> (i32, i32) {
    %c0_i32 = arith.constant 0 : i32
    %c0_i32_0 = arith.constant 0 : i32
    return %c0_i32, %arg1 : i32, i32
  }
  func.func @transform_4(%arg0: i32, %arg1: i32) -> (i32, i32) {
    %c0_i32 = arith.constant 0 : i32
    %c0_i32_0 = arith.constant 0 : i32
    return %arg0, %c0_i32 : i32, i32
  }
}

</mosaic_0001>

<bundles_post_ra>
// kernel: tpu_custom_call.1
= control target key start
LH: loop header
LB: loop body
LE: loop exit
PB: predicated region body
PF: predicated region fallthrough
CT: control target
= control target key end

     0   :  { %vm10846_vm0 = vcmask 64512   ;;  %v4667_v3 = vmov 0   ;;  %s10841_s1 = inlined_call_operand.vmem [shape: f32[8,128], index: 1, kind: input, shape index: {}]   ;;  %s10842_s0 = inlined_call_operand.vmem [shape: f32[128,8], index: 0, kind: input, shape index: {}]   ;;  %s10843_s2 = inlined_call_operand.vmem [shape: s32[128,1], index: 2, kind: input, shape index: {}]   ;;  %s10844_s3 = inlined_call_operand.vmem [shape: s32[1,128], index: 3, kind: input, shape index: {}]   ;;  %s10845_s4 = inlined_call_operand.vmem [shape: s32[128,8], index: 4, kind: output, shape index: {}]  }
   0x1   :  { %v4699_v0 = vld [vmem:[%s10841_s1] sm:$0xff]  ;;  %4620 = vset.pattern.permute.xlu1 %v4667_v3  ;;  %4619 = vset.pattern.permute.xlu0 %v4667_v3  ;;  %v54_v5 = vld [vmem:[%s10842_s0 + $0x8] sm:$0xff]  ;;  %v55_v7 = vld [vmem:[%s10842_s0 + $0x10] sm:$0xff]  ;;  %v4668_v3 = vmov 1e+30  }
   0x2   :  { %v53_v1 = vld [vmem:[%s10842_s0] sm:$0xff]  ;;  %4588 = vmatprep.subr.mxu0 %v4699_v0  ;;  %4614 = vmatprep.subr.mxu1 %v4699_v0  ;;  %v62_v6 = vld [vmem:[%s10842_s0 + $0x48] sm:$0xff]  ;;  %v72_v8 = vmul.f32 %v55_v7, %v55_v7  ;;  %v56_v9 = vld [vmem:[%s10842_s0 + $0x18] sm:$0xff]  ;;  %v71_v14 = vmul.f32 %v54_v5, %v54_v5  ;;  %22 = vst [vmem:[#allocation2 + $0x10] sm:$0xff] %v4668_v3 }
   0x3   :  { %v61_v2 = vld [vmem:[%s10842_s0 + $0x40] sm:$0xff]  ;;  %v70_v4 = vmul.f32 %v53_v1, %v53_v1  ;;  %4589 = vmatpush3.msra.mxu0 %v4699_v0  ;;  %4615 = vmatpush3.msra.mxu1 %v4699_v0  ;;  %v63_v10 = vld [vmem:[%s10842_s0 + $0x50] sm:$0xff]  ;;  %v73_v11 = vmul.f32 %v56_v9, %v56_v9  ;;  %v58_v12 = vld [vmem:[%s10842_s0 + $0x28] sm:$0xff]  ;;  %v79_v33 = vmul.f32 %v62_v6, %v62_v6 }
   0x4   :  { %4590 = vmatprep.mubr.msk.f32.mxu0 %vm10846_vm0, %v53_v1  ;;  %4602 = vmatprep.mubr.msk.f32.mxu1 %vm10846_vm0, %v61_v2  ;;  %v93_v15 = vsel %vm10846_vm0, %v72_v8, 0.0  ;;  %v64_v16 = vld [vmem:[%s10842_s0 + $0x58] sm:$0xff]  ;;  %v57_v18 = vld [vmem:[%s10842_s0 + $0x20] sm:$0xff]  ;;  %v75_v19 = vmul.f32 %v58_v12, %v58_v12  ;;  %v90_v22 = vsel %vm10846_vm0, %v71_v14, 0.0  ;;  %v66_v24 = vld [vmem:[%s10842_s0 + $0x68] sm:$0xff]  ;;  %v78_v34 = vmul.f32 %v61_v2, %v61_v2 }
   0x5   :  { %v87_v13 = vsel %vm10846_vm0, %v70_v4, 0.0  ;;  %4591 = vmatmul.mubr.msk.f32.vlgmr.msra.gmra.mrb[0].mxu0 %vm10846_vm0, %v54_v5  ;;  %4603 = vmatmul.mubr.msk.f32.vlgmr.msra.gmra.mrb[0].mxu1 %vm10846_vm0, %v62_v6  ;;  %v96_v17 = vsel %vm10846_vm0, %v73_v11, 0.0  ;;  %v65_v20 = vld [vmem:[%s10842_s0 + $0x60] sm:$0xff]  ;;  %v60_v21 = vld [vmem:[%s10842_s0 + $0x38] sm:$0xff]  ;;  %v74_v23 = vmul.f32 %v57_v18, %v57_v18  ;;  %v59_v26 = vld [vmem:[%s10842_s0 + $0x30] sm:$0xff]  ;;  %v114_v36 = vsel %vm10846_vm0, %v79_v33, 0.0 }
   0x6   :  { %94 = vadd.xlane.f32.xlu1 %v93_v15  ;;  %4593 = vmatprep.mubr.msk.f32.mxu0 %vm10846_vm0, %v55_v7  ;;  %v102_v25 = vsel %vm10846_vm0, %v75_v19, 0.0  ;;  %v77_v27 = vmul.f32 %v60_v21, %v60_v21  ;;  %v67_v28 = vld [vmem:[%s10842_s0 + $0x70] sm:$0xff]  ;;  %v76_v30 = vmul.f32 %v59_v26, %v59_v26  ;;  %v68_v31 = vld [vmem:[%s10842_s0 + $0x78] sm:$0xff]  ;;  %v81_v37 = vmul.f32 %v64_v16, %v64_v16  ;;  %v384_v50 = vld [vmem:[%s10843_s2 + $0x8] sm:$0xff] }
   0x7   :  { %4605 = vmatprep.mubr.msk.f32.mxu1 %vm10846_vm0, %v63_v10  ;;  %88 = vadd.xlane.f32.xlu0 %v87_v13  ;;  %v99_v29 = vsel %vm10846_vm0, %v74_v23, 0.0  ;;  %v111_v38 = vsel %vm10846_vm0, %v78_v34, 0.0  ;;  %v80_v39 = vmul.f32 %v63_v10, %v63_v10  ;;  %v83_v41 = vmul.f32 %v66_v24, %v66_v24  ;;  %v385_v51 = vld [vmem:[%s10843_s2 + $0x10] sm:$0xff]  ;;  %v383_v52 = vld [vmem:[%s10843_s2] sm:$0xff]  ;;  %v386_v53 = vld [vmem:[%s10843_s2 + $0x18] sm:$0xff] }
   0x8   :  { %v108_v32 = vsel %vm10846_vm0, %v77_v27, 0.0  ;;  %v105_v35 = vsel %vm10846_vm0, %v76_v30, 0.0  ;;  %v120_v40 = vsel %vm10846_vm0, %v81_v37, 0.0  ;;  %v82_v43 = vmul.f32 %v65_v20, %v65_v20  ;;  %v392_v54 = vld [vmem:[%s10843_s2 + $0x48] sm:$0xff]  ;;  %v387_v55 = vld [vmem:[%s10843_s2 + $0x20] sm:$0xff]  ;;  %v394_v56 = vld [vmem:[%s10843_s2 + $0x58] sm:$0xff] }
   0x9   :  { %4594 = vmatmul.mubr.msk.f32.gmra.mrb[2].mxu0 %vm10846_vm0, %v56_v9  ;;  %4606 = vmatmul.mubr.msk.f32.gmra.mrb[2].mxu1 %vm10846_vm0, %v64_v16  ;;  %v117_v42 = vsel %vm10846_vm0, %v80_v39, 0.0  ;;  %v126_v44 = vsel %vm10846_vm0, %v83_v41, 0.0  ;;  %v85_v45 = vmul.f32 %v68_v31, %v68_v31  ;;  %v84_v47 = vmul.f32 %v67_v28, %v67_v28  ;;  %v388_v57 = vld [vmem:[%s10843_s2 + $0x28] sm:$0xff]  ;;  %v389_v59 = vld [vmem:[%s10843_s2 + $0x30] sm:$0xff]  ;;  %v398_v60 = vld [vmem:[%s10843_s2 + $0x78] sm:$0xff] }
   0xa   :  { %97 = vadd.xlane.f32.xlu1 %v96_v17  ;;  %4596 = vmatprep.mubr.msk.f32.mxu0 %vm10846_vm0, %v57_v18  ;;  %v123_v46 = vsel %vm10846_vm0, %v82_v43, 0.0  ;;  %v396_v58 = vld [vmem:[%s10843_s2 + $0x68] sm:$0xff]  ;;  %v390_v61 = vld [vmem:[%s10843_s2 + $0x38] sm:$0xff]  ;;  %v391_v62 = vld [vmem:[%s10843_s2 + $0x40] sm:$0xff]  ;;  %v135_v19 = vmul.f32 %v4699_v0, %v4699_v0 }
   0xb   :  { %4608 = vmatprep.mubr.msk.f32.mxu1 %vm10846_vm0, %v65_v20  ;;  %91 = vadd.xlane.f32.xlu0 %v90_v22  ;;  %v132_v48 = vsel %vm10846_vm0, %v85_v45, 0.0  ;;  %v129_v49 = vsel %vm10846_vm0, %v84_v47, 0.0  ;;  %v393_v63 = vld [vmem:[%s10843_s2 + $0x50] sm:$0xff]  ;;  %v395_v1 = vld [vmem:[%s10843_s2 + $0x60] sm:$0xff] }
   0xc   :  { %v397_v2 = vld [vmem:[%s10843_s2 + $0x70] sm:$0xff]  ;;  %v136_v22 = vrot.slane %v135_v19, 4 }
   0xd   :  { %4597 = vmatmul.mubr.msk.f32.gmra.mrb[4].mxu0 %vm10846_vm0, %v58_v12  ;;  %4609 = vmatmul.mubr.msk.f32.gmra.mrb[4].mxu1 %vm10846_vm0, %v66_v24 }
   0xe   :  { %103 = vadd.xlane.f32.xlu1 %v102_v25  ;;  %4599 = vmatprep.mubr.msk.f32.mxu0 %vm10846_vm0, %v59_v26  ;;  %v137_v25 = vadd.f32 %v136_v22, %v135_v19 }
   0xf   :  { %4611 = vmatprep.mubr.msk.f32.mxu1 %vm10846_vm0, %v67_v28  ;;  %100 = vadd.xlane.f32.xlu0 %v99_v29 }
  0x10   :  { %v138_v27 = vrot.slane %v137_v25, 2 }
  0x11   :  { %4600 = vmatmul.mubr.msk.f32.gmra.mrb[6].mxu0 %vm10846_vm0, %v60_v21  ;;  %4612 = vmatmul.mubr.msk.f32.gmra.mrb[6].mxu1 %vm10846_vm0, %v68_v31 }
  0x12   :  { %109 = vadd.xlane.f32.xlu1 %v108_v32  ;;  %v139_v29 = vadd.f32 %v138_v27, %v137_v25 }
  0x13   :  { %106 = vadd.xlane.f32.xlu0 %v105_v35 }
  0x14   :  { %v140_v32 = vrot.slane %v139_v29, 1 }
  0x16   :  { %115 = vadd.xlane.f32.xlu1 %v114_v36  ;;  %v4851_v0 = vadd.f32 %v140_v32, %v139_v29 }
  0x17   :  { %112 = vadd.xlane.f32.xlu0 %v111_v38 }
  0x1a   :  { %121 = vadd.xlane.f32.xlu1 %v120_v40 }
  0x1b   :  { %118 = vadd.xlane.f32.xlu0 %v117_v42  ;;  %v4868_v42 = vld [vmem:[%s10844_s3] ss:$0 sm:$0xff] }
  0x1e   :  { %127 = vadd.xlane.f32.xlu1 %v126_v44 }
  0x1f   :  { %124 = vadd.xlane.f32.xlu0 %v123_v46 }
  0x22   :  { %133 = vadd.xlane.f32.xlu1 %v132_v48 }
  0x23   :  { %130 = vadd.xlane.f32.xlu0 %v129_v49 }
  0x33   :  { %404 = vperm.xlu1 %4620, %v384_v50  }
  0x37   :  { %407 = vperm.xlu1 %4620, %v385_v51  }
  0x39   :  { %401 = vperm.xlu0 %4619, %v383_v52  }
  0x3b   :  { %410 = vperm.xlu1 %4620, %v386_v53  }
  0x3d   :  { %428 = vperm.xlu0 %4619, %v392_v54  }
  0x3f   :  { %413 = vperm.xlu1 %4620, %v387_v55  }
  0x41   :  { %434 = vperm.xlu0 %4619, %v394_v56  }
  0x43   :  { %416 = vperm.xlu1 %4620, %v388_v57  }
  0x45   :  { %440 = vperm.xlu0 %4619, %v396_v58  }
  0x47   :  { %419 = vperm.xlu1 %4620, %v389_v59  }
  0x49   :  { %446 = vperm.xlu0 %4619, %v398_v60  }
  0x4b   :  { %422 = vperm.xlu1 %4620, %v390_v61  }
  0x4f   :  { %425 = vperm.xlu1 %4620, %v391_v62  }
  0x53   :  { %431 = vperm.xlu1 %4620, %v393_v63  }
  0x57   :  { %437 = vperm.xlu1 %4620, %v395_v1  }
  0x5b   :  { %443 = vperm.xlu1 %4620, %v397_v2  }
  0x93   :  { %v95_v4 = vpop.xlane.xlu1 %94 }
  0x94   :  { %v89_v7 = vpop.xlane.xlu0 %88  ;;  %v4854_v35 = vadd.f32 %v4851_v0, %v95_v4 }
  0x95   :  { %v335_v36 = vadd.f32 %v4851_v0, %v89_v7 }
  0x97   :  { %v98_v5 = vpop.xlane.xlu1 %97 }
  0x98   :  { %v92_v9 = vpop.xlane.xlu0 %91  ;;  %v338_v38 = vadd.f32 %v4851_v0, %v98_v5 }
  0x99   :  { %v336_v40 = vadd.f32 %v4851_v0, %v92_v9 }
  0x9b   :  { %v104_v6 = vpop.xlane.xlu1 %103 }
  0x9c   :  { %v101_v12 = vpop.xlane.xlu0 %100  ;;  %v4859_v39 = vadd.f32 %v4851_v0, %v104_v6 }
  0x9d   :  { %v4863_v41 = vadd.f32 %v4851_v0, %v101_v12 }
  0x9f   :  { %v110_v8 = vpop.xlane.xlu1 %109 }
  0xa0   :  { %v107_v14 = vpop.xlane.xlu0 %106  ;;  %v4871_v43 = vadd.f32 %v4851_v0, %v110_v8 }
  0xa1   :  { %v4875_v45 = vadd.f32 %v4851_v0, %v107_v14 }
  0xa3   :  { %v116_v10 = vpop.xlane.xlu1 %115 }
  0xa4   :  { %v113_v17 = vpop.xlane.xlu0 %112  ;;  %v344_v44 = vadd.f32 %v4851_v0, %v116_v10 }
  0xa5   :  { %v343_v46 = vadd.f32 %v4851_v0, %v113_v17 }
  0xa7   :  { %v122_v11 = vpop.xlane.xlu1 %121 }
  0xa8   :  { %v119_v20 = vpop.xlane.xlu0 %118  ;;  %v346_v48 = vadd.f32 %v4851_v0, %v122_v11 }
  0xa9   :  { %v4883_v50 = vadd.f32 %v4851_v0, %v119_v20 }
  0xab   :  { %v128_v13 = vpop.xlane.xlu1 %127 }
  0xac   :  { %v125_v24 = vpop.xlane.xlu0 %124  ;;  %v4880_v49 = vadd.f32 %v4851_v0, %v128_v13 }
  0xad   :  { %v4886_v51 = vadd.f32 %v4851_v0, %v125_v24 }
  0xaf   :  { %v134_v15 = vpop.xlane.xlu1 %133 }
  0xb0   :  { %v4845_v28 = vpop.xlane.xlu0 %130  ;;  %v4889_v54 = vadd.f32 %v4851_v0, %v134_v15 }
  0xb3   :  { %v4833_v16 = vpop.permute.xlu1 %404 }
  0xb4   :  { %vm453_vm1 = vcmp.eq.s32.totalorder %v4833_v16, %v4868_v42 }
  0xb7   :  { %v4835_v18 = vpop.permute.xlu1 %407 }
  0xb8   :  { %v402_v31 = vpop.permute.xlu0 %401  ;;  %vm454_vm2 = vcmp.eq.s32.totalorder %v4835_v18, %v4868_v42 }
  0xb9   :  { %vm452_vm3 = vcmp.eq.s32.totalorder %v402_v31, %v4868_v42 }
  0xbb   :  { %v4839_v21 = vpop.permute.xlu1 %410 }
  0xbc   :  { %v429_v34 = vpop.permute.xlu0 %428  ;;  %vm455_vm4 = vcmp.eq.s32.totalorder %v4839_v21, %v4868_v42 }
  0xbd   :  { %vm461_vm5 = vcmp.eq.s32.totalorder %v429_v34, %v4868_v42 }
  0xbf   :  { %v4841_v23 = vpop.permute.xlu1 %413 }
  0xc0   :  { %v435_v47 = vpop.permute.xlu0 %434  ;;  %vm456_vm8 = vcmp.eq.s32.totalorder %v4841_v23, %v4868_v42 }
  0xc1   :  { %vm463_vm7 = vcmp.eq.s32.totalorder %v435_v47, %v4868_v42 }
  0xc3   :  { %v4843_v26 = vpop.permute.xlu1 %416 }
  0xc4   :  { %v441_v5 = vpop.permute.xlu0 %440  ;;  %vm457_vm9 = vcmp.eq.s32.totalorder %v4843_v26, %v4868_v42 }
  0xc5   :  { %vm465_vm11 = vcmp.eq.s32.totalorder %v441_v5, %v4868_v42 }
  0xc7   :  { %v4847_v30 = vpop.permute.xlu1 %419 }
  0xc8   :  { %v447_v21 = vpop.permute.xlu0 %446  ;;  %vm458_vm15 = vcmp.eq.s32.totalorder %v4847_v30, %v4868_v42 }
  0xc9   :  { %vm467_vm14 = vcmp.eq.s32.totalorder %v447_v21, %v4868_v42 }
  0xcb   :  { %v4849_v33 = vpop.permute.xlu1 %422 }
  0xcc   :  { %vm459_vm13 = vcmp.eq.s32.totalorder %v4849_v33, %v4868_v42 }
  0xcf   :  { %v426_v37 = vpop.permute.xlu1 %425 }
  0xd0   :  { %vm460_vm6 = vcmp.eq.s32.totalorder %v426_v37, %v4868_v42 }
  0xd3   :  { %v432_v61 = vpop.permute.xlu1 %431 }
  0xd4   :  { %vm462_vm10 = vcmp.eq.s32.totalorder %v432_v61, %v4868_v42 }
  0xd7   :  { %v438_v37 = vpop.permute.xlu1 %437 }
  0xd8   :  { %v4592_v52 = vpop.f32.mrb[0].mxu0  ;;  %v4604_v53 = vpop.f32.mrb[0].mxu1  ;;  %vm464_vm12 = vcmp.eq.s32.totalorder %v438_v37, %v4868_v42 }
  0xd9   :  { %v352_v55 = vmul.f32 2.0, %v4592_v52  ;;  %v360_v56 = vmul.f32 2.0, %v4604_v53  ;;  %v256_v57 = vpop.f32.mrb[1].mxu0  ;;  %v296_v58 = vpop.f32.mrb[1].mxu1 }
  0xda   :  { %v351_v59 = vmul.f32 2.0, %v256_v57  ;;  %v359_v60 = vmul.f32 2.0, %v296_v58 }
  0xdb   :  { %v368_v62 = vsub.f32 %v336_v40, %v352_v55  ;;  %v376_v63 = vsub.f32 %v344_v44, %v360_v56  ;;  %v444_v23 = vpop.permute.xlu1 %443 }
  0xdc   :  { %v367_v1 = vsub.f32 %v335_v36, %v351_v59  ;;  %v375_v2 = vsub.f32 %v343_v46, %v359_v60  ;;  %v4595_v3 = vpop.f32.mrb[2].mxu0  ;;  %v4607_v4 = vpop.f32.mrb[2].mxu1 }
  0xdd   :  { %v4906_v6 = vsel %vm453_vm1, %v368_v62, 1e+30  ;;  %v4908_v7 = vsel %vm461_vm5, %v376_v63, 1e+30  ;;  %v354_v8 = vmul.f32 2.0, %v4595_v3  ;;  %v362_v9 = vmul.f32 2.0, %v4607_v4 }
  0xde   :  { %v4912_v10 = vsel %vm452_vm3, %v367_v1, 1e+30  ;;  %v4914_v11 = vsel %vm460_vm6, %v375_v2, 1e+30  ;;  %v266_v12 = vpop.f32.mrb[3].mxu0  ;;  %v306_v13 = vpop.f32.mrb[3].mxu1  ;;  %v349_v2 = vadd.f32 %v4851_v0, %v4845_v28  ;;  %vm466_vm1 = vcmp.eq.s32.totalorder %v444_v23, %v4868_v42 }
  0xdf   :  { %v588_v14 = vmin.f32 %v4906_v6, 1e+30  ;;  %v612_v15 = vmin.f32 %v4908_v7, 1e+30  ;;  %v370_v17 = vsub.f32 %v338_v38, %v354_v8  ;;  %v378_v16 = vsub.f32 %v346_v48, %v362_v9 }
  0xe0   :  { %v353_v19 = vmul.f32 2.0, %v266_v12  ;;  %v361_v20 = vmul.f32 2.0, %v306_v13  ;;  %v4598_v22 = vpop.f32.mrb[4].mxu0  ;;  %v4610_v24 = vpop.f32.mrb[4].mxu1  ;;  %v609_v25 = vmin.f32 %v4914_v11, 1e+30  ;;  %v10861_v9 = vlaneseq }
  0xe1   :  { %589 = vmin.xlane.f32.xlu0 %v588_v14  ;;  %613 = vmin.xlane.f32.xlu1 %v612_v15  ;;  %v4925_v27 = vsel %vm455_vm4, %v370_v17, 1e+30  ;;  %v4929_v29 = vsel %vm463_vm7, %v378_v16, 1e+30  ;;  %v276_v34 = vpop.f32.mrb[5].mxu0  ;;  %v316_v36 = vpop.f32.mrb[5].mxu1 }
  0xe2   :  { %v369_v31 = vsub.f32 %v4854_v35, %v353_v19  ;;  %v377_v32 = vsub.f32 %v4883_v50, %v361_v20  ;;  %v356_v38 = vmul.f32 2.0, %v4598_v22  ;;  %v364_v40 = vmul.f32 2.0, %v4610_v24 }
  0xe3   :  { %v355_v44 = vmul.f32 2.0, %v276_v34  ;;  %v363_v46 = vmul.f32 2.0, %v316_v36  ;;  %v585_v48 = vmin.f32 %v4912_v10, 1e+30  ;;  %v594_v61 = vmin.f32 %v4925_v27, 1e+30 }
  0xe4   :  { %v4937_v47 = vsel %vm454_vm2, %v369_v31, 1e+30  ;;  %v4941_v35 = vsel %vm462_vm10, %v377_v32, 1e+30  ;;  %v372_v50 = vsub.f32 %v4859_v39, %v356_v38  ;;  %v380_v52 = vsub.f32 %v4880_v49, %v364_v40  ;;  %v4601_v56 = vpop.f32.mrb[6].mxu0  ;;  %v4613_v57 = vpop.f32.mrb[6].mxu1 }
  0xe5   :  { %v371_v53 = vsub.f32 %v4863_v41, %v355_v44  ;;  %v379_v55 = vsub.f32 %v4886_v51, %v363_v46  ;;  %610 = vmin.xlane.f32.xlu0 %v609_v25  ;;  %v358_v18 = vmul.f32 2.0, %v4601_v56  ;;  %v366_v58 = vmul.f32 2.0, %v4613_v57  ;;  %v286_v59 = vpop.f32.mrb[7].mxu0  ;;  %v326_v60 = vpop.f32.mrb[7].mxu1  ;;  %586 = vmin.xlane.f32.xlu1 %v585_v48 }
  0xe6   :  { %v4953_v39 = vsel %vm457_vm9, %v372_v50, 1e+30  ;;  %v4957_v41 = vsel %vm465_vm11, %v380_v52, 1e+30  ;;  %v591_v51 = vmin.f32 %v4937_v47, 1e+30 }
  0xe7   :  { %v4962_v49 = vsel %vm456_vm8, %v371_v53, 1e+30  ;;  %v4965_v62 = vsel %vm464_vm12, %v379_v55, 1e+30  ;;  %v374_v63 = vsub.f32 %v4871_v43, %v358_v18  ;;  %v382_v1 = vsub.f32 %v4889_v54, %v366_v58 }
  0xe8   :  { %11541 = vst [vmem:[#allocation4_spill] sm:$0xff] %v4962_v49  ;;  %11542 = vst [vmem:[#allocation5_spill] sm:$0xff] %v4965_v62  ;;  %v357_v26 = vmul.f32 2.0, %v286_v59  ;;  %v365_v3 = vmul.f32 2.0, %v326_v60  ;;  %v615_v28 = vmin.f32 %v4941_v35, 1e+30 }
  0xe9   :  { %592 = vmin.xlane.f32.xlu0 %v591_v51  ;;  %v4974_v4 = vsel %vm459_vm13, %v374_v63, 1e+30  ;;  %v4976_v5 = vsel %vm467_vm14, %v382_v1, 1e+30  ;;  %595 = vmin.xlane.f32.xlu1 %v594_v61  ;;  %v618_v0 = vmin.f32 %v4929_v29, 1e+30 }
  0xea   :  { %11543 = vst [vmem:[#allocation6_spill] sm:$0xff] %v4974_v4  ;;  %11544 = vst [vmem:[#allocation7_spill] sm:$0xff] %v4976_v5  ;;  %v373_v43 = vsub.f32 %v4875_v45, %v357_v26  ;;  %v381_v54 = vsub.f32 %v349_v2, %v365_v3  ;;  %v597_v45 = vmin.f32 %v4962_v49, 1e+30  ;;  %v600_v30 = vmin.f32 %v4953_v39, 1e+30 }
  0xeb   :  { %v4992_v12 = vand.u32 127, %v10861_v9  ;;  %v621_v42 = vmin.f32 %v4965_v62, 1e+30  ;;  %v4669_v13 = vmov 4294967295   ;;  %v624_v14 = vmin.f32 %v4957_v41, 1e+30 }
  0xec   :  { %v4983_v33 = vsel %vm458_vm15, %v373_v43, 1e+30  ;;  %v4986_v8 = vsel %vm466_vm1, %v381_v54, 1e+30  ;;  %38 = vst [vmem:[#allocation3 + $0x10] sm:$0xff] %v4669_v13 }
  0xed   :  { %11545 = vst [vmem:[#allocation8_spill] sm:$0xff] %v4983_v33  ;;  %11546 = vst [vmem:[#allocation9_spill] sm:$0xff] %v4986_v8  ;;  %616 = vmin.xlane.f32.xlu0 %v615_v28  ;;  %619 = vmin.xlane.f32.xlu1 %v618_v0  ;;  %v603_v15 = vmin.f32 %v4983_v33, 1e+30  ;;  %v606_v17 = vmin.f32 %v4974_v4, 1e+30 }
  0xee   :  { %503 = vst [vmem:[#allocation2 + $0xe8] sm:$0xff] %v4986_v8  ;;  %506 = vst [vmem:[#allocation3 + $0x18] sm:$0xff] %v4992_v12  ;;  %v627_v16 = vmin.f32 %v4986_v8, 1e+30  ;;  %v630_v19 = vmin.f32 %v4976_v5, 1e+30 }
  0xef   :  { %v10879_v24 = vmov 2147483647  }
  0xf1   :  { %598 = vmin.xlane.f32.xlu0 %v597_v45  ;;  %601 = vmin.xlane.f32.xlu1 %v600_v30 }
  0xf5   :  { %622 = vmin.xlane.f32.xlu0 %v621_v42  ;;  %625 = vmin.xlane.f32.xlu1 %v624_v14 }
  0xf9   :  { %604 = vmin.xlane.f32.xlu0 %v603_v15  ;;  %607 = vmin.xlane.f32.xlu1 %v606_v17 }
  0xfd   :  { %628 = vmin.xlane.f32.xlu0 %v627_v16  ;;  %631 = vmin.xlane.f32.xlu1 %v630_v19 }
 0x16e   :  { %v5001_v20 = vpop.xlane.xlu1 %613  ;;  %v5003_v22 = vpop.xlane.xlu0 %589 }
 0x16f   :  { %11547 = vst [vmem:[#allocation10_spill] sm:$0xff] %v5001_v20  ;;  %11548 = vst [vmem:[#allocation11_spill] sm:$0xff] %v5003_v22  ;;  %vm4635_vm2 = vcmp.eq.f32.partialorder %v5001_v20, 1e+30  ;;  %vm652_vm3 = vcmp.eq.f32.partialorder %v4908_v7, %v5001_v20  ;;  %vm4636_vm4 = vcmp.eq.f32.partialorder %v5003_v22, 1e+30  ;;  %vm636_vm5 = vcmp.eq.f32.partialorder %v4906_v6, %v5003_v22 }
 0x170   :  { %v667_v25 = vsel %vm4636_vm4, 4294967295, %v10879_v24  ;;  %v668_v31 = vsel %vm636_vm5, %v4992_v12, 2147483647  ;;  %v683_v32 = vsel %vm4635_vm2, 4294967295, %v10879_v24  ;;  %v684_v34 = vsel %vm652_vm3, %v4992_v12, 2147483647 }
 0x171   :  { %vm713_vm6 = vcmp.lt.s32.totalorder %v667_v25, %v668_v31  ;;  %vm841_vm7 = vcmp.lt.s32.totalorder %v683_v32, %v684_v34 }
 0x172   :  { %v5025_v36 = vpop.xlane.xlu0 %610  ;;  %v5027_v37 = vsel %vm713_vm6, %v667_v25, %v668_v31  ;;  %v5029_v38 = vpop.xlane.xlu1 %586  ;;  %v5035_v44 = vsel %vm841_vm7, %v683_v32, %v684_v34 }
 0x173   :  { %11549 = vst [vmem:[#allocation12_spill] sm:$0xff] %v5025_v36  ;;  %11550 = vst [vmem:[#allocation13_spill] sm:$0xff] %v5029_v38  ;;  %vm4637_vm8 = vcmp.eq.f32.partialorder %v5025_v36, 1e+30  ;;  %vm10848_vm9 = vcmp.eq.f32.partialorder %v4914_v11, %v5025_v36  ;;  %v716_v40 = vshra.s32 %v5027_v37, 16  ;;  %vm634_vm11 = vcmp.eq.f32.partialorder %v4912_v10, %v5029_v38 }
 0x174   :  { %vm4638_vm10 = vcmp.eq.f32.partialorder %v5029_v38, 1e+30  ;;  %v844_v46 = vshra.s32 %v5035_v44, 16  ;;  %v681_v21 = vsel %vm4637_vm8, 4294967295, %v10879_v24  ;;  %v666_v52 = vsel %vm634_vm11, %v4992_v12, 2147483647 }
 0x175   :  { %v5044_v48 = vcvt.s32.f32 %v716_v40  ;;  %v665_v50 = vsel %vm4638_vm10, 4294967295, %v10879_v24  ;;  %v682_v53 = vsel %vm10848_vm9, %v4992_v12, 2147483647 }
 0x176   :  { %v5057_v55 = vpop.xlane.xlu0 %592  ;;  %vm697_vm12 = vcmp.lt.s32.totalorder %v665_v50, %v666_v52  ;;  %vm825_vm13 = vcmp.lt.s32.totalorder %v681_v21, %v682_v53  ;;  %v5059_v56 = vpop.xlane.xlu1 %595  ;;  %v5074_v60 = vcvt.s32.f32 %v844_v46 }
 0x177   :  { %11551 = vst [vmem:[#allocation14_spill] sm:$0xff] %v5057_v55  ;;  %11552 = vst [vmem:[#allocation15_spill] sm:$0xff] %v5059_v56  ;;  %vm10847_vm14 = vcmp.eq.f32.partialorder %v5057_v55, 1e+30  ;;  %vm10849_vm15 = vcmp.eq.f32.partialorder %v4937_v47, %v5057_v55  ;;  %719 = vmin.xlane.f32.xlu1 %v5044_v48  ;;  %v5065_v57 = vsel %vm697_vm12, %v665_v50, %v666_v52  ;;  %vm4640_vm1 = vcmp.eq.f32.partialorder %v5059_v56, 1e+30 }
 0x178   :  { %v5067_v18 = vsel %vm825_vm13, %v681_v21, %v682_v53  ;;  %vm640_vm6 = vcmp.eq.f32.partialorder %v4925_v27, %v5059_v56  ;;  %v700_v58 = vshra.s32 %v5065_v57, 16  ;;  %v671_v61 = vsel %vm4640_vm1, 4294967295, %v10879_v24 }
 0x179   :  { %v828_v59 = vshra.s32 %v5067_v18, 16  ;;  %v672_v51 = vsel %vm640_vm6, %v4992_v12, 2147483647  ;;  %v669_v63 = vsel %vm10847_vm14, 4294967295, %v10879_v24  ;;  %v670_v2 = vsel %vm10849_vm15, %v4992_v12, 2147483647 }
 0x17a   :  { %v5086_v1 = vpop.xlane.xlu0 %616  ;;  %v5088_v26 = vcvt.s32.f32 %v700_v58  ;;  %vm745_vm7 = vcmp.lt.s32.totalorder %v671_v61, %v672_v51  ;;  %v5094_v23 = vpop.xlane.xlu1 %619  ;;  %vm729_vm0 = vcmp.lt.s32.totalorder %v669_v63, %v670_v2 }
 0x17b   :  { %11553 = vst [vmem:[#allocation16_spill] sm:$0xff] %v5086_v1  ;;  %11554 = vst [vmem:[#allocation17_spill] sm:$0xff] %v5094_v23  ;;  %vm10851_vm12 = vcmp.eq.f32.partialorder %v5086_v1, 1e+30  ;;  %vm10852_vm13 = vcmp.eq.f32.partialorder %v4941_v35, %v5086_v1  ;;  %847 = vmin.xlane.f32.xlu1 %v5074_v60  ;;  %v5100_v3 = vsel %vm745_vm7, %v671_v61, %v672_v51  ;;  %vm10856_vm14 = vcmp.eq.f32.partialorder %v5094_v23, 1e+30 }
 0x17c   :  { %vm10850_vm9 = vcmp.eq.f32.partialorder %v4929_v29, %v5094_v23  ;;  %703 = vmin.xlane.f32.xlu0 %v5088_v26  ;;  %v748_v43 = vshra.s32 %v5100_v3, 16  ;;  %v5107_v54 = vsel %vm729_vm0, %v669_v63, %v670_v2  ;;  %v5109_v28 = vcvt.s32.f32 %v828_v59 }
 0x17d   :  { %v687_v0 = vsel %vm10856_vm14, 4294967295, %v10879_v24  ;;  %v688_v45 = vsel %vm10850_vm9, %v4992_v12, 2147483647  ;;  %v732_v30 = vshra.s32 %v5107_v54, 16  ;;  %v685_v14 = vsel %vm10851_vm12, 4294967295, %v10879_v24 }
 0x17e   :  { %v5119_v42 = vpop.xlane.xlu0 %598  ;;  %v5121_v13 = vcvt.s32.f32 %v748_v43  ;;  %vm873_vm7 = vcmp.lt.s32.totalorder %v687_v0, %v688_v45  ;;  %v686_v15 = vsel %vm10852_vm13, %v4992_v12, 2147483647  ;;  %v5130_v17 = vpop.xlane.xlu1 %601 }
 0x17f   :  { %11555 = vst [vmem:[#allocation18_spill] sm:$0xff] %v5119_v42  ;;  %11556 = vst [vmem:[#allocation19_spill] sm:$0xff] %v5130_v17  ;;  %vm10854_vm0 = vcmp.eq.f32.partialorder %v5119_v42, 1e+30  ;;  %vm10857_vm15 = vcmp.eq.f32.partialorder %v4962_v49, %v5119_v42  ;;  %v5135_v16 = vsel %vm873_vm7, %v687_v0, %v688_v45  ;;  %v5137_v19 = vcvt.s32.f32 %v732_v30 }
 0x180   :  { %vm10855_vm9 = vcmp.eq.f32.partialorder %v5130_v17, 1e+30  ;;  %vm10853_vm12 = vcmp.eq.f32.partialorder %v4953_v39, %v5130_v17  ;;  %751 = vmin.xlane.f32.xlu1 %v5121_v13  ;;  %831 = vmin.xlane.f32.xlu0 %v5109_v28  ;;  %v876_v25 = vshra.s32 %v5135_v16, 16  ;;  %vm857_vm13 = vcmp.lt.s32.totalorder %v685_v14, %v686_v15 }
 0x181   :  { %v675_v31 = vsel %vm10855_vm9, 4294967295, %v10879_v24  ;;  %v676_v32 = vsel %vm10853_vm12, %v4992_v12, 2147483647  ;;  %v5152_v34 = vsel %vm857_vm13, %v685_v14, %v686_v15  ;;  %v673_v40 = vsel %vm10854_vm0, 4294967295, %v10879_v24 }
 0x182   :  { %v5157_v46 = vpop.xlane.xlu0 %622  ;;  %v5159_v21 = vcvt.s32.f32 %v876_v25  ;;  %vm777_vm7 = vcmp.lt.s32.totalorder %v675_v31, %v676_v32  ;;  %v860_v50 = vshra.s32 %v5152_v34, 16  ;;  %v674_v52 = vsel %vm10857_vm15, %v4992_v12, 2147483647  ;;  %v5166_v53 = vpop.xlane.xlu1 %625 }
 0x183   :  { %11557 = vst [vmem:[#allocation20_spill] sm:$0xff] %v5157_v46  ;;  %11558 = vst [vmem:[#allocation21_spill] sm:$0xff] %v5166_v53  ;;  %vm10858_vm13 = vcmp.eq.f32.partialorder %v5157_v46, 1e+30  ;;  %vm10864_vm12 = vcmp.eq.f32.partialorder %v4965_v62, %v5157_v46  ;;  %v5171_v58 = vsel %vm777_vm7, %v675_v31, %v676_v32  ;;  %vm761_vm0 = vcmp.lt.s32.totalorder %v673_v40, %v674_v52 }
 0x184   :  { %vm10860_vm9 = vcmp.eq.f32.partialorder %v5166_v53, 1e+30  ;;  %vm10859_vm14 = vcmp.eq.f32.partialorder %v4957_v41, %v5166_v53  ;;  %879 = vmin.xlane.f32.xlu1 %v5159_v21  ;;  %735 = vmin.xlane.f32.xlu0 %v5137_v19  ;;  %v780_v59 = vshra.s32 %v5171_v58, 16  ;;  %v5179_v61 = vcvt.s32.f32 %v860_v50 }
 0x185   :  { %v691_v51 = vsel %vm10860_vm9, 4294967295, %v10879_v24  ;;  %v692_v63 = vsel %vm10859_vm14, %v4992_v12, 2147483647  ;;  %v5188_v2 = vsel %vm761_vm0, %v673_v40, %v674_v52  ;;  %v689_v43 = vsel %vm10858_vm13, 4294967295, %v10879_v24 }
 0x186   :  { %v5193_v0 = vpop.xlane.xlu0 %604  ;;  %v5195_v45 = vcvt.s32.f32 %v780_v59  ;;  %vm905_vm7 = vcmp.lt.s32.totalorder %v691_v51, %v692_v63  ;;  %v764_v30 = vshra.s32 %v5188_v2, 16  ;;  %v690_v14 = vsel %vm10864_vm12, %v4992_v12, 2147483647  ;;  %v5202_v15 = vpop.xlane.xlu1 %607 }
 0x187   :  { %11559 = vst [vmem:[#allocation22_spill] sm:$0xff] %v5193_v0  ;;  %11560 = vst [vmem:[#allocation23_spill] sm:$0xff] %v5202_v15  ;;  %vm10865_vm0 = vcmp.eq.f32.partialorder %v5193_v0, 1e+30  ;;  %vm10878_vm15 = vcmp.eq.f32.partialorder %v4983_v33, %v5193_v0  ;;  %v5207_v25 = vsel %vm905_vm7, %v691_v51, %v692_v63  ;;  %vm889_vm13 = vcmp.lt.s32.totalorder %v689_v43, %v690_v14 }
 0x188   :  { %vm10867_vm14 = vcmp.eq.f32.partialorder %v5202_v15, 1e+30  ;;  %vm10866_vm9 = vcmp.eq.f32.partialorder %v4974_v4, %v5202_v15  ;;  %783 = vmin.xlane.f32.xlu1 %v5195_v45  ;;  %863 = vmin.xlane.f32.xlu0 %v5179_v61  ;;  %v908_v31 = vshra.s32 %v5207_v25, 16  ;;  %v5215_v32 = vcvt.s32.f32 %v764_v30 }
 0x189   :  { %v679_v40 = vsel %vm10867_vm14, 4294967295, %v10879_v24  ;;  %v680_v50 = vsel %vm10866_vm9, %v4992_v12, 2147483647  ;;  %v5224_v52 = vsel %vm889_vm13, %v689_v43, %v690_v14  ;;  %v677_v59 = vsel %vm10865_vm0, 4294967295, %v10879_v24 }
 0x18a   :  { %v5229_v51 = vpop.xlane.xlu0 %628  ;;  %v5231_v63 = vcvt.s32.f32 %v908_v31  ;;  %vm809_vm7 = vcmp.lt.s32.totalorder %v679_v40, %v680_v50  ;;  %v892_v30 = vshra.s32 %v5224_v52, 16  ;;  %v678_v9 = vsel %vm10878_vm15, %v4992_v12, 2147483647  ;;  %v5238_v62 = vpop.xlane.xlu1 %631 }
 0x18b   :  { %11561 = vst [vmem:[#allocation24_spill] sm:$0xff] %v5229_v51  ;;  %11562 = vst [vmem:[#allocation25_spill] sm:$0xff] %v5238_v62  ;;  %vm4649_vm13 = vcmp.eq.f32.partialorder %v5229_v51, 1e+30  ;;  %vm10889_vm12 = vcmp.eq.f32.partialorder %v4986_v8, %v5229_v51  ;;  %v5243_v43 = vsel %vm809_vm7, %v679_v40, %v680_v50  ;;  %vm793_vm0 = vcmp.lt.s32.totalorder %v677_v59, %v678_v9 }
 0x18c   :  { %vm4650_vm9 = vcmp.eq.f32.partialorder %v5238_v62, 1e+30  ;;  %vm664_vm14 = vcmp.eq.f32.partialorder %v4976_v5, %v5238_v62  ;;  %911 = vmin.xlane.f32.xlu1 %v5231_v63  ;;  %767 = vmin.xlane.f32.xlu0 %v5215_v32  ;;  %v812_v14 = vshra.s32 %v5243_v43, 16  ;;  %v5251_v31 = vcvt.s32.f32 %v892_v30 }
 0x18d   :  { %v695_v33 = vsel %vm4650_vm9, 4294967295, %v10879_v24  ;;  %v696_v40 = vsel %vm664_vm14, %v4992_v12, 2147483647  ;;  %v5260_v50 = vsel %vm793_vm0, %v677_v59, %v678_v9  ;;  %v693_v0 = vsel %vm4649_vm13, 4294967295, %v10879_v24 }
 0x18e   :  { %v5265_v46 = vcvt.s32.f32 %v812_v14  ;;  %vm937_vm7 = vcmp.lt.s32.totalorder %v695_v33, %v696_v40  ;;  %v796_v30 = vshra.s32 %v5260_v50, 16  ;;  %v694_v4 = vsel %vm10889_vm12, %v4992_v12, 2147483647 }
 0x18f   :  { %v5272_v15 = vsel %vm937_vm7, %v695_v33, %v696_v40  ;;  %vm921_vm15 = vcmp.lt.s32.totalorder %v693_v0, %v694_v4  ;;  %v715_v40 = vand.u32 65535, %v5027_v37 }
 0x190   :  { %815 = vmin.xlane.f32.xlu1 %v5265_v46  ;;  %895 = vmin.xlane.f32.xlu0 %v5251_v31  ;;  %v940_v9 = vshra.s32 %v5272_v15, 16  ;;  %v5277_v59 = vsel %vm921_vm15, %v693_v0, %v694_v4  ;;  %v5281_v24 = vcvt.s32.f32 %v796_v30  ;;  %v843_v0 = vand.u32 65535, %v5035_v44 }
 0x191   :  { %v924_v5 = vshra.s32 %v5277_v59, 16  ;;  %v717_v4 = vcvt.s32.f32 %v715_v40  ;;  %v699_v30 = vand.u32 65535, %v5065_v57  ;;  %v747_v40 = vand.u32 65535, %v5100_v3 }
 0x192   :  { %v5279_v14 = vcvt.s32.f32 %v940_v9  ;;  %v827_v44 = vand.u32 65535, %v5067_v18 }
 0x193   :  { %v5286_v33 = vcvt.s32.f32 %v924_v5  ;;  %v845_v5 = vcvt.s32.f32 %v843_v0  ;;  %v701_v37 = vcvt.s32.f32 %v699_v30  ;;  %v749_v0 = vcvt.s32.f32 %v747_v40 }
 0x194   :  { %943 = vmin.xlane.f32.xlu1 %v5279_v14  ;;  %799 = vmin.xlane.f32.xlu0 %v5281_v24  ;;  %v731_v30 = vand.u32 65535, %v5107_v54  ;;  %v859_v54 = vand.u32 65535, %v5152_v34  ;;  %v763_v34 = vand.u32 65535, %v5188_v2  ;;  %v891_v2 = vand.u32 65535, %v5224_v52 }
 0x195   :  { %v795_v52 = vand.u32 65535, %v5260_v50 }
 0x198   :  { %927 = vmin.xlane.f32.xlu0 %v5286_v33 }
 0x204   :  { %v5290_v8 = vpop.xlane.xlu1 %719 }
 0x205   :  { %vm721_vm15 = vcmp.eq.f32.partialorder %v5044_v48, %v5290_v8 }
 0x206   :  { %v722_v9 = vsel %vm721_vm15, %v717_v4, inf }
 0x207   :  { %723 = vmin.xlane.f32.xlu1 %v722_v9  ;;  %v829_v9 = vcvt.s32.f32 %v827_v44 }
 0x208   :  { %v5296_v51 = vpop.xlane.xlu1 %847 }
 0x209   :  { %v5298_v62 = vpop.xlane.xlu0 %703  ;;  %vm849_vm0 = vcmp.eq.f32.partialorder %v5074_v60, %v5296_v51  ;;  %v875_v60 = vand.u32 65535, %v5135_v16  ;;  %v779_v16 = vand.u32 65535, %v5171_v58  ;;  %v907_v58 = vand.u32 65535, %v5207_v25 }
 0x20a   :  { %v850_v49 = vsel %vm849_vm0, %v845_v5, inf  ;;  %vm705_vm7 = vcmp.eq.f32.partialorder %v5088_v26, %v5298_v62  ;;  %v811_v25 = vand.u32 65535, %v5243_v43  ;;  %v939_v43 = vand.u32 65535, %v5272_v15 }
 0x20b   :  { %851 = vmin.xlane.f32.xlu1 %v850_v49  ;;  %v706_v48 = vsel %vm705_vm7, %v701_v37, inf  ;;  %v877_v5 = vcvt.s32.f32 %v875_v60  ;;  %v733_v37 = vcvt.s32.f32 %v731_v30  ;;  %v909_v30 = vcvt.s32.f32 %v907_v58 }
 0x20c   :  { %707 = vmin.xlane.f32.xlu0 %v706_v48  ;;  %v781_v48 = vcvt.s32.f32 %v779_v16  ;;  %v893_v16 = vcvt.s32.f32 %v891_v2  ;;  %v923_v15 = vand.u32 65535, %v5277_v59  ;;  %v726_v59 = vcvt.f32.s32 %v5290_v8 }
 0x20d   :  { %v5306_v57 = vpop.xlane.xlu1 %751  ;;  %v5308_v4 = vpop.xlane.xlu0 %831 }
 0x20e   :  { %vm753_vm15 = vcmp.eq.f32.partialorder %v5121_v13, %v5306_v57  ;;  %vm833_vm0 = vcmp.eq.f32.partialorder %v5109_v28, %v5308_v4 }
 0x20f   :  { %v754_v18 = vsel %vm753_vm15, %v749_v0, inf  ;;  %v834_v49 = vsel %vm833_vm0, %v829_v9, inf  ;;  %v861_v0 = vcvt.s32.f32 %v859_v54 }
 0x210   :  { %755 = vmin.xlane.f32.xlu1 %v754_v18  ;;  %835 = vmin.xlane.f32.xlu0 %v834_v49  ;;  %v765_v18 = vcvt.s32.f32 %v763_v34 }
 0x211   :  { %v5316_v26 = vpop.xlane.xlu1 %879  ;;  %v5318_v3 = vpop.xlane.xlu0 %735 }
 0x212   :  { %vm881_vm7 = vcmp.eq.f32.partialorder %v5159_v21, %v5316_v26  ;;  %vm737_vm12 = vcmp.eq.f32.partialorder %v5137_v19, %v5318_v3 }
 0x213   :  { %v882_v28 = vsel %vm881_vm7, %v877_v5, inf  ;;  %v738_v13 = vsel %vm737_vm12, %v733_v37, inf  ;;  %v813_v37 = vcvt.s32.f32 %v811_v25  ;;  %v838_v25 = vcvt.f32.s32 %v5308_v4 }
 0x214   :  { %883 = vmin.xlane.f32.xlu1 %v882_v28  ;;  %739 = vmin.xlane.f32.xlu0 %v738_v13  ;;  %v941_v13 = vcvt.s32.f32 %v939_v43 }
 0x215   :  { %v5326_v40 = vpop.xlane.xlu1 %783  ;;  %v5328_v44 = vpop.xlane.xlu0 %863 }
 0x216   :  { %vm785_vm15 = vcmp.eq.f32.partialorder %v5195_v45, %v5326_v40  ;;  %vm865_vm0 = vcmp.eq.f32.partialorder %v5179_v61, %v5328_v44 }
 0x217   :  { %v786_v19 = vsel %vm785_vm15, %v781_v48, inf  ;;  %v866_v21 = vsel %vm865_vm0, %v861_v0, inf  ;;  %v797_v48 = vcvt.s32.f32 %v795_v52  ;;  %v925_v0 = vcvt.s32.f32 %v923_v15 }
 0x218   :  { %787 = vmin.xlane.f32.xlu1 %v786_v19  ;;  %867 = vmin.xlane.f32.xlu0 %v866_v21  ;;  %v727_v19 = vshll.u32 %v726_v59, 16  ;;  %v839_v52 = vshll.u32 %v838_v25, 16 }
 0x219   :  { %v5336_v9 = vpop.xlane.xlu1 %911  ;;  %v5338_v60 = vpop.xlane.xlu0 %767 }
 0x21a   :  { %vm913_vm12 = vcmp.eq.f32.partialorder %v5231_v63, %v5336_v9  ;;  %vm769_vm7 = vcmp.eq.f32.partialorder %v5215_v32, %v5338_v60 }
 0x21b   :  { %v914_v61 = vsel %vm913_vm12, %v909_v30, inf  ;;  %v770_v45 = vsel %vm769_vm7, %v765_v18, inf  ;;  %v758_v18 = vcvt.f32.s32 %v5306_v57  ;;  %v790_v57 = vcvt.f32.s32 %v5326_v40 }
 0x21c   :  { %915 = vmin.xlane.f32.xlu1 %v914_v61  ;;  %771 = vmin.xlane.f32.xlu0 %v770_v45 }
 0x21d   :  { %v5346_v49 = vpop.xlane.xlu1 %815  ;;  %v5348_v5 = vpop.xlane.xlu0 %895 }
 0x21e   :  { %vm817_vm15 = vcmp.eq.f32.partialorder %v5265_v46, %v5346_v49  ;;  %vm897_vm0 = vcmp.eq.f32.partialorder %v5251_v31, %v5348_v5 }
 0x21f   :  { %v818_v32 = vsel %vm817_vm15, %v813_v37, inf  ;;  %v898_v63 = vsel %vm897_vm0, %v893_v16, inf  ;;  %v5389_v16 = vld [vmem:[#allocation2 + $0x10] sm:$0xff] }
 0x220   :  { %819 = vmin.xlane.f32.xlu1 %v818_v32  ;;  %899 = vmin.xlane.f32.xlu0 %v898_v63 }
 0x221   :  { %v5356_v54 = vpop.xlane.xlu1 %943  ;;  %v5358_v28 = vpop.xlane.xlu0 %799 }
 0x222   :  { %vm945_vm12 = vcmp.eq.f32.partialorder %v5279_v14, %v5356_v54  ;;  %vm801_vm7 = vcmp.eq.f32.partialorder %v5281_v24, %v5358_v28  ;;  %v854_v14 = vcvt.f32.s32 %v5296_v51  ;;  %v710_v24 = vcvt.f32.s32 %v5298_v62 }
 0x223   :  { %v946_v46 = vsel %vm945_vm12, %v941_v13, inf  ;;  %v802_v31 = vsel %vm801_vm7, %v797_v48, inf  ;;  %v886_v51 = vcvt.f32.s32 %v5316_v26  ;;  %v742_v62 = vcvt.f32.s32 %v5318_v3 }
 0x224   :  { %947 = vmin.xlane.f32.xlu1 %v946_v46  ;;  %803 = vmin.xlane.f32.xlu0 %v802_v31  ;;  %v855_v61 = vshll.u32 %v854_v14, 16  ;;  %v711_v8 = vshll.u32 %v710_v24, 16  ;;  %v759_v26 = vshll.u32 %v758_v18, 16  ;;  %v870_v3 = vcvt.f32.s32 %v5328_v44 }
 0x225   :  { %v5365_v50 = vpop.xlane.xlu0 %927  ;;  %v743_v44 = vshll.u32 %v742_v62, 16  ;;  %v791_v31 = vshll.u32 %v790_v57, 16  ;;  %v902_v62 = vcvt.f32.s32 %v5348_v5 }
 0x226   :  { %vm929_vm15 = vcmp.eq.f32.partialorder %v5286_v33, %v5365_v50  ;;  %v871_v14 = vshll.u32 %v870_v3, 16 }
 0x227   :  { %v930_v58 = vsel %vm929_vm15, %v925_v0, inf }
 0x228   :  { %931 = vmin.xlane.f32.xlu0 %v930_v58  ;;  %v918_v58 = vcvt.f32.s32 %v5336_v9 }
 0x294   :  { %v724_v34 = vpop.xlane.xlu1 %723 }
 0x295   :  { %v725_v21 = vcvt.f32.s32 %v724_v34 }
 0x297   :  { %v5372_v30 = vadd.s32 %v727_v19, %v725_v21  ;;  %v774_v21 = vcvt.f32.s32 %v5338_v60 }
 0x298   :  { %v852_v2 = vpop.xlane.xlu1 %851 }
 0x299   :  { %11563 = vst [vmem:[#allocation26_spill] sm:$0xff] %v5372_v30  ;;  %v853_v33 = vcvt.f32.s32 %v852_v2  ;;  %v708_v45 = vpop.xlane.xlu0 %707  ;;  %vm4651_vm0 = vcmp.eq.s32.totalorder %v5372_v30, 4294967295  ;;  %vm956_vm12 = vcmp.eq.s32.totalorder %v4992_v12, %v5372_v30 }
 0x29a   :  { %v709_v37 = vcvt.f32.s32 %v708_v45  ;;  %vm987_vm7 = vmand %vm4636_vm4, %vm4651_vm0 }
 0x29b   :  { %v5384_v4 = vadd.s32 %v855_v61, %v853_v33  ;;  %vm988_vm15 = vmand %vm636_vm5, %vm956_vm12  ;;  %v5392_v43 = vsel %vm987_vm7, 1e+30, %v5389_v16  ;;  %v919_v33 = vshll.u32 %v918_v58, 16 }
 0x29c   :  { %v5394_v32 = vadd.s32 %v711_v8, %v709_v37  ;;  %v5397_v63 = vsel %vm988_vm15, 1e+30, %v4906_v6  ;;  %v887_v6 = vshll.u32 %v886_v51, 16  ;;  %v775_v51 = vshll.u32 %v774_v21, 16 }
 0x29d   :  { %11564 = vst [vmem:[#allocation27_spill] sm:$0xff] %v5384_v4  ;;  %v756_v40 = vpop.xlane.xlu1 %755  ;;  %v836_v13 = vpop.xlane.xlu0 %835  ;;  %v1052_v48 = vmin.f32 %v5392_v43, %v5397_v63  ;;  %vm4652_vm4 = vcmp.eq.s32.totalorder %v5384_v4, 4294967295  ;;  %vm972_vm5 = vcmp.eq.s32.totalorder %v4992_v12, %v5384_v4  ;;  %v822_v37 = vcvt.f32.s32 %v5346_v49 }
 0x29e   :  { %11565 = vst [vmem:[#allocation28_spill] sm:$0xff] %v5394_v32  ;;  %v757_v15 = vcvt.f32.s32 %v756_v40  ;;  %v837_v46 = vcvt.f32.s32 %v836_v13  ;;  %vm1003_vm0 = vmand %vm4635_vm2, %vm4652_vm4  ;;  %vm4653_vm12 = vcmp.eq.s32.totalorder %v5394_v32, 4294967295  ;;  %vm954_vm7 = vcmp.eq.s32.totalorder %v4992_v12, %v5394_v32 }
 0x29f   :  { %1053 = vmin.xlane.f32.xlu1 %v1052_v48  ;;  %vm1004_vm15 = vmand %vm652_vm3, %vm972_vm5  ;;  %v5414_v0 = vsel %vm1003_vm0, 1e+30, %v5389_v16 }
 0x2a0   :  { %v5417_v59 = vadd.s32 %v759_v26, %v757_v15  ;;  %v5419_v34 = vadd.s32 %v839_v52, %v837_v46  ;;  %v5422_v19 = vsel %vm1004_vm15, 1e+30, %v4908_v7  ;;  %vm985_vm2 = vmand %vm4638_vm10, %vm4653_vm12  ;;  %v903_v46 = vshll.u32 %v902_v62, 16 }
 0x2a1   :  { %v884_v24 = vpop.xlane.xlu1 %883  ;;  %v740_v18 = vpop.xlane.xlu0 %739  ;;  %v1076_v25 = vmin.f32 %v5414_v0, %v5422_v19  ;;  %vm986_vm3 = vmand %vm634_vm11, %vm954_vm7  ;;  %v5436_v7 = vsel %vm985_vm2, 1e+30, %v5389_v16 }
 0x2a2   :  { %11566 = vst [vmem:[#allocation29_spill] sm:$0xff] %v5417_v59  ;;  %11567 = vst [vmem:[#allocation30_spill] sm:$0xff] %v5419_v34  ;;  %v885_v9 = vcvt.f32.s32 %v884_v24  ;;  %v741_v2 = vcvt.f32.s32 %v740_v18  ;;  %v5439_v61 = vsel %vm986_vm3, 1e+30, %v4912_v10  ;;  %vm4654_vm10 = vcmp.eq.s32.totalorder %v5417_v59, 4294967295 }
 0x2a3   :  { %1077 = vmin.xlane.f32.xlu1 %v1076_v25  ;;  %v1049_v60 = vmin.f32 %v5436_v7, %v5439_v61  ;;  %vm960_vm4 = vcmp.eq.s32.totalorder %v4992_v12, %v5417_v59  ;;  %vm991_vm11 = vmand %vm4640_vm1, %vm4654_vm10  ;;  %vm4655_vm5 = vcmp.eq.s32.totalorder %v5419_v34, 4294967295  ;;  %vm970_vm0 = vcmp.eq.s32.totalorder %v4992_v12, %v5419_v34 }
 0x2a4   :  { %v5451_v10 = vadd.s32 %v887_v6, %v885_v9  ;;  %v5453_v45 = vadd.s32 %v743_v44, %v741_v2  ;;  %vm992_vm12 = vmand %vm640_vm6, %vm960_vm4  ;;  %v5459_v8 = vsel %vm991_vm11, 1e+30, %v5389_v16  ;;  %vm11570_vm6 = vcmp.eq.f32.partialorder %v4914_v11, %v5025_v36 }
 0x2a5   :  { %1050 = vmin.xlane.f32.xlu0 %v1049_v60  ;;  %v788_v57 = vpop.xlane.xlu1 %787  ;;  %v868_v26 = vpop.xlane.xlu0 %867  ;;  %v5464_v52 = vsel %vm992_vm12, 1e+30, %v4925_v27  ;;  %vm1001_vm1 = vmand %vm4637_vm8, %vm4655_vm5  ;;  %vm11573_vm3 = vcmp.eq.f32.partialorder %v5094_v23, 1e+30  ;;  %v950_v6 = vcvt.f32.s32 %v5356_v54  ;;  %vm11574_vm11 = vcmp.eq.f32.partialorder %v4929_v29, %v5094_v23 }
 0x2a6   :  { %11568 = vst [vmem:[#allocation31_spill] sm:$0xff] %v5451_v10  ;;  %11569 = vst [vmem:[#allocation32_spill] sm:$0xff] %v5453_v45  ;;  %v789_v3 = vcvt.f32.s32 %v788_v57  ;;  %v869_v40 = vcvt.f32.s32 %v868_v26  ;;  %v1058_v13 = vmin.f32 %v5459_v8, %v5464_v52  ;;  %v5477_v49 = vsel %vm1001_vm1, 1e+30, %v5389_v16 }
 0x2a7   :  { %vm1002_vm7 = vmand %vm11570_vm6, %vm970_vm0  ;;  %vm4656_vm8 = vcmp.eq.s32.totalorder %v5451_v10, 4294967295  ;;  %vm976_vm15 = vcmp.eq.s32.totalorder %v4992_v12, %v5451_v10  ;;  %vm4657_vm2 = vcmp.eq.s32.totalorder %v5453_v45, 4294967295  ;;  %vm958_vm4 = vcmp.eq.s32.totalorder %v4992_v12, %v5453_v45 }
 0x2a8   :  { %v5480_v27 = vsel %vm1002_vm7, 1e+30, %v4914_v11  ;;  %v5486_v5 = vadd.s32 %v791_v31, %v789_v3  ;;  %v5488_v48 = vadd.s32 %v871_v14, %v869_v40  ;;  %1059 = vmin.xlane.f32.xlu1 %v1058_v13  ;;  %vm1007_vm10 = vmand %vm11573_vm3, %vm4656_vm8  ;;  %v823_v11 = vshll.u32 %v822_v37, 16 }
 0x2a9   :  { %v1073_v15 = vmin.f32 %v5477_v49, %v5480_v27  ;;  %v916_v44 = vpop.xlane.xlu1 %915  ;;  %v772_v58 = vpop.xlane.xlu0 %771  ;;  %vm1008_vm5 = vmand %vm11574_vm11, %vm976_vm15  ;;  %v5501_v31 = vsel %vm1007_vm10, 1e+30, %v5389_v16  ;;  %vm11575_vm0 = vcmp.eq.f32.partialorder %v5057_v55, 1e+30  ;;  %vm11576_vm6 = vcmp.eq.f32.partialorder %v4937_v47, %v5057_v55 }
 0x2aa   :  { %11571 = vst [vmem:[#allocation33_spill] sm:$0xff] %v5486_v5  ;;  %11572 = vst [vmem:[#allocation34_spill] sm:$0xff] %v5488_v48  ;;  %v917_v14 = vcvt.f32.s32 %v916_v44  ;;  %v773_v21 = vcvt.f32.s32 %v772_v58  ;;  %v5504_v24 = vsel %vm1008_vm5, 1e+30, %v4929_v29  ;;  %vm4658_vm1 = vcmp.eq.s32.totalorder %v5486_v5, 4294967295 }
 0x2ab   :  { %1074 = vmin.xlane.f32.xlu0 %v1073_v15  ;;  %vm989_vm12 = vmand %vm11575_vm0, %vm4657_vm2  ;;  %v1082_v54 = vmin.f32 %v5501_v31, %v5504_v24  ;;  %vm964_vm8 = vcmp.eq.s32.totalorder %v4992_v12, %v5486_v5  ;;  %vm4659_vm15 = vcmp.eq.s32.totalorder %v5488_v48, 4294967295  ;;  %vm11580_vm2 = vcmp.eq.f32.partialorder %v5130_v17, 1e+30 }
 0x2ac   :  { %vm990_vm7 = vmand %vm11576_vm6, %vm958_vm4  ;;  %v5520_v29 = vsel %vm989_vm12, 1e+30, %v5389_v16  ;;  %v5525_v18 = vadd.s32 %v919_v33, %v917_v14  ;;  %v5527_v25 = vadd.s32 %v775_v51, %v773_v21  ;;  %vm974_vm10 = vcmp.eq.s32.totalorder %v4992_v12, %v5488_v48 }
 0x2ad   :  { %v5530_v9 = vsel %vm990_vm7, 1e+30, %v4937_v47  ;;  %vm995_vm3 = vmand %vm11580_vm2, %vm4658_vm1  ;;  %v951_v2 = vshll.u32 %v950_v6, 16  ;;  %v806_v60 = vcvt.f32.s32 %v5358_v28  ;;  %1083 = vmin.xlane.f32.xlu1 %v1082_v54  ;;  %v820_v33 = vpop.xlane.xlu1 %819  ;;  %v900_v62 = vpop.xlane.xlu0 %899  ;;  %vm11581_vm4 = vcmp.eq.f32.partialorder %v4953_v39, %v5130_v17  ;;  %v11595_v54 = vld [vmem:[#allocation4_spill] sm:$0xff] }
 0x2ae   :  { %11577 = vst [vmem:[#allocation35_spill] sm:$0xff] %v5525_v18  ;;  %11578 = vst [vmem:[#allocation36_spill] sm:$0xff] %v5527_v25  ;;  %v1055_v37 = vmin.f32 %v5520_v29, %v5530_v9  ;;  %v5543_v47 = vsel %vm995_vm3, 1e+30, %v5389_v16  ;;  %v821_v51 = vcvt.f32.s32 %v820_v33  ;;  %v901_v57 = vcvt.f32.s32 %v900_v62  ;;  %v11601_v62 = vld [vmem:[#allocation23_spill] sm:$0xff] }
 0x2af   :  { %11579 = vst [vmem:[#allocation37_spill] sm:$0xff] %v5530_v9  ;;  %vm996_vm11 = vmand %vm11581_vm4, %vm964_vm8  ;;  %vm11584_vm5 = vcmp.eq.f32.partialorder %v5086_v1, 1e+30  ;;  %vm4660_vm12 = vcmp.eq.s32.totalorder %v5525_v18, 4294967295  ;;  %vm11585_vm1 = vcmp.eq.f32.partialorder %v4941_v35, %v5086_v1  ;;  %vm980_vm7 = vcmp.eq.s32.totalorder %v4992_v12, %v5525_v18 }
 0x2b0   :  { %11582 = vst [vmem:[#allocation38_spill] sm:$0xff] %v5543_v47  ;;  %v5546_v26 = vsel %vm996_vm11, 1e+30, %v4953_v39  ;;  %vm1005_vm0 = vmand %vm11584_vm5, %vm4659_vm15  ;;  %1056 = vmin.xlane.f32.xlu0 %v1055_v37  ;;  %vm4661_vm8 = vcmp.eq.s32.totalorder %v5527_v25, 4294967295  ;;  %v5567_v3 = vadd.s32 %v823_v11, %v821_v51  ;;  %v5569_v40 = vadd.s32 %v903_v46, %v901_v57 }
 0x2b1   :  { %11583 = vst [vmem:[#allocation39_spill] sm:$0xff] %v5546_v26  ;;  %v1064_v28 = vmin.f32 %v5543_v47, %v5546_v26  ;;  %vm1006_vm6 = vmand %vm11585_vm1, %vm974_vm10  ;;  %v5562_v39 = vsel %vm1005_vm0, 1e+30, %v5389_v16  ;;  %vm11590_vm15 = vcmp.eq.f32.partialorder %v5166_v53, 1e+30  ;;  %vm962_vm3 = vcmp.eq.s32.totalorder %v4992_v12, %v5527_v25  ;;  %v948_v11 = vpop.xlane.xlu1 %947  ;;  %v804_v58 = vpop.xlane.xlu0 %803 }
 0x2b2   :  { %11586 = vst [vmem:[#allocation40_spill] sm:$0xff] %v5562_v39  ;;  %11587 = vst [vmem:[#allocation41_spill] sm:$0xff] %v5567_v3  ;;  %v5572_v13 = vsel %vm1006_vm6, 1e+30, %v4941_v35  ;;  %v807_v15 = vshll.u32 %v806_v60, 16  ;;  %v934_v6 = vcvt.f32.s32 %v5365_v50  ;;  %vm11591_vm10 = vcmp.eq.f32.partialorder %v4957_v41, %v5166_v53  ;;  %v4622_v53 = vld [vmem:[#allocation2 + $0xe8] sm:$0xff] }
 0x2b3   :  { %11588 = vst [vmem:[#allocation42_spill] sm:$0xff] %v5569_v40  ;;  %11589 = vst [vmem:[#allocation43_spill] sm:$0xff] %v5572_v13  ;;  %1065 = vmin.xlane.f32.xlu1 %v1064_v28  ;;  %v1079_v44 = vmin.f32 %v5562_v39, %v5572_v13  ;;  %v949_v46 = vcvt.f32.s32 %v948_v11  ;;  %v805_v14 = vcvt.f32.s32 %v804_v58  ;;  %vm11594_vm11 = vcmp.eq.f32.partialorder %v5119_v42, 1e+30  ;;  %v11607_v58 = vld [vmem:[#allocation20_spill] sm:$0xff] }
 0x2b4   :  { %vm1011_vm2 = vmand %vm11590_vm15, %vm4660_vm12  ;;  %vm4662_vm0 = vcmp.eq.s32.totalorder %v5567_v3, 4294967295  ;;  %vm11596_vm12 = vcmp.eq.f32.partialorder %v11595_v54, %v5119_v42  ;;  %vm968_vm6 = vcmp.eq.s32.totalorder %v4992_v12, %v5567_v3  ;;  %v935_v51 = vshll.u32 %v934_v6, 16  ;;  %v11625_v42 = vld [vmem:[#allocation9_spill] sm:$0xff] }
 0x2b5   :  { %vm1012_vm4 = vmand %vm11591_vm10, %vm980_vm7  ;;  %v5585_v35 = vsel %vm1011_vm2, 1e+30, %v5389_v16  ;;  %1080 = vmin.xlane.f32.xlu0 %v1079_v44  ;;  %vm4663_vm7 = vcmp.eq.s32.totalorder %v5569_v40, 4294967295  ;;  %v5609_v60 = vadd.s32 %v951_v2, %v949_v46  ;;  %v5611_v37 = vadd.s32 %v807_v15, %v805_v14  ;;  %v932_v28 = vpop.xlane.xlu0 %931  ;;  %v11603_v44 = vld [vmem:[#allocation6_spill] sm:$0xff]  ;;  %v11609_v46 = vld [vmem:[#allocation5_spill] sm:$0xff] }
 0x2b6   :  { %11592 = vst [vmem:[#allocation44_spill] sm:$0xff] %v5585_v35  ;;  %v5588_v21 = vsel %vm1012_vm4, 1e+30, %v4957_v41  ;;  %vm993_vm5 = vmand %vm11594_vm11, %vm4661_vm8  ;;  %vm11602_vm8 = vcmp.eq.f32.partialorder %v11601_v62, 1e+30  ;;  %vm978_vm2 = vcmp.eq.s32.totalorder %v4992_v12, %v5569_v40  ;;  %v933_v15 = vcvt.f32.s32 %v932_v28  ;;  %v11620_v28 = vld [vmem:[#allocation8_spill] sm:$0xff] }
 0x2b7   :  { %11593 = vst [vmem:[#allocation45_spill] sm:$0xff] %v5588_v21  ;;  %v1088_v50 = vmin.f32 %v5585_v35, %v5588_v21  ;;  %vm994_vm1 = vmand %vm11596_vm12, %vm962_vm3  ;;  %v5604_v41 = vsel %vm993_vm5, 1e+30, %v5389_v16  ;;  %vm11604_vm3 = vcmp.eq.f32.partialorder %v11603_v44, %v11601_v62  ;;  %vm11608_vm4 = vcmp.eq.f32.partialorder %v11607_v58, 1e+30  ;;  %v11624_v62 = vld [vmem:[#allocation24_spill] sm:$0xff] }
 0x2b8   :  { %11597 = vst [vmem:[#allocation4_spill] sm:$0xff] %v5604_v41  ;;  %11598 = vst [vmem:[#allocation46_spill] sm:$0xff] %v5609_v60  ;;  %v5614_v33 = vsel %vm994_vm1, 1e+30, %v11595_v54  ;;  %vm4664_vm5 = vcmp.eq.s32.totalorder %v5609_v60, 4294967295  ;;  %vm11610_vm12 = vcmp.eq.f32.partialorder %v11609_v46, %v11607_v58 }
 0x2b9   :  { %11599 = vst [vmem:[#allocation47_spill] sm:$0xff] %v5611_v37  ;;  %11600 = vst [vmem:[#allocation48_spill] sm:$0xff] %v5614_v33  ;;  %1089 = vmin.xlane.f32.xlu1 %v1088_v50  ;;  %v1061_v57 = vmin.f32 %v5604_v41, %v5614_v33  ;;  %v5645_v50 = vadd.s32 %v935_v51, %v933_v15 }
 0x2ba   :  { %vm999_vm15 = vmand %vm11602_vm8, %vm4662_vm0  ;;  %vm984_vm0 = vcmp.eq.s32.totalorder %v4992_v12, %v5609_v60  ;;  %vm966_vm8 = vcmp.eq.s32.totalorder %v4992_v12, %v5611_v37 }
 0x2bb   :  { %vm1000_vm10 = vmand %vm11604_vm3, %vm968_vm6  ;;  %v5626_v2 = vsel %vm999_vm15, 1e+30, %v5389_v16  ;;  %1062 = vmin.xlane.f32.xlu0 %v1061_v57  ;;  %vm4665_vm6 = vcmp.eq.s32.totalorder %v5611_v37, 4294967295  ;;  %11612 = vst [vmem:[#allocation50_spill] sm:$0xff] %v5645_v50  ;;  %vm4666_vm3 = vcmp.eq.s32.totalorder %v5645_v50, 4294967295 }
 0x2bc   :  { %11605 = vst [vmem:[#allocation6_spill] sm:$0xff] %v5626_v2  ;;  %v5629_v11 = vsel %vm1000_vm10, 1e+30, %v11603_v44  ;;  %vm1009_vm11 = vmand %vm11608_vm4, %vm4663_vm7  ;;  %v11615_v44 = vld [vmem:[#allocation7_spill] sm:$0xff]  ;;  %vm982_vm10 = vcmp.eq.s32.totalorder %v4992_v12, %v5645_v50 }
 0x2bd   :  { %11606 = vst [vmem:[#allocation49_spill] sm:$0xff] %v5629_v11  ;;  %v1070_v6 = vmin.f32 %v5626_v2, %v5629_v11  ;;  %vm1010_vm1 = vmand %vm11610_vm12, %vm978_vm2  ;;  %v5642_v14 = vsel %vm1009_vm11, 1e+30, %v5389_v16 }
 0x2be   :  { %11611 = vst [vmem:[#allocation5_spill] sm:$0xff] %v5642_v14  ;;  %v5648_v54 = vsel %vm1010_vm1, 1e+30, %v11609_v46  ;;  %vm1015_vm7 = vmand %vm4650_vm9, %vm4664_vm5  ;;  %v11618_v46 = vld [vmem:[#allocation22_spill] sm:$0xff]  ;;  %vm11626_vm5 = vcmp.eq.f32.partialorder %v11625_v42, %v11624_v62  ;;  %v11630_v42 = vmov 2147483647  }
 0x2bf   :  { %11613 = vst [vmem:[#allocation51_spill] sm:$0xff] %v5648_v54  ;;  %1071 = vmin.xlane.f32.xlu1 %v1070_v6  ;;  %v1085_v57 = vmin.f32 %v5642_v14, %v5648_v54  ;;  %vm1016_vm15 = vmand %vm664_vm14, %vm984_vm0  ;;  %v5660_v51 = vsel %vm1015_vm7, 1e+30, %v5389_v16  ;;  %vm11619_vm2 = vcmp.eq.f32.partialorder %v11618_v46, 1e+30  ;;  %vm11621_vm14 = vcmp.eq.f32.partialorder %v11620_v28, %v11618_v46  ;;  %v5718_v62 = vld [vmem:[#allocation3 + $0x10] sm:$0xff] }
 0x2c0   :  { %11616 = vst [vmem:[#allocation7_spill] sm:$0xff] %v5660_v51  ;;  %v5663_v15 = vsel %vm1016_vm15, 1e+30, %v11615_v44  ;;  %vm997_vm9 = vmand %vm11619_vm2, %vm4665_vm6 }
 0x2c1   :  { %11617 = vst [vmem:[#allocation52_spill] sm:$0xff] %v5663_v15  ;;  %1086 = vmin.xlane.f32.xlu0 %v1085_v57  ;;  %v1094_v6 = vmin.f32 %v5660_v51, %v5663_v15  ;;  %vm998_vm4 = vmand %vm11621_vm14, %vm966_vm8  ;;  %v5676_v58 = vsel %vm997_vm9, 1e+30, %v5389_v16 }
 0x2c2   :  { %11622 = vst [vmem:[#allocation8_spill] sm:$0xff] %v5676_v58  ;;  %v5679_v44 = vsel %vm998_vm4, 1e+30, %v11620_v28  ;;  %vm1013_vm11 = vmand %vm4649_vm13, %vm4666_vm3 }
 0x2c3   :  { %11623 = vst [vmem:[#allocation53_spill] sm:$0xff] %v5679_v44  ;;  %1095 = vmin.xlane.f32.xlu1 %v1094_v6  ;;  %v1067_v57 = vmin.f32 %v5676_v58, %v5679_v44  ;;  %vm1014_vm0 = vmand %vm11626_vm5, %vm982_vm10  ;;  %v5689_v46 = vsel %vm1013_vm11, 1e+30, %v5389_v16 }
 0x2c4   :  { %11627 = vst [vmem:[#allocation9_spill] sm:$0xff] %v5689_v46  ;;  %v5691_v1 = vsel %vm1014_vm0, 1e+30, %v4622_v53 }
 0x2c5   :  { %11628 = vst [vmem:[#allocation54_spill] sm:$0xff] %v5691_v1  ;;  %1068 = vmin.xlane.f32.xlu0 %v1067_v57  ;;  %v1091_v28 = vmin.f32 %v5689_v46, %v5691_v1 }
 0x2c9   :  { %1092 = vmin.xlane.f32.xlu0 %v1091_v28 }
 0x32c   :  { %v5695_v17 = vpop.xlane.xlu1 %1053 }
 0x32d   :  { %11629 = vst [vmem:[#allocation55_spill] sm:$0xff] %v5695_v17  ;;  %vm1099_vm13 = vcmp.eq.f32.partialorder %v5392_v43, %v5695_v17  ;;  %vm1100_vm12 = vcmp.eq.f32.partialorder %v5397_v63, %v5695_v17 }
 0x32e   :  { %v1131_v16 = vsel %vm1099_vm13, 4294967295, %v11630_v42  ;;  %v1132_v53 = vsel %vm1100_vm12, %v4992_v12, 2147483647  ;;  %v5724_v42 = vld [vmem:[#allocation3 + $0x18] sm:$0xff] }
 0x32f   :  { %vm1177_vm1 = vcmp.lt.s32.totalorder %v1131_v16, %v1132_v53 }
 0x330   :  { %v5709_v6 = vpop.xlane.xlu1 %1077  ;;  %v5711_v57 = vsel %vm1177_vm1, %v1131_v16, %v1132_v53 }
 0x331   :  { %11631 = vst [vmem:[#allocation56_spill] sm:$0xff] %v5709_v6  ;;  %vm1115_vm6 = vcmp.eq.f32.partialorder %v5414_v0, %v5709_v6  ;;  %vm1116_vm7 = vcmp.eq.f32.partialorder %v5422_v19, %v5709_v6  ;;  %v1180_v28 = vshra.s32 %v5711_v57, 16 }
 0x332   :  { %v1147_v12 = vsel %vm1115_vm6, %v5718_v62, 2147483647  ;;  %v1148_v16 = vsel %vm1116_vm7, %v5724_v42, 2147483647  ;;  %v5730_v53 = vpop.xlane.xlu0 %1050 }
 0x333   :  { %11632 = vst [vmem:[#allocation57_spill] sm:$0xff] %v5730_v53  ;;  %vm1097_vm8 = vcmp.eq.f32.partialorder %v5436_v7, %v5730_v53  ;;  %vm1098_vm15 = vcmp.eq.f32.partialorder %v5439_v61, %v5730_v53  ;;  %v5736_v55 = vcvt.s32.f32 %v1180_v28  ;;  %vm1305_vm2 = vcmp.lt.s32.totalorder %v1147_v12, %v1148_v16 }
 0x334   :  { %v1129_v23 = vsel %vm1097_vm8, %v5718_v62, 2147483647  ;;  %v1130_v36 = vsel %vm1098_vm15, %v5724_v42, 2147483647  ;;  %v5749_v38 = vsel %vm1305_vm2, %v1147_v12, %v1148_v16 }
 0x335   :  { %v5746_v56 = vpop.xlane.xlu1 %1059  ;;  %1183 = vmin.xlane.f32.xlu1 %v5736_v55  ;;  %vm1161_vm9 = vcmp.lt.s32.totalorder %v1129_v23, %v1130_v36  ;;  %v1308_v28 = vshra.s32 %v5749_v38, 16 }
 0x336   :  { %11633 = vst [vmem:[#allocation58_spill] sm:$0xff] %v5746_v56  ;;  %vm1103_vm3 = vcmp.eq.f32.partialorder %v5459_v8, %v5746_v56  ;;  %vm1104_vm10 = vcmp.eq.f32.partialorder %v5464_v52, %v5746_v56  ;;  %v5766_v22 = vsel %vm1161_vm9, %v1129_v23, %v1130_v36 }
 0x337   :  { %v1135_v20 = vsel %vm1103_vm3, %v5718_v62, 2147483647  ;;  %v1136_v12 = vsel %vm1104_vm10, %v5724_v42, 2147483647  ;;  %v5772_v50 = vcvt.s32.f32 %v1308_v28  ;;  %v1164_v37 = vshra.s32 %v5766_v22, 16 }
 0x338   :  { %v5764_v16 = vpop.xlane.xlu0 %1074  ;;  %vm1209_vm11 = vcmp.lt.s32.totalorder %v1135_v20, %v1136_v12 }
 0x339   :  { %11634 = vst [vmem:[#allocation59_spill] sm:$0xff] %v5764_v16  ;;  %vm10931_vm14 = vcmp.eq.f32.partialorder %v5477_v49, %v5764_v16  ;;  %vm10927_vm4 = vcmp.eq.f32.partialorder %v5480_v27, %v5764_v16  ;;  %1311 = vmin.xlane.f32.xlu1 %v5772_v50  ;;  %v5782_v36 = vsel %vm1209_vm11, %v1135_v20, %v1136_v12  ;;  %v5792_v28 = vcvt.s32.f32 %v1164_v37 }
 0x33a   :  { %v1145_v60 = vsel %vm10931_vm14, %v5718_v62, 2147483647  ;;  %v5779_v40 = vpop.xlane.xlu1 %1083  ;;  %v1146_v23 = vsel %vm10927_vm4, %v5724_v42, 2147483647  ;;  %v1212_v25 = vshra.s32 %v5782_v36, 16 }
 0x33b   :  { %11635 = vst [vmem:[#allocation60_spill] sm:$0xff] %v5779_v40  ;;  %vm10923_vm5 = vcmp.eq.f32.partialorder %v5501_v31, %v5779_v40  ;;  %vm10915_vm0 = vcmp.eq.f32.partialorder %v5504_v24, %v5779_v40  ;;  %vm1289_vm1 = vcmp.lt.s32.totalorder %v1145_v60, %v1146_v23  ;;  %1167 = vmin.xlane.f32.xlu0 %v5792_v28 }
 0x33c   :  { %v1151_v3 = vsel %vm10923_vm5, %v5718_v62, 2147483647  ;;  %v1152_v20 = vsel %vm10915_vm0, %v5724_v42, 2147483647  ;;  %v5806_v18 = vsel %vm1289_vm1, %v1145_v60, %v1146_v23  ;;  %v5812_v48 = vcvt.s32.f32 %v1212_v25 }
 0x33d   :  { %v5802_v12 = vpop.xlane.xlu0 %1056  ;;  %v1292_v5 = vshra.s32 %v5806_v18, 16  ;;  %vm1337_vm9 = vcmp.lt.s32.totalorder %v1151_v3, %v1152_v20 }
 0x33e   :  { %11636 = vst [vmem:[#allocation61_spill] sm:$0xff] %v5802_v12  ;;  %vm10924_vm2 = vcmp.eq.f32.partialorder %v5520_v29, %v5802_v12  ;;  %vm10926_vm11 = vcmp.eq.f32.partialorder %v5530_v9, %v5802_v12  ;;  %v5821_v60 = vsel %vm1337_vm9, %v1151_v3, %v1152_v20  ;;  %1215 = vmin.xlane.f32.xlu1 %v5812_v48 }
 0x33f   :  { %v5834_v10 = vcvt.s32.f32 %v1292_v5  ;;  %v1340_v34 = vshra.s32 %v5821_v60, 16  ;;  %v1133_v3 = vsel %vm10924_vm2, %v5718_v62, 2147483647  ;;  %v1134_v32 = vsel %vm10926_vm11, %v5724_v42, 2147483647 }
 0x340   :  { %v5810_v37 = vpop.xlane.xlu1 %1065  ;;  %vm1193_vm5 = vcmp.lt.s32.totalorder %v1133_v3, %v1134_v32 }
 0x341   :  { %11637 = vst [vmem:[#allocation62_spill] sm:$0xff] %v5810_v37  ;;  %vm10922_vm0 = vcmp.eq.f32.partialorder %v5543_v47, %v5810_v37  ;;  %vm10921_vm1 = vcmp.eq.f32.partialorder %v5546_v26, %v5810_v37  ;;  %1295 = vmin.xlane.f32.xlu0 %v5834_v10  ;;  %v5844_v59 = vcvt.s32.f32 %v1340_v34  ;;  %v5859_v34 = vsel %vm1193_vm5, %v1133_v3, %v1134_v32 }
 0x342   :  { %v1139_v25 = vsel %vm10922_vm0, %v5718_v62, 2147483647  ;;  %v1140_v23 = vsel %vm10921_vm1, %v5724_v42, 2147483647  ;;  %v5831_v45 = vpop.xlane.xlu0 %1080  ;;  %v1196_v30 = vshra.s32 %v5859_v34, 16 }
 0x343   :  { %11638 = vst [vmem:[#allocation63_spill] sm:$0xff] %v5831_v45  ;;  %vm1241_vm9 = vcmp.lt.s32.totalorder %v1139_v25, %v1140_v23  ;;  %vm1117_vm1 = vcmp.eq.f32.partialorder %v5562_v39, %v5831_v45  ;;  %1343 = vmin.xlane.f32.xlu1 %v5844_v59  ;;  %vm1118_vm11 = vcmp.eq.f32.partialorder %v5572_v13, %v5831_v45 }
 0x344   :  { %v5861_v4 = vsel %vm1241_vm9, %v1139_v25, %v1140_v23  ;;  %v1149_v23 = vsel %vm1117_vm1, %v5718_v62, 2147483647  ;;  %v5885_v37 = vcvt.s32.f32 %v1196_v30  ;;  %v1150_v30 = vsel %vm1118_vm11, %v5724_v42, 2147483647 }
 0x345   :  { %v1244_v25 = vshra.s32 %v5861_v4, 16 }
 0x346   :  { %v5842_v20 = vpop.xlane.xlu1 %1089  ;;  %1199 = vmin.xlane.f32.xlu0 %v5885_v37 }
 0x347   :  { %11639 = vst [vmem:[#allocation64_spill] sm:$0xff] %v5842_v20  ;;  %vm10944_vm0 = vcmp.eq.f32.partialorder %v5585_v35, %v5842_v20  ;;  %vm10942_vm2 = vcmp.eq.f32.partialorder %v5588_v21, %v5842_v20  ;;  %v5897_v47 = vcvt.s32.f32 %v1244_v25 }
 0x348   :  { %v5856_v5 = vpop.xlane.xlu0 %1062  ;;  %v1155_v26 = vsel %vm10944_vm0, %v5718_v62, 2147483647  ;;  %v1156_v3 = vsel %vm10942_vm2, %v5724_v42, 2147483647  ;;  %vm1321_vm0 = vcmp.lt.s32.totalorder %v1149_v23, %v1150_v30 }
 0x349   :  { %11640 = vst [vmem:[#allocation65_spill] sm:$0xff] %v5856_v5  ;;  %vm10943_vm4 = vcmp.eq.f32.partialorder %v5604_v41, %v5856_v5  ;;  %vm10951_vm14 = vcmp.eq.f32.partialorder %v5614_v33, %v5856_v5  ;;  %1247 = vmin.xlane.f32.xlu1 %v5897_v47  ;;  %v5921_v5 = vsel %vm1321_vm0, %v1149_v23, %v1150_v30 }
 0x34a   :  { %v1137_v35 = vsel %vm10943_vm4, %v5718_v62, 2147483647  ;;  %v1138_v21 = vsel %vm10951_vm14, %v5724_v42, 2147483647  ;;  %vm1369_vm14 = vcmp.lt.s32.totalorder %v1155_v26, %v1156_v3 }
 0x34c   :  { %v5874_v32 = vpop.xlane.xlu1 %1071 }
 0x34d   :  { %11641 = vst [vmem:[#allocation66_spill] sm:$0xff] %v5874_v32  ;;  %vm10956_vm5 = vcmp.eq.f32.partialorder %v5626_v2, %v5874_v32  ;;  %vm10957_vm9 = vcmp.eq.f32.partialorder %v5629_v11, %v5874_v32  ;;  %v1324_v2 = vshra.s32 %v5921_v5, 16  ;;  %v5948_v32 = vsel %vm1369_vm14, %v1155_v26, %v1156_v3 }
 0x34e   :  { %v5895_v39 = vpop.xlane.xlu0 %1086  ;;  %v1143_v25 = vsel %vm10956_vm5, %v5718_v62, 2147483647  ;;  %v1144_v33 = vsel %vm10957_vm9, %v5724_v42, 2147483647  ;;  %v1372_v26 = vshra.s32 %v5948_v32, 16  ;;  %vm1225_vm14 = vcmp.lt.s32.totalorder %v1137_v35, %v1138_v21 }
 0x34f   :  { %11642 = vst [vmem:[#allocation67_spill] sm:$0xff] %v5895_v39  ;;  %vm10973_vm2 = vcmp.eq.f32.partialorder %v5642_v14, %v5895_v39  ;;  %vm10966_vm4 = vcmp.eq.f32.partialorder %v5648_v54, %v5895_v39  ;;  %v5950_v13 = vcvt.s32.f32 %v1324_v2  ;;  %v5966_v2 = vsel %vm1225_vm14, %v1137_v35, %v1138_v21 }
 0x350   :  { %v5923_v41 = vpop.xlane.xlu1 %1095  ;;  %v1153_v20 = vsel %vm10973_vm2, %v5718_v62, 2147483647  ;;  %v1154_v23 = vsel %vm10966_vm4, %v5724_v42, 2147483647  ;;  %v5968_v3 = vcvt.s32.f32 %v1372_v26 }
 0x351   :  { %11643 = vst [vmem:[#allocation68_spill] sm:$0xff] %v5923_v41  ;;  %vm10972_vm5 = vcmp.eq.f32.partialorder %v5660_v51, %v5923_v41  ;;  %vm10971_vm9 = vcmp.eq.f32.partialorder %v5663_v15, %v5923_v41  ;;  %1327 = vmin.xlane.f32.xlu0 %v5950_v13 }
 0x352   :  { %v1159_v30 = vsel %vm10972_vm5, %v5718_v62, 2147483647  ;;  %v1160_v14 = vsel %vm10971_vm9, %v5724_v42, 2147483647  ;;  %v5946_v11 = vpop.xlane.xlu0 %1068  ;;  %vm1273_vm9 = vcmp.lt.s32.totalorder %v1143_v25, %v1144_v33  ;;  %vm1353_vm5 = vcmp.lt.s32.totalorder %v1153_v20, %v1154_v23  ;;  %1375 = vmin.xlane.f32.xlu1 %v5968_v3 }
 0x353   :  { %11644 = vst [vmem:[#allocation69_spill] sm:$0xff] %v5946_v11  ;;  %vm1109_vm0 = vcmp.eq.f32.partialorder %v5676_v58, %v5946_v11  ;;  %vm10982_vm4 = vcmp.eq.f32.partialorder %v5679_v44, %v5946_v11  ;;  %vm1401_vm2 = vcmp.lt.s32.totalorder %v1159_v30, %v1160_v14  ;;  %v1228_v58 = vshra.s32 %v5966_v2, 16 }
 0x354   :  { %v1141_v51 = vsel %vm1109_vm0, %v5718_v62, 2147483647  ;;  %v1142_v15 = vsel %vm10982_vm4, %v5724_v42, 2147483647  ;;  %v5973_v54 = vsel %vm1273_vm9, %v1143_v25, %v1144_v33  ;;  %v5975_v44 = vsel %vm1353_vm5, %v1153_v20, %v1154_v23 }
 0x355   :  { %v1276_v35 = vshra.s32 %v5973_v54, 16  ;;  %v5983_v21 = vcvt.s32.f32 %v1228_v58  ;;  %v1356_v25 = vshra.s32 %v5975_v44, 16  ;;  %v5996_v26 = vsel %vm1401_vm2, %v1159_v30, %v1160_v14 }
 0x356   :  { %v5971_v41 = vpop.xlane.xlu0 %1092  ;;  %vm1257_vm5 = vcmp.lt.s32.totalorder %v1141_v51, %v1142_v15 }
 0x357   :  { %11645 = vst [vmem:[#allocation70_spill] sm:$0xff] %v5971_v41  ;;  %vm1125_vm4 = vcmp.eq.f32.partialorder %v5689_v46, %v5971_v41  ;;  %vm10997_vm14 = vcmp.eq.f32.partialorder %v5691_v1, %v5971_v41  ;;  %v5994_v23 = vcvt.s32.f32 %v1276_v35  ;;  %1231 = vmin.xlane.f32.xlu0 %v5983_v21  ;;  %v5999_v58 = vcvt.s32.f32 %v1356_v25 }
 0x358   :  { %v1157_v33 = vsel %vm1125_vm4, %v5718_v62, 2147483647  ;;  %v1158_v20 = vsel %vm10997_vm14, %v5724_v42, 2147483647  ;;  %v1404_v46 = vshra.s32 %v5996_v26, 16  ;;  %v6002_v11 = vsel %vm1257_vm5, %v1141_v51, %v1142_v15 }
 0x359   :  { %vm1385_vm9 = vcmp.lt.s32.totalorder %v1157_v33, %v1158_v20  ;;  %v1260_v39 = vshra.s32 %v6002_v11, 16  ;;  %1279 = vmin.xlane.f32.xlu1 %v5994_v23  ;;  %v1179_v15 = vand.u32 65535, %v5711_v57  ;;  %v1163_v25 = vand.u32 65535, %v5766_v22 }
 0x35a   :  { %v6005_v1 = vsel %vm1385_vm9, %v1157_v33, %v1158_v20  ;;  %v6008_v35 = vcvt.s32.f32 %v1404_v46  ;;  %v1211_v57 = vand.u32 65535, %v5782_v36 }
 0x35b   :  { %1359 = vmin.xlane.f32.xlu0 %v5999_v58  ;;  %v6011_v14 = vcvt.s32.f32 %v1260_v39  ;;  %v1388_v30 = vshra.s32 %v6005_v1, 16  ;;  %v1181_v46 = vcvt.s32.f32 %v1179_v15  ;;  %v1307_v39 = vand.u32 65535, %v5749_v38 }
 0x35c   :  { %v1165_v15 = vcvt.s32.f32 %v1163_v25  ;;  %v1195_v25 = vand.u32 65535, %v5859_v34 }
 0x35d   :  { %1407 = vmin.xlane.f32.xlu1 %v6008_v35  ;;  %v6016_v51 = vcvt.s32.f32 %v1388_v30  ;;  %v1309_v30 = vcvt.s32.f32 %v1307_v39  ;;  %v1339_v39 = vand.u32 65535, %v5821_v60 }
 0x35f   :  { %1263 = vmin.xlane.f32.xlu0 %v6011_v14 }
 0x363   :  { %1391 = vmin.xlane.f32.xlu0 %v6016_v51 }
 0x3c2   :  { %v6020_v33 = vpop.xlane.xlu1 %1183 }
 0x3c3   :  { %vm1185_vm2 = vcmp.eq.f32.partialorder %v5736_v55, %v6020_v33  ;;  %v1291_v55 = vand.u32 65535, %v5806_v18 }
 0x3c4   :  { %v1186_v20 = vsel %vm1185_vm2, %v1181_v46, inf  ;;  %v1213_v46 = vcvt.s32.f32 %v1211_v57  ;;  %v1197_v57 = vcvt.s32.f32 %v1195_v25 }
 0x3c5   :  { %1187 = vmin.xlane.f32.xlu1 %v1186_v20  ;;  %v1341_v20 = vcvt.s32.f32 %v1339_v39 }
 0x3c6   :  { %v6026_v41 = vpop.xlane.xlu1 %1311 }
 0x3c7   :  { %vm1313_vm5 = vcmp.eq.f32.partialorder %v5772_v50, %v6026_v41 }
 0x3c8   :  { %v1314_v45 = vsel %vm1313_vm5, %v1309_v30, inf  ;;  %v6031_v9 = vpop.xlane.xlu0 %1167 }
 0x3c9   :  { %1315 = vmin.xlane.f32.xlu1 %v1314_v45  ;;  %vm1169_vm9 = vcmp.eq.f32.partialorder %v5792_v28, %v6031_v9  ;;  %v1293_v45 = vcvt.s32.f32 %v1291_v55  ;;  %v1323_v55 = vand.u32 65535, %v5921_v5 }
 0x3ca   :  { %v1170_v38 = vsel %vm1169_vm9, %v1165_v15, inf }
 0x3cb   :  { %1171 = vmin.xlane.f32.xlu0 %v1170_v38  ;;  %v6036_v22 = vpop.xlane.xlu1 %1215 }
 0x3cc   :  { %vm1217_vm2 = vcmp.eq.f32.partialorder %v5812_v48, %v6036_v22  ;;  %v1243_v48 = vand.u32 65535, %v5861_v4  ;;  %v1371_v4 = vand.u32 65535, %v5948_v32 }
 0x3cd   :  { %v1218_v36 = vsel %vm1217_vm2, %v1213_v46, inf  ;;  %v1325_v46 = vcvt.s32.f32 %v1323_v55 }
 0x3ce   :  { %v6041_v50 = vpop.xlane.xlu0 %1295  ;;  %1219 = vmin.xlane.f32.xlu1 %v1218_v36  ;;  %v1245_v15 = vcvt.s32.f32 %v1243_v48  ;;  %v1373_v36 = vcvt.s32.f32 %v1371_v4 }
 0x3cf   :  { %vm1297_vm5 = vcmp.eq.f32.partialorder %v5834_v10, %v6041_v50 }
 0x3d0   :  { %v1298_v18 = vsel %vm1297_vm5, %v1293_v45, inf  ;;  %v6045_v28 = vpop.xlane.xlu1 %1343 }
 0x3d1   :  { %1299 = vmin.xlane.f32.xlu0 %v1298_v18  ;;  %vm1345_vm9 = vcmp.eq.f32.partialorder %v5844_v59, %v6045_v28 }
 0x3d2   :  { %v1346_v60 = vsel %vm1345_vm9, %v1341_v20, inf  ;;  %v1355_v20 = vand.u32 65535, %v5975_v44  ;;  %v1259_v44 = vand.u32 65535, %v6002_v11 }
 0x3d3   :  { %1347 = vmin.xlane.f32.xlu1 %v1346_v60  ;;  %v6051_v30 = vpop.xlane.xlu0 %1199  ;;  %v1403_v60 = vand.u32 65535, %v5996_v26 }
 0x3d4   :  { %vm1201_vm2 = vcmp.eq.f32.partialorder %v5885_v37, %v6051_v30  ;;  %v1227_v37 = vand.u32 65535, %v5966_v2  ;;  %v1357_v48 = vcvt.s32.f32 %v1355_v20  ;;  %v1261_v55 = vcvt.s32.f32 %v1259_v44 }
 0x3d5   :  { %v1202_v34 = vsel %vm1201_vm2, %v1197_v57, inf }
 0x3d6   :  { %v6055_v10 = vpop.xlane.xlu1 %1247  ;;  %1203 = vmin.xlane.f32.xlu0 %v1202_v34  ;;  %v1229_v18 = vcvt.s32.f32 %v1227_v37  ;;  %v1387_v34 = vand.u32 65535, %v6005_v1  ;;  %v1318_v1 = vcvt.f32.s32 %v6026_v41 }
 0x3d7   :  { %vm1249_vm5 = vcmp.eq.f32.partialorder %v5897_v47, %v6055_v10  ;;  %v1275_v47 = vand.u32 65535, %v5973_v54 }
 0x3d8   :  { %v1250_v59 = vsel %vm1249_vm5, %v1245_v15, inf  ;;  %v1405_v15 = vcvt.s32.f32 %v1403_v60 }
 0x3d9   :  { %1251 = vmin.xlane.f32.xlu1 %v1250_v59  ;;  %v1277_v25 = vcvt.s32.f32 %v1275_v47  ;;  %v1389_v59 = vcvt.s32.f32 %v1387_v34 }
 0x3de   :  { %v6061_v38 = vpop.xlane.xlu0 %1327 }
 0x3df   :  { %vm1329_vm9 = vcmp.eq.f32.partialorder %v5950_v13, %v6061_v38  ;;  %v6066_v5 = vpop.xlane.xlu1 %1375 }
 0x3e0   :  { %v1330_v39 = vsel %vm1329_vm9, %v1325_v46, inf  ;;  %vm1377_vm2 = vcmp.eq.f32.partialorder %v5968_v3, %v6066_v5 }
 0x3e1   :  { %1331 = vmin.xlane.f32.xlu0 %v1330_v39  ;;  %v1378_v32 = vsel %vm1377_vm2, %v1373_v36, inf }
 0x3e2   :  { %1379 = vmin.xlane.f32.xlu1 %v1378_v32 }
 0x3e4   :  { %v6071_v45 = vpop.xlane.xlu0 %1231 }
 0x3e5   :  { %vm1233_vm5 = vcmp.eq.f32.partialorder %v5983_v21, %v6071_v45 }
 0x3e6   :  { %v1234_v13 = vsel %vm1233_vm5, %v1229_v18, inf  ;;  %v6076_v2 = vpop.xlane.xlu1 %1279 }
 0x3e7   :  { %1235 = vmin.xlane.f32.xlu0 %v1234_v13  ;;  %vm1281_vm9 = vcmp.eq.f32.partialorder %v5994_v23, %v6076_v2 }
 0x3e8   :  { %v6081_v54 = vpop.xlane.xlu0 %1359  ;;  %v1282_v3 = vsel %vm1281_vm9, %v1277_v25, inf }
 0x3e9   :  { %1283 = vmin.xlane.f32.xlu1 %v1282_v3  ;;  %vm1361_vm2 = vcmp.eq.f32.partialorder %v5999_v58, %v6081_v54  ;;  %v1302_v3 = vcvt.f32.s32 %v6041_v50 }
 0x3ea   :  { %v1362_v21 = vsel %vm1361_vm2, %v1357_v48, inf  ;;  %v6086_v57 = vpop.xlane.xlu1 %1407  ;;  %v1350_v48 = vcvt.f32.s32 %v6045_v28 }
 0x3eb   :  { %1363 = vmin.xlane.f32.xlu0 %v1362_v21  ;;  %vm1409_vm5 = vcmp.eq.f32.partialorder %v6008_v35, %v6086_v57  ;;  %v1190_v35 = vcvt.f32.s32 %v6020_v33 }
 0x3ec   :  { %v6090_v26 = vpop.xlane.xlu0 %1263  ;;  %v1410_v23 = vsel %vm1409_vm5, %v1405_v15, inf }
 0x3ed   :  { %1411 = vmin.xlane.f32.xlu1 %v1410_v23  ;;  %vm1265_vm9 = vcmp.eq.f32.partialorder %v6011_v14, %v6090_v26  ;;  %v1191_v37 = vshll.u32 %v1190_v35, 16  ;;  %v1174_v14 = vcvt.f32.s32 %v6031_v9  ;;  %v1222_v9 = vcvt.f32.s32 %v6036_v22 }
 0x3ee   :  { %v1266_v11 = vsel %vm1265_vm9, %v1261_v55, inf  ;;  %v1303_v23 = vshll.u32 %v1302_v3, 16  ;;  %v1382_v3 = vcvt.f32.s32 %v6066_v5 }
 0x3ef   :  { %1267 = vmin.xlane.f32.xlu0 %v1266_v11  ;;  %v1175_v13 = vshll.u32 %v1174_v14, 16  ;;  %v1351_v11 = vshll.u32 %v1350_v48, 16  ;;  %v1238_v48 = vcvt.f32.s32 %v6071_v45 }
 0x3f0   :  { %v6095_v58 = vpop.xlane.xlu0 %1391  ;;  %v1383_v45 = vshll.u32 %v1382_v3, 16 }
 0x3f1   :  { %vm1393_vm2 = vcmp.eq.f32.partialorder %v6016_v51, %v6095_v58  ;;  %v1319_v51 = vshll.u32 %v1318_v1, 16 }
 0x3f2   :  { %v1394_v4 = vsel %vm1393_vm2, %v1389_v59, inf }
 0x3f3   :  { %1395 = vmin.xlane.f32.xlu0 %v1394_v4 }
 0x452   :  { %v1188_v46 = vpop.xlane.xlu1 %1187 }
 0x453   :  { %v1189_v39 = vcvt.f32.s32 %v1188_v46  ;;  %v1206_v46 = vcvt.f32.s32 %v6051_v30 }
 0x455   :  { %v6101_v36 = vadd.s32 %v1191_v37, %v1189_v39  ;;  %v1207_v1 = vshll.u32 %v1206_v46, 16 }
 0x456   :  { %v1316_v47 = vpop.xlane.xlu1 %1315 }
 0x457   :  { %vm1419_vm5 = vcmp.eq.s32.totalorder %v5718_v62, %v6101_v36  ;;  %vm1420_vm9 = vcmp.eq.s32.totalorder %v5724_v42, %v6101_v36  ;;  %v1317_v32 = vcvt.f32.s32 %v1316_v47 }
 0x458   :  { %vm1451_vm2 = vmand %vm1099_vm13, %vm1419_vm5  ;;  %v1172_v18 = vpop.xlane.xlu0 %1171 }
 0x459   :  { %vm1452_vm14 = vmand %vm1100_vm12, %vm1420_vm9  ;;  %v6115_v41 = vsel %vm1451_vm2, 1e+30, %v5392_v43  ;;  %v6118_v33 = vadd.s32 %v1319_v51, %v1317_v32  ;;  %v1173_v25 = vcvt.f32.s32 %v1172_v18  ;;  %v1334_v18 = vcvt.f32.s32 %v6061_v38 }
 0x45a   :  { %v6121_v20 = vsel %vm1452_vm14, 1e+30, %v5397_v63  ;;  %v1223_v63 = vshll.u32 %v1222_v9, 16 }
 0x45b   :  { %v1516_v60 = vmin.f32 %v6115_v41, %v6121_v20  ;;  %vm1435_vm13 = vcmp.eq.s32.totalorder %v5718_v62, %v6118_v33  ;;  %vm1436_vm12 = vcmp.eq.s32.totalorder %v5724_v42, %v6118_v33  ;;  %v6130_v43 = vadd.s32 %v1175_v13, %v1173_v25  ;;  %v1220_v22 = vpop.xlane.xlu1 %1219 }
 0x45c   :  { %vm1467_vm14 = vmand %vm1115_vm6, %vm1435_vm13  ;;  %v1221_v44 = vcvt.f32.s32 %v1220_v22 }
 0x45d   :  { %1517 = vmin.xlane.f32.xlu1 %v1516_v60  ;;  %vm1468_vm5 = vmand %vm1116_vm7, %vm1436_vm12  ;;  %v6140_v50 = vsel %vm1467_vm14, 1e+30, %v5414_v0  ;;  %vm1417_vm9 = vcmp.eq.s32.totalorder %v5718_v62, %v6130_v43  ;;  %vm1418_vm6 = vcmp.eq.s32.totalorder %v5724_v42, %v6130_v43 }
 0x45e   :  { %v1300_v21 = vpop.xlane.xlu0 %1299  ;;  %v6143_v15 = vsel %vm1468_vm5, 1e+30, %v5422_v19  ;;  %v6149_v28 = vadd.s32 %v1223_v63, %v1221_v44  ;;  %vm1449_vm7 = vmand %vm1097_vm8, %vm1417_vm9  ;;  %v11655_v63 = vld [vmem:[#allocation37_spill] sm:$0xff] }
 0x45f   :  { %v1301_v55 = vcvt.f32.s32 %v1300_v21  ;;  %v1540_v34 = vmin.f32 %v6140_v50, %v6143_v15  ;;  %vm1450_vm2 = vmand %vm1098_vm15, %vm1418_vm6  ;;  %v6160_v19 = vsel %vm1449_vm7, 1e+30, %v5436_v7  ;;  %v1254_v7 = vcvt.f32.s32 %v6055_v10  ;;  %v11659_v21 = vld [vmem:[#allocation38_spill] sm:$0xff] }
 0x460   :  { %v1348_v0 = vpop.xlane.xlu1 %1347  ;;  %v6165_v35 = vsel %vm1450_vm2, 1e+30, %v5439_v61  ;;  %vm1423_vm8 = vcmp.eq.s32.totalorder %v5718_v62, %v6149_v28  ;;  %vm1424_vm15 = vcmp.eq.s32.totalorder %v5724_v42, %v6149_v28 }
 0x461   :  { %v6162_v59 = vadd.s32 %v1303_v23, %v1301_v55  ;;  %v1349_v4 = vcvt.f32.s32 %v1348_v0  ;;  %1541 = vmin.xlane.f32.xlu1 %v1540_v34  ;;  %v1513_v37 = vmin.f32 %v6160_v19, %v6165_v35  ;;  %vm1455_vm13 = vmand %vm1103_vm3, %vm1423_vm8  ;;  %vm11646_vm3 = vcmp.eq.f32.partialorder %v5477_v49, %v5764_v16  ;;  %v11660_v23 = vld [vmem:[#allocation62_spill] sm:$0xff] }
 0x462   :  { %vm1456_vm5 = vmand %vm1104_vm10, %vm1424_vm15  ;;  %v6188_v61 = vsel %vm1455_vm13, 1e+30, %v5459_v8  ;;  %vm11647_vm10 = vcmp.eq.f32.partialorder %v5480_v27, %v5764_v16  ;;  %v1255_v51 = vshll.u32 %v1254_v7, 16  ;;  %vm11648_vm8 = vcmp.eq.f32.partialorder %v5501_v31, %v5779_v40 }
 0x463   :  { %v6175_v39 = vadd.s32 %v1351_v11, %v1349_v4  ;;  %vm1433_vm12 = vcmp.eq.s32.totalorder %v5718_v62, %v6162_v59  ;;  %vm1434_vm14 = vcmp.eq.s32.totalorder %v5724_v42, %v6162_v59  ;;  %1514 = vmin.xlane.f32.xlu0 %v1513_v37  ;;  %v1204_v30 = vpop.xlane.xlu0 %1203  ;;  %v6191_v10 = vsel %vm1456_vm5, 1e+30, %v5464_v52  ;;  %v11663_v4 = vld [vmem:[#allocation39_spill] sm:$0xff] }
 0x464   :  { %vm1465_vm9 = vmand %vm11646_vm3, %vm1433_vm12  ;;  %v1205_v14 = vcvt.f32.s32 %v1204_v30  ;;  %v1522_v8 = vmin.f32 %v6188_v61, %v6191_v10  ;;  %vm11650_vm13 = vcmp.eq.f32.partialorder %v5504_v24, %v5779_v40  ;;  %vm11654_vm3 = vcmp.eq.f32.partialorder %v5520_v29, %v5802_v12 }
 0x465   :  { %vm1439_vm6 = vcmp.eq.s32.totalorder %v5718_v62, %v6175_v39  ;;  %vm1440_vm7 = vcmp.eq.s32.totalorder %v5724_v42, %v6175_v39  ;;  %vm1466_vm2 = vmand %vm11647_vm10, %vm1434_vm14  ;;  %v6206_v52 = vsel %vm1465_vm9, 1e+30, %v5477_v49  ;;  %vm11656_vm10 = vcmp.eq.f32.partialorder %v11655_v63, %v5802_v12 }
 0x466   :  { %v1252_v47 = vpop.xlane.xlu1 %1251  ;;  %v6209_v9 = vsel %vm1466_vm2, 1e+30, %v5480_v27  ;;  %vm1471_vm15 = vmand %vm11648_vm8, %vm1439_vm6  ;;  %v6215_v13 = vadd.s32 %v1207_v1, %v1205_v14  ;;  %1523 = vmin.xlane.f32.xlu1 %v1522_v8  ;;  %vm11661_vm8 = vcmp.eq.f32.partialorder %v11659_v21, %v11660_v23  ;;  %v1286_v55 = vcvt.f32.s32 %v6076_v2  ;;  %v11668_v8 = vld [vmem:[#allocation40_spill] sm:$0xff] }
 0x467   :  { %v1253_v32 = vcvt.f32.s32 %v1252_v47  ;;  %v1537_v25 = vmin.f32 %v6206_v52, %v6209_v9  ;;  %vm1472_vm12 = vmand %vm11650_vm13, %vm1440_vm7  ;;  %v6226_v49 = vsel %vm1471_vm15, 1e+30, %v5501_v31  ;;  %v1335_v31 = vshll.u32 %v1334_v18, 16 }
 0x468   :  { %11649 = vst [vmem:[#allocation71_spill] sm:$0xff] %v6215_v13  ;;  %11651 = vst [vmem:[#allocation72_spill] sm:$0xff] %v6226_v49  ;;  %v6231_v38 = vsel %vm1472_vm12, 1e+30, %v5504_v24  ;;  %vm1421_vm14 = vcmp.eq.s32.totalorder %v5718_v62, %v6215_v13  ;;  %vm1422_vm5 = vcmp.eq.s32.totalorder %v5724_v42, %v6215_v13  ;;  %vm11664_vm13 = vcmp.eq.f32.partialorder %v11663_v4, %v11660_v23 }
 0x469   :  { %v6228_v27 = vadd.s32 %v1255_v51, %v1253_v32  ;;  %11653 = vst [vmem:[#allocation74_spill] sm:$0xff] %v6231_v38  ;;  %1538 = vmin.xlane.f32.xlu0 %v1537_v25  ;;  %v1546_v60 = vmin.f32 %v6226_v49, %v6231_v38  ;;  %vm1453_vm9 = vmand %vm11654_vm3, %vm1421_vm14  ;;  %v1239_v30 = vshll.u32 %v1238_v48, 16  ;;  %v1366_v1 = vcvt.f32.s32 %v6081_v54 }
 0x46a   :  { %vm1454_vm2 = vmand %vm11656_vm10, %vm1422_vm5  ;;  %v6251_v5 = vsel %vm1453_vm9, 1e+30, %v5520_v29  ;;  %v1287_v32 = vshll.u32 %v1286_v55, 16  ;;  %v1414_v18 = vcvt.f32.s32 %v6086_v57  ;;  %v1270_v54 = vcvt.f32.s32 %v6090_v26  ;;  %v11675_v55 = vld [vmem:[#allocation44_spill] sm:$0xff] }
 0x46b   :  { %11652 = vst [vmem:[#allocation73_spill] sm:$0xff] %v6228_v27  ;;  %vm1427_vm6 = vcmp.eq.s32.totalorder %v5718_v62, %v6228_v27  ;;  %vm1428_vm7 = vcmp.eq.s32.totalorder %v5724_v42, %v6228_v27  ;;  %1547 = vmin.xlane.f32.xlu1 %v1546_v60  ;;  %11657 = vst [vmem:[#allocation37_spill] sm:$0xff] %v6251_v5  ;;  %v6255_v44 = vsel %vm1454_vm2, 1e+30, %v11655_v63  ;;  %v11670_v60 = vld [vmem:[#allocation43_spill] sm:$0xff]  ;;  %v1367_v48 = vshll.u32 %v1366_v1, 16 }
 0x46c   :  { %11658 = vst [vmem:[#allocation75_spill] sm:$0xff] %v6255_v44  ;;  %vm1459_vm15 = vmand %vm11661_vm8, %vm1427_vm6  ;;  %v1519_v11 = vmin.f32 %v6251_v5, %v6255_v44 }
 0x46d   :  { %vm1460_vm12 = vmand %vm11664_vm13, %vm1428_vm7  ;;  %v6269_v29 = vsel %vm1459_vm15, 1e+30, %v11659_v21 }
 0x46e   :  { %v1332_v22 = vpop.xlane.xlu0 %1331  ;;  %11665 = vst [vmem:[#allocation39_spill] sm:$0xff] %v6269_v29  ;;  %v6272_v37 = vsel %vm1460_vm12, 1e+30, %v11663_v4  ;;  %1520 = vmin.xlane.f32.xlu0 %v1519_v11  ;;  %v1415_v11 = vshll.u32 %v1414_v18, 16 }
 0x46f   :  { %v1333_v24 = vcvt.f32.s32 %v1332_v22  ;;  %v1380_v0 = vpop.xlane.xlu1 %1379  ;;  %11666 = vst [vmem:[#allocation76_spill] sm:$0xff] %v6272_v37  ;;  %v1528_v2 = vmin.f32 %v6269_v29, %v6272_v37 }
 0x470   :  { %v1381_v46 = vcvt.f32.s32 %v1380_v0  ;;  %v11676_v0 = vld [vmem:[#allocation64_spill] sm:$0xff] }
 0x471   :  { %v6261_v34 = vadd.s32 %v1335_v31, %v1333_v24  ;;  %1529 = vmin.xlane.f32.xlu1 %v1528_v2  ;;  %vm11677_vm6 = vcmp.eq.f32.partialorder %v11675_v55, %v11676_v0 }
 0x472   :  { %v6281_v14 = vadd.s32 %v1383_v45, %v1381_v46  ;;  %v11678_v45 = vld [vmem:[#allocation45_spill] sm:$0xff] }
 0x473   :  { %11662 = vst [vmem:[#allocation38_spill] sm:$0xff] %v6261_v34  ;;  %vm1437_vm14 = vcmp.eq.s32.totalorder %v5718_v62, %v6261_v34  ;;  %vm1438_vm5 = vcmp.eq.s32.totalorder %v5724_v42, %v6261_v34  ;;  %vm11679_vm2 = vcmp.eq.f32.partialorder %v11678_v45, %v11676_v0  ;;  %v11716_v0 = vld [vmem:[#allocation53_spill] sm:$0xff] }
 0x474   :  { %v1236_v7 = vpop.xlane.xlu0 %1235  ;;  %11667 = vst [vmem:[#allocation77_spill] sm:$0xff] %v6281_v14  ;;  %vm1469_vm3 = vmand %vm1117_vm1, %vm1437_vm14  ;;  %vm1443_vm1 = vcmp.eq.s32.totalorder %v5718_v62, %v6281_v14 }
 0x475   :  { %v1237_v47 = vcvt.f32.s32 %v1236_v7  ;;  %vm1470_vm9 = vmand %vm1118_vm11, %vm1438_vm5  ;;  %v6291_v3 = vsel %vm1469_vm3, 1e+30, %v11668_v8  ;;  %vm1444_vm11 = vcmp.eq.s32.totalorder %v5724_v42, %v6281_v14  ;;  %v1271_v7 = vshll.u32 %v1270_v54, 16  ;;  %v11684_v8 = vld [vmem:[#allocation65_spill] sm:$0xff] }
 0x476   :  { %v1284_v25 = vpop.xlane.xlu1 %1283  ;;  %11671 = vst [vmem:[#allocation40_spill] sm:$0xff] %v6291_v3  ;;  %v6297_v24 = vsel %vm1470_vm9, 1e+30, %v11670_v60  ;;  %vm1475_vm7 = vmand %vm11677_vm6, %vm1443_vm1  ;;  %v1398_v54 = vcvt.f32.s32 %v6095_v58 }
 0x477   :  { %v6294_v22 = vadd.s32 %v1239_v30, %v1237_v47  ;;  %v1285_v31 = vcvt.f32.s32 %v1284_v25  ;;  %11673 = vst [vmem:[#allocation78_spill] sm:$0xff] %v6297_v24  ;;  %v1543_v57 = vmin.f32 %v6291_v3, %v6297_v24  ;;  %vm1476_vm8 = vmand %vm11679_vm2, %vm1444_vm11  ;;  %v6316_v46 = vsel %vm1475_vm7, 1e+30, %v11675_v55  ;;  %v11683_v47 = vld [vmem:[#allocation4_spill] sm:$0xff] }
 0x478   :  { %v1364_v63 = vpop.xlane.xlu0 %1363  ;;  %11680 = vst [vmem:[#allocation44_spill] sm:$0xff] %v6316_v46  ;;  %v6323_v1 = vsel %vm1476_vm8, 1e+30, %v11678_v45  ;;  %vm11685_vm13 = vcmp.eq.f32.partialorder %v11683_v47, %v11684_v8  ;;  %v11686_v25 = vld [vmem:[#allocation48_spill] sm:$0xff] }
 0x479   :  { %11672 = vst [vmem:[#allocation43_spill] sm:$0xff] %v6294_v22  ;;  %v6305_v21 = vadd.s32 %v1287_v32, %v1285_v31  ;;  %v1365_v26 = vcvt.f32.s32 %v1364_v63  ;;  %vm1425_vm10 = vcmp.eq.s32.totalorder %v5718_v62, %v6294_v22  ;;  %1544 = vmin.xlane.f32.xlu0 %v1543_v57  ;;  %vm1426_vm15 = vcmp.eq.s32.totalorder %v5724_v42, %v6294_v22 }
 0x47a   :  { %v1412_v4 = vpop.xlane.xlu1 %1411  ;;  %11682 = vst [vmem:[#allocation80_spill] sm:$0xff] %v6323_v1  ;;  %vm1457_vm12 = vmand %vm11685_vm13, %vm1425_vm10  ;;  %v1552_v18 = vmin.f32 %v6316_v46, %v6323_v1  ;;  %vm11687_vm14 = vcmp.eq.f32.partialorder %v11686_v25, %v11684_v8  ;;  %v11714_v8 = vld [vmem:[#allocation8_spill] sm:$0xff] }
 0x47b   :  { %11674 = vst [vmem:[#allocation79_spill] sm:$0xff] %v6305_v21  ;;  %v6320_v2 = vadd.s32 %v1367_v48, %v1365_v26  ;;  %v1413_v30 = vcvt.f32.s32 %v1412_v4  ;;  %vm1458_vm5 = vmand %vm11687_vm14, %vm1426_vm15  ;;  %v6334_v60 = vsel %vm1457_vm12, 1e+30, %v11683_v47  ;;  %vm1431_vm3 = vcmp.eq.s32.totalorder %v5718_v62, %v6305_v21  ;;  %v11691_v48 = vld [vmem:[#allocation6_spill] sm:$0xff]  ;;  %v11694_v4 = vld [vmem:[#allocation49_spill] sm:$0xff] }
 0x47c   :  { %v1268_v32 = vpop.xlane.xlu0 %1267  ;;  %11688 = vst [vmem:[#allocation4_spill] sm:$0xff] %v6334_v60  ;;  %vm1432_vm9 = vcmp.eq.s32.totalorder %v5724_v42, %v6305_v21  ;;  %v6344_v57 = vsel %vm1458_vm5, 1e+30, %v11686_v25  ;;  %v11692_v26 = vld [vmem:[#allocation66_spill] sm:$0xff]  ;;  %1553 = vmin.xlane.f32.xlu1 %v1552_v18  ;;  %v11700_v47 = vld [vmem:[#allocation67_spill] sm:$0xff] }
 0x47d   :  { %11681 = vst [vmem:[#allocation45_spill] sm:$0xff] %v6320_v2  ;;  %v6341_v31 = vadd.s32 %v1415_v11, %v1413_v30  ;;  %v1269_v63 = vcvt.f32.s32 %v1268_v32  ;;  %11690 = vst [vmem:[#allocation81_spill] sm:$0xff] %v6344_v57  ;;  %vm11693_vm1 = vcmp.eq.f32.partialorder %v11691_v48, %v11692_v26  ;;  %v1525_v55 = vmin.f32 %v6334_v60, %v6344_v57  ;;  %v11699_v30 = vld [vmem:[#allocation5_spill] sm:$0xff]  ;;  %v11702_v25 = vld [vmem:[#allocation51_spill] sm:$0xff] }
 0x47e   :  { %vm1463_vm11 = vmand %vm11693_vm1, %vm1431_vm3  ;;  %vm11695_vm6 = vcmp.eq.f32.partialorder %v11694_v4, %v11692_v26  ;;  %vm1441_vm10 = vcmp.eq.s32.totalorder %v5718_v62, %v6320_v2  ;;  %vm1442_vm2 = vcmp.eq.s32.totalorder %v5724_v42, %v6320_v2  ;;  %vm11701_vm8 = vcmp.eq.f32.partialorder %v11699_v30, %v11700_v47  ;;  %v11707_v26 = vld [vmem:[#allocation68_spill] sm:$0xff] }
 0x47f   :  { %11689 = vst [vmem:[#allocation48_spill] sm:$0xff] %v6341_v31  ;;  %vm1464_vm7 = vmand %vm11695_vm6, %vm1432_vm9  ;;  %v6355_v58 = vsel %vm1463_vm11, 1e+30, %v11691_v48  ;;  %v6361_v11 = vadd.s32 %v1271_v7, %v1269_v63  ;;  %vm1447_vm13 = vcmp.eq.s32.totalorder %v5718_v62, %v6341_v31  ;;  %1526 = vmin.xlane.f32.xlu0 %v1525_v55  ;;  %vm11703_vm12 = vcmp.eq.f32.partialorder %v11702_v25, %v11700_v47  ;;  %v11706_v55 = vld [vmem:[#allocation7_spill] sm:$0xff]  ;;  %v11709_v47 = vld [vmem:[#allocation52_spill] sm:$0xff] }
 0x480   :  { %11696 = vst [vmem:[#allocation6_spill] sm:$0xff] %v6355_v58  ;;  %v6364_v45 = vsel %vm1464_vm7, 1e+30, %v11694_v4  ;;  %vm1473_vm15 = vmand %vm11701_vm8, %vm1441_vm10  ;;  %v1396_v32 = vpop.xlane.xlu0 %1395  ;;  %vm1448_vm5 = vcmp.eq.s32.totalorder %v5724_v42, %v6341_v31  ;;  %v1399_v63 = vshll.u32 %v1398_v54, 16  ;;  %vm11708_vm3 = vcmp.eq.f32.partialorder %v11706_v55, %v11707_v26 }
 0x481   :  { %11697 = vst [vmem:[#allocation49_spill] sm:$0xff] %v6361_v11  ;;  %11698 = vst [vmem:[#allocation82_spill] sm:$0xff] %v6364_v45  ;;  %v1534_v18 = vmin.f32 %v6355_v58, %v6364_v45  ;;  %v6377_v7 = vsel %vm1473_vm15, 1e+30, %v11699_v30  ;;  %v1397_v48 = vcvt.f32.s32 %v1396_v32  ;;  %vm1429_vm1 = vcmp.eq.s32.totalorder %v5718_v62, %v6361_v11 }
 0x482   :  { %vm1474_vm14 = vmand %vm11703_vm12, %vm1442_vm2  ;;  %11704 = vst [vmem:[#allocation5_spill] sm:$0xff] %v6377_v7  ;;  %vm11710_vm11 = vcmp.eq.f32.partialorder %v11709_v47, %v11707_v26  ;;  %vm1430_vm7 = vcmp.eq.s32.totalorder %v5724_v42, %v6361_v11 }
 0x483   :  { %v6382_v4 = vsel %vm1474_vm14, 1e+30, %v11702_v25  ;;  %vm1479_vm9 = vmand %vm11708_vm3, %vm1447_vm13  ;;  %1535 = vmin.xlane.f32.xlu1 %v1534_v18  ;;  %v6399_v32 = vadd.s32 %v1399_v63, %v1397_v48  ;;  %v11715_v18 = vld [vmem:[#allocation69_spill] sm:$0xff] }
 0x484   :  { %11705 = vst [vmem:[#allocation51_spill] sm:$0xff] %v6382_v4  ;;  %v1549_v30 = vmin.f32 %v6377_v7, %v6382_v4  ;;  %vm1480_vm6 = vmand %vm11710_vm11, %vm1448_vm5  ;;  %v6395_v54 = vsel %vm1479_vm9, 1e+30, %v11706_v55  ;;  %vm11717_vm2 = vcmp.eq.f32.partialorder %v11716_v0, %v11715_v18  ;;  %v11720_v48 = vld [vmem:[#allocation9_spill] sm:$0xff]  ;;  %v11722_v18 = vld [vmem:[#allocation54_spill] sm:$0xff] }
 0x485   :  { %11711 = vst [vmem:[#allocation7_spill] sm:$0xff] %v6395_v54  ;;  %11712 = vst [vmem:[#allocation52_spill] sm:$0xff] %v6399_v32  ;;  %v6402_v25 = vsel %vm1480_vm6, 1e+30, %v11709_v47  ;;  %vm1445_vm15 = vcmp.eq.s32.totalorder %v5718_v62, %v6399_v32 }
 0x486   :  { %11713 = vst [vmem:[#allocation83_spill] sm:$0xff] %v6402_v25  ;;  %vm1461_vm10 = vmand %vm1109_vm0, %vm1429_vm1  ;;  %1550 = vmin.xlane.f32.xlu0 %v1549_v30  ;;  %v1558_v26 = vmin.f32 %v6395_v54, %v6402_v25  ;;  %vm1446_vm0 = vcmp.eq.s32.totalorder %v5724_v42, %v6399_v32  ;;  %v11721_v30 = vld [vmem:[#allocation70_spill] sm:$0xff] }
 0x487   :  { %vm1462_vm8 = vmand %vm11717_vm2, %vm1430_vm7  ;;  %v6413_v55 = vsel %vm1461_vm10, 1e+30, %v11714_v8  ;;  %vm11723_vm12 = vcmp.eq.f32.partialorder %v11722_v18, %v11721_v30 }
 0x488   :  { %11718 = vst [vmem:[#allocation8_spill] sm:$0xff] %v6413_v55  ;;  %v6416_v63 = vsel %vm1462_vm8, 1e+30, %v11716_v0  ;;  %1559 = vmin.xlane.f32.xlu1 %v1558_v26  ;;  %vm1477_vm13 = vmand %vm1125_vm4, %vm1445_vm15 }
 0x489   :  { %11719 = vst [vmem:[#allocation53_spill] sm:$0xff] %v6416_v63  ;;  %v1531_v47 = vmin.f32 %v6413_v55, %v6416_v63  ;;  %vm1478_vm14 = vmand %vm11723_vm12, %vm1446_vm0  ;;  %v6431_v0 = vsel %vm1477_vm13, 1e+30, %v11720_v48 }
 0x48a   :  { %11724 = vst [vmem:[#allocation9_spill] sm:$0xff] %v6431_v0  ;;  %v6434_v8 = vsel %vm1478_vm14, 1e+30, %v11722_v18 }
 0x48b   :  { %1532 = vmin.xlane.f32.xlu0 %v1531_v47  ;;  %11725 = vst [vmem:[#allocation54_spill] sm:$0xff] %v6434_v8  ;;  %v1555_v26 = vmin.f32 %v6431_v0, %v6434_v8 }
 0x48f   :  { %1556 = vmin.xlane.f32.xlu0 %v1555_v26 }
 0x4ea   :  { %v6438_v51 = vpop.xlane.xlu1 %1517 }
 0x4eb   :  { %11726 = vst [vmem:[#allocation84_spill] sm:$0xff] %v6438_v51  ;;  %vm1563_vm4 = vcmp.eq.f32.partialorder %v6115_v41, %v6438_v51  ;;  %vm1564_vm5 = vcmp.eq.f32.partialorder %v6121_v20, %v6438_v51 }
 0x4ec   :  { %v1595_v47 = vsel %vm1563_vm4, %v5718_v62, 2147483647  ;;  %v1596_v18 = vsel %vm1564_vm5, %v5724_v42, 2147483647 }
 0x4ed   :  { %vm1641_vm3 = vcmp.lt.s32.totalorder %v1595_v47, %v1596_v18 }
 0x4ee   :  { %v6452_v48 = vsel %vm1641_vm3, %v1595_v47, %v1596_v18  ;;  %v6454_v26 = vpop.xlane.xlu1 %1541 }
 0x4ef   :  { %11727 = vst [vmem:[#allocation85_spill] sm:$0xff] %v6454_v26  ;;  %v1644_v30 = vshra.s32 %v6452_v48, 16  ;;  %vm1579_vm9 = vcmp.eq.f32.partialorder %v6140_v50, %v6454_v26  ;;  %vm1580_vm1 = vcmp.eq.f32.partialorder %v6143_v15, %v6454_v26 }
 0x4f0   :  { %v1611_v23 = vsel %vm1579_vm9, %v5718_v62, 2147483647  ;;  %v1612_v47 = vsel %vm1580_vm1, %v5724_v42, 2147483647  ;;  %v6471_v12 = vpop.xlane.xlu0 %1514 }
 0x4f1   :  { %v6469_v18 = vcvt.s32.f32 %v1644_v30  ;;  %11728 = vst [vmem:[#allocation86_spill] sm:$0xff] %v6471_v12  ;;  %vm1769_vm11 = vcmp.lt.s32.totalorder %v1611_v23, %v1612_v47  ;;  %vm1561_vm6 = vcmp.eq.f32.partialorder %v6160_v19, %v6471_v12  ;;  %vm1562_vm7 = vcmp.eq.f32.partialorder %v6165_v35, %v6471_v12 }
 0x4f2   :  { %v6478_v40 = vsel %vm1769_vm11, %v1611_v23, %v1612_v47  ;;  %v1593_v16 = vsel %vm1561_vm6, %v5718_v62, 2147483647  ;;  %v1594_v30 = vsel %vm1562_vm7, %v5724_v42, 2147483647 }
 0x4f3   :  { %1647 = vmin.xlane.f32.xlu1 %v6469_v18  ;;  %v1772_v56 = vshra.s32 %v6478_v40, 16  ;;  %vm1625_vm10 = vcmp.lt.s32.totalorder %v1593_v16, %v1594_v30  ;;  %v6489_v53 = vpop.xlane.xlu1 %1523 }
 0x4f4   :  { %11729 = vst [vmem:[#allocation87_spill] sm:$0xff] %v6489_v53  ;;  %v6493_v17 = vsel %vm1625_vm10, %v1593_v16, %v1594_v30  ;;  %vm1567_vm2 = vcmp.eq.f32.partialorder %v6188_v61, %v6489_v53  ;;  %vm1568_vm8 = vcmp.eq.f32.partialorder %v6191_v10, %v6489_v53 }
 0x4f5   :  { %v6491_v6 = vcvt.s32.f32 %v1772_v56  ;;  %v1628_v23 = vshra.s32 %v6493_v17, 16  ;;  %v1599_v47 = vsel %vm1567_vm2, %v5718_v62, 2147483647  ;;  %v1600_v56 = vsel %vm1568_vm8, %v5724_v42, 2147483647 }
 0x4f6   :  { %v6508_v16 = vpop.xlane.xlu0 %1538  ;;  %vm1673_vm13 = vcmp.lt.s32.totalorder %v1599_v47, %v1600_v56 }
 0x4f7   :  { %11730 = vst [vmem:[#allocation88_spill] sm:$0xff] %v6508_v16  ;;  %1775 = vmin.xlane.f32.xlu1 %v6491_v6  ;;  %vm1577_vm15 = vcmp.eq.f32.partialorder %v6206_v52, %v6508_v16  ;;  %vm1578_vm0 = vcmp.eq.f32.partialorder %v6209_v9, %v6508_v16  ;;  %v6515_v30 = vcvt.s32.f32 %v1628_v23  ;;  %v6532_v23 = vsel %vm1673_vm13, %v1599_v47, %v1600_v56 }
 0x4f8   :  { %v1609_v32 = vsel %vm1577_vm15, %v5718_v62, 2147483647  ;;  %v1610_v11 = vsel %vm1578_vm0, %v5724_v42, 2147483647  ;;  %v6525_v31 = vpop.xlane.xlu1 %1547  ;;  %v1676_v22 = vshra.s32 %v6532_v23, 16 }
 0x4f9   :  { %11731 = vst [vmem:[#allocation89_spill] sm:$0xff] %v6525_v31  ;;  %vm11111_vm12 = vcmp.eq.f32.partialorder %v6226_v49, %v6525_v31  ;;  %vm11055_vm14 = vcmp.eq.f32.partialorder %v6231_v38, %v6525_v31  ;;  %1631 = vmin.xlane.f32.xlu0 %v6515_v30  ;;  %vm1753_vm3 = vcmp.lt.s32.totalorder %v1609_v32, %v1610_v11 }
 0x4fa   :  { %v1615_v2 = vsel %vm11111_vm12, %v5718_v62, 2147483647  ;;  %v1616_v21 = vsel %vm11055_vm14, %v5724_v42, 2147483647  ;;  %v6543_v14 = vsel %vm1753_vm3, %v1609_v32, %v1610_v11  ;;  %v6547_v47 = vcvt.s32.f32 %v1676_v22 }
 0x4fb   :  { %vm1801_vm11 = vcmp.lt.s32.totalorder %v1615_v2, %v1616_v21  ;;  %v6545_v34 = vpop.xlane.xlu0 %1520  ;;  %v1756_v56 = vshra.s32 %v6543_v14, 16 }
 0x4fc   :  { %11732 = vst [vmem:[#allocation90_spill] sm:$0xff] %v6545_v34  ;;  %v6550_v27 = vsel %vm1801_vm11, %v1615_v2, %v1616_v21  ;;  %vm11030_vm10 = vcmp.eq.f32.partialorder %v6251_v5, %v6545_v34  ;;  %vm11027_vm13 = vcmp.eq.f32.partialorder %v6255_v44, %v6545_v34  ;;  %1679 = vmin.xlane.f32.xlu1 %v6547_v47  ;;  %v6582_v44 = vld [vmem:[#allocation3 + $0x18] sm:$0xff] }
 0x4fd   :  { %v1804_v38 = vshra.s32 %v6550_v27, 16  ;;  %v1597_v11 = vsel %vm11030_vm10, %v5718_v62, 2147483647  ;;  %v1598_v22 = vsel %vm11027_vm13, %v5724_v42, 2147483647  ;;  %v6568_v2 = vcvt.s32.f32 %v1756_v56  ;;  %v6576_v62 = vld [vmem:[#allocation3 + $0x10] sm:$0xff] }
 0x4fe   :  { %v6565_v21 = vpop.xlane.xlu1 %1529  ;;  %vm1657_vm13 = vcmp.lt.s32.totalorder %v1597_v11, %v1598_v22 }
 0x4ff   :  { %11733 = vst [vmem:[#allocation91_spill] sm:$0xff] %v6565_v21  ;;  %vm11035_vm3 = vcmp.eq.f32.partialorder %v6269_v29, %v6565_v21  ;;  %vm11036_vm11 = vcmp.eq.f32.partialorder %v6272_v37, %v6565_v21  ;;  %v6574_v32 = vcvt.s32.f32 %v1804_v38  ;;  %1759 = vmin.xlane.f32.xlu0 %v6568_v2  ;;  %v6589_v34 = vsel %vm1657_vm13, %v1597_v11, %v1598_v22 }
 0x500   :  { %v1603_v42 = vsel %vm11035_vm3, %v6576_v62, 2147483647  ;;  %v1604_v56 = vsel %vm11036_vm11, %v6582_v44, 2147483647  ;;  %v1660_v29 = vshra.s32 %v6589_v34, 16 }
 0x501   :  { %vm1705_vm10 = vcmp.lt.s32.totalorder %v1603_v42, %v1604_v56  ;;  %1807 = vmin.xlane.f32.xlu1 %v6574_v32 }
 0x502   :  { %v6595_v5 = vsel %vm1705_vm10, %v1603_v42, %v1604_v56  ;;  %v6610_v42 = vcvt.s32.f32 %v1660_v29 }
 0x503   :  { %v1708_v37 = vshra.s32 %v6595_v5, 16 }
 0x504   :  { %1663 = vmin.xlane.f32.xlu0 %v6610_v42 }
 0x505   :  { %v6612_v56 = vcvt.s32.f32 %v1708_v37 }
 0x506   :  { %v6591_v38 = vpop.xlane.xlu0 %1544 }
 0x507   :  { %11734 = vst [vmem:[#allocation92_spill] sm:$0xff] %v6591_v38  ;;  %vm11043_vm3 = vcmp.eq.f32.partialorder %v6291_v3, %v6591_v38  ;;  %vm11044_vm11 = vcmp.eq.f32.partialorder %v6297_v24, %v6591_v38  ;;  %1711 = vmin.xlane.f32.xlu1 %v6612_v56 }
 0x508   :  { %v1613_v11 = vsel %vm11043_vm3, %v6576_v62, 2147483647  ;;  %v1614_v22 = vsel %vm11044_vm11, %v6582_v44, 2147483647 }
 0x509   :  { %vm1785_vm10 = vcmp.lt.s32.totalorder %v1613_v11, %v1614_v22  ;;  %v6614_v21 = vpop.xlane.xlu1 %1553 }
 0x50a   :  { %11735 = vst [vmem:[#allocation93_spill] sm:$0xff] %v6614_v21  ;;  %v6617_v31 = vsel %vm1785_vm10, %v1613_v11, %v1614_v22  ;;  %vm11054_vm13 = vcmp.eq.f32.partialorder %v6316_v46, %v6614_v21  ;;  %vm11053_vm3 = vcmp.eq.f32.partialorder %v6323_v1, %v6614_v21 }
 0x50b   :  { %v1788_v29 = vshra.s32 %v6617_v31, 16  ;;  %v1619_v37 = vsel %vm11054_vm13, %v6576_v62, 2147483647  ;;  %v1620_v11 = vsel %vm11053_vm3, %v6582_v44, 2147483647 }
 0x50c   :  { %v6633_v22 = vpop.xlane.xlu0 %1526  ;;  %vm1833_vm3 = vcmp.lt.s32.totalorder %v1619_v37, %v1620_v11 }
 0x50d   :  { %11736 = vst [vmem:[#allocation94_spill] sm:$0xff] %v6633_v22  ;;  %vm11065_vm10 = vcmp.eq.f32.partialorder %v6334_v60, %v6633_v22  ;;  %vm11064_vm11 = vcmp.eq.f32.partialorder %v6344_v57, %v6633_v22  ;;  %v6639_v24 = vcvt.s32.f32 %v1788_v29  ;;  %v6656_v29 = vsel %vm1833_vm3, %v1619_v37, %v1620_v11 }
 0x50e   :  { %v1601_v46 = vsel %vm11065_vm10, %v6576_v62, 2147483647  ;;  %v1602_v1 = vsel %vm11064_vm11, %v6582_v44, 2147483647  ;;  %v1836_v38 = vshra.s32 %v6656_v29, 16 }
 0x50f   :  { %1791 = vmin.xlane.f32.xlu0 %v6639_v24  ;;  %vm1689_vm11 = vcmp.lt.s32.totalorder %v1601_v46, %v1602_v1 }
 0x510   :  { %v6649_v21 = vpop.xlane.xlu1 %1535  ;;  %v6673_v37 = vsel %vm1689_vm11, %v1601_v46, %v1602_v1 }
 0x511   :  { %11737 = vst [vmem:[#allocation95_spill] sm:$0xff] %v6649_v21  ;;  %vm11075_vm13 = vcmp.eq.f32.partialorder %v6355_v58, %v6649_v21  ;;  %vm11074_vm14 = vcmp.eq.f32.partialorder %v6364_v45, %v6649_v21  ;;  %v6681_v21 = vcvt.s32.f32 %v1836_v38  ;;  %v1692_v58 = vshra.s32 %v6673_v37, 16 }
 0x512   :  { %v1607_v60 = vsel %vm11075_vm13, %v6576_v62, 2147483647  ;;  %v1608_v57 = vsel %vm11074_vm14, %v6582_v44, 2147483647 }
 0x513   :  { %v6666_v22 = vpop.xlane.xlu0 %1550  ;;  %vm1737_vm13 = vcmp.lt.s32.totalorder %v1607_v60, %v1608_v57  ;;  %1839 = vmin.xlane.f32.xlu1 %v6681_v21 }
 0x514   :  { %11738 = vst [vmem:[#allocation96_spill] sm:$0xff] %v6666_v22  ;;  %vm11081_vm10 = vcmp.eq.f32.partialorder %v6377_v7, %v6666_v22  ;;  %vm11080_vm3 = vcmp.eq.f32.partialorder %v6382_v4, %v6666_v22  ;;  %v6703_v4 = vcvt.s32.f32 %v1692_v58  ;;  %v6705_v22 = vsel %vm1737_vm13, %v1607_v60, %v1608_v57 }
 0x515   :  { %v1617_v11 = vsel %vm11081_vm10, %v6576_v62, 2147483647  ;;  %v6679_v45 = vpop.xlane.xlu1 %1559  ;;  %v1618_v3 = vsel %vm11080_vm3, %v6582_v44, 2147483647 }
 0x516   :  { %11739 = vst [vmem:[#allocation97_spill] sm:$0xff] %v6679_v45  ;;  %vm11089_vm11 = vcmp.eq.f32.partialorder %v6395_v54, %v6679_v45  ;;  %vm11086_vm14 = vcmp.eq.f32.partialorder %v6402_v25, %v6679_v45  ;;  %v1740_v54 = vshra.s32 %v6705_v22, 16  ;;  %1695 = vmin.xlane.f32.xlu0 %v6703_v4  ;;  %vm1817_vm13 = vcmp.lt.s32.totalorder %v1617_v11, %v1618_v3 }
 0x517   :  { %v1623_v46 = vsel %vm11089_vm11, %v6576_v62, 2147483647  ;;  %v1624_v1 = vsel %vm11086_vm14, %v6582_v44, 2147483647  ;;  %v6723_v57 = vsel %vm1817_vm13, %v1617_v11, %v1618_v3 }
 0x518   :  { %v6700_v38 = vpop.xlane.xlu0 %1532  ;;  %vm1865_vm14 = vcmp.lt.s32.totalorder %v1623_v46, %v1624_v1  ;;  %v6721_v60 = vcvt.s32.f32 %v1740_v54 }
 0x519   :  { %11740 = vst [vmem:[#allocation98_spill] sm:$0xff] %v6700_v38  ;;  %vm11098_vm3 = vcmp.eq.f32.partialorder %v6413_v55, %v6700_v38  ;;  %vm11097_vm10 = vcmp.eq.f32.partialorder %v6416_v63, %v6700_v38  ;;  %v6725_v45 = vsel %vm1865_vm14, %v1623_v46, %v1624_v1  ;;  %v1820_v55 = vshra.s32 %v6723_v57, 16 }
 0x51a   :  { %v1605_v25 = vsel %vm11098_vm3, %v6576_v62, 2147483647  ;;  %v1606_v58 = vsel %vm11097_vm10, %v6582_v44, 2147483647  ;;  %v1868_v49 = vshra.s32 %v6725_v45, 16  ;;  %1743 = vmin.xlane.f32.xlu1 %v6721_v60 }
 0x51b   :  { %vm1721_vm11 = vcmp.lt.s32.totalorder %v1605_v25, %v1606_v58  ;;  %v6747_v11 = vcvt.s32.f32 %v1820_v55 }
 0x51c   :  { %v6727_v7 = vpop.xlane.xlu0 %1556  ;;  %v6731_v13 = vsel %vm1721_vm11, %v1605_v25, %v1606_v58  ;;  %v6749_v46 = vcvt.s32.f32 %v1868_v49  ;;  %v1643_v49 = vand.u32 65535, %v6452_v48 }
 0x51d   :  { %11741 = vst [vmem:[#allocation99_spill] sm:$0xff] %v6727_v7  ;;  %vm11110_vm10 = vcmp.eq.f32.partialorder %v6431_v0, %v6727_v7  ;;  %vm11109_vm3 = vcmp.eq.f32.partialorder %v6434_v8, %v6727_v7  ;;  %v1724_v3 = vshra.s32 %v6731_v13, 16  ;;  %1823 = vmin.xlane.f32.xlu0 %v6747_v11 }
 0x51e   :  { %v1621_v54 = vsel %vm11110_vm10, %v6576_v62, 2147483647  ;;  %v1622_v25 = vsel %vm11109_vm3, %v6582_v44, 2147483647  ;;  %1871 = vmin.xlane.f32.xlu1 %v6749_v46  ;;  %v1645_v8 = vcvt.s32.f32 %v1643_v49 }
 0x51f   :  { %vm1849_vm14 = vcmp.lt.s32.totalorder %v1621_v54, %v1622_v25  ;;  %v6752_v1 = vcvt.s32.f32 %v1724_v3  ;;  %v1771_v3 = vand.u32 65535, %v6478_v40  ;;  %v1675_v40 = vand.u32 65535, %v6532_v23 }
 0x520   :  { %v6754_v58 = vsel %vm1849_vm14, %v1621_v54, %v1622_v25  ;;  %v1627_v25 = vand.u32 65535, %v6493_v17  ;;  %v1755_v17 = vand.u32 65535, %v6543_v14 }
 0x521   :  { %v1852_v0 = vshra.s32 %v6754_v58, 16  ;;  %1727 = vmin.xlane.f32.xlu0 %v6752_v1 }
 0x522   :  { %v1629_v49 = vcvt.s32.f32 %v1627_v25  ;;  %v1757_v25 = vcvt.s32.f32 %v1755_v17  ;;  %v1787_v17 = vand.u32 65535, %v6617_v31 }
 0x523   :  { %v6759_v63 = vcvt.s32.f32 %v1852_v0  ;;  %v1773_v0 = vcvt.s32.f32 %v1771_v3  ;;  %v1677_v3 = vcvt.s32.f32 %v1675_v40 }
 0x525   :  { %1855 = vmin.xlane.f32.xlu0 %v6759_v63 }
 0x580   :  { %v6763_v55 = vpop.xlane.xlu1 %1647 }
 0x581   :  { %vm1649_vm11 = vcmp.eq.f32.partialorder %v6469_v18, %v6763_v55 }
 0x582   :  { %v1650_v54 = vsel %vm1649_vm11, %v1645_v8, inf }
 0x583   :  { %1651 = vmin.xlane.f32.xlu1 %v1650_v54  ;;  %v1803_v54 = vand.u32 65535, %v6550_v27  ;;  %v1707_v27 = vand.u32 65535, %v6595_v5 }
 0x584   :  { %v6769_v7 = vpop.xlane.xlu1 %1775 }
 0x585   :  { %vm1777_vm13 = vcmp.eq.f32.partialorder %v6491_v6, %v6769_v7  ;;  %v1805_v14 = vcvt.s32.f32 %v1803_v54 }
 0x586   :  { %v1778_v38 = vsel %vm1777_vm13, %v1773_v0, inf  ;;  %v6773_v48 = vpop.xlane.xlu0 %1631  ;;  %v1659_v0 = vand.u32 65535, %v6589_v34 }
 0x587   :  { %1779 = vmin.xlane.f32.xlu1 %v1778_v38  ;;  %vm1633_vm14 = vcmp.eq.f32.partialorder %v6515_v30, %v6773_v48 }
 0x588   :  { %v1634_v8 = vsel %vm1633_vm14, %v1629_v49, inf  ;;  %v1661_v40 = vcvt.s32.f32 %v1659_v0 }
 0x589   :  { %1635 = vmin.xlane.f32.xlu0 %v1634_v8  ;;  %v6779_v18 = vpop.xlane.xlu1 %1679  ;;  %v1709_v8 = vcvt.s32.f32 %v1707_v27 }
 0x58a   :  { %vm1681_vm11 = vcmp.eq.f32.partialorder %v6547_v47, %v6779_v18 }
 0x58b   :  { %v1682_v38 = vsel %vm1681_vm11, %v1677_v3, inf  ;;  %v1789_v3 = vcvt.s32.f32 %v1787_v17 }
 0x58c   :  { %v6784_v6 = vpop.xlane.xlu0 %1759  ;;  %1683 = vmin.xlane.f32.xlu1 %v1682_v38  ;;  %v1691_v38 = vand.u32 65535, %v6673_v37 }
 0x58d   :  { %vm1761_vm13 = vcmp.eq.f32.partialorder %v6568_v2, %v6784_v6 }
 0x58e   :  { %v1762_v30 = vsel %vm1761_vm13, %v1757_v25, inf  ;;  %v6788_v23 = vpop.xlane.xlu1 %1807  ;;  %v1693_v0 = vcvt.s32.f32 %v1691_v38 }
 0x58f   :  { %1763 = vmin.xlane.f32.xlu0 %v1762_v30  ;;  %vm1809_vm14 = vcmp.eq.f32.partialorder %v6574_v32, %v6788_v23 }
 0x590   :  { %v1810_v47 = vsel %vm1809_vm14, %v1805_v14, inf }
 0x591   :  { %1811 = vmin.xlane.f32.xlu1 %v1810_v47  ;;  %v6794_v49 = vpop.xlane.xlu0 %1663  ;;  %v1867_v47 = vand.u32 65535, %v6725_v45 }
 0x592   :  { %vm1665_vm11 = vcmp.eq.f32.partialorder %v6610_v42, %v6794_v49  ;;  %v1835_v42 = vand.u32 65535, %v6656_v29  ;;  %v1819_v29 = vand.u32 65535, %v6723_v57 }
 0x593   :  { %v1666_v34 = vsel %vm1665_vm11, %v1661_v40, inf  ;;  %v1869_v57 = vcvt.s32.f32 %v1867_v47  ;;  %v11743_v47 = vld [vmem:[#allocation27_spill] sm:$0xff] }
 0x594   :  { %v6798_v2 = vpop.xlane.xlu1 %1711  ;;  %1667 = vmin.xlane.f32.xlu0 %v1666_v34  ;;  %v1837_v25 = vcvt.s32.f32 %v1835_v42  ;;  %v1821_v40 = vcvt.s32.f32 %v1819_v29  ;;  %v1654_v42 = vcvt.f32.s32 %v6763_v55 }
 0x595   :  { %vm1713_vm13 = vcmp.eq.f32.partialorder %v6612_v56, %v6798_v2  ;;  %v1739_v56 = vand.u32 65535, %v6705_v22 }
 0x596   :  { %v1714_v32 = vsel %vm1713_vm13, %v1709_v8, inf  ;;  %v1723_v8 = vand.u32 65535, %v6731_v13  ;;  %v1655_v38 = vshll.u32 %v1654_v42, 16 }
 0x597   :  { %1715 = vmin.xlane.f32.xlu1 %v1714_v32  ;;  %v1741_v27 = vcvt.s32.f32 %v1739_v56  ;;  %v1851_v32 = vand.u32 65535, %v6754_v58  ;;  %v1782_v58 = vcvt.f32.s32 %v6769_v7 }
 0x598   :  { %v1725_v34 = vcvt.s32.f32 %v1723_v8 }
 0x599   :  { %v1783_v55 = vshll.u32 %v1782_v58, 16 }
 0x59c   :  { %v6803_v5 = vpop.xlane.xlu0 %1791 }
 0x59d   :  { %vm1793_vm14 = vcmp.eq.f32.partialorder %v6639_v24, %v6803_v5 }
 0x59e   :  { %v1794_v54 = vsel %vm1793_vm14, %v1789_v3, inf  ;;  %v1853_v3 = vcvt.s32.f32 %v1851_v32 }
 0x59f   :  { %1795 = vmin.xlane.f32.xlu0 %v1794_v54 }
 0x5a0   :  { %v6809_v31 = vpop.xlane.xlu1 %1839 }
 0x5a1   :  { %vm1841_vm11 = vcmp.eq.f32.partialorder %v6681_v21, %v6809_v31 }
 0x5a2   :  { %v1842_v14 = vsel %vm1841_vm11, %v1837_v25, inf }
 0x5a3   :  { %v6814_v30 = vpop.xlane.xlu0 %1695  ;;  %1843 = vmin.xlane.f32.xlu1 %v1842_v14 }
 0x5a4   :  { %vm1697_vm13 = vcmp.eq.f32.partialorder %v6703_v4, %v6814_v30 }
 0x5a5   :  { %v1698_v24 = vsel %vm1697_vm13, %v1693_v0, inf  ;;  %v1638_v0 = vcvt.f32.s32 %v6773_v48 }
 0x5a6   :  { %1699 = vmin.xlane.f32.xlu0 %v1698_v24 }
 0x5a7   :  { %v6819_v37 = vpop.xlane.xlu1 %1743 }
 0x5a8   :  { %vm1745_vm14 = vcmp.eq.f32.partialorder %v6721_v60, %v6819_v37 }
 0x5a9   :  { %v1746_v21 = vsel %vm1745_vm14, %v1741_v27, inf }
 0x5aa   :  { %v6824_v22 = vpop.xlane.xlu0 %1823  ;;  %1747 = vmin.xlane.f32.xlu1 %v1746_v21 }
 0x5ab   :  { %vm1825_vm11 = vcmp.eq.f32.partialorder %v6747_v11, %v6824_v22  ;;  %v6829_v4 = vpop.xlane.xlu1 %1871 }
 0x5ac   :  { %v1826_v17 = vsel %vm1825_vm11, %v1821_v40, inf  ;;  %vm1873_vm13 = vcmp.eq.f32.partialorder %v6749_v46, %v6829_v4  ;;  %v1639_v40 = vshll.u32 %v1638_v0, 16 }
 0x5ad   :  { %1827 = vmin.xlane.f32.xlu0 %v1826_v17  ;;  %v1874_v45 = vsel %vm1873_vm13, %v1869_v57, inf  ;;  %vm11129_vm13 = vcmask 7168   ;;  %v1686_v17 = vcvt.f32.s32 %v6779_v18  ;;  %v1814_v18 = vcvt.f32.s32 %v6788_v23 }
 0x5ae   :  { %v6833_v60 = vpop.xlane.xlu0 %1727  ;;  %1875 = vmin.xlane.f32.xlu1 %v1874_v45  ;;  %v4329_v21 = vsel %vm11129_vm13, %v11743_v47, %v6118_v33  ;;  %v11744_v33 = vld [vmem:[#allocation28_spill] sm:$0xff] }
 0x5af   :  { %vm1729_vm14 = vcmp.eq.f32.partialorder %v6752_v1, %v6833_v60  ;;  %v11742_v1 = vld [vmem:[#allocation26_spill] sm:$0xff] }
 0x5b0   :  { %v1730_v13 = vsel %vm1729_vm14, %v1725_v34, inf  ;;  %v4321_v14 = vsel %vm11129_vm13, %v11742_v1, %v6101_v36  ;;  %vm11128_vm14 = vcmask 15360   ;;  %v1766_v34 = vcvt.f32.s32 %v6784_v6 }
 0x5b1   :  { %1731 = vmin.xlane.f32.xlu0 %v1730_v13 }
 0x5b2   :  { %v6838_v11 = vpop.xlane.xlu0 %1855 }
 0x5b3   :  { %vm1857_vm11 = vcmp.eq.f32.partialorder %v6759_v63, %v6838_v11 }
 0x5b4   :  { %v1858_v46 = vsel %vm1857_vm11, %v1853_v3, inf }
 0x5b5   :  { %1859 = vmin.xlane.f32.xlu0 %v1858_v46 }
 0x610   :  { %v1652_v54 = vpop.xlane.xlu1 %1651 }
 0x611   :  { %v1653_v25 = vcvt.f32.s32 %v1652_v54  ;;  %v1767_v54 = vshll.u32 %v1766_v34, 16  ;;  %v11748_v34 = vld [vmem:[#allocation71_spill] sm:$0xff] }
 0x613   :  { %v1656_v56 = vadd.s32 %v1655_v38, %v1653_v25 }
 0x614   :  { %v1780_v24 = vpop.xlane.xlu1 %1779 }
 0x615   :  { %v6849_v63 = vsel %vm11128_vm14, %v4321_v14, %v1656_v56  ;;  %vm1883_vm11 = vcmp.eq.s32.totalorder %v6576_v62, %v1656_v56  ;;  %vm1884_vm3 = vcmp.eq.s32.totalorder %v6582_v44, %v1656_v56  ;;  %v1781_v29 = vcvt.f32.s32 %v1780_v24  ;;  %v11745_v56 = vld [vmem:[#allocation29_spill] sm:$0xff] }
 0x616   :  { %vm1915_vm10 = vmand %vm1563_vm4, %vm1883_vm11  ;;  %v1636_v48 = vpop.xlane.xlu0 %1635  ;;  %v4323_v1 = vsel %vm11129_vm13, %v11745_v56, %v6149_v28  ;;  %v1718_v14 = vcvt.f32.s32 %v6798_v2  ;;  %v11747_v28 = vld [vmem:[#allocation31_spill] sm:$0xff] }
 0x617   :  { %vm1916_vm12 = vmand %vm1564_vm5, %vm1884_vm3  ;;  %v6860_v36 = vsel %vm1915_vm10, 1e+30, %v6115_v41  ;;  %v1784_v7 = vadd.s32 %v1783_v55, %v1781_v29  ;;  %v1637_v8 = vcvt.f32.s32 %v1636_v48  ;;  %v4331_v48 = vsel %vm11129_vm13, %v11747_v28, %v6175_v39  ;;  %v11764_v28 = vld [vmem:[#allocation75_spill] sm:$0xff] }
 0x618   :  { %v6863_v27 = vsel %vm1916_vm12, 1e+30, %v6121_v20  ;;  %v4320_v20 = vsel %vm11129_vm13, %v11744_v33, %v6130_v43  ;;  %v1687_v43 = vshll.u32 %v1686_v17, 16  ;;  %v1719_v39 = vshll.u32 %v1718_v14, 16 }
 0x619   :  { %v1980_v57 = vmin.f32 %v6860_v36, %v6863_v27  ;;  %v6872_v45 = vsel %vm11128_vm14, %v4329_v21, %v1784_v7  ;;  %vm1899_vm4 = vcmp.eq.s32.totalorder %v6576_v62, %v1784_v7  ;;  %vm1900_vm5 = vcmp.eq.s32.totalorder %v6582_v44, %v1784_v7  ;;  %v1684_v3 = vpop.xlane.xlu1 %1683 }
 0x61a   :  { %v1640_v41 = vadd.s32 %v1639_v40, %v1637_v8  ;;  %vm1931_vm12 = vmand %vm1579_vm9, %vm1899_vm4  ;;  %v1685_v6 = vcvt.f32.s32 %v1684_v3  ;;  %v1798_v40 = vcvt.f32.s32 %v6803_v5 }
 0x61b   :  { %1981 = vmin.xlane.f32.xlu1 %v1980_v57  ;;  %vm1932_vm10 = vmand %vm1580_vm1, %vm1900_vm5  ;;  %v6888_v32 = vsel %vm1931_vm12, 1e+30, %v6140_v50  ;;  %v1670_v50 = vcvt.f32.s32 %v6794_v49  ;;  %v1815_v49 = vshll.u32 %v1814_v18, 16  ;;  %v11749_v18 = vld [vmem:[#allocation32_spill] sm:$0xff] }
 0x61c   :  { %v6891_v13 = vsel %vm11128_vm14, %v4320_v20, %v1640_v41  ;;  %v6894_v46 = vsel %vm1932_vm10, 1e+30, %v6143_v15  ;;  %vm1881_vm9 = vcmp.eq.s32.totalorder %v6576_v62, %v1640_v41  ;;  %vm1882_vm3 = vcmp.eq.s32.totalorder %v6582_v44, %v1640_v41  ;;  %v1764_v42 = vpop.xlane.xlu0 %1763 }
 0x61d   :  { %v2004_v23 = vmin.f32 %v6888_v32, %v6894_v46  ;;  %vm1913_vm1 = vmand %vm1561_vm6, %vm1881_vm9  ;;  %v1688_v38 = vadd.s32 %v1687_v43, %v1685_v6  ;;  %v1765_v25 = vcvt.f32.s32 %v1764_v42  ;;  %v1671_v2 = vshll.u32 %v1670_v50, 16  ;;  %v11753_v50 = vld [vmem:[#allocation73_spill] sm:$0xff] }
 0x61e   :  { %vm1914_vm11 = vmand %vm1562_vm7, %vm1882_vm3  ;;  %v6908_v15 = vsel %vm1913_vm1, 1e+30, %v6160_v19  ;;  %v1812_v0 = vpop.xlane.xlu1 %1811  ;;  %v4322_v3 = vsel %vm11129_vm13, %v11749_v18, %v11748_v34 }
 0x61f   :  { %2005 = vmin.xlane.f32.xlu1 %v2004_v23  ;;  %v6911_v58 = vsel %vm1914_vm11, 1e+30, %v6165_v35  ;;  %v6920_v19 = vsel %vm11128_vm14, %v4323_v1, %v1688_v38  ;;  %v1768_v55 = vadd.s32 %v1767_v54, %v1765_v25  ;;  %v1813_v29 = vcvt.f32.s32 %v1812_v0  ;;  %v11746_v35 = vld [vmem:[#allocation30_spill] sm:$0xff]  ;;  %v11750_v23 = vld [vmem:[#allocation72_spill] sm:$0xff] }
 0x620   :  { %v1977_v24 = vmin.f32 %v6908_v15, %v6911_v58  ;;  %vm1887_vm6 = vcmp.eq.s32.totalorder %v6576_v62, %v1688_v38  ;;  %v4328_v7 = vsel %vm11129_vm13, %v11746_v35, %v6162_v59  ;;  %vm1888_vm7 = vcmp.eq.s32.totalorder %v6582_v44, %v1688_v38  ;;  %v11755_v25 = vld [vmem:[#allocation74_spill] sm:$0xff] }
 0x621   :  { %vm1919_vm4 = vmand %vm1567_vm2, %vm1887_vm6  ;;  %v6934_v47 = vsel %vm11128_vm14, %v4328_v7, %v1768_v55  ;;  %v1816_v21 = vadd.s32 %v1815_v49, %v1813_v29  ;;  %vm1897_vm12 = vcmp.eq.s32.totalorder %v6576_v62, %v1768_v55  ;;  %v1668_v8 = vpop.xlane.xlu0 %1667  ;;  %vm1898_vm2 = vcmp.eq.s32.totalorder %v6582_v44, %v1768_v55  ;;  %v11761_v29 = vld [vmem:[#allocation37_spill] sm:$0xff]  ;;  %v11762_v35 = vld [vmem:[#allocation90_spill] sm:$0xff] }
 0x622   :  { %1978 = vmin.xlane.f32.xlu0 %v1977_v24  ;;  %vm1920_vm5 = vmand %vm1568_vm8, %vm1888_vm7  ;;  %v6940_v59 = vsel %vm1919_vm4, 1e+30, %v6188_v61  ;;  %v1669_v61 = vcvt.f32.s32 %v1668_v8  ;;  %v1799_v54 = vshll.u32 %v1798_v40, 16  ;;  %vm11763_vm4 = vcmp.eq.f32.partialorder %v11761_v29, %v11762_v35  ;;  %v11769_v40 = vld [vmem:[#allocation91_spill] sm:$0xff]  ;;  %v11771_v8 = vld [vmem:[#allocation38_spill] sm:$0xff] }
 0x623   :  { %v6945_v57 = vsel %vm1920_vm5, 1e+30, %v6191_v10  ;;  %vm1929_vm10 = vmand %vm1577_vm15, %vm1897_vm12  ;;  %v6952_v17 = vsel %vm11128_vm14, %v4331_v48, %v1816_v21  ;;  %vm1903_vm15 = vcmp.eq.s32.totalorder %v6576_v62, %v1816_v21  ;;  %vm1904_vm9 = vcmp.eq.s32.totalorder %v6582_v44, %v1816_v21 }
 0x624   :  { %v1716_v41 = vpop.xlane.xlu1 %1715  ;;  %v1986_v33 = vmin.f32 %v6940_v59, %v6945_v57  ;;  %vm1930_vm8 = vmand %vm1578_vm0, %vm1898_vm2  ;;  %v6960_v10 = vsel %vm1929_vm10, 1e+30, %v6206_v52  ;;  %v1672_v43 = vadd.s32 %v1671_v2, %v1669_v61  ;;  %v11751_v52 = vld [vmem:[#allocation89_spill] sm:$0xff]  ;;  %v1846_v7 = vcvt.f32.s32 %v6809_v31  ;;  %v11772_v31 = vld [vmem:[#allocation34_spill] sm:$0xff] }
 0x625   :  { %v1717_v5 = vcvt.f32.s32 %v1716_v41  ;;  %v6963_v20 = vsel %vm1930_vm8, 1e+30, %v6209_v9  ;;  %vm11752_vm0 = vcmp.eq.f32.partialorder %v11750_v23, %v11751_v52  ;;  %v11754_v9 = vld [vmem:[#allocation33_spill] sm:$0xff]  ;;  %vm11756_vm1 = vcmp.eq.f32.partialorder %v11755_v25, %v11751_v52 }
 0x626   :  { %1987 = vmin.xlane.f32.xlu1 %v1986_v33  ;;  %v2001_v6 = vmin.f32 %v6960_v10, %v6963_v20  ;;  %vm1935_vm3 = vmand %vm11752_vm0, %vm1903_vm15  ;;  %v4325_v42 = vsel %vm11129_vm13, %v11754_v9, %v11753_v50  ;;  %v6985_v1 = vsel %vm11128_vm14, %v4322_v3, %v1672_v43  ;;  %vm1885_vm6 = vcmp.eq.s32.totalorder %v6576_v62, %v1672_v43  ;;  %v11778_v50 = vld [vmem:[#allocation40_spill] sm:$0xff] }
 0x627   :  { %v1720_v38 = vadd.s32 %v1719_v39, %v1717_v5  ;;  %vm1936_vm11 = vmand %vm11756_vm1, %vm1904_vm9  ;;  %v6982_v56 = vsel %vm1935_vm3, 1e+30, %v11750_v23  ;;  %11758 = vst [vmem:[#allocation27_spill] sm:$0xff] %v6985_v1  ;;  %vm1886_vm7 = vcmp.eq.s32.totalorder %v6582_v44, %v1672_v43  ;;  %vm11765_vm2 = vcmp.eq.f32.partialorder %v11764_v28, %v11762_v35  ;;  %v11768_v39 = vld [vmem:[#allocation39_spill] sm:$0xff]  ;;  %v11773_v5 = vld [vmem:[#allocation76_spill] sm:$0xff] }
 0x628   :  { %11757 = vst [vmem:[#allocation26_spill] sm:$0xff] %v6982_v56  ;;  %2002 = vmin.xlane.f32.xlu0 %v2001_v6  ;;  %v6988_v14 = vsel %vm1936_vm11, 1e+30, %v11755_v25  ;;  %vm1917_vm5 = vmand %vm11763_vm4, %vm1885_vm6  ;;  %vm11770_vm15 = vcmp.eq.f32.partialorder %v11768_v39, %v11769_v40  ;;  %v4330_v61 = vsel %vm11129_vm13, %v11772_v31, %v11771_v8  ;;  %v1702_v41 = vcvt.f32.s32 %v6814_v30  ;;  %v11779_v9 = vld [vmem:[#allocation92_spill] sm:$0xff]  ;;  %v11843_v35 = vld [vmem:[#allocation53_spill] sm:$0xff] }
 0x629   :  { %11759 = vst [vmem:[#allocation28_spill] sm:$0xff] %v6988_v14  ;;  %v6993_v0 = vsel %vm11128_vm14, %v4325_v42, %v1720_v38  ;;  %v2010_v55 = vmin.f32 %v6982_v56, %v6988_v14  ;;  %vm1891_vm12 = vcmp.eq.s32.totalorder %v6576_v62, %v1720_v38  ;;  %vm1918_vm10 = vmand %vm11765_vm2, %vm1886_vm7  ;;  %v7006_v48 = vsel %vm1917_vm5, 1e+30, %v11761_v29  ;;  %v11781_v42 = vld [vmem:[#allocation77_spill] sm:$0xff]  ;;  %v11788_v8 = vld [vmem:[#allocation36_spill] sm:$0xff] }
 0x62a   :  { %11760 = vst [vmem:[#allocation29_spill] sm:$0xff] %v6993_v0  ;;  %11766 = vst [vmem:[#allocation30_spill] sm:$0xff] %v7006_v48  ;;  %vm1892_vm8 = vcmp.eq.s32.totalorder %v6582_v44, %v1720_v38  ;;  %v7010_v21 = vsel %vm1918_vm10, 1e+30, %v11764_v28  ;;  %vm11774_vm0 = vcmp.eq.f32.partialorder %v11773_v5, %v11769_v40  ;;  %v1847_v30 = vshll.u32 %v1846_v7, 16  ;;  %v11815_v40 = vld [vmem:[#allocation82_spill] sm:$0xff] }
 0x62b   :  { %2011 = vmin.xlane.f32.xlu1 %v2010_v55  ;;  %11767 = vst [vmem:[#allocation31_spill] sm:$0xff] %v7010_v21  ;;  %vm1923_vm9 = vmand %vm11770_vm15, %vm1891_vm12  ;;  %v1983_v33 = vmin.f32 %v7006_v48, %v7010_v21  ;;  %vm11780_vm6 = vcmp.eq.f32.partialorder %v11778_v50, %v11779_v9  ;;  %v1750_v25 = vcvt.f32.s32 %v6819_v37  ;;  %v1703_v29 = vshll.u32 %v1702_v41, 16 }
 0x62c   :  { %v1796_v49 = vpop.xlane.xlu0 %1795  ;;  %vm1924_vm3 = vmand %vm11774_vm0, %vm1892_vm8  ;;  %v7025_v34 = vsel %vm1923_vm9, 1e+30, %v11768_v39  ;;  %v11787_v39 = vld [vmem:[#allocation43_spill] sm:$0xff]  ;;  %v1830_v37 = vcvt.f32.s32 %v6824_v22  ;;  %v11793_v22 = vld [vmem:[#allocation42_spill] sm:$0xff] }
 0x62d   :  { %v1797_v24 = vcvt.f32.s32 %v1796_v49  ;;  %11775 = vst [vmem:[#allocation71_spill] sm:$0xff] %v7025_v34  ;;  %v7031_v43 = vsel %vm1924_vm3, 1e+30, %v11773_v5  ;;  %1984 = vmin.xlane.f32.xlu0 %v1983_v33  ;;  %v4324_v31 = vsel %vm11129_vm13, %v11788_v8, %v11787_v39 }
 0x62e   :  { %11777 = vst [vmem:[#allocation72_spill] sm:$0xff] %v7031_v43  ;;  %v1992_v23 = vmin.f32 %v7025_v34, %v7031_v43 }
 0x62f   :  { %v1800_v2 = vadd.s32 %v1799_v54, %v1797_v24  ;;  %v11782_v54 = vld [vmem:[#allocation35_spill] sm:$0xff]  ;;  %v11783_v24 = vld [vmem:[#allocation78_spill] sm:$0xff] }
 0x630   :  { %v1844_v3 = vpop.xlane.xlu1 %1843  ;;  %v4333_v38 = vsel %vm11129_vm13, %v11782_v54, %v11781_v42  ;;  %vm11784_vm4 = vcmp.eq.f32.partialorder %v11783_v24, %v11779_v9  ;;  %1993 = vmin.xlane.f32.xlu1 %v1992_v23  ;;  %v1751_v42 = vshll.u32 %v1750_v25, 16  ;;  %v1831_v25 = vshll.u32 %v1830_v37, 16 }
 0x631   :  { %v7028_v18 = vsel %vm11128_vm14, %v4330_v61, %v1800_v2  ;;  %vm1901_vm1 = vcmp.eq.s32.totalorder %v6576_v62, %v1800_v2  ;;  %vm1902_vm11 = vcmp.eq.s32.totalorder %v6582_v44, %v1800_v2  ;;  %v1845_v6 = vcvt.f32.s32 %v1844_v3 }
 0x632   :  { %11776 = vst [vmem:[#allocation32_spill] sm:$0xff] %v7028_v18  ;;  %vm1933_vm7 = vmand %vm11780_vm6, %vm1901_vm1  ;;  %v1878_v61 = vcvt.f32.s32 %v6829_v4 }
 0x633   :  { %v1700_v49 = vpop.xlane.xlu0 %1699  ;;  %vm1934_vm5 = vmand %vm11784_vm4, %vm1902_vm11  ;;  %v7048_v55 = vsel %vm1933_vm7, 1e+30, %v11778_v50  ;;  %v1848_v7 = vadd.s32 %v1847_v30, %v1845_v6  ;;  %v11790_v30 = vld [vmem:[#allocation79_spill] sm:$0xff]  ;;  %v11791_v6 = vld [vmem:[#allocation41_spill] sm:$0xff] }
 0x634   :  { %11785 = vst [vmem:[#allocation73_spill] sm:$0xff] %v7048_v55  ;;  %v1701_v28 = vcvt.f32.s32 %v1700_v49  ;;  %v7051_v2 = vsel %vm1934_vm5, 1e+30, %v11783_v24  ;;  %v4327_v23 = vsel %vm11129_vm13, %v11791_v6, %v11790_v30  ;;  %v11792_v50 = vld [vmem:[#allocation45_spill] sm:$0xff]  ;;  %v11794_v49 = vld [vmem:[#allocation44_spill] sm:$0xff]  ;;  %v1879_v30 = vshll.u32 %v1878_v61, 16 }
 0x635   :  { %11786 = vst [vmem:[#allocation33_spill] sm:$0xff] %v7051_v2  ;;  %v2007_v33 = vmin.f32 %v7048_v55, %v7051_v2  ;;  %v7061_v5 = vsel %vm11128_vm14, %v4333_v38, %v1848_v7  ;;  %vm1907_vm12 = vcmp.eq.s32.totalorder %v6576_v62, %v1848_v7  ;;  %vm1908_vm2 = vcmp.eq.s32.totalorder %v6582_v44, %v1848_v7  ;;  %v11795_v38 = vld [vmem:[#allocation93_spill] sm:$0xff]  ;;  %v11810_v61 = vld [vmem:[#allocation48_spill] sm:$0xff] }
 0x636   :  { %11789 = vst [vmem:[#allocation74_spill] sm:$0xff] %v7061_v5  ;;  %v1704_v41 = vadd.s32 %v1703_v29, %v1701_v28  ;;  %v4332_v4 = vsel %vm11129_vm13, %v11793_v22, %v11792_v50  ;;  %vm11796_vm10 = vcmp.eq.f32.partialorder %v11794_v49, %v11795_v38  ;;  %v11798_v29 = vld [vmem:[#allocation80_spill] sm:$0xff]  ;;  %v1734_v28 = vcvt.f32.s32 %v6833_v60 }
 0x637   :  { %v1748_v3 = vpop.xlane.xlu1 %1747  ;;  %2008 = vmin.xlane.f32.xlu0 %v2007_v33  ;;  %vm1939_vm8 = vmand %vm11796_vm10, %vm1907_vm12  ;;  %vm11799_vm15 = vcmp.eq.f32.partialorder %v11798_v29, %v11795_v38 }
 0x638   :  { %v1749_v54 = vcvt.f32.s32 %v1748_v3  ;;  %v7075_v24 = vsel %vm11128_vm14, %v4324_v31, %v1704_v41  ;;  %vm1940_vm9 = vmand %vm11799_vm15, %vm1908_vm2  ;;  %v7081_v7 = vsel %vm1939_vm8, 1e+30, %v11794_v49  ;;  %vm1889_vm0 = vcmp.eq.s32.totalorder %v6576_v62, %v1704_v41  ;;  %v11802_v31 = vld [vmem:[#allocation4_spill] sm:$0xff]  ;;  %v11803_v3 = vld [vmem:[#allocation94_spill] sm:$0xff] }
 0x639   :  { %11797 = vst [vmem:[#allocation37_spill] sm:$0xff] %v7075_v24  ;;  %11800 = vst [vmem:[#allocation75_spill] sm:$0xff] %v7081_v7  ;;  %vm1890_vm3 = vcmp.eq.s32.totalorder %v6582_v44, %v1704_v41  ;;  %v7087_v33 = vsel %vm1940_vm9, 1e+30, %v11798_v29  ;;  %vm11804_vm1 = vcmp.eq.f32.partialorder %v11802_v31, %v11803_v3  ;;  %v11805_v49 = vld [vmem:[#allocation81_spill] sm:$0xff] }
 0x63a   :  { %v1752_v39 = vadd.s32 %v1751_v42, %v1749_v54  ;;  %v1828_v8 = vpop.xlane.xlu0 %1827  ;;  %11801 = vst [vmem:[#allocation39_spill] sm:$0xff] %v7087_v33  ;;  %vm1921_vm11 = vmand %vm11804_vm1, %vm1889_vm0  ;;  %v2016_v22 = vmin.f32 %v7081_v7, %v7087_v33  ;;  %vm11806_vm6 = vcmp.eq.f32.partialorder %v11805_v49, %v11803_v3  ;;  %v11811_v54 = vld [vmem:[#allocation46_spill] sm:$0xff] }
 0x63b   :  { %v1829_v6 = vcvt.f32.s32 %v1828_v8  ;;  %v1876_v50 = vpop.xlane.xlu1 %1875  ;;  %vm1922_vm7 = vmand %vm11806_vm6, %vm1890_vm3  ;;  %v7098_v60 = vsel %vm1921_vm11, 1e+30, %v11802_v31  ;;  %v4335_v29 = vsel %vm11129_vm13, %v11811_v54, %v11810_v61  ;;  %v11812_v31 = vld [vmem:[#allocation6_spill] sm:$0xff]  ;;  %v11828_v61 = vld [vmem:[#allocation47_spill] sm:$0xff] }
 0x63c   :  { %11807 = vst [vmem:[#allocation38_spill] sm:$0xff] %v7098_v60  ;;  %v7101_v37 = vsel %vm11128_vm14, %v4327_v23, %v1752_v39  ;;  %v1877_v41 = vcvt.f32.s32 %v1876_v50  ;;  %v7104_v42 = vsel %vm1922_vm7, 1e+30, %v11805_v49  ;;  %vm1895_vm4 = vcmp.eq.s32.totalorder %v6576_v62, %v1752_v39  ;;  %2017 = vmin.xlane.f32.xlu1 %v2016_v22  ;;  %v11813_v23 = vld [vmem:[#allocation95_spill] sm:$0xff] }
 0x63d   :  { %11808 = vst [vmem:[#allocation34_spill] sm:$0xff] %v7101_v37  ;;  %11809 = vst [vmem:[#allocation76_spill] sm:$0xff] %v7104_v42  ;;  %v1832_v8 = vadd.s32 %v1831_v25, %v1829_v6  ;;  %v1989_v3 = vmin.f32 %v7098_v60, %v7104_v42  ;;  %vm1896_vm5 = vcmp.eq.s32.totalorder %v6582_v44, %v1752_v39  ;;  %v1735_v50 = vshll.u32 %v1734_v28, 16 }
 0x63e   :  { %vm11814_vm12 = vcmp.eq.f32.partialorder %v11812_v31, %v11813_v23  ;;  %v1862_v49 = vcvt.f32.s32 %v6838_v11  ;;  %v1880_v38 = vadd.s32 %v1879_v30, %v1877_v41  ;;  %v1732_v9 = vpop.xlane.xlu0 %1731  ;;  %vm11816_vm10 = vcmp.eq.f32.partialorder %v11815_v40, %v11813_v23  ;;  %v11821_v30 = vld [vmem:[#allocation5_spill] sm:$0xff]  ;;  %v11822_v41 = vld [vmem:[#allocation96_spill] sm:$0xff]  ;;  %v11834_v23 = vld [vmem:[#allocation83_spill] sm:$0xff] }
 0x63f   :  { %vm1927_vm2 = vmand %vm11814_vm12, %vm1895_vm4  ;;  %v7124_v6 = vsel %vm11128_vm14, %v4332_v4, %v1832_v8  ;;  %v1733_v39 = vcvt.f32.s32 %v1732_v9  ;;  %1990 = vmin.xlane.f32.xlu0 %v1989_v3  ;;  %vm1905_vm15 = vcmp.eq.s32.totalorder %v6576_v62, %v1832_v8  ;;  %vm1906_vm9 = vcmp.eq.s32.totalorder %v6582_v44, %v1832_v8  ;;  %v11824_v4 = vld [vmem:[#allocation51_spill] sm:$0xff]  ;;  %v11827_v3 = vld [vmem:[#allocation49_spill] sm:$0xff] }
 0x640   :  { %vm1928_vm8 = vmand %vm11816_vm10, %vm1896_vm5  ;;  %v7121_v25 = vsel %vm1927_vm2, 1e+30, %v11812_v31  ;;  %11818 = vst [vmem:[#allocation77_spill] sm:$0xff] %v7124_v6  ;;  %v7131_v11 = vsel %vm11128_vm14, %v4335_v29, %v1880_v38  ;;  %vm11823_vm0 = vcmp.eq.f32.partialorder %v11821_v30, %v11822_v41  ;;  %vm1911_vm1 = vcmp.eq.s32.totalorder %v6576_v62, %v1880_v38 }
 0x641   :  { %11817 = vst [vmem:[#allocation40_spill] sm:$0xff] %v7121_v25  ;;  %v7127_v22 = vsel %vm1928_vm8, 1e+30, %v11815_v40  ;;  %11820 = vst [vmem:[#allocation78_spill] sm:$0xff] %v7131_v11  ;;  %v1736_v9 = vadd.s32 %v1735_v50, %v1733_v39  ;;  %vm11825_vm11 = vcmp.eq.f32.partialorder %v11824_v4, %v11822_v41  ;;  %vm1912_vm7 = vcmp.eq.s32.totalorder %v6582_v44, %v1880_v38  ;;  %v11830_v50 = vld [vmem:[#allocation7_spill] sm:$0xff]  ;;  %v11831_v39 = vld [vmem:[#allocation97_spill] sm:$0xff] }
 0x642   :  { %11819 = vst [vmem:[#allocation35_spill] sm:$0xff] %v7127_v22  ;;  %v1998_v28 = vmin.f32 %v7121_v25, %v7127_v22  ;;  %vm1937_vm3 = vmand %vm11823_vm0, %vm1905_vm15  ;;  %v4326_v54 = vsel %vm11129_vm13, %v11828_v61, %v11827_v3  ;;  %v1863_v29 = vshll.u32 %v1862_v49, 16  ;;  %v1860_v8 = vpop.xlane.xlu0 %1859  ;;  %vm11832_vm4 = vcmp.eq.f32.partialorder %v11830_v50, %v11831_v39  ;;  %v11838_v61 = vld [vmem:[#allocation8_spill] sm:$0xff] }
 0x643   :  { %vm1938_vm6 = vmand %vm11825_vm11, %vm1906_vm9  ;;  %v7144_v40 = vsel %vm1937_vm3, 1e+30, %v11821_v30  ;;  %v7157_v41 = vsel %vm11128_vm14, %v4326_v54, %v1736_v9  ;;  %v1861_v30 = vcvt.f32.s32 %v1860_v8  ;;  %vm11835_vm12 = vcmp.eq.f32.partialorder %v11834_v23, %v11831_v39  ;;  %v11839_v54 = vld [vmem:[#allocation98_spill] sm:$0xff]  ;;  %v11841_v8 = vld [vmem:[#allocation52_spill] sm:$0xff] }
 0x644   :  { %11826 = vst [vmem:[#allocation43_spill] sm:$0xff] %v7144_v40  ;;  %1999 = vmin.xlane.f32.xlu1 %v1998_v28  ;;  %v7151_v31 = vsel %vm1938_vm6, 1e+30, %v11824_v4  ;;  %vm1943_vm5 = vmand %vm11832_vm4, %vm1911_vm1  ;;  %vm1893_vm10 = vcmp.eq.s32.totalorder %v6576_v62, %v1736_v9  ;;  %vm1894_vm8 = vcmp.eq.s32.totalorder %v6582_v44, %v1736_v9  ;;  %vm11840_vm15 = vcmp.eq.f32.partialorder %v11838_v61, %v11839_v54  ;;  %v11842_v39 = vld [vmem:[#allocation50_spill] sm:$0xff] }
 0x645   :  { %11829 = vst [vmem:[#allocation36_spill] sm:$0xff] %v7151_v31  ;;  %11833 = vst [vmem:[#allocation79_spill] sm:$0xff] %v7157_v41  ;;  %v2013_v38 = vmin.f32 %v7144_v40, %v7151_v31  ;;  %v7165_v49 = vsel %vm1943_vm5, 1e+30, %v11830_v50  ;;  %v1864_v4 = vadd.s32 %v1863_v29, %v1861_v30  ;;  %v4334_v50 = vsel %vm11129_vm13, %v11842_v39, %v11841_v8  ;;  %v11848_v30 = vld [vmem:[#allocation9_spill] sm:$0xff] }
 0x646   :  { %vm1944_vm2 = vmand %vm11835_vm12, %vm1912_vm7  ;;  %11836 = vst [vmem:[#allocation41_spill] sm:$0xff] %v7165_v49  ;;  %vm11844_vm0 = vcmp.eq.f32.partialorder %v11843_v35, %v11839_v54 }
 0x647   :  { %v7168_v28 = vsel %vm1944_vm2, 1e+30, %v11834_v23  ;;  %2014 = vmin.xlane.f32.xlu0 %v2013_v38  ;;  %vm1925_vm9 = vmand %vm11840_vm15, %vm1893_vm10  ;;  %v7187_v9 = vsel %vm11128_vm14, %v4334_v50, %v1864_v4  ;;  %vm1909_vm1 = vcmp.eq.s32.totalorder %v6576_v62, %v1864_v4  ;;  %vm1910_vm11 = vcmp.eq.s32.totalorder %v6582_v44, %v1864_v4  ;;  %v11849_v38 = vld [vmem:[#allocation99_spill] sm:$0xff] }
 0x648   :  { %11837 = vst [vmem:[#allocation45_spill] sm:$0xff] %v7168_v28  ;;  %v2022_v3 = vmin.f32 %v7165_v49, %v7168_v28  ;;  %vm1926_vm3 = vmand %vm11844_vm0, %vm1894_vm8  ;;  %v7184_v23 = vsel %vm1925_vm9, 1e+30, %v11838_v61  ;;  %vm11850_vm6 = vcmp.eq.f32.partialorder %v11848_v30, %v11849_v38  ;;  %v11851_v61 = vld [vmem:[#allocation54_spill] sm:$0xff] }
 0x649   :  { %11845 = vst [vmem:[#allocation42_spill] sm:$0xff] %v7184_v23  ;;  %11846 = vst [vmem:[#allocation44_spill] sm:$0xff] %v7187_v9  ;;  %v7190_v29 = vsel %vm1926_vm3, 1e+30, %v11843_v35  ;;  %vm11852_vm4 = vcmp.eq.f32.partialorder %v11851_v61, %v11849_v38 }
 0x64a   :  { %2023 = vmin.xlane.f32.xlu1 %v2022_v3  ;;  %11847 = vst [vmem:[#allocation80_spill] sm:$0xff] %v7190_v29  ;;  %v1995_v39 = vmin.f32 %v7184_v23, %v7190_v29  ;;  %vm1941_vm7 = vmand %vm11850_vm6, %vm1909_vm1 }
 0x64b   :  { %vm1942_vm5 = vmand %vm11852_vm4, %vm1910_vm11  ;;  %v7203_v3 = vsel %vm1941_vm7, 1e+30, %v11848_v30 }
 0x64c   :  { %11853 = vst [vmem:[#allocation4_spill] sm:$0xff] %v7203_v3  ;;  %1996 = vmin.xlane.f32.xlu0 %v1995_v39  ;;  %v7206_v35 = vsel %vm1942_vm5, 1e+30, %v11851_v61 }
 0x64d   :  { %11854 = vst [vmem:[#allocation81_spill] sm:$0xff] %v7206_v35  ;;  %v2019_v4 = vmin.f32 %v7203_v3, %v7206_v35 }
 0x650   :  { %2020 = vmin.xlane.f32.xlu0 %v2019_v4 }
 0x6a8   :  { %v7210_v8 = vpop.xlane.xlu1 %1981 }
 0x6a9   :  { %11855 = vst [vmem:[#allocation48_spill] sm:$0xff] %v7210_v8  ;;  %vm2027_vm12 = vcmp.eq.f32.partialorder %v6860_v36, %v7210_v8  ;;  %vm2028_vm2 = vcmp.eq.f32.partialorder %v6863_v27, %v7210_v8 }
 0x6aa   :  { %v2059_v50 = vsel %vm2027_vm12, %v6576_v62, 2147483647  ;;  %v2060_v39 = vsel %vm2028_vm2, %v6582_v44, 2147483647 }
 0x6ab   :  { %vm2105_vm10 = vcmp.lt.s32.totalorder %v2059_v50, %v2060_v39 }
 0x6ac   :  { %v7224_v30 = vsel %vm2105_vm10, %v2059_v50, %v2060_v39  ;;  %v7226_v61 = vpop.xlane.xlu1 %2005 }
 0x6ad   :  { %11856 = vst [vmem:[#allocation46_spill] sm:$0xff] %v7226_v61  ;;  %v2108_v4 = vshra.s32 %v7224_v30, 16  ;;  %vm2043_vm8 = vcmp.eq.f32.partialorder %v6888_v32, %v7226_v61  ;;  %vm2044_vm15 = vcmp.eq.f32.partialorder %v6894_v46, %v7226_v61 }
 0x6ae   :  { %v2075_v38 = vsel %vm2043_vm8, %v6576_v62, 2147483647  ;;  %v2076_v50 = vsel %vm2044_vm15, %v6582_v44, 2147483647 }
 0x6af   :  { %v7241_v39 = vcvt.s32.f32 %v2108_v4  ;;  %v7243_v54 = vpop.xlane.xlu0 %1978  ;;  %vm2233_vm9 = vcmp.lt.s32.totalorder %v2075_v38, %v2076_v50 }
 0x6b0   :  { %11857 = vst [vmem:[#allocation6_spill] sm:$0xff] %v7243_v54  ;;  %vm2025_vm0 = vcmp.eq.f32.partialorder %v6908_v15, %v7243_v54  ;;  %vm2026_vm3 = vcmp.eq.f32.partialorder %v6911_v58, %v7243_v54  ;;  %v7250_v52 = vsel %vm2233_vm9, %v2075_v38, %v2076_v50 }
 0x6b1   :  { %2111 = vmin.xlane.f32.xlu1 %v7241_v39  ;;  %v2057_v16 = vsel %vm2025_vm0, %v6576_v62, 2147483647  ;;  %v2058_v4 = vsel %vm2026_vm3, %v6582_v44, 2147483647  ;;  %v2236_v53 = vshra.s32 %v7250_v52, 16 }
 0x6b2   :  { %vm2089_vm1 = vcmp.lt.s32.totalorder %v2057_v16, %v2058_v4 }
 0x6b3   :  { %v7261_v12 = vcvt.s32.f32 %v2236_v53  ;;  %v7263_v26 = vsel %vm2089_vm1, %v2057_v16, %v2058_v4  ;;  %v7265_v51 = vpop.xlane.xlu1 %1987 }
 0x6b4   :  { %11858 = vst [vmem:[#allocation82_spill] sm:$0xff] %v7265_v51  ;;  %v2092_v38 = vshra.s32 %v7263_v26, 16  ;;  %vm2031_vm11 = vcmp.eq.f32.partialorder %v6940_v59, %v7265_v51  ;;  %vm2032_vm6 = vcmp.eq.f32.partialorder %v6945_v57, %v7265_v51 }
 0x6b5   :  { %2239 = vmin.xlane.f32.xlu1 %v7261_v12  ;;  %v2063_v53 = vsel %vm2031_vm11, %v6576_v62, 2147483647  ;;  %v2064_v16 = vsel %vm2032_vm6, %v6582_v44, 2147483647  ;;  %v7281_v50 = vpop.xlane.xlu0 %2002 }
 0x6b6   :  { %11859 = vst [vmem:[#allocation5_spill] sm:$0xff] %v7281_v50  ;;  %v7283_v4 = vcvt.s32.f32 %v2092_v38  ;;  %vm2041_vm7 = vcmp.eq.f32.partialorder %v6960_v10, %v7281_v50  ;;  %vm2042_vm4 = vcmp.eq.f32.partialorder %v6963_v20, %v7281_v50  ;;  %vm2137_vm5 = vcmp.lt.s32.totalorder %v2063_v53, %v2064_v16 }
 0x6b7   :  { %v2073_v9 = vsel %vm2041_vm7, %v6576_v62, 2147483647  ;;  %v2074_v41 = vsel %vm2042_vm4, %v6582_v44, 2147483647  ;;  %v7298_v38 = vsel %vm2137_vm5, %v2063_v53, %v2064_v16 }
 0x6b8   :  { %2095 = vmin.xlane.f32.xlu0 %v7283_v4  ;;  %v7300_v11 = vpop.xlane.xlu1 %2011  ;;  %v2140_v6 = vshra.s32 %v7298_v38, 16  ;;  %vm2217_vm10 = vcmp.lt.s32.totalorder %v2073_v9, %v2074_v41 }
 0x6b9   :  { %11860 = vst [vmem:[#allocation51_spill] sm:$0xff] %v7300_v11  ;;  %vm11139_vm9 = vcmp.eq.f32.partialorder %v6982_v56, %v7300_v11  ;;  %vm11130_vm1 = vcmp.eq.f32.partialorder %v6988_v14, %v7300_v11  ;;  %v7307_v37 = vsel %vm2217_vm10, %v2073_v9, %v2074_v41 }
 0x6ba   :  { %v2079_v24 = vsel %vm11139_vm9, %v6576_v62, 2147483647  ;;  %v2080_v53 = vsel %vm11130_vm1, %v6582_v44, 2147483647  ;;  %v7317_v16 = vcvt.s32.f32 %v2140_v6  ;;  %v2220_v5 = vshra.s32 %v7307_v37, 16  ;;  %v7320_v18 = vpop.xlane.xlu0 %1984 }
 0x6bb   :  { %11861 = vst [vmem:[#allocation49_spill] sm:$0xff] %v7320_v18  ;;  %vm2265_vm5 = vcmp.lt.s32.totalorder %v2079_v24, %v2080_v53  ;;  %vm11138_vm10 = vcmp.eq.f32.partialorder %v7006_v48, %v7320_v18  ;;  %vm11137_vm14 = vcmp.eq.f32.partialorder %v7010_v21, %v7320_v18 }
 0x6bc   :  { %2143 = vmin.xlane.f32.xlu1 %v7317_v16  ;;  %v7327_v41 = vcvt.s32.f32 %v2220_v5  ;;  %v2061_v6 = vsel %vm11138_vm10, %v6576_v62, 2147483647  ;;  %v2062_v9 = vsel %vm11137_vm14, %v6582_v44, 2147483647  ;;  %v7339_v1 = vsel %vm2265_vm5, %v2079_v24, %v2080_v53 }
 0x6bd   :  { %v7337_v0 = vpop.xlane.xlu1 %1993  ;;  %v2268_v5 = vshra.s32 %v7339_v1, 16  ;;  %vm2121_vm5 = vcmp.lt.s32.totalorder %v2061_v6, %v2062_v9 }
 0x6be   :  { %11862 = vst [vmem:[#allocation47_spill] sm:$0xff] %v7337_v0  ;;  %vm11187_vm13 = vcmp.eq.f32.partialorder %v7025_v34, %v7337_v0  ;;  %vm11162_vm1 = vcmp.eq.f32.partialorder %v7031_v43, %v7337_v0  ;;  %2223 = vmin.xlane.f32.xlu0 %v7327_v41  ;;  %v7359_v48 = vsel %vm2121_vm5, %v2061_v6, %v2062_v9 }
 0x6bf   :  { %v2067_v21 = vsel %vm11187_vm13, %v6576_v62, 2147483647  ;;  %v2068_v24 = vsel %vm11162_vm1, %v6582_v44, 2147483647  ;;  %v7357_v18 = vcvt.s32.f32 %v2268_v5  ;;  %v2124_v34 = vshra.s32 %v7359_v48, 16 }
 0x6c0   :  { %vm2169_vm14 = vcmp.lt.s32.totalorder %v2067_v21, %v2068_v24 }
 0x6c1   :  { %2271 = vmin.xlane.f32.xlu1 %v7357_v18  ;;  %v7375_v9 = vsel %vm2169_vm14, %v2067_v21, %v2068_v24  ;;  %v7377_v5 = vcvt.s32.f32 %v2124_v34  ;;  %v7398_v34 = vld [vmem:[#allocation3 + $0x18] sm:$0xff] }
 0x6c2   :  { %v2172_v0 = vshra.s32 %v7375_v9, 16 }
 0x6c3   :  { %2127 = vmin.xlane.f32.xlu0 %v7377_v5 }
 0x6c4   :  { %v7355_v53 = vpop.xlane.xlu0 %2008 }
 0x6c5   :  { %11863 = vst [vmem:[#allocation7_spill] sm:$0xff] %v7355_v53  ;;  %vm11153_vm10 = vcmp.eq.f32.partialorder %v7048_v55, %v7355_v53  ;;  %vm11152_vm9 = vcmp.eq.f32.partialorder %v7051_v2, %v7355_v53 }
 0x6c6   :  { %v2077_v43 = vsel %vm11153_vm10, %v6576_v62, 2147483647  ;;  %v2078_v6 = vsel %vm11152_vm9, %v6582_v44, 2147483647  ;;  %v7385_v62 = vcvt.s32.f32 %v2172_v0  ;;  %v7392_v44 = vld [vmem:[#allocation3 + $0x10] sm:$0xff] }
 0x6c7   :  { %vm2249_vm5 = vcmp.lt.s32.totalorder %v2077_v43, %v2078_v6 }
 0x6c8   :  { %v7380_v14 = vsel %vm2249_vm5, %v2077_v43, %v2078_v6  ;;  %2175 = vmin.xlane.f32.xlu1 %v7385_v62 }
 0x6c9   :  { %v7382_v11 = vpop.xlane.xlu1 %2017  ;;  %v2252_v2 = vshra.s32 %v7380_v14, 16 }
 0x6ca   :  { %11864 = vst [vmem:[#allocation83_spill] sm:$0xff] %v7382_v11  ;;  %vm11154_vm9 = vcmp.eq.f32.partialorder %v7081_v7, %v7382_v11  ;;  %vm11161_vm14 = vcmp.eq.f32.partialorder %v7087_v33, %v7382_v11 }
 0x6cb   :  { %v2083_v21 = vsel %vm11154_vm9, %v7392_v44, 2147483647  ;;  %v2084_v0 = vsel %vm11161_vm14, %v7398_v34, 2147483647  ;;  %v7407_v24 = vcvt.s32.f32 %v2252_v2 }
 0x6cc   :  { %v7404_v43 = vpop.xlane.xlu0 %1990  ;;  %vm2297_vm9 = vcmp.lt.s32.totalorder %v2083_v21, %v2084_v0 }
 0x6cd   :  { %11865 = vst [vmem:[#allocation8_spill] sm:$0xff] %v7404_v43  ;;  %vm11163_vm5 = vcmp.eq.f32.partialorder %v7098_v60, %v7404_v43  ;;  %vm11172_vm10 = vcmp.eq.f32.partialorder %v7104_v42, %v7404_v43  ;;  %2255 = vmin.xlane.f32.xlu0 %v7407_v24  ;;  %v7422_v2 = vsel %vm2297_vm9, %v2083_v21, %v2084_v0 }
 0x6ce   :  { %v2065_v6 = vsel %vm11163_vm5, %v7392_v44, 2147483647  ;;  %v2066_v33 = vsel %vm11172_vm10, %v7398_v34, 2147483647  ;;  %v2300_v7 = vshra.s32 %v7422_v2, 16 }
 0x6cf   :  { %vm2153_vm14 = vcmp.lt.s32.totalorder %v2065_v6, %v2066_v33 }
 0x6d0   :  { %v7431_v60 = vsel %vm2153_vm14, %v2065_v6, %v2066_v33  ;;  %v7441_v0 = vcvt.s32.f32 %v2300_v7 }
 0x6d1   :  { %v7424_v11 = vpop.xlane.xlu1 %1999  ;;  %v2156_v43 = vshra.s32 %v7431_v60, 16 }
 0x6d2   :  { %11866 = vst [vmem:[#allocation52_spill] sm:$0xff] %v7424_v11  ;;  %vm11178_vm1 = vcmp.eq.f32.partialorder %v7121_v25, %v7424_v11  ;;  %vm11177_vm5 = vcmp.eq.f32.partialorder %v7127_v22, %v7424_v11  ;;  %2303 = vmin.xlane.f32.xlu1 %v7441_v0 }
 0x6d3   :  { %v2071_v42 = vsel %vm11178_vm1, %v7392_v44, 2147483647  ;;  %v2072_v21 = vsel %vm11177_vm5, %v7398_v34, 2147483647  ;;  %v7451_v33 = vcvt.s32.f32 %v2156_v43 }
 0x6d4   :  { %v7444_v53 = vpop.xlane.xlu0 %2014  ;;  %vm2201_vm9 = vcmp.lt.s32.totalorder %v2071_v42, %v2072_v21 }
 0x6d5   :  { %11867 = vst [vmem:[#allocation50_spill] sm:$0xff] %v7444_v53  ;;  %vm11186_vm14 = vcmp.eq.f32.partialorder %v7144_v40, %v7444_v53  ;;  %vm11185_vm10 = vcmp.eq.f32.partialorder %v7151_v31, %v7444_v53  ;;  %v7463_v11 = vsel %vm2201_vm9, %v2071_v42, %v2072_v21  ;;  %2159 = vmin.xlane.f32.xlu0 %v7451_v33 }
 0x6d6   :  { %v2081_v7 = vsel %vm11186_vm14, %v7392_v44, 2147483647  ;;  %v2082_v6 = vsel %vm11185_vm10, %v7398_v34, 2147483647  ;;  %v2204_v43 = vshra.s32 %v7463_v11, 16 }
 0x6d7   :  { %v7461_v22 = vpop.xlane.xlu1 %2023  ;;  %vm2281_vm9 = vcmp.lt.s32.totalorder %v2081_v7, %v2082_v6 }
 0x6d8   :  { %11868 = vst [vmem:[#allocation53_spill] sm:$0xff] %v7461_v22  ;;  %vm2055_vm5 = vcmp.eq.f32.partialorder %v7165_v49, %v7461_v22  ;;  %vm11199_vm1 = vcmp.eq.f32.partialorder %v7168_v28, %v7461_v22  ;;  %v7481_v53 = vcvt.s32.f32 %v2204_v43  ;;  %v7483_v40 = vsel %vm2281_vm9, %v2081_v7, %v2082_v6 }
 0x6d9   :  { %v2087_v31 = vsel %vm2055_vm5, %v7392_v44, 2147483647  ;;  %v2088_v42 = vsel %vm11199_vm1, %v7398_v34, 2147483647  ;;  %v7479_v21 = vpop.xlane.xlu0 %1996  ;;  %v2284_v49 = vshra.s32 %v7483_v40, 16 }
 0x6da   :  { %11869 = vst [vmem:[#allocation9_spill] sm:$0xff] %v7479_v21  ;;  %vm2329_vm10 = vcmp.lt.s32.totalorder %v2087_v31, %v2088_v42  ;;  %vm11198_vm14 = vcmp.eq.f32.partialorder %v7184_v23, %v7479_v21  ;;  %vm11216_vm13 = vcmp.eq.f32.partialorder %v7190_v29, %v7479_v21  ;;  %2207 = vmin.xlane.f32.xlu1 %v7481_v53 }
 0x6db   :  { %v2069_v28 = vsel %vm11198_vm14, %v7392_v44, 2147483647  ;;  %v2070_v7 = vsel %vm11216_vm13, %v7398_v34, 2147483647  ;;  %v7499_v6 = vsel %vm2329_vm10, %v2087_v31, %v2088_v42  ;;  %v7501_v43 = vcvt.s32.f32 %v2284_v49 }
 0x6dc   :  { %v2332_v22 = vshra.s32 %v7499_v6, 16  ;;  %vm2185_vm9 = vcmp.lt.s32.totalorder %v2069_v28, %v2070_v7 }
 0x6dd   :  { %v7504_v25 = vpop.xlane.xlu0 %2020  ;;  %v7506_v55 = vsel %vm2185_vm9, %v2069_v28, %v2070_v7  ;;  %2287 = vmin.xlane.f32.xlu0 %v7501_v43 }
 0x6de   :  { %11870 = vst [vmem:[#allocation54_spill] sm:$0xff] %v7504_v25  ;;  %vm11215_vm14 = vcmp.eq.f32.partialorder %v7203_v3, %v7504_v25  ;;  %vm11214_vm1 = vcmp.eq.f32.partialorder %v7206_v35, %v7504_v25  ;;  %v7513_v29 = vcvt.s32.f32 %v2332_v22  ;;  %v2188_v28 = vshra.s32 %v7506_v55, 16 }
 0x6df   :  { %v2085_v31 = vsel %vm11215_vm14, %v7392_v44, 2147483647  ;;  %v2086_v49 = vsel %vm11214_vm1, %v7398_v34, 2147483647  ;;  %v2107_v35 = vand.u32 65535, %v7224_v30 }
 0x6e0   :  { %2335 = vmin.xlane.f32.xlu1 %v7513_v29  ;;  %vm2313_vm10 = vcmp.lt.s32.totalorder %v2085_v31, %v2086_v49  ;;  %v7525_v42 = vcvt.s32.f32 %v2188_v28  ;;  %v2235_v28 = vand.u32 65535, %v7250_v52  ;;  %v2139_v52 = vand.u32 65535, %v7298_v38 }
 0x6e1   :  { %v7527_v7 = vsel %vm2313_vm10, %v2085_v31, %v2086_v49  ;;  %v2109_v21 = vcvt.s32.f32 %v2107_v35  ;;  %v2091_v49 = vand.u32 65535, %v7263_v26  ;;  %v2219_v26 = vand.u32 65535, %v7307_v37 }
 0x6e2   :  { %v2316_v22 = vshra.s32 %v7527_v7, 16  ;;  %2191 = vmin.xlane.f32.xlu0 %v7525_v42  ;;  %v2123_v37 = vand.u32 65535, %v7359_v48 }
 0x6e3   :  { %v2093_v35 = vcvt.s32.f32 %v2091_v49  ;;  %v2267_v49 = vand.u32 65535, %v7339_v1 }
 0x6e4   :  { %v7531_v3 = vcvt.s32.f32 %v2316_v22  ;;  %v2237_v22 = vcvt.s32.f32 %v2235_v28  ;;  %v2141_v28 = vcvt.s32.f32 %v2139_v52  ;;  %v2125_v1 = vcvt.s32.f32 %v2123_v37 }
 0x6e6   :  { %2319 = vmin.xlane.f32.xlu0 %v7531_v3 }
 0x73e   :  { %v7535_v25 = vpop.xlane.xlu1 %2111 }
 0x73f   :  { %vm2113_vm9 = vcmp.eq.f32.partialorder %v7241_v39, %v7535_v25 }
 0x740   :  { %v2114_v31 = vsel %vm2113_vm9, %v2109_v21, inf }
 0x741   :  { %2115 = vmin.xlane.f32.xlu1 %v2114_v31 }
 0x742   :  { %v7541_v23 = vpop.xlane.xlu1 %2239 }
 0x743   :  { %vm2241_vm10 = vcmp.eq.f32.partialorder %v7261_v12, %v7541_v23 }
 0x744   :  { %v2242_v56 = vsel %vm2241_vm10, %v2237_v22, inf  ;;  %v2269_v22 = vcvt.s32.f32 %v2267_v49 }
 0x745   :  { %v7545_v30 = vpop.xlane.xlu0 %2095  ;;  %2243 = vmin.xlane.f32.xlu1 %v2242_v56  ;;  %v2221_v56 = vcvt.s32.f32 %v2219_v26 }
 0x746   :  { %vm2097_vm1 = vcmp.eq.f32.partialorder %v7283_v4, %v7545_v30 }
 0x747   :  { %v2098_v39 = vsel %vm2097_vm1, %v2093_v35, inf }
 0x748   :  { %2099 = vmin.xlane.f32.xlu0 %v2098_v39  ;;  %v2251_v39 = vand.u32 65535, %v7380_v14  ;;  %v2299_v14 = vand.u32 65535, %v7422_v2 }
 0x749   :  { %v7551_v21 = vpop.xlane.xlu1 %2143 }
 0x74a   :  { %vm2145_vm9 = vcmp.eq.f32.partialorder %v7317_v16, %v7551_v21  ;;  %v2171_v16 = vand.u32 65535, %v7375_v9  ;;  %v2301_v49 = vcvt.s32.f32 %v2299_v14 }
 0x74b   :  { %v7555_v12 = vpop.xlane.xlu0 %2223  ;;  %v2146_v31 = vsel %vm2145_vm9, %v2141_v28, inf  ;;  %v2253_v28 = vcvt.s32.f32 %v2251_v39 }
 0x74c   :  { %2147 = vmin.xlane.f32.xlu1 %v2146_v31  ;;  %vm2225_vm10 = vcmp.eq.f32.partialorder %v7327_v41, %v7555_v12  ;;  %v2173_v26 = vcvt.s32.f32 %v2171_v16 }
 0x74d   :  { %v2226_v4 = vsel %vm2225_vm10, %v2221_v56, inf }
 0x74e   :  { %2227 = vmin.xlane.f32.xlu0 %v2226_v4  ;;  %v7561_v38 = vpop.xlane.xlu1 %2271 }
 0x74f   :  { %vm2273_vm1 = vcmp.eq.f32.partialorder %v7357_v18, %v7561_v38 }
 0x750   :  { %v2274_v35 = vsel %vm2273_vm1, %v2269_v22, inf  ;;  %v7566_v52 = vpop.xlane.xlu0 %2127  ;;  %v2203_v22 = vand.u32 65535, %v7463_v11 }
 0x751   :  { %2275 = vmin.xlane.f32.xlu1 %v2274_v35  ;;  %vm2129_vm9 = vcmp.eq.f32.partialorder %v7377_v5, %v7566_v52  ;;  %v2155_v5 = vand.u32 65535, %v7431_v60  ;;  %v2283_v60 = vand.u32 65535, %v7483_v40 }
 0x752   :  { %v2130_v41 = vsel %vm2129_vm9, %v2125_v1, inf  ;;  %v2205_v16 = vcvt.s32.f32 %v2203_v22 }
 0x753   :  { %2131 = vmin.xlane.f32.xlu0 %v2130_v41  ;;  %v2157_v37 = vcvt.s32.f32 %v2155_v5  ;;  %v2285_v11 = vcvt.s32.f32 %v2283_v60 }
 0x755   :  { %v7571_v48 = vpop.xlane.xlu1 %2175 }
 0x756   :  { %vm2177_vm10 = vcmp.eq.f32.partialorder %v7385_v62, %v7571_v48 }
 0x757   :  { %v2178_v9 = vsel %vm2177_vm10, %v2173_v26, inf }
 0x758   :  { %2179 = vmin.xlane.f32.xlu1 %v2178_v9  ;;  %v2315_v9 = vand.u32 65535, %v7527_v7  ;;  %v2246_v7 = vcvt.f32.s32 %v7541_v23 }
 0x75a   :  { %v7575_v18 = vpop.xlane.xlu0 %2255 }
 0x75b   :  { %vm2257_vm1 = vcmp.eq.f32.partialorder %v7407_v24, %v7575_v18 }
 0x75c   :  { %v2258_v31 = vsel %vm2257_vm1, %v2253_v28, inf  ;;  %v2317_v28 = vcvt.s32.f32 %v2315_v9 }
 0x75d   :  { %2259 = vmin.xlane.f32.xlu0 %v2258_v31 }
 0x75f   :  { %v7581_v56 = vpop.xlane.xlu1 %2303 }
 0x760   :  { %vm2305_vm9 = vcmp.eq.f32.partialorder %v7441_v0, %v7581_v56  ;;  %v2331_v0 = vand.u32 65535, %v7499_v6 }
 0x761   :  { %v2306_v4 = vsel %vm2305_vm9, %v2301_v49, inf }
 0x762   :  { %v7585_v62 = vpop.xlane.xlu0 %2159  ;;  %2307 = vmin.xlane.f32.xlu1 %v2306_v4  ;;  %v2333_v41 = vcvt.s32.f32 %v2331_v0 }
 0x763   :  { %vm2161_vm10 = vcmp.eq.f32.partialorder %v7451_v33, %v7585_v62  ;;  %v2187_v33 = vand.u32 65535, %v7506_v55 }
 0x764   :  { %v2162_v24 = vsel %vm2161_vm10, %v2157_v37, inf }
 0x765   :  { %2163 = vmin.xlane.f32.xlu0 %v2162_v24  ;;  %v2189_v26 = vcvt.s32.f32 %v2187_v33 }
 0x767   :  { %v7591_v2 = vpop.xlane.xlu1 %2207 }
 0x768   :  { %vm2209_vm1 = vcmp.eq.f32.partialorder %v7481_v53, %v7591_v2 }
 0x769   :  { %v2210_v35 = vsel %vm2209_vm1, %v2205_v16, inf }
 0x76a   :  { %v7596_v1 = vpop.xlane.xlu0 %2287  ;;  %2211 = vmin.xlane.f32.xlu1 %v2210_v35  ;;  %v2150_v35 = vcvt.f32.s32 %v7551_v21 }
 0x76b   :  { %vm2289_vm9 = vcmp.eq.f32.partialorder %v7501_v43, %v7596_v1 }
 0x76c   :  { %v2290_v39 = vsel %vm2289_vm9, %v2285_v11, inf }
 0x76d   :  { %v7601_v40 = vpop.xlane.xlu1 %2335  ;;  %2291 = vmin.xlane.f32.xlu0 %v2290_v39 }
 0x76e   :  { %vm2337_vm10 = vcmp.eq.f32.partialorder %v7513_v29, %v7601_v40  ;;  %v2118_v29 = vcvt.f32.s32 %v7535_v25 }
 0x76f   :  { %v2338_v53 = vsel %vm2337_vm10, %v2333_v41, inf  ;;  %v7605_v6 = vpop.xlane.xlu0 %2191  ;;  %vm11233_vm10 = vcmask 23552  }
 0x770   :  { %2339 = vmin.xlane.f32.xlu1 %v2338_v53  ;;  %vm2193_vm1 = vcmp.eq.f32.partialorder %v7525_v42, %v7605_v6  ;;  %v2119_v5 = vshll.u32 %v2118_v29, 16  ;;  %v2102_v42 = vcvt.f32.s32 %v7545_v30 }
 0x771   :  { %v2194_v43 = vsel %vm2193_vm1, %v2189_v26, inf }
 0x772   :  { %2195 = vmin.xlane.f32.xlu0 %v2194_v43  ;;  %v2103_v60 = vshll.u32 %v2102_v42, 16 }
 0x773   :  { %v7610_v55 = vpop.xlane.xlu0 %2319 }
 0x774   :  { %vm2321_vm9 = vcmp.eq.f32.partialorder %v7531_v3, %v7610_v55  ;;  %v2247_v3 = vshll.u32 %v2246_v7, 16 }
 0x775   :  { %v2322_v14 = vsel %vm2321_vm9, %v2317_v28, inf }
 0x776   :  { %2323 = vmin.xlane.f32.xlu0 %v2322_v14 }
 0x7ce   :  { %v2116_v31 = vpop.xlane.xlu1 %2115 }
 0x7cf   :  { %v2117_v49 = vcvt.f32.s32 %v2116_v31  ;;  %v2134_v31 = vcvt.f32.s32 %v7566_v52  ;;  %v2182_v52 = vcvt.f32.s32 %v7571_v48 }
 0x7d1   :  { %v2120_v4 = vadd.s32 %v2119_v5, %v2117_v49  ;;  %v2135_v48 = vshll.u32 %v2134_v31, 16  ;;  %v11888_v31 = vld [vmem:[#allocation32_spill] sm:$0xff] }
 0x7d2   :  { %v2244_v22 = vpop.xlane.xlu1 %2243 }
 0x7d3   :  { %v7619_v37 = vsel %vm11233_vm10, %v6849_v63, %v2120_v4  ;;  %vm2347_vm1 = vcmp.eq.s32.totalorder %v7392_v44, %v2120_v4  ;;  %vm2348_vm9 = vcmp.eq.s32.totalorder %v7398_v34, %v2120_v4  ;;  %v2245_v25 = vcvt.f32.s32 %v2244_v22 }
 0x7d4   :  { %vm2379_vm14 = vmand %vm2027_vm12, %vm2347_vm1 }
 0x7d5   :  { %vm2380_vm13 = vmand %vm2028_vm2, %vm2348_vm9  ;;  %v7630_v23 = vsel %vm2379_vm14, 1e+30, %v6860_v36  ;;  %v2248_v63 = vadd.s32 %v2247_v3, %v2245_v25  ;;  %v2100_v30 = vpop.xlane.xlu0 %2099 }
 0x7d6   :  { %v7633_v24 = vsel %vm2380_vm13, 1e+30, %v6863_v27  ;;  %v2101_v16 = vcvt.f32.s32 %v2100_v30  ;;  %v2230_v27 = vcvt.f32.s32 %v7555_v12  ;;  %v2151_v12 = vshll.u32 %v2150_v35, 16 }
 0x7d7   :  { %v2444_v0 = vmin.f32 %v7630_v23, %v7633_v24  ;;  %v7640_v11 = vsel %vm11233_vm10, %v6872_v45, %v2248_v63  ;;  %vm2363_vm12 = vcmp.eq.s32.totalorder %v7392_v44, %v2248_v63  ;;  %vm2364_vm2 = vcmp.eq.s32.totalorder %v7398_v34, %v2248_v63 }
 0x7d8   :  { %v2104_v36 = vadd.s32 %v2103_v60, %v2101_v16  ;;  %vm2395_vm13 = vmand %vm2043_vm8, %vm2363_vm12  ;;  %v2231_v26 = vshll.u32 %v2230_v27, 16  ;;  %v11871_v16 = vld [vmem:[#allocation26_spill] sm:$0xff] }
 0x7d9   :  { %2445 = vmin.xlane.f32.xlu1 %v2444_v0  ;;  %vm2396_vm14 = vmand %vm2044_vm15, %vm2364_vm2  ;;  %v7652_v21 = vsel %vm2395_vm13, 1e+30, %v6888_v32  ;;  %v2148_v33 = vpop.xlane.xlu1 %2147  ;;  %v2278_v32 = vcvt.f32.s32 %v7561_v38  ;;  %v11872_v0 = vld [vmem:[#allocation51_spill] sm:$0xff] }
 0x7da   :  { %v7656_v45 = vsel %vm11233_vm10, %v6891_v13, %v2104_v36  ;;  %v7659_v39 = vsel %vm2396_vm14, 1e+30, %v6894_v46  ;;  %vm2345_vm1 = vcmp.eq.s32.totalorder %v7392_v44, %v2104_v36  ;;  %vm2346_vm8 = vcmp.eq.s32.totalorder %v7398_v34, %v2104_v36  ;;  %v11874_v36 = vld [vmem:[#allocation28_spill] sm:$0xff] }
 0x7db   :  { %v2149_v41 = vcvt.f32.s32 %v2148_v33  ;;  %v2468_v53 = vmin.f32 %v7652_v21, %v7659_v39  ;;  %vm2377_vm15 = vmand %vm2025_vm0, %vm2345_vm1  ;;  %v2228_v13 = vpop.xlane.xlu0 %2227  ;;  %vm11873_vm1 = vcmp.eq.f32.partialorder %v11871_v16, %v11872_v0  ;;  %v11877_v33 = vld [vmem:[#allocation27_spill] sm:$0xff] }
 0x7dc   :  { %vm2378_vm9 = vmand %vm2026_vm3, %vm2346_vm8  ;;  %v7673_v46 = vsel %vm2377_vm15, 1e+30, %v6908_v15  ;;  %v2229_v43 = vcvt.f32.s32 %v2228_v13  ;;  %v2279_v15 = vshll.u32 %v2278_v32, 16  ;;  %vm11875_vm15 = vcmp.eq.f32.partialorder %v11874_v36, %v11872_v0 }
 0x7dd   :  { %v2152_v9 = vadd.s32 %v2151_v12, %v2149_v41  ;;  %2469 = vmin.xlane.f32.xlu1 %v2468_v53  ;;  %v7676_v28 = vsel %vm2378_vm9, 1e+30, %v6911_v58 }
 0x7de   :  { %v2441_v14 = vmin.f32 %v7673_v46, %v7676_v28  ;;  %v2232_v29 = vadd.s32 %v2231_v26, %v2229_v43  ;;  %v2276_v5 = vpop.xlane.xlu1 %2275  ;;  %v11880_v26 = vld [vmem:[#allocation29_spill] sm:$0xff] }
 0x7df   :  { %v7682_v38 = vsel %vm11233_vm10, %v6920_v19, %v2152_v9  ;;  %vm2351_vm0 = vcmp.eq.s32.totalorder %v7392_v44, %v2152_v9  ;;  %vm2352_vm3 = vcmp.eq.s32.totalorder %v7398_v34, %v2152_v9  ;;  %v2277_v19 = vcvt.f32.s32 %v2276_v5 }
 0x7e0   :  { %2442 = vmin.xlane.f32.xlu0 %v2441_v14  ;;  %vm2383_vm12 = vmand %vm2031_vm11, %vm2351_vm0  ;;  %v7692_v58 = vsel %vm11233_vm10, %v6934_v47, %v2232_v29  ;;  %vm2361_vm13 = vcmp.eq.s32.totalorder %v7392_v44, %v2232_v29  ;;  %vm2362_vm11 = vcmp.eq.s32.totalorder %v7398_v34, %v2232_v29  ;;  %v2262_v47 = vcvt.f32.s32 %v7575_v18  ;;  %v2132_v42 = vpop.xlane.xlu0 %2131  ;;  %v11882_v14 = vld [vmem:[#allocation30_spill] sm:$0xff]  ;;  %v11883_v29 = vld [vmem:[#allocation49_spill] sm:$0xff] }
 0x7e1   :  { %vm2384_vm2 = vmand %vm2032_vm6, %vm2352_vm3  ;;  %v7698_v49 = vsel %vm2383_vm12, 1e+30, %v6940_v59  ;;  %v2280_v4 = vadd.s32 %v2279_v15, %v2277_v19  ;;  %v2133_v22 = vcvt.f32.s32 %v2132_v42  ;;  %vm11884_vm12 = vcmp.eq.f32.partialorder %v11882_v14, %v11883_v29 }
 0x7e2   :  { %v7703_v7 = vsel %vm2384_vm2, 1e+30, %v6945_v57  ;;  %vm2393_vm14 = vmand %vm2041_vm7, %vm2361_vm13 }
 0x7e3   :  { %v2450_v59 = vmin.f32 %v7698_v49, %v7703_v7  ;;  %vm2394_vm6 = vmand %vm2042_vm4, %vm2362_vm11  ;;  %v7716_v57 = vsel %vm2393_vm14, 1e+30, %v6960_v10  ;;  %v7723_v18 = vsel %vm11233_vm10, %v6952_v17, %v2280_v4  ;;  %vm2367_vm7 = vcmp.eq.s32.totalorder %v7392_v44, %v2280_v4 }
 0x7e4   :  { %v7719_v3 = vsel %vm2394_vm6, 1e+30, %v6963_v20  ;;  %vm2368_vm4 = vcmp.eq.s32.totalorder %v7398_v34, %v2280_v4  ;;  %v2183_v10 = vshll.u32 %v2182_v52, 16  ;;  %v2136_v30 = vadd.s32 %v2135_v48, %v2133_v22  ;;  %vm2399_vm8 = vmand %vm11873_vm1, %vm2367_vm7  ;;  %v11892_v4 = vld [vmem:[#allocation47_spill] sm:$0xff]  ;;  %v11894_v22 = vld [vmem:[#allocation72_spill] sm:$0xff] }
 0x7e5   :  { %v2180_v25 = vpop.xlane.xlu1 %2179  ;;  %2451 = vmin.xlane.f32.xlu1 %v2450_v59  ;;  %v2465_v63 = vmin.f32 %v7716_v57, %v7719_v3  ;;  %v2263_v20 = vshll.u32 %v2262_v47, 16  ;;  %v2310_v17 = vcvt.f32.s32 %v7581_v56  ;;  %vm2400_vm9 = vmand %vm11875_vm15, %vm2368_vm4  ;;  %v7737_v27 = vsel %vm2399_vm8, 1e+30, %v11871_v16  ;;  %v11891_v47 = vld [vmem:[#allocation71_spill] sm:$0xff]  ;;  %v11898_v16 = vld [vmem:[#allocation73_spill] sm:$0xff] }
 0x7e6   :  { %v2181_v60 = vcvt.f32.s32 %v2180_v25  ;;  %11876 = vst [vmem:[#allocation26_spill] sm:$0xff] %v7737_v27  ;;  %v7741_v12 = vsel %vm11233_vm10, %v11877_v33, %v2136_v30  ;;  %v7744_v32 = vsel %vm2400_vm9, 1e+30, %v11874_v36  ;;  %v2166_v56 = vcvt.f32.s32 %v7585_v62  ;;  %v11885_v62 = vld [vmem:[#allocation31_spill] sm:$0xff]  ;;  %v11901_v33 = vld [vmem:[#allocation33_spill] sm:$0xff] }
 0x7e7   :  { %2466 = vmin.xlane.f32.xlu0 %v2465_v63  ;;  %11878 = vst [vmem:[#allocation28_spill] sm:$0xff] %v7741_v12  ;;  %11879 = vst [vmem:[#allocation27_spill] sm:$0xff] %v7744_v32  ;;  %v2474_v13 = vmin.f32 %v7737_v27, %v7744_v32  ;;  %vm2349_vm0 = vcmp.eq.s32.totalorder %v7392_v44, %v2136_v30  ;;  %vm2350_vm3 = vcmp.eq.s32.totalorder %v7398_v34, %v2136_v30 }
 0x7e8   :  { %v2184_v41 = vadd.s32 %v2183_v10, %v2181_v60  ;;  %vm2381_vm2 = vmand %vm11884_vm12, %vm2349_vm0  ;;  %vm11886_vm14 = vcmp.eq.f32.partialorder %v11885_v62, %v11883_v29  ;;  %vm11893_vm7 = vcmp.eq.f32.partialorder %v11891_v47, %v11892_v4  ;;  %v2311_v42 = vshll.u32 %v2310_v17, 16 }
 0x7e9   :  { %2475 = vmin.xlane.f32.xlu1 %v2474_v13  ;;  %vm2382_vm6 = vmand %vm11886_vm14, %vm2350_vm3  ;;  %v7764_v15 = vsel %vm2381_vm2, 1e+30, %v11882_v14  ;;  %vm11895_vm15 = vcmp.eq.f32.partialorder %v11894_v22, %v11892_v4  ;;  %v2167_v63 = vshll.u32 %v2166_v56, 16  ;;  %v2214_v10 = vcvt.f32.s32 %v7591_v2  ;;  %v11954_v4 = vld [vmem:[#allocation80_spill] sm:$0xff] }
 0x7ea   :  { %v2260_v35 = vpop.xlane.xlu0 %2259  ;;  %v7753_v9 = vsel %vm11233_vm10, %v11880_v26, %v2184_v41  ;;  %vm2355_vm13 = vcmp.eq.s32.totalorder %v7392_v44, %v2184_v41  ;;  %vm2356_vm11 = vcmp.eq.s32.totalorder %v7398_v34, %v2184_v41  ;;  %11887 = vst [vmem:[#allocation30_spill] sm:$0xff] %v7764_v15  ;;  %v7771_v52 = vsel %vm2382_vm6, 1e+30, %v11885_v62 }
 0x7eb   :  { %v2261_v53 = vcvt.f32.s32 %v2260_v35  ;;  %11881 = vst [vmem:[#allocation29_spill] sm:$0xff] %v7753_v9  ;;  %11890 = vst [vmem:[#allocation32_spill] sm:$0xff] %v7771_v52  ;;  %v2447_v48 = vmin.f32 %v7764_v15, %v7771_v52  ;;  %v2294_v14 = vcvt.f32.s32 %v7596_v1  ;;  %v2342_v1 = vcvt.f32.s32 %v7601_v40 }
 0x7ec   :  { %vm2387_vm4 = vmand %vm11893_vm7, %vm2355_vm13 }
 0x7ed   :  { %v2264_v43 = vadd.s32 %v2263_v20, %v2261_v53  ;;  %vm2388_vm9 = vmand %vm11895_vm15, %vm2356_vm11  ;;  %v7784_v25 = vsel %vm2387_vm4, 1e+30, %v11891_v47  ;;  %v11899_v20 = vld [vmem:[#allocation7_spill] sm:$0xff]  ;;  %2448 = vmin.xlane.f32.xlu0 %v2447_v48  ;;  %v11905_v53 = vld [vmem:[#allocation74_spill] sm:$0xff] }
 0x7ee   :  { %11896 = vst [vmem:[#allocation71_spill] sm:$0xff] %v7784_v25  ;;  %v7788_v60 = vsel %vm2388_vm9, 1e+30, %v11894_v22  ;;  %vm11900_vm0 = vcmp.eq.f32.partialorder %v11898_v16, %v11899_v20  ;;  %vm11902_vm12 = vcmp.eq.f32.partialorder %v11901_v33, %v11899_v20  ;;  %v11910_v47 = vld [vmem:[#allocation37_spill] sm:$0xff]  ;;  %v11912_v48 = vld [vmem:[#allocation39_spill] sm:$0xff] }
 0x7ef   :  { %v7768_v5 = vsel %vm11233_vm10, %v11888_v31, %v2264_v43  ;;  %v2308_v19 = vpop.xlane.xlu1 %2307  ;;  %vm2365_vm1 = vcmp.eq.s32.totalorder %v7392_v44, %v2264_v43  ;;  %vm2366_vm8 = vcmp.eq.s32.totalorder %v7398_v34, %v2264_v43  ;;  %11897 = vst [vmem:[#allocation72_spill] sm:$0xff] %v7788_v60  ;;  %v2456_v36 = vmin.f32 %v7784_v25, %v7788_v60  ;;  %v11907_v31 = vld [vmem:[#allocation75_spill] sm:$0xff]  ;;  %v11952_v20 = vld [vmem:[#allocation9_spill] sm:$0xff] }
 0x7f0   :  { %11889 = vst [vmem:[#allocation31_spill] sm:$0xff] %v7768_v5  ;;  %v2309_v59 = vcvt.f32.s32 %v2308_v19  ;;  %vm2397_vm3 = vmand %vm11900_vm0, %vm2365_vm1  ;;  %v2215_v43 = vshll.u32 %v2214_v10, 16  ;;  %v11908_v19 = vld [vmem:[#allocation83_spill] sm:$0xff]  ;;  %v11916_v10 = vld [vmem:[#allocation38_spill] sm:$0xff] }
 0x7f1   :  { %vm2398_vm2 = vmand %vm11902_vm12, %vm2366_vm8  ;;  %v7801_v2 = vsel %vm2397_vm3, 1e+30, %v11898_v16  ;;  %2457 = vmin.xlane.f32.xlu1 %v2456_v36  ;;  %vm11909_vm14 = vcmp.eq.f32.partialorder %v11907_v31, %v11908_v19  ;;  %vm11913_vm7 = vcmp.eq.f32.partialorder %v11912_v48, %v11908_v19  ;;  %v11919_v36 = vld [vmem:[#allocation76_spill] sm:$0xff] }
 0x7f2   :  { %v2164_v30 = vpop.xlane.xlu0 %2163  ;;  %v2312_v17 = vadd.s32 %v2311_v42, %v2309_v59  ;;  %11903 = vst [vmem:[#allocation73_spill] sm:$0xff] %v7801_v2  ;;  %v7804_v41 = vsel %vm2398_vm2, 1e+30, %v11901_v33  ;;  %v2295_v33 = vshll.u32 %v2294_v14, 16  ;;  %v2343_v14 = vshll.u32 %v2342_v1, 16 }
 0x7f3   :  { %v2165_v35 = vcvt.f32.s32 %v2164_v30  ;;  %11904 = vst [vmem:[#allocation33_spill] sm:$0xff] %v7804_v41  ;;  %v2471_v26 = vmin.f32 %v7801_v2, %v7804_v41  ;;  %v11917_v30 = vld [vmem:[#allocation8_spill] sm:$0xff] }
 0x7f4   :  { %v7808_v56 = vsel %vm11233_vm10, %v11905_v53, %v2312_v17  ;;  %vm2371_vm13 = vcmp.eq.s32.totalorder %v7392_v44, %v2312_v17  ;;  %vm2372_vm11 = vcmp.eq.s32.totalorder %v7398_v34, %v2312_v17  ;;  %vm11918_vm15 = vcmp.eq.f32.partialorder %v11916_v10, %v11917_v30 }
 0x7f5   :  { %11906 = vst [vmem:[#allocation74_spill] sm:$0xff] %v7808_v56  ;;  %v2168_v13 = vadd.s32 %v2167_v63, %v2165_v35  ;;  %vm2403_vm6 = vmand %vm11909_vm14, %vm2371_vm13  ;;  %2472 = vmin.xlane.f32.xlu0 %v2471_v26  ;;  %vm11920_vm0 = vcmp.eq.f32.partialorder %v11919_v36, %v11917_v30  ;;  %v2198_v53 = vcvt.f32.s32 %v7605_v6  ;;  %v11944_v30 = vld [vmem:[#allocation53_spill] sm:$0xff] }
 0x7f6   :  { %vm2404_vm4 = vmand %vm11913_vm7, %vm2372_vm11  ;;  %v7826_v22 = vsel %vm2403_vm6, 1e+30, %v11907_v31 }
 0x7f7   :  { %v2212_v62 = vpop.xlane.xlu1 %2211  ;;  %v7820_v42 = vsel %vm11233_vm10, %v11910_v47, %v2168_v13  ;;  %11914 = vst [vmem:[#allocation37_spill] sm:$0xff] %v7826_v22  ;;  %vm2353_vm1 = vcmp.eq.s32.totalorder %v7392_v44, %v2168_v13  ;;  %v7831_v63 = vsel %vm2404_vm4, 1e+30, %v11912_v48  ;;  %vm2354_vm8 = vcmp.eq.s32.totalorder %v7398_v34, %v2168_v13  ;;  %v11925_v48 = vld [vmem:[#allocation40_spill] sm:$0xff] }
 0x7f8   :  { %11911 = vst [vmem:[#allocation75_spill] sm:$0xff] %v7820_v42  ;;  %v2213_v59 = vcvt.f32.s32 %v2212_v62  ;;  %11915 = vst [vmem:[#allocation39_spill] sm:$0xff] %v7831_v63  ;;  %v2480_v35 = vmin.f32 %v7826_v22, %v7831_v63  ;;  %v11923_v62 = vld [vmem:[#allocation34_spill] sm:$0xff] }
 0x7f9   :  { %vm2385_vm9 = vmand %vm11918_vm15, %vm2353_vm1 }
 0x7fa   :  { %v2216_v16 = vadd.s32 %v2215_v43, %v2213_v59  ;;  %v2292_v17 = vpop.xlane.xlu0 %2291  ;;  %vm2386_vm3 = vmand %vm11920_vm0, %vm2354_vm8  ;;  %v7843_v40 = vsel %vm2385_vm9, 1e+30, %v11916_v10  ;;  %2481 = vmin.xlane.f32.xlu1 %v2480_v35  ;;  %v11926_v10 = vld [vmem:[#allocation52_spill] sm:$0xff] }
 0x7fb   :  { %11921 = vst [vmem:[#allocation38_spill] sm:$0xff] %v7843_v40  ;;  %v2293_v13 = vcvt.f32.s32 %v2292_v17  ;;  %v7847_v26 = vsel %vm2386_vm3, 1e+30, %v11919_v36  ;;  %vm11927_vm13 = vcmp.eq.f32.partialorder %v11925_v48, %v11926_v10  ;;  %v2326_v17 = vcvt.f32.s32 %v7610_v55  ;;  %v11928_v36 = vld [vmem:[#allocation35_spill] sm:$0xff] }
 0x7fc   :  { %11922 = vst [vmem:[#allocation76_spill] sm:$0xff] %v7847_v26  ;;  %v7851_v43 = vsel %vm11233_vm10, %v11923_v62, %v2216_v16  ;;  %v2453_v47 = vmin.f32 %v7843_v40, %v7847_v26  ;;  %vm2359_vm12 = vcmp.eq.s32.totalorder %v7392_v44, %v2216_v16  ;;  %vm2360_vm2 = vcmp.eq.s32.totalorder %v7398_v34, %v2216_v16  ;;  %v11931_v62 = vld [vmem:[#allocation77_spill] sm:$0xff] }
 0x7fd   :  { %11924 = vst [vmem:[#allocation34_spill] sm:$0xff] %v7851_v43  ;;  %v2340_v31 = vpop.xlane.xlu1 %2339  ;;  %v2296_v59 = vadd.s32 %v2295_v33, %v2293_v13  ;;  %vm2391_vm11 = vmand %vm11927_vm13, %vm2359_vm12  ;;  %vm11929_vm14 = vcmp.eq.f32.partialorder %v11928_v36, %v11926_v10  ;;  %v2199_v55 = vshll.u32 %v2198_v53, 16  ;;  %v11935_v10 = vld [vmem:[#allocation50_spill] sm:$0xff] }
 0x7fe   :  { %v2341_v6 = vcvt.f32.s32 %v2340_v31  ;;  %2454 = vmin.xlane.f32.xlu0 %v2453_v47  ;;  %vm2392_vm6 = vmand %vm11929_vm14, %vm2360_vm2  ;;  %v7865_v35 = vsel %vm2391_vm11, 1e+30, %v11925_v48  ;;  %v11934_v48 = vld [vmem:[#allocation43_spill] sm:$0xff] }
 0x7ff   :  { %11930 = vst [vmem:[#allocation40_spill] sm:$0xff] %v7865_v35  ;;  %v7869_v16 = vsel %vm11233_vm10, %v11931_v62, %v2296_v59  ;;  %v2196_v33 = vpop.xlane.xlu0 %2195  ;;  %v7872_v13 = vsel %vm2392_vm6, 1e+30, %v11928_v36  ;;  %vm2369_vm7 = vcmp.eq.s32.totalorder %v7392_v44, %v2296_v59  ;;  %vm2370_vm4 = vcmp.eq.s32.totalorder %v7398_v34, %v2296_v59  ;;  %v11937_v62 = vld [vmem:[#allocation78_spill] sm:$0xff] }
 0x800   :  { %11932 = vst [vmem:[#allocation35_spill] sm:$0xff] %v7869_v16  ;;  %v2344_v1 = vadd.s32 %v2343_v14, %v2341_v6  ;;  %11933 = vst [vmem:[#allocation77_spill] sm:$0xff] %v7872_v13  ;;  %v2197_v31 = vcvt.f32.s32 %v2196_v33  ;;  %v2462_v47 = vmin.f32 %v7865_v35, %v7872_v13  ;;  %vm11936_vm1 = vcmp.eq.f32.partialorder %v11934_v48, %v11935_v10  ;;  %v11939_v6 = vld [vmem:[#allocation36_spill] sm:$0xff]  ;;  %v11943_v33 = vld [vmem:[#allocation41_spill] sm:$0xff] }
 0x801   :  { %vm2401_vm8 = vmand %vm11936_vm1, %vm2369_vm7  ;;  %vm11940_vm15 = vcmp.eq.f32.partialorder %v11939_v6, %v11935_v10  ;;  %vm11955_vm7 = vcmp.eq.f32.partialorder %v11954_v4, %v11952_v20 }
 0x802   :  { %v7883_v14 = vsel %vm11233_vm10, %v11937_v62, %v2344_v1  ;;  %vm2402_vm9 = vmand %vm11940_vm15, %vm2370_vm4  ;;  %v7889_v53 = vsel %vm2401_vm8, 1e+30, %v11934_v48  ;;  %vm2375_vm0 = vcmp.eq.s32.totalorder %v7392_v44, %v2344_v1  ;;  %vm2376_vm3 = vcmp.eq.s32.totalorder %v7398_v34, %v2344_v1  ;;  %2463 = vmin.xlane.f32.xlu1 %v2462_v47  ;;  %v11945_v48 = vld [vmem:[#allocation45_spill] sm:$0xff] }
 0x803   :  { %11938 = vst [vmem:[#allocation43_spill] sm:$0xff] %v7883_v14  ;;  %11941 = vst [vmem:[#allocation78_spill] sm:$0xff] %v7889_v53  ;;  %v2200_v59 = vadd.s32 %v2199_v55, %v2197_v31  ;;  %v7894_v36 = vsel %vm2402_vm9, 1e+30, %v11939_v6  ;;  %v2327_v62 = vshll.u32 %v2326_v17, 16  ;;  %v2324_v19 = vpop.xlane.xlu0 %2323  ;;  %vm11946_vm2 = vcmp.eq.f32.partialorder %v11945_v48, %v11944_v30  ;;  %v11948_v55 = vld [vmem:[#allocation79_spill] sm:$0xff] }
 0x804   :  { %11942 = vst [vmem:[#allocation36_spill] sm:$0xff] %v7894_v36  ;;  %vm2407_vm12 = vmand %vm2055_vm5, %vm2375_vm0  ;;  %v2477_v10 = vmin.f32 %v7889_v53, %v7894_v36  ;;  %v2325_v47 = vcvt.f32.s32 %v2324_v19  ;;  %v11951_v30 = vld [vmem:[#allocation42_spill] sm:$0xff] }
 0x805   :  { %vm2408_vm13 = vmand %vm11946_vm2, %vm2376_vm3  ;;  %v7905_v1 = vsel %vm2407_vm12, 1e+30, %v11943_v33  ;;  %v7909_v31 = vsel %vm11233_vm10, %v11948_v55, %v2200_v59  ;;  %vm2357_vm5 = vcmp.eq.s32.totalorder %v7392_v44, %v2200_v59  ;;  %vm2358_vm11 = vcmp.eq.s32.totalorder %v7398_v34, %v2200_v59 }
 0x806   :  { %11947 = vst [vmem:[#allocation41_spill] sm:$0xff] %v7905_v1  ;;  %11949 = vst [vmem:[#allocation45_spill] sm:$0xff] %v7909_v31  ;;  %v7912_v6 = vsel %vm2408_vm13, 1e+30, %v11945_v48  ;;  %2478 = vmin.xlane.f32.xlu0 %v2477_v10  ;;  %vm11953_vm14 = vcmp.eq.f32.partialorder %v11951_v30, %v11952_v20  ;;  %v2328_v33 = vadd.s32 %v2327_v62, %v2325_v47  ;;  %v11958_v48 = vld [vmem:[#allocation44_spill] sm:$0xff]  ;;  %v11961_v47 = vld [vmem:[#allocation54_spill] sm:$0xff] }
 0x807   :  { %11950 = vst [vmem:[#allocation79_spill] sm:$0xff] %v7912_v6  ;;  %v2486_v17 = vmin.f32 %v7905_v1, %v7912_v6  ;;  %vm2389_vm6 = vmand %vm11953_vm14, %vm2357_vm5  ;;  %v11960_v62 = vld [vmem:[#allocation4_spill] sm:$0xff] }
 0x808   :  { %vm2390_vm4 = vmand %vm11955_vm7, %vm2358_vm11  ;;  %v7925_v19 = vsel %vm2389_vm6, 1e+30, %v11951_v30  ;;  %v7932_v55 = vsel %vm11233_vm10, %v11958_v48, %v2328_v33  ;;  %vm2373_vm1 = vcmp.eq.s32.totalorder %v7392_v44, %v2328_v33  ;;  %vm2374_vm8 = vcmp.eq.s32.totalorder %v7398_v34, %v2328_v33  ;;  %v11963_v30 = vld [vmem:[#allocation81_spill] sm:$0xff] }
 0x809   :  { %11956 = vst [vmem:[#allocation42_spill] sm:$0xff] %v7925_v19  ;;  %2487 = vmin.xlane.f32.xlu1 %v2486_v17  ;;  %v7928_v10 = vsel %vm2390_vm4, 1e+30, %v11954_v4  ;;  %11959 = vst [vmem:[#allocation44_spill] sm:$0xff] %v7932_v55  ;;  %vm11962_vm15 = vcmp.eq.f32.partialorder %v11960_v62, %v11961_v47  ;;  %vm11964_vm0 = vcmp.eq.f32.partialorder %v11963_v30, %v11961_v47 }
 0x80a   :  { %11957 = vst [vmem:[#allocation80_spill] sm:$0xff] %v7928_v10  ;;  %v2459_v59 = vmin.f32 %v7925_v19, %v7928_v10  ;;  %vm2405_vm9 = vmand %vm11962_vm15, %vm2373_vm1 }
 0x80b   :  { %vm2406_vm3 = vmand %vm11964_vm0, %vm2374_vm8  ;;  %v7945_v4 = vsel %vm2405_vm9, 1e+30, %v11960_v62 }
 0x80c   :  { %2460 = vmin.xlane.f32.xlu0 %v2459_v59  ;;  %11965 = vst [vmem:[#allocation4_spill] sm:$0xff] %v7945_v4  ;;  %v7948_v17 = vsel %vm2406_vm3, 1e+30, %v11963_v30 }
 0x80d   :  { %11966 = vst [vmem:[#allocation81_spill] sm:$0xff] %v7948_v17  ;;  %v2483_v48 = vmin.f32 %v7945_v4, %v7948_v17 }
 0x810   :  { %2484 = vmin.xlane.f32.xlu0 %v2483_v48 }
 0x866   :  { %v7952_v33 = vpop.xlane.xlu1 %2445 }
 0x867   :  { %11967 = vst [vmem:[#allocation100_spill] sm:$0xff] %v7952_v33  ;;  %vm2491_vm12 = vcmp.eq.f32.partialorder %v7630_v23, %v7952_v33  ;;  %vm2492_vm2 = vcmp.eq.f32.partialorder %v7633_v24, %v7952_v33 }
 0x868   :  { %v2523_v59 = vsel %vm2491_vm12, %v7392_v44, 2147483647  ;;  %v2524_v62 = vsel %vm2492_vm2, %v7398_v34, 2147483647 }
 0x869   :  { %vm2569_vm13 = vcmp.lt.s32.totalorder %v2523_v59, %v2524_v62 }
 0x86a   :  { %v7966_v30 = vsel %vm2569_vm13, %v2523_v59, %v2524_v62  ;;  %v7968_v48 = vpop.xlane.xlu1 %2469 }
 0x86b   :  { %11968 = vst [vmem:[#allocation101_spill] sm:$0xff] %v7968_v48  ;;  %v2572_v47 = vshra.s32 %v7966_v30, 16  ;;  %vm2507_vm5 = vcmp.eq.f32.partialorder %v7652_v21, %v7968_v48  ;;  %vm2508_vm11 = vcmp.eq.f32.partialorder %v7659_v39, %v7968_v48 }
 0x86c   :  { %v2539_v20 = vsel %vm2507_vm5, %v7392_v44, 2147483647  ;;  %v2540_v59 = vsel %vm2508_vm11, %v7398_v34, 2147483647 }
 0x86d   :  { %v7983_v62 = vcvt.s32.f32 %v2572_v47  ;;  %v7985_v29 = vpop.xlane.xlu0 %2442  ;;  %vm2697_vm14 = vcmp.lt.s32.totalorder %v2539_v20, %v2540_v59 }
 0x86e   :  { %11969 = vst [vmem:[#allocation102_spill] sm:$0xff] %v7985_v29  ;;  %vm2489_vm6 = vcmp.eq.f32.partialorder %v7673_v46, %v7985_v29  ;;  %vm2490_vm7 = vcmp.eq.f32.partialorder %v7676_v28, %v7985_v29  ;;  %v7992_v0 = vsel %vm2697_vm14, %v2539_v20, %v2540_v59 }
 0x86f   :  { %2575 = vmin.xlane.f32.xlu1 %v7983_v62  ;;  %v2521_v50 = vsel %vm2489_vm6, %v7392_v44, 2147483647  ;;  %v2522_v47 = vsel %vm2490_vm7, %v7398_v34, 2147483647  ;;  %v2700_v51 = vshra.s32 %v7992_v0, 16 }
 0x870   :  { %vm2553_vm4 = vcmp.lt.s32.totalorder %v2521_v50, %v2522_v47 }
 0x871   :  { %v8003_v54 = vcvt.s32.f32 %v2700_v51  ;;  %v8005_v61 = vsel %vm2553_vm4, %v2521_v50, %v2522_v47 }
 0x872   :  { %v8007_v8 = vpop.xlane.xlu1 %2451  ;;  %v2556_v20 = vshra.s32 %v8005_v61, 16 }
 0x873   :  { %11970 = vst [vmem:[#allocation103_spill] sm:$0xff] %v8007_v8  ;;  %vm2495_vm1 = vcmp.eq.f32.partialorder %v7698_v49, %v8007_v8  ;;  %vm2496_vm8 = vcmp.eq.f32.partialorder %v7703_v7, %v8007_v8  ;;  %2703 = vmin.xlane.f32.xlu1 %v8003_v54 }
 0x874   :  { %v2527_v51 = vsel %vm2495_vm1, %v7392_v44, 2147483647  ;;  %v2528_v50 = vsel %vm2496_vm8, %v7398_v34, 2147483647  ;;  %v8023_v59 = vpop.xlane.xlu0 %2466  ;;  %v8025_v47 = vcvt.s32.f32 %v2556_v20 }
 0x875   :  { %11971 = vst [vmem:[#allocation104_spill] sm:$0xff] %v8023_v59  ;;  %vm2505_vm15 = vcmp.eq.f32.partialorder %v7716_v57, %v8023_v59  ;;  %vm2506_vm9 = vcmp.eq.f32.partialorder %v7719_v3, %v8023_v59  ;;  %vm2601_vm0 = vcmp.lt.s32.totalorder %v2527_v51, %v2528_v50 }
 0x876   :  { %v2537_v55 = vsel %vm2505_vm15, %v7392_v44, 2147483647  ;;  %v2538_v31 = vsel %vm2506_vm9, %v7398_v34, 2147483647  ;;  %2559 = vmin.xlane.f32.xlu0 %v8025_v47  ;;  %v8040_v20 = vsel %vm2601_vm0, %v2527_v51, %v2528_v50  ;;  %v8043_v16 = vpop.xlane.xlu1 %2475 }
 0x877   :  { %v2604_v14 = vshra.s32 %v8040_v20, 16  ;;  %vm2681_vm3 = vcmp.lt.s32.totalorder %v2537_v55, %v2538_v31  ;;  %11972 = vst [vmem:[#allocation105_spill] sm:$0xff] %v8043_v16  ;;  %vm2511_vm13 = vcmp.eq.f32.partialorder %v7737_v27, %v8043_v16  ;;  %vm11242_vm14 = vcmp.eq.f32.partialorder %v7744_v32, %v8043_v16 }
 0x878   :  { %v8045_v43 = vsel %vm2681_vm3, %v2537_v55, %v2538_v31  ;;  %v2543_v51 = vsel %vm2511_vm13, %v7392_v44, 2147483647  ;;  %v2544_v50 = vsel %vm11242_vm14, %v7398_v34, 2147483647 }
 0x879   :  { %v8051_v42 = vcvt.s32.f32 %v2604_v14  ;;  %v2684_v31 = vshra.s32 %v8045_v43, 16  ;;  %vm2729_vm4 = vcmp.lt.s32.totalorder %v2543_v51, %v2544_v50 }
 0x87a   :  { %v8063_v55 = vpop.xlane.xlu0 %2448  ;;  %v8067_v14 = vsel %vm2729_vm4, %v2543_v51, %v2544_v50 }
 0x87b   :  { %2607 = vmin.xlane.f32.xlu1 %v8051_v42  ;;  %11973 = vst [vmem:[#allocation106_spill] sm:$0xff] %v8063_v55  ;;  %v8065_v56 = vcvt.s32.f32 %v2684_v31  ;;  %vm11241_vm0 = vcmp.eq.f32.partialorder %v7764_v15, %v8063_v55  ;;  %vm11240_vm3 = vcmp.eq.f32.partialorder %v7771_v52, %v8063_v55  ;;  %v2732_v5 = vshra.s32 %v8067_v14, 16 }
 0x87c   :  { %v2525_v9 = vsel %vm11241_vm0, %v7392_v44, 2147483647  ;;  %v2526_v31 = vsel %vm11240_vm3, %v7398_v34, 2147483647 }
 0x87d   :  { %2687 = vmin.xlane.f32.xlu0 %v8065_v56  ;;  %v8089_v50 = vcvt.s32.f32 %v2732_v5  ;;  %vm2585_vm3 = vcmp.lt.s32.totalorder %v2525_v9, %v2526_v31 }
 0x87e   :  { %v8082_v51 = vpop.xlane.xlu1 %2457  ;;  %v8106_v5 = vsel %vm2585_vm3, %v2525_v9, %v2526_v31 }
 0x87f   :  { %11974 = vst [vmem:[#allocation107_spill] sm:$0xff] %v8082_v51  ;;  %vm11250_vm4 = vcmp.eq.f32.partialorder %v7784_v25, %v8082_v51  ;;  %vm11249_vm10 = vcmp.eq.f32.partialorder %v7788_v60, %v8082_v51  ;;  %2735 = vmin.xlane.f32.xlu1 %v8089_v50  ;;  %v2588_v51 = vshra.s32 %v8106_v5, 16 }
 0x880   :  { %v2531_v15 = vsel %vm11250_vm4, %v7392_v44, 2147483647  ;;  %v2532_v52 = vsel %vm11249_vm10, %v7398_v34, 2147483647 }
 0x881   :  { %vm2633_vm10 = vcmp.lt.s32.totalorder %v2531_v15, %v2532_v52  ;;  %v8121_v9 = vcvt.s32.f32 %v2588_v51 }
 0x882   :  { %v8099_v55 = vpop.xlane.xlu0 %2472  ;;  %v8117_v12 = vsel %vm2633_vm10, %v2531_v15, %v2532_v52 }
 0x883   :  { %11975 = vst [vmem:[#allocation108_spill] sm:$0xff] %v8099_v55  ;;  %vm11274_vm0 = vcmp.eq.f32.partialorder %v7801_v2, %v8099_v55  ;;  %vm11255_vm14 = vcmp.eq.f32.partialorder %v7804_v41, %v8099_v55  ;;  %v2636_v31 = vshra.s32 %v8117_v12, 16  ;;  %2591 = vmin.xlane.f32.xlu0 %v8121_v9 }
 0x884   :  { %v2541_v25 = vsel %vm11274_vm0, %v7392_v44, 2147483647  ;;  %v2542_v60 = vsel %vm11255_vm14, %v7398_v34, 2147483647 }
 0x885   :  { %vm2713_vm4 = vcmp.lt.s32.totalorder %v2541_v25, %v2542_v60 }
 0x886   :  { %v8124_v16 = vsel %vm2713_vm4, %v2541_v25, %v2542_v60  ;;  %v8142_v60 = vcvt.s32.f32 %v2636_v31 }
 0x887   :  { %v8119_v32 = vpop.xlane.xlu1 %2481  ;;  %v2716_v41 = vshra.s32 %v8124_v16, 16 }
 0x888   :  { %11976 = vst [vmem:[#allocation109_spill] sm:$0xff] %v8119_v32  ;;  %vm11263_vm3 = vcmp.eq.f32.partialorder %v7826_v22, %v8119_v32  ;;  %vm11262_vm14 = vcmp.eq.f32.partialorder %v7831_v63, %v8119_v32  ;;  %2639 = vmin.xlane.f32.xlu1 %v8142_v60 }
 0x889   :  { %v2547_v15 = vsel %vm11263_vm3, %v7392_v44, 2147483647  ;;  %v2548_v52 = vsel %vm11262_vm14, %v7398_v34, 2147483647  ;;  %v8148_v51 = vcvt.s32.f32 %v2716_v41 }
 0x88a   :  { %vm2761_vm14 = vcmp.lt.s32.totalorder %v2547_v15, %v2548_v52 }
 0x88b   :  { %v8139_v25 = vpop.xlane.xlu0 %2454  ;;  %v8159_v31 = vsel %vm2761_vm14, %v2547_v15, %v2548_v52  ;;  %2719 = vmin.xlane.f32.xlu0 %v8148_v51 }
 0x88c   :  { %11977 = vst [vmem:[#allocation110_spill] sm:$0xff] %v8139_v25  ;;  %vm11268_vm10 = vcmp.eq.f32.partialorder %v7843_v40, %v8139_v25  ;;  %vm11269_vm4 = vcmp.eq.f32.partialorder %v7847_v26, %v8139_v25  ;;  %v2764_v41 = vshra.s32 %v8159_v31, 16 }
 0x88d   :  { %v2529_v63 = vsel %vm11268_vm10, %v7392_v44, 2147483647  ;;  %v2530_v32 = vsel %vm11269_vm4, %v7398_v34, 2147483647 }
 0x88e   :  { %vm2617_vm3 = vcmp.lt.s32.totalorder %v2529_v63, %v2530_v32 }
 0x88f   :  { %v8161_v22 = vpop.xlane.xlu1 %2463  ;;  %v8165_v55 = vsel %vm2617_vm3, %v2529_v63, %v2530_v32  ;;  %v8180_v32 = vcvt.s32.f32 %v2764_v41 }
 0x890   :  { %11978 = vst [vmem:[#allocation111_spill] sm:$0xff] %v8161_v22  ;;  %vm11282_vm10 = vcmp.eq.f32.partialorder %v7865_v35, %v8161_v22  ;;  %vm11281_vm4 = vcmp.eq.f32.partialorder %v7872_v13, %v8161_v22  ;;  %v2620_v26 = vshra.s32 %v8165_v55, 16 }
 0x891   :  { %v2535_v15 = vsel %vm11282_vm10, %v7392_v44, 2147483647  ;;  %v2536_v52 = vsel %vm11281_vm4, %v7398_v34, 2147483647  ;;  %2767 = vmin.xlane.f32.xlu1 %v8180_v32 }
 0x892   :  { %v8184_v25 = vcvt.s32.f32 %v2620_v26  ;;  %vm2665_vm14 = vcmp.lt.s32.totalorder %v2535_v15, %v2536_v52 }
 0x893   :  { %v8182_v63 = vpop.xlane.xlu0 %2478  ;;  %v8191_v35 = vsel %vm2665_vm14, %v2535_v15, %v2536_v52  ;;  %v8209_v15 = vld [vmem:[#allocation3 + $0x10] sm:$0xff] }
 0x894   :  { %11979 = vst [vmem:[#allocation112_spill] sm:$0xff] %v8182_v63  ;;  %vm11292_vm3 = vcmp.eq.f32.partialorder %v7889_v53, %v8182_v63  ;;  %vm11291_vm0 = vcmp.eq.f32.partialorder %v7894_v36, %v8182_v63  ;;  %2623 = vmin.xlane.f32.xlu0 %v8184_v25  ;;  %v2668_v22 = vshra.s32 %v8191_v35, 16 }
 0x895   :  { %v2545_v41 = vsel %vm11292_vm3, %v7392_v44, 2147483647  ;;  %v2546_v26 = vsel %vm11291_vm0, %v7398_v34, 2147483647  ;;  %v8215_v34 = vld [vmem:[#allocation3 + $0x18] sm:$0xff] }
 0x896   :  { %v8201_v13 = vpop.xlane.xlu1 %2487  ;;  %vm2745_vm10 = vcmp.lt.s32.totalorder %v2545_v41, %v2546_v26  ;;  %v8221_v36 = vcvt.s32.f32 %v2668_v22 }
 0x897   :  { %11980 = vst [vmem:[#allocation113_spill] sm:$0xff] %v8201_v13  ;;  %vm11293_vm14 = vcmp.eq.f32.partialorder %v7905_v1, %v8201_v13  ;;  %vm11320_vm4 = vcmp.eq.f32.partialorder %v7912_v6, %v8201_v13  ;;  %v8223_v63 = vsel %vm2745_vm10, %v2545_v41, %v2546_v26 }
 0x898   :  { %v2551_v44 = vsel %vm11293_vm14, %v8209_v15, 2147483647  ;;  %v2552_v52 = vsel %vm11320_vm4, %v8215_v34, 2147483647  ;;  %v2748_v40 = vshra.s32 %v8223_v63, 16  ;;  %2671 = vmin.xlane.f32.xlu1 %v8221_v36 }
 0x899   :  { %v8225_v53 = vpop.xlane.xlu0 %2460  ;;  %vm2793_vm0 = vcmp.lt.s32.totalorder %v2551_v44, %v2552_v52 }
 0x89a   :  { %11981 = vst [vmem:[#allocation114_spill] sm:$0xff] %v8225_v53  ;;  %vm11300_vm3 = vcmp.eq.f32.partialorder %v7925_v19, %v8225_v53  ;;  %vm11319_vm14 = vcmp.eq.f32.partialorder %v7928_v10, %v8225_v53  ;;  %v8233_v1 = vsel %vm2793_vm0, %v2551_v44, %v2552_v52  ;;  %v8243_v26 = vcvt.s32.f32 %v2748_v40 }
 0x89b   :  { %v2533_v22 = vsel %vm11300_vm3, %v8209_v15, 2147483647  ;;  %v2534_v41 = vsel %vm11319_vm14, %v8215_v34, 2147483647  ;;  %v2796_v6 = vshra.s32 %v8233_v1, 16 }
 0x89c   :  { %vm2649_vm10 = vcmp.lt.s32.totalorder %v2533_v22, %v2534_v41  ;;  %2751 = vmin.xlane.f32.xlu0 %v8243_v26 }
 0x89d   :  { %v8246_v13 = vpop.xlane.xlu0 %2484  ;;  %v8249_v44 = vcvt.s32.f32 %v2796_v6  ;;  %v8251_v52 = vsel %vm2649_vm10, %v2533_v22, %v2534_v41 }
 0x89e   :  { %11982 = vst [vmem:[#allocation115_spill] sm:$0xff] %v8246_v13  ;;  %vm11318_vm0 = vcmp.eq.f32.partialorder %v7945_v4, %v8246_v13  ;;  %vm11313_vm3 = vcmp.eq.f32.partialorder %v7948_v17, %v8246_v13  ;;  %v2652_v40 = vshra.s32 %v8251_v52, 16  ;;  %v2571_v4 = vand.u32 65535, %v7966_v30 }
 0x89f   :  { %v2549_v10 = vsel %vm11318_vm0, %v8209_v15, 2147483647  ;;  %v2550_v6 = vsel %vm11313_vm3, %v8215_v34, 2147483647  ;;  %2799 = vmin.xlane.f32.xlu1 %v8249_v44 }
 0x8a0   :  { %v8267_v22 = vcvt.s32.f32 %v2652_v40  ;;  %vm2777_vm10 = vcmp.lt.s32.totalorder %v2549_v10, %v2550_v6  ;;  %v2573_v17 = vcvt.s32.f32 %v2571_v4  ;;  %v2699_v40 = vand.u32 65535, %v7992_v0 }
 0x8a1   :  { %v8269_v41 = vsel %vm2777_vm10, %v2549_v10, %v2550_v6  ;;  %v2555_v6 = vand.u32 65535, %v8005_v61  ;;  %v2603_v0 = vand.u32 65535, %v8040_v20  ;;  %v2683_v61 = vand.u32 65535, %v8045_v43 }
 0x8a2   :  { %2655 = vmin.xlane.f32.xlu0 %v8267_v22  ;;  %v2780_v53 = vshra.s32 %v8269_v41, 16 }
 0x8a3   :  { %v2557_v4 = vcvt.s32.f32 %v2555_v6  ;;  %v2685_v6 = vcvt.s32.f32 %v2683_v61 }
 0x8a4   :  { %v8273_v19 = vcvt.s32.f32 %v2780_v53  ;;  %v2701_v53 = vcvt.s32.f32 %v2699_v40  ;;  %v2605_v40 = vcvt.s32.f32 %v2603_v0 }
 0x8a6   :  { %2783 = vmin.xlane.f32.xlu0 %v8273_v19 }
 0x8fc   :  { %v8277_v2 = vpop.xlane.xlu1 %2575 }
 0x8fd   :  { %vm2577_vm3 = vcmp.eq.f32.partialorder %v7983_v62, %v8277_v2 }
 0x8fe   :  { %v2578_v10 = vsel %vm2577_vm3, %v2573_v17, inf }
 0x8ff   :  { %2579 = vmin.xlane.f32.xlu1 %v2578_v10  ;;  %v2731_v10 = vand.u32 65535, %v8067_v14  ;;  %v2635_v14 = vand.u32 65535, %v8117_v12 }
 0x900   :  { %v8283_v13 = vpop.xlane.xlu1 %2703 }
 0x901   :  { %vm2705_vm10 = vcmp.eq.f32.partialorder %v8003_v54, %v8283_v13  ;;  %v2733_v43 = vcvt.s32.f32 %v2731_v10 }
 0x902   :  { %v2706_v27 = vsel %vm2705_vm10, %v2701_v53, inf }
 0x903   :  { %v8287_v30 = vpop.xlane.xlu0 %2559  ;;  %2707 = vmin.xlane.f32.xlu1 %v2706_v27 }
 0x904   :  { %vm2561_vm0 = vcmp.eq.f32.partialorder %v8025_v47, %v8287_v30 }
 0x905   :  { %v2562_v17 = vsel %vm2561_vm0, %v2557_v4, inf }
 0x906   :  { %2563 = vmin.xlane.f32.xlu0 %v2562_v17  ;;  %v2715_v17 = vand.u32 65535, %v8124_v16  ;;  %v2619_v16 = vand.u32 65535, %v8165_v55  ;;  %v2747_v55 = vand.u32 65535, %v8223_v63 }
 0x908   :  { %v8293_v62 = vpop.xlane.xlu1 %2607  ;;  %v2717_v12 = vcvt.s32.f32 %v2715_v17 }
 0x909   :  { %vm2609_vm3 = vcmp.eq.f32.partialorder %v8051_v42, %v8293_v62  ;;  %v2587_v42 = vand.u32 65535, %v8106_v5 }
 0x90a   :  { %v2610_v54 = vsel %vm2609_vm3, %v2605_v40, inf  ;;  %v8298_v27 = vpop.xlane.xlu0 %2687  ;;  %v2637_v40 = vcvt.s32.f32 %v2635_v14 }
 0x90b   :  { %2611 = vmin.xlane.f32.xlu1 %v2610_v54  ;;  %vm2689_vm10 = vcmp.eq.f32.partialorder %v8065_v56, %v8298_v27  ;;  %v2589_v0 = vcvt.s32.f32 %v2587_v42  ;;  %v2763_v54 = vand.u32 65535, %v8159_v31 }
 0x90c   :  { %v2690_v47 = vsel %vm2689_vm10, %v2685_v6, inf  ;;  %v8302_v20 = vpop.xlane.xlu1 %2735 }
 0x90d   :  { %2691 = vmin.xlane.f32.xlu0 %v2690_v47  ;;  %vm2737_vm0 = vcmp.eq.f32.partialorder %v8089_v50, %v8302_v20  ;;  %v2765_v6 = vcvt.s32.f32 %v2763_v54 }
 0x90e   :  { %v2738_v53 = vsel %vm2737_vm0, %v2733_v43, inf  ;;  %v2667_v43 = vand.u32 65535, %v8191_v35  ;;  %v2749_v35 = vcvt.s32.f32 %v2747_v55 }
 0x90f   :  { %2739 = vmin.xlane.f32.xlu1 %v2738_v53 }
 0x910   :  { %v8308_v4 = vpop.xlane.xlu0 %2591  ;;  %v2669_v53 = vcvt.s32.f32 %v2667_v43 }
 0x911   :  { %vm2593_vm3 = vcmp.eq.f32.partialorder %v8121_v9, %v8308_v4 }
 0x912   :  { %v2594_v56 = vsel %vm2593_vm3, %v2589_v0, inf }
 0x913   :  { %2595 = vmin.xlane.f32.xlu0 %v2594_v56 }
 0x915   :  { %v8313_v61 = vpop.xlane.xlu1 %2639 }
 0x916   :  { %vm2641_vm10 = vcmp.eq.f32.partialorder %v8142_v60, %v8313_v61  ;;  %v2621_v60 = vcvt.s32.f32 %v2619_v16 }
 0x917   :  { %v2642_v5 = vsel %vm2641_vm10, %v2637_v40, inf }
 0x918   :  { %v8317_v50 = vpop.xlane.xlu0 %2719  ;;  %2643 = vmin.xlane.f32.xlu1 %v2642_v5  ;;  %v2779_v5 = vand.u32 65535, %v8269_v41  ;;  %v2710_v41 = vcvt.f32.s32 %v8283_v13 }
 0x919   :  { %vm2721_vm0 = vcmp.eq.f32.partialorder %v8148_v51, %v8317_v50 }
 0x91a   :  { %v2722_v9 = vsel %vm2721_vm0, %v2717_v12, inf  ;;  %v2781_v12 = vcvt.s32.f32 %v2779_v5 }
 0x91b   :  { %2723 = vmin.xlane.f32.xlu0 %v2722_v9 }
 0x91e   :  { %v8323_v10 = vpop.xlane.xlu1 %2767 }
 0x91f   :  { %vm2769_vm3 = vcmp.eq.f32.partialorder %v8180_v32, %v8323_v10  ;;  %v2795_v32 = vand.u32 65535, %v8233_v1 }
 0x920   :  { %v2770_v31 = vsel %vm2769_vm3, %v2765_v6, inf }
 0x921   :  { %v8325_v47 = vpop.xlane.xlu0 %2623  ;;  %2771 = vmin.xlane.f32.xlu1 %v2770_v31  ;;  %v2797_v56 = vcvt.s32.f32 %v2795_v32 }
 0x922   :  { %vm2625_vm10 = vcmp.eq.f32.partialorder %v8184_v25, %v8325_v47  ;;  %v2651_v25 = vand.u32 65535, %v8251_v52 }
 0x923   :  { %v2626_v51 = vsel %vm2625_vm10, %v2621_v60, inf }
 0x924   :  { %2627 = vmin.xlane.f32.xlu0 %v2626_v51  ;;  %v2653_v40 = vcvt.s32.f32 %v2651_v25 }
 0x925   :  { %v8333_v42 = vpop.xlane.xlu1 %2671 }
 0x926   :  { %vm2673_vm0 = vcmp.eq.f32.partialorder %v8221_v36, %v8333_v42 }
 0x927   :  { %v2674_v14 = vsel %vm2673_vm0, %v2669_v53, inf }
 0x928   :  { %2675 = vmin.xlane.f32.xlu1 %v2674_v14  ;;  %v2614_v14 = vcvt.f32.s32 %v8293_v62 }
 0x929   :  { %v8338_v0 = vpop.xlane.xlu0 %2751 }
 0x92a   :  { %vm2753_vm3 = vcmp.eq.f32.partialorder %v8243_v26, %v8338_v0 }
 0x92b   :  { %v2754_v17 = vsel %vm2753_vm3, %v2749_v35, inf }
 0x92c   :  { %v8343_v63 = vpop.xlane.xlu1 %2799  ;;  %2755 = vmin.xlane.f32.xlu0 %v2754_v17 }
 0x92d   :  { %vm2801_vm10 = vcmp.eq.f32.partialorder %v8249_v44, %v8343_v63  ;;  %v2582_v44 = vcvt.f32.s32 %v8277_v2 }
 0x92e   :  { %v2802_v36 = vsel %vm2801_vm10, %v2797_v56, inf  ;;  %vm11337_vm10 = vcmask 31744  }
 0x92f   :  { %v8347_v1 = vpop.xlane.xlu0 %2655  ;;  %2803 = vmin.xlane.f32.xlu1 %v2802_v36  ;;  %v2583_v9 = vshll.u32 %v2582_v44, 16 }
 0x930   :  { %vm2657_vm0 = vcmp.eq.f32.partialorder %v8267_v22, %v8347_v1  ;;  %v2566_v22 = vcvt.f32.s32 %v8287_v30 }
 0x931   :  { %v2658_v26 = vsel %vm2657_vm0, %v2653_v40, inf }
 0x932   :  { %2659 = vmin.xlane.f32.xlu0 %v2658_v26  ;;  %v2567_v55 = vshll.u32 %v2566_v22, 16 }
 0x933   :  { %v8352_v52 = vpop.xlane.xlu0 %2783 }
 0x934   :  { %vm2785_vm3 = vcmp.eq.f32.partialorder %v8273_v19, %v8352_v52  ;;  %v2711_v19 = vshll.u32 %v2710_v41, 16 }
 0x935   :  { %v2786_v54 = vsel %vm2785_vm3, %v2781_v12, inf }
 0x936   :  { %2787 = vmin.xlane.f32.xlu0 %v2786_v54 }
 0x98c   :  { %v2580_v16 = vpop.xlane.xlu1 %2579 }
 0x98d   :  { %v2581_v6 = vcvt.f32.s32 %v2580_v16  ;;  %v2598_v16 = vcvt.f32.s32 %v8308_v4 }
 0x98f   :  { %v2584_v60 = vadd.s32 %v2583_v9, %v2581_v6 }
 0x990   :  { %v2708_v31 = vpop.xlane.xlu1 %2707 }
 0x991   :  { %v8361_v43 = vsel %vm11337_vm10, %v7619_v37, %v2584_v60  ;;  %vm2811_vm0 = vcmp.eq.s32.totalorder %v8209_v15, %v2584_v60  ;;  %vm2812_vm3 = vcmp.eq.s32.totalorder %v8215_v34, %v2584_v60  ;;  %v2709_v2 = vcvt.f32.s32 %v2708_v31 }
 0x992   :  { %vm2843_vm14 = vmand %vm2491_vm12, %vm2811_vm0 }
 0x993   :  { %vm2844_vm4 = vmand %vm2492_vm2, %vm2812_vm3  ;;  %v8372_v13 = vsel %vm2843_vm14, 1e+30, %v7630_v23  ;;  %v2712_v37 = vadd.s32 %v2711_v19, %v2709_v2  ;;  %v2564_v30 = vpop.xlane.xlu0 %2563 }
 0x994   :  { %v8375_v51 = vsel %vm2844_vm4, 1e+30, %v7633_v24  ;;  %v2565_v53 = vcvt.f32.s32 %v2564_v30  ;;  %v2694_v24 = vcvt.f32.s32 %v8298_v27  ;;  %v2615_v27 = vshll.u32 %v2614_v14, 16 }
 0x995   :  { %v2908_v32 = vmin.f32 %v8372_v13, %v8375_v51  ;;  %v8382_v35 = vsel %vm11337_vm10, %v7640_v11, %v2712_v37  ;;  %vm2827_vm12 = vcmp.eq.s32.totalorder %v8209_v15, %v2712_v37  ;;  %vm2828_vm2 = vcmp.eq.s32.totalorder %v8215_v34, %v2712_v37  ;;  %v11984_v37 = vld [vmem:[#allocation105_spill] sm:$0xff] }
 0x996   :  { %v2568_v23 = vadd.s32 %v2567_v55, %v2565_v53  ;;  %vm2859_vm4 = vmand %vm2507_vm5, %vm2827_vm12  ;;  %v2695_v26 = vshll.u32 %v2694_v24, 16  ;;  %v11985_v55 = vld [vmem:[#allocation27_spill] sm:$0xff] }
 0x997   :  { %2909 = vmin.xlane.f32.xlu1 %v2908_v32  ;;  %vm2860_vm14 = vmand %vm2508_vm11, %vm2828_vm2  ;;  %v8394_v62 = vsel %vm2859_vm4, 1e+30, %v7652_v21 }
 0x998   :  { %v8398_v11 = vsel %vm11337_vm10, %v7656_v45, %v2568_v23  ;;  %v2612_v25 = vpop.xlane.xlu1 %2611  ;;  %v8401_v17 = vsel %vm2860_vm14, 1e+30, %v7659_v39  ;;  %vm2809_vm0 = vcmp.eq.s32.totalorder %v8209_v15, %v2568_v23  ;;  %vm2810_vm5 = vcmp.eq.s32.totalorder %v8215_v34, %v2568_v23 }
 0x999   :  { %v2613_v56 = vcvt.f32.s32 %v2612_v25  ;;  %v2932_v36 = vmin.f32 %v8394_v62, %v8401_v17  ;;  %vm2841_vm11 = vmand %vm2489_vm6, %vm2809_vm0  ;;  %v2742_v45 = vcvt.f32.s32 %v8302_v20  ;;  %v2630_v25 = vcvt.f32.s32 %v8325_v47  ;;  %v11993_v47 = vld [vmem:[#allocation29_spill] sm:$0xff] }
 0x99a   :  { %vm2842_vm3 = vmand %vm2490_vm7, %vm2810_vm5  ;;  %v8414_v21 = vsel %vm2841_vm11, 1e+30, %v7673_v46  ;;  %v2692_v40 = vpop.xlane.xlu0 %2691  ;;  %vm11986_vm5 = vcmp.eq.f32.partialorder %v11985_v55, %v11984_v37 }
 0x99b   :  { %v2616_v39 = vadd.s32 %v2615_v27, %v2613_v56  ;;  %2933 = vmin.xlane.f32.xlu1 %v2932_v36  ;;  %v8418_v5 = vsel %vm2842_vm3, 1e+30, %v7676_v28  ;;  %v2693_v12 = vcvt.f32.s32 %v2692_v40  ;;  %v2743_v28 = vshll.u32 %v2742_v45, 16  ;;  %v11988_v56 = vld [vmem:[#allocation28_spill] sm:$0xff] }
 0x99c   :  { %v2905_v54 = vmin.f32 %v8414_v21, %v8418_v5  ;;  %v2740_v20 = vpop.xlane.xlu1 %2739 }
 0x99d   :  { %v8424_v44 = vsel %vm11337_vm10, %v7682_v38, %v2616_v39  ;;  %vm2815_vm6 = vcmp.eq.s32.totalorder %v8209_v15, %v2616_v39  ;;  %vm2816_vm7 = vcmp.eq.s32.totalorder %v8215_v34, %v2616_v39  ;;  %v2696_v46 = vadd.s32 %v2695_v26, %v2693_v12  ;;  %v11990_v26 = vld [vmem:[#allocation30_spill] sm:$0xff] }
 0x99e   :  { %2906 = vmin.xlane.f32.xlu0 %v2905_v54  ;;  %vm2847_vm12 = vmand %vm2495_vm1, %vm2815_vm6  ;;  %v2741_v9 = vcvt.f32.s32 %v2740_v20  ;;  %v11991_v12 = vld [vmem:[#allocation106_spill] sm:$0xff]  ;;  %v11995_v20 = vld [vmem:[#allocation32_spill] sm:$0xff] }
 0x99f   :  { %vm2848_vm2 = vmand %vm2496_vm8, %vm2816_vm7  ;;  %v8436_v38 = vsel %vm2847_vm12, 1e+30, %v7698_v49  ;;  %v8440_v6 = vsel %vm11337_vm10, %v7692_v58, %v2696_v46  ;;  %vm2825_vm1 = vcmp.eq.s32.totalorder %v8209_v15, %v2696_v46  ;;  %vm2826_vm4 = vcmp.eq.s32.totalorder %v8215_v34, %v2696_v46 }
 0x9a0   :  { %v8443_v41 = vsel %vm2848_vm2, 1e+30, %v7703_v7  ;;  %v2744_v4 = vadd.s32 %v2743_v28, %v2741_v9  ;;  %vm2857_vm8 = vmand %vm2505_vm15, %vm2825_vm1  ;;  %v2646_v49 = vcvt.f32.s32 %v8313_v61  ;;  %v2726_v58 = vcvt.f32.s32 %v8317_v50  ;;  %v2596_v31 = vpop.xlane.xlu0 %2595 }
 0x9a1   :  { %v2914_v60 = vmin.f32 %v8436_v38, %v8443_v41  ;;  %vm2858_vm14 = vmand %vm2506_vm9, %vm2826_vm4  ;;  %v8458_v7 = vsel %vm2857_vm8, 1e+30, %v7716_v57  ;;  %v2599_v61 = vshll.u32 %v2598_v16, 16  ;;  %v2597_v50 = vcvt.f32.s32 %v2596_v31  ;;  %v11983_v57 = vld [vmem:[#allocation26_spill] sm:$0xff]  ;;  %v12002_v31 = vld [vmem:[#allocation31_spill] sm:$0xff] }
 0x9a2   :  { %v8462_v22 = vsel %vm11337_vm10, %v7723_v18, %v2744_v4  ;;  %v8465_v19 = vsel %vm2858_vm14, 1e+30, %v7719_v3  ;;  %vm2831_vm15 = vcmp.eq.s32.totalorder %v8209_v15, %v2744_v4  ;;  %vm2832_vm0 = vcmp.eq.s32.totalorder %v8215_v34, %v2744_v4 }
 0x9a3   :  { %2915 = vmin.xlane.f32.xlu1 %v2914_v60  ;;  %v2929_v2 = vmin.f32 %v8458_v7, %v8465_v19  ;;  %vm2863_vm9 = vmand %vm2511_vm13, %vm2831_vm15  ;;  %v2774_v18 = vcvt.f32.s32 %v8323_v10  ;;  %v2647_v53 = vshll.u32 %v2646_v49, 16  ;;  %v2600_v32 = vadd.s32 %v2599_v61, %v2597_v50  ;;  %v11999_v49 = vld [vmem:[#allocation71_spill] sm:$0xff] }
 0x9a4   :  { %vm2864_vm11 = vmand %vm11986_vm5, %vm2832_vm0  ;;  %v8479_v3 = vsel %vm2863_vm9, 1e+30, %v11983_v57  ;;  %v2727_v24 = vshll.u32 %v2726_v58, 16  ;;  %vm11992_vm6 = vcmp.eq.f32.partialorder %v11990_v26, %v11991_v12  ;;  %vm11996_vm12 = vcmp.eq.f32.partialorder %v11995_v20, %v11991_v12  ;;  %v12000_v58 = vld [vmem:[#allocation107_spill] sm:$0xff] }
 0x9a5   :  { %v2644_v30 = vpop.xlane.xlu1 %2643  ;;  %2930 = vmin.xlane.f32.xlu0 %v2929_v2  ;;  %v8482_v23 = vsel %vm2864_vm11, 1e+30, %v11985_v55  ;;  %v8489_v36 = vsel %vm11337_vm10, %v11988_v56, %v2600_v32  ;;  %vm2813_vm13 = vcmp.eq.s32.totalorder %v8209_v15, %v2600_v32  ;;  %v2775_v40 = vshll.u32 %v2774_v18, 16  ;;  %v12011_v56 = vld [vmem:[#allocation33_spill] sm:$0xff] }
 0x9a6   :  { %v2645_v14 = vcvt.f32.s32 %v2644_v30  ;;  %11987 = vst [vmem:[#allocation26_spill] sm:$0xff] %v8482_v23  ;;  %v2938_v10 = vmin.f32 %v8479_v3, %v8482_v23  ;;  %11989 = vst [vmem:[#allocation27_spill] sm:$0xff] %v8489_v36  ;;  %vm2814_vm3 = vcmp.eq.s32.totalorder %v8215_v34, %v2600_v32  ;;  %v2631_v16 = vshll.u32 %v2630_v25, 16 }
 0x9a7   :  { %vm2845_vm7 = vmand %vm11992_vm6, %vm2813_vm13  ;;  %v2678_v9 = vcvt.f32.s32 %v8333_v42  ;;  %vm12001_vm8 = vcmp.eq.f32.partialorder %v11999_v49, %v12000_v58  ;;  %v12004_v42 = vld [vmem:[#allocation72_spill] sm:$0xff] }
 0x9a8   :  { %v2724_v27 = vpop.xlane.xlu0 %2723  ;;  %v2648_v45 = vadd.s32 %v2647_v53, %v2645_v14  ;;  %2939 = vmin.xlane.f32.xlu1 %v2938_v10  ;;  %vm2846_vm2 = vmand %vm11996_vm12, %vm2814_vm3  ;;  %v8504_v28 = vsel %vm2845_vm7, 1e+30, %v11990_v26  ;;  %vm12005_vm15 = vcmp.eq.f32.partialorder %v12004_v42, %v12000_v58  ;;  %v12008_v14 = vld [vmem:[#allocation73_spill] sm:$0xff]  ;;  %v12065_v58 = vld [vmem:[#allocation80_spill] sm:$0xff] }
 0x9a9   :  { %v2725_v39 = vcvt.f32.s32 %v2724_v27  ;;  %11997 = vst [vmem:[#allocation30_spill] sm:$0xff] %v8504_v28  ;;  %v8509_v60 = vsel %vm2846_vm2, 1e+30, %v11995_v20  ;;  %v2679_v25 = vshll.u32 %v2678_v9, 16  ;;  %v2758_v27 = vcvt.f32.s32 %v8338_v0  ;;  %v12017_v0 = vld [vmem:[#allocation75_spill] sm:$0xff]  ;;  %v12019_v9 = vld [vmem:[#allocation37_spill] sm:$0xff] }
 0x9aa   :  { %v8498_v54 = vsel %vm11337_vm10, %v11993_v47, %v2648_v45  ;;  %vm2819_vm1 = vcmp.eq.s32.totalorder %v8209_v15, %v2648_v45  ;;  %11998 = vst [vmem:[#allocation29_spill] sm:$0xff] %v8509_v60  ;;  %vm2820_vm4 = vcmp.eq.s32.totalorder %v8215_v34, %v2648_v45  ;;  %v2911_v57 = vmin.f32 %v8504_v28, %v8509_v60 }
 0x9ab   :  { %11994 = vst [vmem:[#allocation28_spill] sm:$0xff] %v8498_v54  ;;  %v2728_v46 = vadd.s32 %v2727_v24, %v2725_v39  ;;  %vm2851_vm14 = vmand %vm12001_vm8, %vm2819_vm1  ;;  %v12009_v24 = vld [vmem:[#allocation108_spill] sm:$0xff]  ;;  %v12014_v39 = vld [vmem:[#allocation74_spill] sm:$0xff] }
 0x9ac   :  { %vm2852_vm0 = vmand %vm12005_vm15, %vm2820_vm4  ;;  %v8525_v18 = vsel %vm2851_vm14, 1e+30, %v11999_v49  ;;  %2912 = vmin.xlane.f32.xlu0 %v2911_v57  ;;  %vm12010_vm11 = vcmp.eq.f32.partialorder %v12008_v14, %v12009_v24  ;;  %vm12012_vm3 = vcmp.eq.f32.partialorder %v12011_v56, %v12009_v24  ;;  %v2806_v49 = vcvt.f32.s32 %v8343_v63  ;;  %v12063_v24 = vld [vmem:[#allocation114_spill] sm:$0xff] }
 0x9ad   :  { %v8517_v61 = vsel %vm11337_vm10, %v12002_v31, %v2728_v46  ;;  %12006 = vst [vmem:[#allocation71_spill] sm:$0xff] %v8525_v18  ;;  %v8528_v55 = vsel %vm2852_vm0, 1e+30, %v12004_v42  ;;  %vm2829_vm9 = vcmp.eq.s32.totalorder %v8209_v15, %v2728_v46  ;;  %vm2830_vm5 = vcmp.eq.s32.totalorder %v8215_v34, %v2728_v46  ;;  %v12022_v31 = vld [vmem:[#allocation39_spill] sm:$0xff] }
 0x9ae   :  { %v2772_v4 = vpop.xlane.xlu1 %2771  ;;  %12003 = vst [vmem:[#allocation32_spill] sm:$0xff] %v8517_v61  ;;  %12007 = vst [vmem:[#allocation31_spill] sm:$0xff] %v8528_v55  ;;  %v2920_v32 = vmin.f32 %v8525_v18, %v8528_v55  ;;  %v2662_v63 = vcvt.f32.s32 %v8347_v1  ;;  %v2807_v1 = vshll.u32 %v2806_v49, 16  ;;  %v12041_v49 = vld [vmem:[#allocation35_spill] sm:$0xff] }
 0x9af   :  { %v2773_v50 = vcvt.f32.s32 %v2772_v4  ;;  %vm2861_vm13 = vmand %vm12010_vm11, %vm2829_vm9  ;;  %v12020_v4 = vld [vmem:[#allocation109_spill] sm:$0xff] }
 0x9b0   :  { %vm2862_vm6 = vmand %vm12012_vm3, %vm2830_vm5  ;;  %v8542_v45 = vsel %vm2861_vm13, 1e+30, %v12008_v14  ;;  %2921 = vmin.xlane.f32.xlu1 %v2920_v32  ;;  %vm12021_vm2 = vcmp.eq.f32.partialorder %v12019_v9, %v12020_v4  ;;  %vm12023_vm8 = vcmp.eq.f32.partialorder %v12022_v31, %v12020_v4  ;;  %v12027_v32 = vld [vmem:[#allocation110_spill] sm:$0xff] }
 0x9b1   :  { %v2628_v2 = vpop.xlane.xlu0 %2627  ;;  %v2776_v53 = vadd.s32 %v2775_v40, %v2773_v50  ;;  %12013 = vst [vmem:[#allocation72_spill] sm:$0xff] %v8542_v45  ;;  %v8549_v47 = vsel %vm2862_vm6, 1e+30, %v12011_v56 }
 0x9b2   :  { %v2629_v30 = vcvt.f32.s32 %v2628_v2  ;;  %12016 = vst [vmem:[#allocation33_spill] sm:$0xff] %v8549_v47  ;;  %v2759_v2 = vshll.u32 %v2758_v27, 16  ;;  %v12032_v27 = vld [vmem:[#allocation34_spill] sm:$0xff] }
 0x9b3   :  { %v8546_v40 = vsel %vm11337_vm10, %v12014_v39, %v2776_v53  ;;  %vm2835_vm7 = vcmp.eq.s32.totalorder %v8209_v15, %v2776_v53  ;;  %vm2836_vm12 = vcmp.eq.s32.totalorder %v8215_v34, %v2776_v53  ;;  %v12026_v53 = vld [vmem:[#allocation38_spill] sm:$0xff]  ;;  %v12029_v39 = vld [vmem:[#allocation76_spill] sm:$0xff] }
 0x9b4   :  { %v2632_v10 = vadd.s32 %v2631_v16, %v2629_v30  ;;  %12015 = vst [vmem:[#allocation73_spill] sm:$0xff] %v8546_v40  ;;  %v2935_v16 = vmin.f32 %v8542_v45, %v8549_v47  ;;  %vm2867_vm1 = vmand %vm12021_vm2, %vm2835_vm7  ;;  %vm12028_vm0 = vcmp.eq.f32.partialorder %v12026_v53, %v12027_v32  ;;  %vm12030_vm5 = vcmp.eq.f32.partialorder %v12029_v39, %v12027_v32  ;;  %v12045_v32 = vld [vmem:[#allocation112_spill] sm:$0xff] }
 0x9b5   :  { %v2676_v26 = vpop.xlane.xlu1 %2675  ;;  %vm2868_vm14 = vmand %vm12023_vm8, %vm2836_vm12  ;;  %v8568_v50 = vsel %vm2867_vm1, 1e+30, %v12019_v9 }
 0x9b6   :  { %v8555_v46 = vsel %vm11337_vm10, %v12017_v0, %v2632_v10  ;;  %v2677_v20 = vcvt.f32.s32 %v2676_v26  ;;  %vm2817_vm4 = vcmp.eq.s32.totalorder %v8209_v15, %v2632_v10  ;;  %12024 = vst [vmem:[#allocation75_spill] sm:$0xff] %v8568_v50  ;;  %vm2818_vm15 = vcmp.eq.s32.totalorder %v8215_v34, %v2632_v10  ;;  %2936 = vmin.xlane.f32.xlu0 %v2935_v16 }
 0x9b7   :  { %12018 = vst [vmem:[#allocation74_spill] sm:$0xff] %v8555_v46  ;;  %v8572_v30 = vsel %vm2868_vm14, 1e+30, %v12022_v31  ;;  %vm2849_vm9 = vmand %vm12028_vm0, %vm2817_vm4  ;;  %v12035_v31 = vld [vmem:[#allocation40_spill] sm:$0xff] }
 0x9b8   :  { %v2680_v57 = vadd.s32 %v2679_v25, %v2677_v20  ;;  %12025 = vst [vmem:[#allocation37_spill] sm:$0xff] %v8572_v30  ;;  %v2944_v56 = vmin.f32 %v8568_v50, %v8572_v30  ;;  %vm2850_vm11 = vmand %vm12030_vm5, %vm2818_vm15  ;;  %v8584_v25 = vsel %vm2849_vm9, 1e+30, %v12026_v53  ;;  %v2790_v53 = vcvt.f32.s32 %v8352_v52 }
 0x9b9   :  { %v2756_v42 = vpop.xlane.xlu0 %2755  ;;  %12031 = vst [vmem:[#allocation39_spill] sm:$0xff] %v8584_v25  ;;  %v8591_v0 = vsel %vm2850_vm11, 1e+30, %v12029_v39  ;;  %v2663_v52 = vshll.u32 %v2662_v63, 16 }
 0x9ba   :  { %v2757_v14 = vcvt.f32.s32 %v2756_v42  ;;  %v8588_v10 = vsel %vm11337_vm10, %v12032_v27, %v2680_v57  ;;  %12034 = vst [vmem:[#allocation76_spill] sm:$0xff] %v8591_v0  ;;  %vm2823_vm13 = vcmp.eq.s32.totalorder %v8209_v15, %v2680_v57  ;;  %vm2824_vm3 = vcmp.eq.s32.totalorder %v8215_v34, %v2680_v57  ;;  %2945 = vmin.xlane.f32.xlu1 %v2944_v56  ;;  %v12036_v42 = vld [vmem:[#allocation111_spill] sm:$0xff]  ;;  %v12038_v27 = vld [vmem:[#allocation77_spill] sm:$0xff] }
 0x9bb   :  { %12033 = vst [vmem:[#allocation38_spill] sm:$0xff] %v8588_v10  ;;  %v2917_v9 = vmin.f32 %v8584_v25, %v8591_v0  ;;  %vm12037_vm6 = vcmp.eq.f32.partialorder %v12035_v31, %v12036_v42  ;;  %vm12039_vm12 = vcmp.eq.f32.partialorder %v12038_v27, %v12036_v42 }
 0x9bc   :  { %v2804_v26 = vpop.xlane.xlu1 %2803  ;;  %v2760_v20 = vadd.s32 %v2759_v2, %v2757_v14  ;;  %vm2855_vm7 = vmand %vm12037_vm6, %vm2823_vm13 }
 0x9bd   :  { %v2805_v16 = vcvt.f32.s32 %v2804_v26  ;;  %vm2856_vm2 = vmand %vm12039_vm12, %vm2824_vm3  ;;  %v8605_v39 = vsel %vm2855_vm7, 1e+30, %v12035_v31  ;;  %2918 = vmin.xlane.f32.xlu0 %v2917_v9  ;;  %v12044_v31 = vld [vmem:[#allocation78_spill] sm:$0xff] }
 0x9be   :  { %12040 = vst [vmem:[#allocation34_spill] sm:$0xff] %v8605_v39  ;;  %v8609_v2 = vsel %vm11337_vm10, %v12041_v49, %v2760_v20  ;;  %v8612_v56 = vsel %vm2856_vm2, 1e+30, %v12038_v27  ;;  %vm2833_vm1 = vcmp.eq.s32.totalorder %v8209_v15, %v2760_v20  ;;  %vm2834_vm4 = vcmp.eq.s32.totalorder %v8215_v34, %v2760_v20  ;;  %v12047_v49 = vld [vmem:[#allocation43_spill] sm:$0xff]  ;;  %v12053_v27 = vld [vmem:[#allocation41_spill] sm:$0xff] }
 0x9bf   :  { %12042 = vst [vmem:[#allocation40_spill] sm:$0xff] %v8609_v2  ;;  %v2808_v57 = vadd.s32 %v2807_v1, %v2805_v16  ;;  %v2660_v14 = vpop.xlane.xlu0 %2659  ;;  %12043 = vst [vmem:[#allocation77_spill] sm:$0xff] %v8612_v56  ;;  %v2926_v42 = vmin.f32 %v8605_v39, %v8612_v56  ;;  %vm12046_vm8 = vcmp.eq.f32.partialorder %v12044_v31, %v12045_v32  ;;  %v12049_v16 = vld [vmem:[#allocation36_spill] sm:$0xff] }
 0x9c0   :  { %v2661_v26 = vcvt.f32.s32 %v2660_v14  ;;  %vm2865_vm14 = vmand %vm12046_vm8, %vm2833_vm1  ;;  %vm12050_vm15 = vcmp.eq.f32.partialorder %v12049_v16, %v12045_v32  ;;  %v12054_v14 = vld [vmem:[#allocation113_spill] sm:$0xff] }
 0x9c1   :  { %v8623_v1 = vsel %vm11337_vm10, %v12047_v49, %v2808_v57  ;;  %vm2866_vm0 = vmand %vm12050_vm15, %vm2834_vm4  ;;  %v8629_v63 = vsel %vm2865_vm14, 1e+30, %v12044_v31  ;;  %vm2839_vm9 = vcmp.eq.s32.totalorder %v8209_v15, %v2808_v57  ;;  %vm2840_vm5 = vcmp.eq.s32.totalorder %v8215_v34, %v2808_v57  ;;  %2927 = vmin.xlane.f32.xlu1 %v2926_v42  ;;  %v12056_v31 = vld [vmem:[#allocation79_spill] sm:$0xff]  ;;  %v12059_v42 = vld [vmem:[#allocation45_spill] sm:$0xff] }
 0x9c2   :  { %12048 = vst [vmem:[#allocation35_spill] sm:$0xff] %v8623_v1  ;;  %12051 = vst [vmem:[#allocation78_spill] sm:$0xff] %v8629_v63  ;;  %v2664_v20 = vadd.s32 %v2663_v52, %v2661_v26  ;;  %v8634_v9 = vsel %vm2866_vm0, 1e+30, %v12049_v16  ;;  %vm12055_vm11 = vcmp.eq.f32.partialorder %v12053_v27, %v12054_v14  ;;  %v2791_v49 = vshll.u32 %v2790_v53, 16 }
 0x9c3   :  { %12052 = vst [vmem:[#allocation43_spill] sm:$0xff] %v8634_v9  ;;  %vm2871_vm13 = vmand %vm12055_vm11, %vm2839_vm9  ;;  %v2788_v4 = vpop.xlane.xlu0 %2787  ;;  %v2941_v32 = vmin.f32 %v8629_v63, %v8634_v9  ;;  %vm12057_vm3 = vcmp.eq.f32.partialorder %v12056_v31, %v12054_v14  ;;  %v12062_v14 = vld [vmem:[#allocation42_spill] sm:$0xff]  ;;  %vm12066_vm4 = vcmp.eq.f32.partialorder %v12065_v58, %v12063_v24 }
 0x9c4   :  { %vm2872_vm6 = vmand %vm12057_vm3, %vm2840_vm5  ;;  %v8645_v57 = vsel %vm2871_vm13, 1e+30, %v12053_v27  ;;  %v8649_v52 = vsel %vm11337_vm10, %v12059_v42, %v2664_v20  ;;  %v2789_v26 = vcvt.f32.s32 %v2788_v4  ;;  %vm2821_vm7 = vcmp.eq.s32.totalorder %v8209_v15, %v2664_v20 }
 0x9c5   :  { %12058 = vst [vmem:[#allocation36_spill] sm:$0xff] %v8645_v57  ;;  %12060 = vst [vmem:[#allocation41_spill] sm:$0xff] %v8649_v52  ;;  %v8652_v16 = vsel %vm2872_vm6, 1e+30, %v12056_v31  ;;  %2942 = vmin.xlane.f32.xlu0 %v2941_v32  ;;  %vm2822_vm12 = vcmp.eq.s32.totalorder %v8215_v34, %v2664_v20  ;;  %vm12064_vm2 = vcmp.eq.f32.partialorder %v12062_v14, %v12063_v24  ;;  %v12069_v31 = vld [vmem:[#allocation44_spill] sm:$0xff] }
 0x9c6   :  { %12061 = vst [vmem:[#allocation79_spill] sm:$0xff] %v8652_v16  ;;  %v2950_v53 = vmin.f32 %v8645_v57, %v8652_v16  ;;  %vm2853_vm1 = vmand %vm12064_vm2, %vm2821_vm7  ;;  %v2792_v27 = vadd.s32 %v2791_v49, %v2789_v26  ;;  %v12071_v49 = vld [vmem:[#allocation4_spill] sm:$0xff]  ;;  %v12072_v26 = vld [vmem:[#allocation115_spill] sm:$0xff] }
 0x9c7   :  { %vm2854_vm8 = vmand %vm12066_vm4, %vm2822_vm12  ;;  %v8665_v4 = vsel %vm2853_vm1, 1e+30, %v12062_v14  ;;  %vm12073_vm0 = vcmp.eq.f32.partialorder %v12071_v49, %v12072_v26  ;;  %v12074_v14 = vld [vmem:[#allocation81_spill] sm:$0xff] }
 0x9c8   :  { %12067 = vst [vmem:[#allocation45_spill] sm:$0xff] %v8665_v4  ;;  %2951 = vmin.xlane.f32.xlu1 %v2950_v53  ;;  %v8668_v32 = vsel %vm2854_vm8, 1e+30, %v12065_v58  ;;  %v8672_v42 = vsel %vm11337_vm10, %v12069_v31, %v2792_v27  ;;  %vm2837_vm14 = vcmp.eq.s32.totalorder %v8209_v15, %v2792_v27  ;;  %vm2838_vm15 = vcmp.eq.s32.totalorder %v8215_v34, %v2792_v27 }
 0x9c9   :  { %12068 = vst [vmem:[#allocation42_spill] sm:$0xff] %v8668_v32  ;;  %12070 = vst [vmem:[#allocation80_spill] sm:$0xff] %v8672_v42  ;;  %v2923_v20 = vmin.f32 %v8665_v4, %v8668_v32  ;;  %vm12075_vm5 = vcmp.eq.f32.partialorder %v12074_v14, %v12072_v26 }
 0x9ca   :  { %vm2869_vm9 = vmand %vm12073_vm0, %vm2837_vm14 }
 0x9cb   :  { %2924 = vmin.xlane.f32.xlu0 %v2923_v20  ;;  %vm2870_vm11 = vmand %vm12075_vm5, %vm2838_vm15  ;;  %v8685_v58 = vsel %vm2869_vm9, 1e+30, %v12071_v49 }
 0x9cc   :  { %12076 = vst [vmem:[#allocation44_spill] sm:$0xff] %v8685_v58  ;;  %v8688_v53 = vsel %vm2870_vm11, 1e+30, %v12074_v14 }
 0x9cd   :  { %12077 = vst [vmem:[#allocation4_spill] sm:$0xff] %v8688_v53  ;;  %v2947_v31 = vmin.f32 %v8685_v58, %v8688_v53 }
 0x9cf   :  { %2948 = vmin.xlane.f32.xlu0 %v2947_v31 }
 0xa24   :  { %v8692_v27 = vpop.xlane.xlu1 %2909 }
 0xa25   :  { %12078 = vst [vmem:[#allocation81_spill] sm:$0xff] %v8692_v27  ;;  %vm2955_vm13 = vcmp.eq.f32.partialorder %v8372_v13, %v8692_v27  ;;  %vm2956_vm3 = vcmp.eq.f32.partialorder %v8375_v51, %v8692_v27 }
 0xa26   :  { %v2987_v20 = vsel %vm2955_vm13, %v8209_v15, 2147483647  ;;  %v2988_v49 = vsel %vm2956_vm3, %v8215_v34, 2147483647 }
 0xa27   :  { %vm3033_vm6 = vcmp.lt.s32.totalorder %v2987_v20, %v2988_v49 }
 0xa28   :  { %v8706_v14 = vsel %vm3033_vm6, %v2987_v20, %v2988_v49  ;;  %v8708_v31 = vpop.xlane.xlu1 %2933 }
 0xa29   :  { %12079 = vst [vmem:[#allocation116_spill] sm:$0xff] %v8708_v31  ;;  %v3036_v26 = vshra.s32 %v8706_v14, 16  ;;  %vm2971_vm7 = vcmp.eq.f32.partialorder %v8394_v62, %v8708_v31  ;;  %vm2972_vm12 = vcmp.eq.f32.partialorder %v8401_v17, %v8708_v31 }
 0xa2a   :  { %v3003_v24 = vsel %vm2971_vm7, %v8209_v15, 2147483647  ;;  %v3004_v20 = vsel %vm2972_vm12, %v8215_v34, 2147483647 }
 0xa2b   :  { %v8723_v49 = vcvt.s32.f32 %v3036_v26  ;;  %v8725_v12 = vpop.xlane.xlu0 %2906  ;;  %vm3161_vm2 = vcmp.lt.s32.totalorder %v3003_v24, %v3004_v20 }
 0xa2c   :  { %12080 = vst [vmem:[#allocation117_spill] sm:$0xff] %v8725_v12  ;;  %vm2953_vm1 = vcmp.eq.f32.partialorder %v8414_v21, %v8725_v12  ;;  %vm2954_vm4 = vcmp.eq.f32.partialorder %v8418_v5, %v8725_v12  ;;  %v8732_v37 = vsel %vm3161_vm2, %v3003_v24, %v3004_v20 }
 0xa2d   :  { %3039 = vmin.xlane.f32.xlu1 %v8723_v49  ;;  %v2985_v59 = vsel %vm2953_vm1, %v8209_v15, 2147483647  ;;  %v2986_v26 = vsel %vm2954_vm4, %v8215_v34, 2147483647  ;;  %v3164_v8 = vshra.s32 %v8732_v37, 16 }
 0xa2e   :  { %vm3017_vm8 = vcmp.lt.s32.totalorder %v2985_v59, %v2986_v26 }
 0xa2f   :  { %v8743_v29 = vcvt.s32.f32 %v3164_v8  ;;  %v8745_v48 = vsel %vm3017_vm8, %v2985_v59, %v2986_v26 }
 0xa30   :  { %v8747_v33 = vpop.xlane.xlu1 %2915  ;;  %v3020_v24 = vshra.s32 %v8745_v48, 16 }
 0xa31   :  { %12081 = vst [vmem:[#allocation118_spill] sm:$0xff] %v8747_v33  ;;  %vm2959_vm14 = vcmp.eq.f32.partialorder %v8436_v38, %v8747_v33  ;;  %vm2960_vm15 = vcmp.eq.f32.partialorder %v8443_v41, %v8747_v33  ;;  %3167 = vmin.xlane.f32.xlu1 %v8743_v29 }
 0xa32   :  { %v2991_v8 = vsel %vm2959_vm14, %v8209_v15, 2147483647  ;;  %v2992_v59 = vsel %vm2960_vm15, %v8215_v34, 2147483647  ;;  %v8763_v20 = vcvt.s32.f32 %v3020_v24  ;;  %v8765_v26 = vpop.xlane.xlu0 %2930 }
 0xa33   :  { %12082 = vst [vmem:[#allocation119_spill] sm:$0xff] %v8765_v26  ;;  %vm3065_vm0 = vcmp.lt.s32.totalorder %v2991_v8, %v2992_v59  ;;  %vm2969_vm9 = vcmp.eq.f32.partialorder %v8458_v7, %v8765_v26  ;;  %vm2970_vm5 = vcmp.eq.f32.partialorder %v8465_v19, %v8765_v26 }
 0xa34   :  { %3023 = vmin.xlane.f32.xlu0 %v8763_v20  ;;  %v8772_v42 = vsel %vm3065_vm0, %v2991_v8, %v2992_v59  ;;  %v3001_v52 = vsel %vm2969_vm9, %v8209_v15, 2147483647  ;;  %v3002_v24 = vsel %vm2970_vm5, %v8215_v34, 2147483647 }
 0xa35   :  { %v3068_v1 = vshra.s32 %v8772_v42, 16  ;;  %v8783_v2 = vpop.xlane.xlu1 %2939  ;;  %vm3145_vm11 = vcmp.lt.s32.totalorder %v3001_v52, %v3002_v24 }
 0xa36   :  { %12083 = vst [vmem:[#allocation120_spill] sm:$0xff] %v8783_v2  ;;  %vm2975_vm6 = vcmp.eq.f32.partialorder %v8479_v3, %v8783_v2  ;;  %vm11338_vm2 = vcmp.eq.f32.partialorder %v8482_v23, %v8783_v2  ;;  %v8791_v59 = vsel %vm3145_vm11, %v3001_v52, %v3002_v24 }
 0xa37   :  { %v8789_v8 = vcvt.s32.f32 %v3068_v1  ;;  %v3007_v10 = vsel %vm2975_vm6, %v8209_v15, 2147483647  ;;  %v3008_v46 = vsel %vm11338_vm2, %v8215_v34, 2147483647  ;;  %v3148_v40 = vshra.s32 %v8791_v59, 16 }
 0xa38   :  { %vm3193_vm8 = vcmp.lt.s32.totalorder %v3007_v10, %v3008_v46 }
 0xa39   :  { %3071 = vmin.xlane.f32.xlu1 %v8789_v8  ;;  %v8803_v61 = vcvt.s32.f32 %v3148_v40  ;;  %v8805_v1 = vsel %vm3193_vm8, %v3007_v10, %v3008_v46  ;;  %v8807_v52 = vpop.xlane.xlu0 %2912 }
 0xa3a   :  { %12084 = vst [vmem:[#allocation121_spill] sm:$0xff] %v8807_v52  ;;  %v3196_v24 = vshra.s32 %v8805_v1, 16  ;;  %vm11346_vm0 = vcmp.eq.f32.partialorder %v8504_v28, %v8807_v52  ;;  %vm11345_vm11 = vcmp.eq.f32.partialorder %v8509_v60, %v8807_v52 }
 0xa3b   :  { %3151 = vmin.xlane.f32.xlu0 %v8803_v61  ;;  %v2989_v40 = vsel %vm11346_vm0, %v8209_v15, 2147483647  ;;  %v2990_v46 = vsel %vm11345_vm11, %v8215_v34, 2147483647 }
 0xa3c   :  { %v8825_v54 = vcvt.s32.f32 %v3196_v24  ;;  %vm3049_vm2 = vcmp.lt.s32.totalorder %v2989_v40, %v2990_v46 }
 0xa3d   :  { %v8823_v10 = vpop.xlane.xlu1 %2921  ;;  %v8840_v24 = vsel %vm3049_vm2, %v2989_v40, %v2990_v46 }
 0xa3e   :  { %12085 = vst [vmem:[#allocation122_spill] sm:$0xff] %v8823_v10  ;;  %vm11347_vm8 = vcmp.eq.f32.partialorder %v8525_v18, %v8823_v10  ;;  %vm11356_vm10 = vcmp.eq.f32.partialorder %v8528_v55, %v8823_v10  ;;  %3199 = vmin.xlane.f32.xlu1 %v8825_v54  ;;  %v3052_v36 = vshra.s32 %v8840_v24, 16 }
 0xa3f   :  { %v2995_v28 = vsel %vm11347_vm8, %v8209_v15, 2147483647  ;;  %v2996_v60 = vsel %vm11356_vm10, %v8215_v34, 2147483647 }
 0xa40   :  { %vm3097_vm11 = vcmp.lt.s32.totalorder %v2995_v28, %v2996_v60  ;;  %v8859_v46 = vcvt.s32.f32 %v3052_v36 }
 0xa41   :  { %v8849_v18 = vsel %vm3097_vm11, %v2995_v28, %v2996_v60 }
 0xa42   :  { %v3100_v10 = vshra.s32 %v8849_v18, 16  ;;  %3055 = vmin.xlane.f32.xlu0 %v8859_v46 }
 0xa43   :  { %v8842_v52 = vpop.xlane.xlu0 %2936 }
 0xa44   :  { %12086 = vst [vmem:[#allocation123_spill] sm:$0xff] %v8842_v52  ;;  %vm11364_vm0 = vcmp.eq.f32.partialorder %v8542_v45, %v8842_v52  ;;  %vm11363_vm8 = vcmp.eq.f32.partialorder %v8549_v47, %v8842_v52  ;;  %v8869_v28 = vcvt.s32.f32 %v3100_v10 }
 0xa45   :  { %v3005_v55 = vsel %vm11364_vm0, %v8209_v15, 2147483647  ;;  %v3006_v40 = vsel %vm11363_vm8, %v8215_v34, 2147483647 }
 0xa46   :  { %vm3177_vm2 = vcmp.lt.s32.totalorder %v3005_v55, %v3006_v40  ;;  %3103 = vmin.xlane.f32.xlu1 %v8869_v28 }
 0xa47   :  { %v8862_v23 = vpop.xlane.xlu1 %2945  ;;  %v8871_v60 = vsel %vm3177_vm2, %v3005_v55, %v3006_v40 }
 0xa48   :  { %12087 = vst [vmem:[#allocation124_spill] sm:$0xff] %v8862_v23  ;;  %vm11372_vm11 = vcmp.eq.f32.partialorder %v8568_v50, %v8862_v23  ;;  %vm11371_vm10 = vcmp.eq.f32.partialorder %v8572_v30, %v8862_v23  ;;  %v3180_v45 = vshra.s32 %v8871_v60, 16 }
 0xa49   :  { %v3011_v36 = vsel %vm11372_vm11, %v8209_v15, 2147483647  ;;  %v3012_v47 = vsel %vm11371_vm10, %v8215_v34, 2147483647 }
 0xa4a   :  { %v8881_v52 = vpop.xlane.xlu0 %2918  ;;  %vm3225_vm0 = vcmp.lt.s32.totalorder %v3011_v36, %v3012_v47  ;;  %v8897_v40 = vcvt.s32.f32 %v3180_v45 }
 0xa4b   :  { %12088 = vst [vmem:[#allocation125_spill] sm:$0xff] %v8881_v52  ;;  %vm11373_vm8 = vcmp.eq.f32.partialorder %v8584_v25, %v8881_v52  ;;  %vm11380_vm2 = vcmp.eq.f32.partialorder %v8591_v0, %v8881_v52  ;;  %v8899_v30 = vsel %vm3225_vm0, %v3011_v36, %v3012_v47 }
 0xa4c   :  { %v2993_v55 = vsel %vm11373_vm8, %v8209_v15, 2147483647  ;;  %v2994_v10 = vsel %vm11380_vm2, %v8215_v34, 2147483647  ;;  %v3228_v50 = vshra.s32 %v8899_v30, 16  ;;  %3183 = vmin.xlane.f32.xlu0 %v8897_v40 }
 0xa4d   :  { %vm3081_vm10 = vcmp.lt.s32.totalorder %v2993_v55, %v2994_v10 }
 0xa4e   :  { %v8901_v23 = vpop.xlane.xlu1 %2927  ;;  %v8909_v25 = vsel %vm3081_vm10, %v2993_v55, %v2994_v10  ;;  %v8919_v36 = vcvt.s32.f32 %v3228_v50 }
 0xa4f   :  { %12089 = vst [vmem:[#allocation126_spill] sm:$0xff] %v8901_v23  ;;  %vm11388_vm11 = vcmp.eq.f32.partialorder %v8605_v39, %v8901_v23  ;;  %vm11387_vm8 = vcmp.eq.f32.partialorder %v8612_v56, %v8901_v23  ;;  %v3084_v0 = vshra.s32 %v8909_v25, 16 }
 0xa50   :  { %v2999_v45 = vsel %vm11388_vm11, %v8209_v15, 2147483647  ;;  %v3000_v47 = vsel %vm11387_vm8, %v8215_v34, 2147483647  ;;  %3231 = vmin.xlane.f32.xlu1 %v8919_v36 }
 0xa51   :  { %vm3129_vm0 = vcmp.lt.s32.totalorder %v2999_v45, %v3000_v47  ;;  %v8929_v55 = vcvt.s32.f32 %v3084_v0 }
 0xa52   :  { %v8922_v52 = vpop.xlane.xlu0 %2942  ;;  %v8931_v10 = vsel %vm3129_vm0, %v2999_v45, %v3000_v47 }
 0xa53   :  { %12090 = vst [vmem:[#allocation127_spill] sm:$0xff] %v8922_v52  ;;  %vm11396_vm10 = vcmp.eq.f32.partialorder %v8629_v63, %v8922_v52  ;;  %vm11395_vm2 = vcmp.eq.f32.partialorder %v8634_v9, %v8922_v52  ;;  %v3132_v39 = vshra.s32 %v8931_v10, 16  ;;  %3087 = vmin.xlane.f32.xlu0 %v8929_v55 }
 0xa54   :  { %v3009_v50 = vsel %vm11396_vm10, %v8209_v15, 2147483647  ;;  %v3010_v56 = vsel %vm11395_vm2, %v8215_v34, 2147483647 }
 0xa55   :  { %v8941_v23 = vpop.xlane.xlu1 %2951  ;;  %vm3209_vm11 = vcmp.lt.s32.totalorder %v3009_v50, %v3010_v56  ;;  %v8957_v47 = vcvt.s32.f32 %v3132_v39 }
 0xa56   :  { %12091 = vst [vmem:[#allocation128_spill] sm:$0xff] %v8941_v23  ;;  %vm11397_vm8 = vcmp.eq.f32.partialorder %v8645_v57, %v8941_v23  ;;  %vm11420_vm0 = vcmp.eq.f32.partialorder %v8652_v16, %v8941_v23  ;;  %v8959_v9 = vsel %vm3209_vm11, %v3009_v50, %v3010_v56 }
 0xa57   :  { %v3015_v0 = vsel %vm11397_vm8, %v8209_v15, 2147483647  ;;  %v3016_v45 = vsel %vm11420_vm0, %v8215_v34, 2147483647  ;;  %v3212_v63 = vshra.s32 %v8959_v9, 16  ;;  %3135 = vmin.xlane.f32.xlu1 %v8957_v47 }
 0xa58   :  { %v8961_v52 = vpop.xlane.xlu0 %2924  ;;  %vm3257_vm2 = vcmp.lt.s32.totalorder %v3015_v0, %v3016_v45 }
 0xa59   :  { %12092 = vst [vmem:[#allocation129_spill] sm:$0xff] %v8961_v52  ;;  %vm11404_vm10 = vcmp.eq.f32.partialorder %v8665_v4, %v8961_v52  ;;  %vm11419_vm8 = vcmp.eq.f32.partialorder %v8668_v32, %v8961_v52  ;;  %v8969_v57 = vsel %vm3257_vm2, %v3015_v0, %v3016_v45  ;;  %v8979_v50 = vcvt.s32.f32 %v3212_v63 }
 0xa5a   :  { %v2997_v39 = vsel %vm11404_vm10, %v8209_v15, 2147483647  ;;  %v2998_v56 = vsel %vm11419_vm8, %v8215_v34, 2147483647  ;;  %v3260_v16 = vshra.s32 %v8969_v57, 16 }
 0xa5b   :  { %vm3113_vm11 = vcmp.lt.s32.totalorder %v2997_v39, %v2998_v56  ;;  %3215 = vmin.xlane.f32.xlu0 %v8979_v50 }
 0xa5c   :  { %v8982_v23 = vpop.xlane.xlu0 %2948  ;;  %v8985_v0 = vcvt.s32.f32 %v3260_v16  ;;  %v8987_v45 = vsel %vm3113_vm11, %v2997_v39, %v2998_v56 }
 0xa5d   :  { %12093 = vst [vmem:[#allocation130_spill] sm:$0xff] %v8982_v23  ;;  %vm11418_vm2 = vcmp.eq.f32.partialorder %v8685_v58, %v8982_v23  ;;  %vm11413_vm10 = vcmp.eq.f32.partialorder %v8688_v53, %v8982_v23  ;;  %v3116_v63 = vshra.s32 %v8987_v45, 16 }
 0xa5e   :  { %v3013_v32 = vsel %vm11418_vm2, %v8209_v15, 2147483647  ;;  %v3014_v16 = vsel %vm11413_vm10, %v8215_v34, 2147483647  ;;  %3263 = vmin.xlane.f32.xlu1 %v8985_v0  ;;  %v3035_v15 = vand.u32 65535, %v8706_v14 }
 0xa5f   :  { %v9003_v39 = vcvt.s32.f32 %v3116_v63  ;;  %vm3241_vm11 = vcmp.lt.s32.totalorder %v3013_v32, %v3014_v16  ;;  %v3163_v63 = vand.u32 65535, %v8732_v37  ;;  %v3067_v37 = vand.u32 65535, %v8772_v42 }
 0xa60   :  { %v9005_v56 = vsel %vm3241_vm11, %v3013_v32, %v3014_v16  ;;  %v3037_v34 = vcvt.s32.f32 %v3035_v15  ;;  %v3019_v16 = vand.u32 65535, %v8745_v48  ;;  %v3147_v48 = vand.u32 65535, %v8791_v59 }
 0xa61   :  { %3119 = vmin.xlane.f32.xlu0 %v9003_v39  ;;  %v3244_v52 = vshra.s32 %v9005_v56, 16 }
 0xa62   :  { %v3021_v15 = vcvt.s32.f32 %v3019_v16  ;;  %v3149_v16 = vcvt.s32.f32 %v3147_v48 }
 0xa63   :  { %v9009_v4 = vcvt.s32.f32 %v3244_v52  ;;  %v3165_v52 = vcvt.s32.f32 %v3163_v63  ;;  %v3069_v63 = vcvt.s32.f32 %v3067_v37 }
 0xa65   :  { %3247 = vmin.xlane.f32.xlu0 %v9009_v4 }
 0xaba   :  { %v9013_v58 = vpop.xlane.xlu1 %3039 }
 0xabb   :  { %vm3041_vm10 = vcmp.eq.f32.partialorder %v8723_v49, %v9013_v58 }
 0xabc   :  { %v3042_v32 = vsel %vm3041_vm10, %v3037_v34, inf }
 0xabd   :  { %3043 = vmin.xlane.f32.xlu1 %v3042_v32  ;;  %v3195_v32 = vand.u32 65535, %v8805_v1  ;;  %v3099_v1 = vand.u32 65535, %v8849_v18 }
 0xabe   :  { %v9019_v53 = vpop.xlane.xlu1 %3167 }
 0xabf   :  { %vm3169_vm11 = vcmp.eq.f32.partialorder %v8743_v29, %v9019_v53  ;;  %v3197_v59 = vcvt.s32.f32 %v3195_v32 }
 0xac0   :  { %v3170_v23 = vsel %vm3169_vm11, %v3165_v52, inf }
 0xac1   :  { %v9023_v14 = vpop.xlane.xlu0 %3023  ;;  %3171 = vmin.xlane.f32.xlu1 %v3170_v23 }
 0xac2   :  { %vm3025_vm2 = vcmp.eq.f32.partialorder %v8763_v20, %v9023_v14 }
 0xac3   :  { %v3026_v49 = vsel %vm3025_vm2, %v3021_v15, inf }
 0xac4   :  { %3027 = vmin.xlane.f32.xlu0 %v3026_v49 }
 0xac6   :  { %v9029_v34 = vpop.xlane.xlu1 %3071 }
 0xac7   :  { %vm3073_vm10 = vcmp.eq.f32.partialorder %v8789_v8, %v9029_v34  ;;  %v3051_v8 = vand.u32 65535, %v8840_v24  ;;  %v3227_v24 = vand.u32 65535, %v8899_v30 }
 0xac8   :  { %v3074_v29 = vsel %vm3073_vm10, %v3069_v63, inf  ;;  %v9034_v23 = vpop.xlane.xlu0 %3151  ;;  %v3101_v63 = vcvt.s32.f32 %v3099_v1 }
 0xac9   :  { %3075 = vmin.xlane.f32.xlu1 %v3074_v29  ;;  %vm3153_vm11 = vcmp.eq.f32.partialorder %v8803_v61, %v9034_v23  ;;  %v3053_v37 = vcvt.s32.f32 %v3051_v8  ;;  %v3179_v61 = vand.u32 65535, %v8871_v60 }
 0xaca   :  { %v3154_v42 = vsel %vm3153_vm11, %v3149_v16, inf  ;;  %v3229_v16 = vcvt.s32.f32 %v3227_v24 }
 0xacb   :  { %3155 = vmin.xlane.f32.xlu0 %v3154_v42  ;;  %v9038_v20 = vpop.xlane.xlu1 %3199  ;;  %v3181_v29 = vcvt.s32.f32 %v3179_v61 }
 0xacc   :  { %vm3201_vm2 = vcmp.eq.f32.partialorder %v8825_v54, %v9038_v20 }
 0xacd   :  { %v3202_v52 = vsel %vm3201_vm2, %v3197_v59, inf }
 0xace   :  { %3203 = vmin.xlane.f32.xlu1 %v3202_v52 }
 0xacf   :  { %v9044_v15 = vpop.xlane.xlu0 %3055 }
 0xad0   :  { %vm3057_vm10 = vcmp.eq.f32.partialorder %v8859_v46, %v9044_v15  ;;  %v3083_v46 = vand.u32 65535, %v8909_v25  ;;  %v3211_v25 = vand.u32 65535, %v8959_v9 }
 0xad1   :  { %v3058_v49 = vsel %vm3057_vm10, %v3053_v37, inf }
 0xad2   :  { %3059 = vmin.xlane.f32.xlu0 %v3058_v49  ;;  %v3085_v59 = vcvt.s32.f32 %v3083_v46  ;;  %v3213_v37 = vcvt.s32.f32 %v3211_v25 }
 0xad3   :  { %v9049_v48 = vpop.xlane.xlu1 %3103 }
 0xad4   :  { %vm3105_vm11 = vcmp.eq.f32.partialorder %v8869_v28, %v9049_v48  ;;  %v3131_v28 = vand.u32 65535, %v8931_v10 }
 0xad5   :  { %v3106_v54 = vsel %vm3105_vm11, %v3101_v63, inf }
 0xad6   :  { %3107 = vmin.xlane.f32.xlu1 %v3106_v54  ;;  %v3133_v52 = vcvt.s32.f32 %v3131_v28  ;;  %v3243_v54 = vand.u32 65535, %v9005_v56  ;;  %v3174_v56 = vcvt.f32.s32 %v9019_v53 }
 0xad8   :  { %v3245_v24 = vcvt.s32.f32 %v3243_v54 }
 0xad9   :  { %v9054_v18 = vpop.xlane.xlu0 %3183 }
 0xada   :  { %vm3185_vm2 = vcmp.eq.f32.partialorder %v8897_v40, %v9054_v18 }
 0xadb   :  { %v3186_v60 = vsel %vm3185_vm2, %v3181_v29, inf }
 0xadc   :  { %3187 = vmin.xlane.f32.xlu0 %v3186_v60 }
 0xadd   :  { %v9059_v32 = vpop.xlane.xlu1 %3231 }
 0xade   :  { %vm3233_vm10 = vcmp.eq.f32.partialorder %v8919_v36, %v9059_v32  ;;  %v3259_v36 = vand.u32 65535, %v8969_v57 }
 0xadf   :  { %v3234_v42 = vsel %vm3233_vm10, %v3229_v16, inf }
 0xae0   :  { %v9064_v30 = vpop.xlane.xlu0 %3087  ;;  %3235 = vmin.xlane.f32.xlu1 %v3234_v42  ;;  %v3261_v49 = vcvt.s32.f32 %v3259_v36 }
 0xae1   :  { %vm3089_vm11 = vcmp.eq.f32.partialorder %v8929_v55, %v9064_v30  ;;  %v3115_v55 = vand.u32 65535, %v8987_v45 }
 0xae2   :  { %v3090_v40 = vsel %vm3089_vm11, %v3085_v59, inf }
 0xae3   :  { %3091 = vmin.xlane.f32.xlu0 %v3090_v40  ;;  %v3117_v63 = vcvt.s32.f32 %v3115_v55  ;;  %v9099_v40 = vld [vmem:[#allocation3 + $0x10] sm:$0xff]  ;;  %v3078_v55 = vcvt.f32.s32 %v9029_v34 }
 0xae4   :  { %v9069_v8 = vpop.xlane.xlu1 %3135 }
 0xae5   :  { %vm3137_vm2 = vcmp.eq.f32.partialorder %v8957_v47, %v9069_v8 }
 0xae6   :  { %v3138_v10 = vsel %vm3137_vm2, %v3133_v52, inf }
 0xae7   :  { %3139 = vmin.xlane.f32.xlu1 %v3138_v10 }
 0xae8   :  { %v9074_v1 = vpop.xlane.xlu0 %3215 }
 0xae9   :  { %vm3217_vm10 = vcmp.eq.f32.partialorder %v8979_v50, %v9074_v1 }
 0xaea   :  { %v3218_v9 = vsel %vm3217_vm10, %v3213_v37, inf }
 0xaeb   :  { %v9079_v61 = vpop.xlane.xlu1 %3263  ;;  %3219 = vmin.xlane.f32.xlu0 %v3218_v9 }
 0xaec   :  { %vm3265_vm11 = vcmp.eq.f32.partialorder %v8985_v0, %v9079_v61  ;;  %v3046_v0 = vcvt.f32.s32 %v9013_v58  ;;  %v3175_v58 = vshll.u32 %v3174_v56, 16 }
 0xaed   :  { %v3266_v47 = vsel %vm3265_vm11, %v3261_v49, inf  ;;  %vm11437_vm11 = vcmask 39936  }
 0xaee   :  { %v9083_v57 = vpop.xlane.xlu0 %3119  ;;  %3267 = vmin.xlane.f32.xlu1 %v3266_v47  ;;  %v3047_v60 = vshll.u32 %v3046_v0, 16 }
 0xaef   :  { %vm3121_vm2 = vcmp.eq.f32.partialorder %v9003_v39, %v9083_v57  ;;  %v3030_v39 = vcvt.f32.s32 %v9023_v14 }
 0xaf0   :  { %v3122_v50 = vsel %vm3121_vm2, %v3117_v63, inf }
 0xaf1   :  { %3123 = vmin.xlane.f32.xlu0 %v3122_v50  ;;  %v3031_v36 = vshll.u32 %v3030_v39, 16 }
 0xaf2   :  { %v9088_v45 = vpop.xlane.xlu0 %3247 }
 0xaf3   :  { %vm3249_vm10 = vcmp.eq.f32.partialorder %v9009_v4, %v9088_v45  ;;  %v9102_v4 = vld [vmem:[#allocation3 + $0x18] sm:$0xff] }
 0xaf4   :  { %v3250_v29 = vsel %vm3249_vm10, %v3245_v24, inf }
 0xaf5   :  { %3251 = vmin.xlane.f32.xlu0 %v3250_v29 }
 0xb4a   :  { %v3044_v46 = vpop.xlane.xlu1 %3043 }
 0xb4b   :  { %v3045_v16 = vcvt.f32.s32 %v3044_v46 }
 0xb4d   :  { %v3048_v28 = vadd.s32 %v3047_v60, %v3045_v16  ;;  %v3062_v16 = vcvt.f32.s32 %v9044_v15 }
 0xb4e   :  { %v3172_v59 = vpop.xlane.xlu1 %3171 }
 0xb4f   :  { %v9097_v42 = vsel %vm11437_vm11, %v8361_v43, %v3048_v28  ;;  %vm3275_vm2 = vcmp.eq.s32.totalorder %v9099_v40, %v3048_v28  ;;  %vm3276_vm10 = vcmp.eq.s32.totalorder %v9102_v4, %v3048_v28  ;;  %v3173_v25 = vcvt.f32.s32 %v3172_v59 }
 0xb50   :  { %vm3307_vm8 = vmand %vm2955_vm13, %vm3275_vm2 }
 0xb51   :  { %vm3308_vm0 = vmand %vm2956_vm3, %vm3276_vm10  ;;  %v9112_v43 = vsel %vm3307_vm8, 1e+30, %v8372_v13  ;;  %v3176_v53 = vadd.s32 %v3175_v58, %v3173_v25  ;;  %v3028_v14 = vpop.xlane.xlu0 %3027 }
 0xb52   :  { %v9115_v52 = vsel %vm3308_vm0, 1e+30, %v8375_v51  ;;  %v3029_v10 = vcvt.f32.s32 %v3028_v14  ;;  %v3158_v51 = vcvt.f32.s32 %v9034_v23  ;;  %v3079_v23 = vshll.u32 %v3078_v55, 16 }
 0xb53   :  { %v3372_v37 = vmin.f32 %v9112_v43, %v9115_v52  ;;  %v9122_v9 = vsel %vm11437_vm11, %v8382_v35, %v3176_v53  ;;  %vm3291_vm13 = vcmp.eq.s32.totalorder %v9099_v40, %v3176_v53  ;;  %vm3292_vm3 = vcmp.eq.s32.totalorder %v9102_v4, %v3176_v53 }
 0xb54   :  { %v3032_v13 = vadd.s32 %v3031_v36, %v3029_v10  ;;  %vm3323_vm8 = vmand %vm2971_vm7, %vm3291_vm13  ;;  %v3159_v29 = vshll.u32 %v3158_v51, 16  ;;  %v12094_v36 = vld [vmem:[#allocation26_spill] sm:$0xff]  ;;  %v3238_v51 = vcvt.f32.s32 %v9059_v32  ;;  %v12101_v32 = vld [vmem:[#allocation121_spill] sm:$0xff] }
 0xb55   :  { %3373 = vmin.xlane.f32.xlu1 %v3372_v37  ;;  %vm3324_vm0 = vmand %vm2972_vm12, %vm3292_vm3  ;;  %v9134_v34 = vsel %vm3323_vm8, 1e+30, %v8394_v62 }
 0xb56   :  { %v9138_v35 = vsel %vm11437_vm11, %v8398_v11, %v3032_v13  ;;  %v3076_v49 = vpop.xlane.xlu1 %3075  ;;  %v9141_v47 = vsel %vm3324_vm0, 1e+30, %v8401_v17  ;;  %vm3273_vm2 = vcmp.eq.s32.totalorder %v9099_v40, %v3032_v13  ;;  %vm3274_vm7 = vcmp.eq.s32.totalorder %v9102_v4, %v3032_v13 }
 0xb57   :  { %v3077_v63 = vcvt.f32.s32 %v3076_v49  ;;  %v3396_v54 = vmin.f32 %v9134_v34, %v9141_v47  ;;  %vm3305_vm12 = vmand %vm2953_vm1, %vm3273_vm2  ;;  %v3206_v11 = vcvt.f32.s32 %v9038_v20  ;;  %v12098_v49 = vld [vmem:[#allocation27_spill] sm:$0xff] }
 0xb58   :  { %vm3306_vm10 = vmand %vm2954_vm4, %vm3274_vm7  ;;  %v9154_v62 = vsel %vm3305_vm12, 1e+30, %v8414_v21  ;;  %v3156_v50 = vpop.xlane.xlu0 %3155  ;;  %vm12095_vm7 = vcmp.eq.f32.partialorder %v12094_v36, %v8783_v2 }
 0xb59   :  { %v3080_v17 = vadd.s32 %v3079_v23, %v3077_v63  ;;  %3397 = vmin.xlane.f32.xlu1 %v3396_v54  ;;  %v9158_v24 = vsel %vm3306_vm10, 1e+30, %v8418_v5  ;;  %v3157_v0 = vcvt.f32.s32 %v3156_v50  ;;  %v3207_v5 = vshll.u32 %v3206_v11, 16  ;;  %v12100_v50 = vld [vmem:[#allocation30_spill] sm:$0xff] }
 0xb5a   :  { %v3369_v46 = vmin.f32 %v9154_v62, %v9158_v24  ;;  %v3094_v11 = vcvt.f32.s32 %v9064_v30  ;;  %v3142_v30 = vcvt.f32.s32 %v9069_v8 }
 0xb5b   :  { %v9164_v60 = vsel %vm11437_vm11, %v8424_v44, %v3080_v17  ;;  %vm3279_vm1 = vcmp.eq.s32.totalorder %v9099_v40, %v3080_v17  ;;  %vm3280_vm4 = vcmp.eq.s32.totalorder %v9102_v4, %v3080_v17  ;;  %v3160_v21 = vadd.s32 %v3159_v29, %v3157_v0  ;;  %v3204_v20 = vpop.xlane.xlu1 %3203  ;;  %v12103_v29 = vld [vmem:[#allocation28_spill] sm:$0xff] }
 0xb5c   :  { %3370 = vmin.xlane.f32.xlu0 %v3369_v46  ;;  %vm3311_vm13 = vmand %vm2959_vm14, %vm3279_vm1  ;;  %v3205_v56 = vcvt.f32.s32 %v3204_v20  ;;  %vm12102_vm1 = vcmp.eq.f32.partialorder %v12100_v50, %v12101_v32  ;;  %v12105_v46 = vld [vmem:[#allocation29_spill] sm:$0xff] }
 0xb5d   :  { %vm3312_vm3 = vmand %vm2960_vm15, %vm3280_vm4  ;;  %v9176_v44 = vsel %vm3311_vm13, 1e+30, %v8436_v38  ;;  %v9180_v28 = vsel %vm11437_vm11, %v8440_v6, %v3160_v21  ;;  %vm3289_vm14 = vcmp.eq.s32.totalorder %v9099_v40, %v3160_v21  ;;  %vm3290_vm8 = vcmp.eq.s32.totalorder %v9102_v4, %v3160_v21 }
 0xb5e   :  { %v9183_v39 = vsel %vm3312_vm3, 1e+30, %v8443_v41  ;;  %v3208_v15 = vadd.s32 %v3207_v5, %v3205_v56  ;;  %vm3321_vm15 = vmand %vm2969_vm9, %vm3289_vm14  ;;  %v3110_v38 = vcvt.f32.s32 %v9049_v48  ;;  %v3063_v48 = vshll.u32 %v3062_v16, 16  ;;  %v12109_v56 = vld [vmem:[#allocation71_spill] sm:$0xff] }
 0xb5f   :  { %v3378_v59 = vmin.f32 %v9176_v44, %v9183_v39  ;;  %vm3322_vm0 = vmand %vm2970_vm5, %vm3290_vm8  ;;  %v9197_v6 = vsel %vm3321_vm15, 1e+30, %v8458_v7  ;;  %v3060_v58 = vpop.xlane.xlu0 %3059  ;;  %v3190_v7 = vcvt.f32.s32 %v9054_v18  ;;  %vm12106_vm13 = vcmp.eq.f32.partialorder %v12105_v46, %v12101_v32 }
 0xb60   :  { %v9201_v41 = vsel %vm11437_vm11, %v8462_v22, %v3208_v15  ;;  %v9204_v25 = vsel %vm3322_vm0, 1e+30, %v8465_v19  ;;  %vm3295_vm9 = vcmp.eq.s32.totalorder %v9099_v40, %v3208_v15  ;;  %vm3296_vm2 = vcmp.eq.s32.totalorder %v9102_v4, %v3208_v15  ;;  %v12110_v15 = vld [vmem:[#allocation122_spill] sm:$0xff] }
 0xb61   :  { %3379 = vmin.xlane.f32.xlu1 %v3378_v59  ;;  %v3061_v53 = vcvt.f32.s32 %v3060_v58  ;;  %v3393_v14 = vmin.f32 %v9197_v6, %v9204_v25  ;;  %vm3327_vm5 = vmand %vm2975_vm6, %vm3295_vm9  ;;  %v3111_v10 = vshll.u32 %v3110_v38, 16  ;;  %vm12111_vm15 = vcmp.eq.f32.partialorder %v12109_v56, %v12110_v15 }
 0xb62   :  { %vm3328_vm12 = vmand %vm12095_vm7, %vm3296_vm2  ;;  %v9218_v19 = vsel %vm3327_vm5, 1e+30, %v8479_v3  ;;  %v3191_v3 = vshll.u32 %v3190_v7, 16  ;;  %v3239_v59 = vshll.u32 %v3238_v51, 16  ;;  %v12118_v51 = vld [vmem:[#allocation72_spill] sm:$0xff] }
 0xb63   :  { %v3108_v22 = vpop.xlane.xlu1 %3107  ;;  %12096 = vst [vmem:[#allocation26_spill] sm:$0xff] %v9218_v19  ;;  %v3064_v37 = vadd.s32 %v3063_v48, %v3061_v53  ;;  %3394 = vmin.xlane.f32.xlu0 %v3393_v14  ;;  %v9221_v13 = vsel %vm3328_vm12, 1e+30, %v12094_v36  ;;  %v12112_v48 = vld [vmem:[#allocation31_spill] sm:$0xff]  ;;  %v12115_v53 = vld [vmem:[#allocation32_spill] sm:$0xff]  ;;  %v3095_v36 = vshll.u32 %v3094_v11, 16 }
 0xb64   :  { %v3109_v55 = vcvt.f32.s32 %v3108_v22  ;;  %12097 = vst [vmem:[#allocation131_spill] sm:$0xff] %v9221_v13  ;;  %v3402_v18 = vmin.f32 %v9218_v19, %v9221_v13  ;;  %vm12113_vm9 = vcmp.eq.f32.partialorder %v12112_v48, %v12110_v15  ;;  %v12124_v11 = vld [vmem:[#allocation73_spill] sm:$0xff]  ;;  %v12175_v15 = vld [vmem:[#allocation42_spill] sm:$0xff] }
 0xb65   :  { %v9228_v23 = vsel %vm11437_vm11, %v12098_v49, %v3064_v37  ;;  %vm3277_vm6 = vcmp.eq.s32.totalorder %v9099_v40, %v3064_v37  ;;  %vm3278_vm10 = vcmp.eq.s32.totalorder %v9102_v4, %v3064_v37  ;;  %v3143_v49 = vshll.u32 %v3142_v30, 16 }
 0xb66   :  { %12099 = vst [vmem:[#allocation27_spill] sm:$0xff] %v9228_v23  ;;  %v3112_v63 = vadd.s32 %v3111_v10, %v3109_v55  ;;  %3403 = vmin.xlane.f32.xlu1 %v3402_v18  ;;  %vm3309_vm4 = vmand %vm12102_vm1, %vm3277_vm6  ;;  %v12119_v18 = vld [vmem:[#allocation123_spill] sm:$0xff] }
 0xb67   :  { %vm3310_vm3 = vmand %vm12106_vm13, %vm3278_vm10  ;;  %v9244_v21 = vsel %vm3309_vm4, 1e+30, %v12100_v50  ;;  %vm12120_vm12 = vcmp.eq.f32.partialorder %v12118_v51, %v12119_v18 }
 0xb68   :  { %v9238_v0 = vsel %vm11437_vm11, %v12103_v29, %v3112_v63  ;;  %12107 = vst [vmem:[#allocation28_spill] sm:$0xff] %v9244_v21  ;;  %vm3283_vm14 = vcmp.eq.s32.totalorder %v9099_v40, %v3112_v63  ;;  %vm3284_vm8 = vcmp.eq.s32.totalorder %v9102_v4, %v3112_v63  ;;  %v9250_v16 = vsel %vm3310_vm3, 1e+30, %v12105_v46 }
 0xb69   :  { %v3188_v54 = vpop.xlane.xlu0 %3187  ;;  %12104 = vst [vmem:[#allocation30_spill] sm:$0xff] %v9238_v0  ;;  %12108 = vst [vmem:[#allocation29_spill] sm:$0xff] %v9250_v16  ;;  %v3375_v58 = vmin.f32 %v9244_v21, %v9250_v16  ;;  %v3222_v63 = vcvt.f32.s32 %v9074_v1  ;;  %v3270_v1 = vcvt.f32.s32 %v9079_v61 }
 0xb6a   :  { %v3189_v17 = vcvt.f32.s32 %v3188_v54  ;;  %vm3315_vm0 = vmand %vm12111_vm15, %vm3283_vm14  ;;  %v12121_v54 = vld [vmem:[#allocation33_spill] sm:$0xff] }
 0xb6b   :  { %vm3316_vm2 = vmand %vm12113_vm9, %vm3284_vm8  ;;  %v9261_v8 = vsel %vm3315_vm0, 1e+30, %v12109_v56  ;;  %3376 = vmin.xlane.f32.xlu0 %v3375_v58  ;;  %vm12122_vm10 = vcmp.eq.f32.partialorder %v12121_v54, %v12119_v18  ;;  %v12128_v56 = vld [vmem:[#allocation124_spill] sm:$0xff]  ;;  %v12132_v58 = vld [vmem:[#allocation37_spill] sm:$0xff] }
 0xb6c   :  { %v3192_v20 = vadd.s32 %v3191_v3, %v3189_v17  ;;  %12114 = vst [vmem:[#allocation71_spill] sm:$0xff] %v9261_v8  ;;  %v9268_v22 = vsel %vm3316_vm2, 1e+30, %v12112_v48  ;;  %vm12133_vm8 = vcmp.eq.f32.partialorder %v12132_v58, %v12128_v56  ;;  %v3223_v48 = vshll.u32 %v3222_v63, 16  ;;  %v12142_v63 = vld [vmem:[#allocation38_spill] sm:$0xff] }
 0xb6d   :  { %v3236_v5 = vpop.xlane.xlu1 %3235  ;;  %12117 = vst [vmem:[#allocation32_spill] sm:$0xff] %v9268_v22  ;;  %v3384_v55 = vmin.f32 %v9261_v8, %v9268_v22 }
 0xb6e   :  { %v3237_v38 = vcvt.f32.s32 %v3236_v5  ;;  %v9265_v14 = vsel %vm11437_vm11, %v12115_v53, %v3192_v20  ;;  %vm3293_vm5 = vcmp.eq.s32.totalorder %v9099_v40, %v3192_v20  ;;  %vm3294_vm7 = vcmp.eq.s32.totalorder %v9102_v4, %v3192_v20  ;;  %v12127_v5 = vld [vmem:[#allocation75_spill] sm:$0xff] }
 0xb6f   :  { %12116 = vst [vmem:[#allocation31_spill] sm:$0xff] %v9265_v14  ;;  %vm3325_vm6 = vmand %vm12120_vm12, %vm3293_vm5  ;;  %3385 = vmin.xlane.f32.xlu1 %v3384_v55  ;;  %vm12129_vm3 = vcmp.eq.f32.partialorder %v12127_v5, %v12128_v56  ;;  %v3126_v55 = vcvt.f32.s32 %v9083_v57  ;;  %v3271_v57 = vshll.u32 %v3270_v1, 16  ;;  %v12151_v1 = vld [vmem:[#allocation40_spill] sm:$0xff] }
 0xb70   :  { %v3092_v7 = vpop.xlane.xlu0 %3091  ;;  %v3240_v10 = vadd.s32 %v3239_v59, %v3237_v38  ;;  %vm3326_vm1 = vmand %vm12122_vm10, %vm3294_vm7  ;;  %v9282_v3 = vsel %vm3325_vm6, 1e+30, %v12118_v51  ;;  %v12130_v59 = vld [vmem:[#allocation74_spill] sm:$0xff] }
 0xb71   :  { %v3093_v37 = vcvt.f32.s32 %v3092_v7  ;;  %12123 = vst [vmem:[#allocation72_spill] sm:$0xff] %v9282_v3  ;;  %v9289_v46 = vsel %vm3326_vm1, 1e+30, %v12121_v54 }
 0xb72   :  { %v9286_v17 = vsel %vm11437_vm11, %v12124_v11, %v3240_v10  ;;  %12126 = vst [vmem:[#allocation73_spill] sm:$0xff] %v9289_v46  ;;  %vm3299_vm4 = vcmp.eq.s32.totalorder %v9099_v40, %v3240_v10  ;;  %v3399_v20 = vmin.f32 %v9282_v3, %v9289_v46  ;;  %vm3300_vm13 = vcmp.eq.s32.totalorder %v9102_v4, %v3240_v10  ;;  %v12136_v10 = vld [vmem:[#allocation39_spill] sm:$0xff]  ;;  %v12139_v11 = vld [vmem:[#allocation76_spill] sm:$0xff] }
 0xb73   :  { %12125 = vst [vmem:[#allocation33_spill] sm:$0xff] %v9286_v17  ;;  %v3096_v50 = vadd.s32 %v3095_v36, %v3093_v37  ;;  %vm3331_vm14 = vmand %vm12129_vm3, %vm3299_vm4  ;;  %v12137_v37 = vld [vmem:[#allocation125_spill] sm:$0xff] }
 0xb74   :  { %v3140_v29 = vpop.xlane.xlu1 %3139  ;;  %vm3332_vm15 = vmand %vm12133_vm8, %vm3300_vm13  ;;  %v9307_v61 = vsel %vm3331_vm14, 1e+30, %v12127_v5  ;;  %3400 = vmin.xlane.f32.xlu0 %v3399_v20  ;;  %vm12138_vm2 = vcmp.eq.f32.partialorder %v12136_v10, %v12137_v37  ;;  %vm12140_vm7 = vcmp.eq.f32.partialorder %v12139_v11, %v12137_v37  ;;  %v12155_v37 = vld [vmem:[#allocation127_spill] sm:$0xff] }
 0xb75   :  { %v3141_v30 = vcvt.f32.s32 %v3140_v29  ;;  %v9301_v38 = vsel %vm11437_vm11, %v12130_v59, %v3096_v50  ;;  %12134 = vst [vmem:[#allocation74_spill] sm:$0xff] %v9307_v61  ;;  %vm3281_vm0 = vcmp.eq.s32.totalorder %v9099_v40, %v3096_v50  ;;  %vm3282_vm9 = vcmp.eq.s32.totalorder %v9102_v4, %v3096_v50 }
 0xb76   :  { %12131 = vst [vmem:[#allocation75_spill] sm:$0xff] %v9301_v38  ;;  %v9312_v36 = vsel %vm3332_vm15, 1e+30, %v12132_v58  ;;  %vm3313_vm5 = vmand %vm12138_vm2, %vm3281_vm0  ;;  %v12145_v58 = vld [vmem:[#allocation34_spill] sm:$0xff] }
 0xb77   :  { %v3144_v53 = vadd.s32 %v3143_v49, %v3141_v30  ;;  %12135 = vst [vmem:[#allocation37_spill] sm:$0xff] %v9312_v36  ;;  %v3408_v54 = vmin.f32 %v9307_v61, %v9312_v36  ;;  %vm3314_vm12 = vmand %vm12140_vm7, %vm3282_vm9  ;;  %v9324_v49 = vsel %vm3313_vm5, 1e+30, %v12136_v10  ;;  %v3254_v10 = vcvt.f32.s32 %v9088_v45 }
 0xb78   :  { %v3220_v7 = vpop.xlane.xlu0 %3219  ;;  %12141 = vst [vmem:[#allocation39_spill] sm:$0xff] %v9324_v49  ;;  %v9331_v30 = vsel %vm3314_vm12, 1e+30, %v12139_v11  ;;  %v3127_v45 = vshll.u32 %v3126_v55, 16 }
 0xb79   :  { %v3221_v51 = vcvt.f32.s32 %v3220_v7  ;;  %v9328_v50 = vsel %vm11437_vm11, %v12142_v63, %v3144_v53  ;;  %12144 = vst [vmem:[#allocation38_spill] sm:$0xff] %v9331_v30  ;;  %vm3287_vm6 = vcmp.eq.s32.totalorder %v9099_v40, %v3144_v53  ;;  %vm3288_vm10 = vcmp.eq.s32.totalorder %v9102_v4, %v3144_v53  ;;  %3409 = vmin.xlane.f32.xlu1 %v3408_v54  ;;  %v12146_v7 = vld [vmem:[#allocation126_spill] sm:$0xff]  ;;  %v12148_v63 = vld [vmem:[#allocation77_spill] sm:$0xff] }
 0xb7a   :  { %12143 = vst [vmem:[#allocation76_spill] sm:$0xff] %v9328_v50  ;;  %v3381_v59 = vmin.f32 %v9324_v49, %v9331_v30  ;;  %vm12147_vm1 = vcmp.eq.f32.partialorder %v12145_v58, %v12146_v7  ;;  %vm12149_vm13 = vcmp.eq.f32.partialorder %v12148_v63, %v12146_v7  ;;  %v3255_v56 = vshll.u32 %v3254_v10, 16 }
 0xb7b   :  { %v3268_v29 = vpop.xlane.xlu1 %3267  ;;  %v3224_v20 = vadd.s32 %v3223_v48, %v3221_v51  ;;  %vm3319_vm4 = vmand %vm12147_vm1, %vm3287_vm6 }
 0xb7c   :  { %v3269_v5 = vcvt.f32.s32 %v3268_v29  ;;  %vm3320_vm3 = vmand %vm12149_vm13, %vm3288_vm10  ;;  %v9345_v11 = vsel %vm3319_vm4, 1e+30, %v12145_v58  ;;  %3382 = vmin.xlane.f32.xlu0 %v3381_v59  ;;  %v12154_v58 = vld [vmem:[#allocation78_spill] sm:$0xff]  ;;  %v12159_v59 = vld [vmem:[#allocation43_spill] sm:$0xff] }
 0xb7d   :  { %12150 = vst [vmem:[#allocation34_spill] sm:$0xff] %v9345_v11  ;;  %v9349_v48 = vsel %vm11437_vm11, %v12151_v1, %v3224_v20  ;;  %v9352_v54 = vsel %vm3320_vm3, 1e+30, %v12148_v63  ;;  %vm3297_vm14 = vcmp.eq.s32.totalorder %v9099_v40, %v3224_v20  ;;  %vm3298_vm8 = vcmp.eq.s32.totalorder %v9102_v4, %v3224_v20  ;;  %v12163_v1 = vld [vmem:[#allocation36_spill] sm:$0xff] }
 0xb7e   :  { %12152 = vst [vmem:[#allocation77_spill] sm:$0xff] %v9349_v48  ;;  %v3272_v53 = vadd.s32 %v3271_v57, %v3269_v5  ;;  %v3124_v51 = vpop.xlane.xlu0 %3123  ;;  %12153 = vst [vmem:[#allocation40_spill] sm:$0xff] %v9352_v54  ;;  %v3390_v7 = vmin.f32 %v9345_v11, %v9352_v54  ;;  %vm12156_vm15 = vcmp.eq.f32.partialorder %v12154_v58, %v12155_v37  ;;  %v12157_v57 = vld [vmem:[#allocation35_spill] sm:$0xff] }
 0xb7f   :  { %v3125_v29 = vcvt.f32.s32 %v3124_v51  ;;  %vm3329_vm0 = vmand %vm12156_vm15, %vm3297_vm14  ;;  %vm12160_vm5 = vcmp.eq.f32.partialorder %v12159_v59, %v12155_v37  ;;  %v12164_v51 = vld [vmem:[#allocation128_spill] sm:$0xff]  ;;  %v12173_v37 = vld [vmem:[#allocation129_spill] sm:$0xff] }
 0xb80   :  { %vm3303_vm9 = vcmp.eq.s32.totalorder %v9099_v40, %v3272_v53  ;;  %vm3304_vm2 = vcmp.eq.s32.totalorder %v9102_v4, %v3272_v53  ;;  %v9365_v5 = vsel %vm11437_vm11, %v12157_v57, %v3272_v53  ;;  %vm3330_vm7 = vmand %vm12160_vm5, %vm3298_vm8  ;;  %v9371_v55 = vsel %vm3329_vm0, 1e+30, %v12154_v58  ;;  %3391 = vmin.xlane.f32.xlu1 %v3390_v7  ;;  %v12166_v57 = vld [vmem:[#allocation79_spill] sm:$0xff]  ;;  %v12169_v7 = vld [vmem:[#allocation41_spill] sm:$0xff] }
 0xb81   :  { %12158 = vst [vmem:[#allocation78_spill] sm:$0xff] %v9365_v5  ;;  %12161 = vst [vmem:[#allocation35_spill] sm:$0xff] %v9371_v55  ;;  %v3128_v20 = vadd.s32 %v3127_v45, %v3125_v29  ;;  %v9374_v63 = vsel %vm3330_vm7, 1e+30, %v12159_v59  ;;  %vm12165_vm12 = vcmp.eq.f32.partialorder %v12163_v1, %v12164_v51  ;;  %vm12167_vm10 = vcmp.eq.f32.partialorder %v12166_v57, %v12164_v51  ;;  %v12172_v51 = vld [vmem:[#allocation45_spill] sm:$0xff] }
 0xb82   :  { %12162 = vst [vmem:[#allocation43_spill] sm:$0xff] %v9374_v63  ;;  %vm3335_vm6 = vmand %vm12165_vm12, %vm3303_vm9  ;;  %v3252_v18 = vpop.xlane.xlu0 %3251  ;;  %v3405_v53 = vmin.f32 %v9371_v55, %v9374_v63  ;;  %vm12174_vm3 = vcmp.eq.f32.partialorder %v12172_v51, %v12173_v37  ;;  %vm12176_vm8 = vcmp.eq.f32.partialorder %v12175_v15, %v12173_v37 }
 0xb83   :  { %vm3336_vm1 = vmand %vm12167_vm10, %vm3304_vm2  ;;  %v9385_v58 = vsel %vm3335_vm6, 1e+30, %v12163_v1  ;;  %v9389_v45 = vsel %vm11437_vm11, %v12169_v7, %v3128_v20  ;;  %v3253_v29 = vcvt.f32.s32 %v3252_v18  ;;  %vm3285_vm4 = vcmp.eq.s32.totalorder %v9099_v40, %v3128_v20  ;;  %v12181_v7 = vld [vmem:[#allocation44_spill] sm:$0xff] }
 0xb84   :  { %12168 = vst [vmem:[#allocation36_spill] sm:$0xff] %v9385_v58  ;;  %12170 = vst [vmem:[#allocation79_spill] sm:$0xff] %v9389_v45  ;;  %v9392_v59 = vsel %vm3336_vm1, 1e+30, %v12166_v57  ;;  %3406 = vmin.xlane.f32.xlu0 %v3405_v53  ;;  %vm3286_vm13 = vcmp.eq.s32.totalorder %v9102_v4, %v3128_v20  ;;  %v12179_v20 = vld [vmem:[#allocation80_spill] sm:$0xff] }
 0xb85   :  { %12171 = vst [vmem:[#allocation41_spill] sm:$0xff] %v9392_v59  ;;  %v3414_v10 = vmin.f32 %v9385_v58, %v9392_v59  ;;  %vm3317_vm14 = vmand %vm12174_vm3, %vm3285_vm4  ;;  %v3256_v1 = vadd.s32 %v3255_v56, %v3253_v29  ;;  %v12182_v29 = vld [vmem:[#allocation130_spill] sm:$0xff] }
 0xb86   :  { %vm3318_vm15 = vmand %vm12176_vm8, %vm3286_vm13  ;;  %v9405_v18 = vsel %vm3317_vm14, 1e+30, %v12172_v51  ;;  %vm12183_vm2 = vcmp.eq.f32.partialorder %v12181_v7, %v12182_v29  ;;  %v12184_v51 = vld [vmem:[#allocation4_spill] sm:$0xff] }
 0xb87   :  { %12177 = vst [vmem:[#allocation45_spill] sm:$0xff] %v9405_v18  ;;  %3415 = vmin.xlane.f32.xlu1 %v3414_v10  ;;  %v9408_v53 = vsel %vm3318_vm15, 1e+30, %v12175_v15  ;;  %vm3301_vm0 = vcmp.eq.s32.totalorder %v9099_v40, %v3256_v1  ;;  %vm3302_vm9 = vcmp.eq.s32.totalorder %v9102_v4, %v3256_v1  ;;  %v9414_v57 = vsel %vm11437_vm11, %v12179_v20, %v3256_v1 }
 0xb88   :  { %12178 = vst [vmem:[#allocation42_spill] sm:$0xff] %v9408_v53  ;;  %12180 = vst [vmem:[#allocation80_spill] sm:$0xff] %v9414_v57  ;;  %v3387_v56 = vmin.f32 %v9405_v18, %v9408_v53  ;;  %vm12185_vm7 = vcmp.eq.f32.partialorder %v12184_v51, %v12182_v29 }
 0xb89   :  { %vm3333_vm5 = vmand %vm12183_vm2, %vm3301_vm0 }
 0xb8a   :  { %3388 = vmin.xlane.f32.xlu0 %v3387_v56  ;;  %vm3334_vm12 = vmand %vm12185_vm7, %vm3302_vm9  ;;  %v9425_v15 = vsel %vm3333_vm5, 1e+30, %v12181_v7 }
 0xb8b   :  { %12186 = vst [vmem:[#allocation44_spill] sm:$0xff] %v9425_v15  ;;  %v9428_v10 = vsel %vm3334_vm12, 1e+30, %v12184_v51 }
 0xb8c   :  { %12187 = vst [vmem:[#allocation4_spill] sm:$0xff] %v9428_v10  ;;  %v3411_v1 = vmin.f32 %v9425_v15, %v9428_v10 }
 0xb8e   :  { %3412 = vmin.xlane.f32.xlu0 %v3411_v1 }
 0xbe2   :  { %v9432_v20 = vpop.xlane.xlu1 %3373 }
 0xbe3   :  { %vm3419_vm6 = vcmp.eq.f32.partialorder %v9112_v43, %v9432_v20  ;;  %vm3420_vm10 = vcmp.eq.f32.partialorder %v9115_v52, %v9432_v20 }
 0xbe4   :  { %v3451_v56 = vsel %vm3419_vm6, %v9099_v40, 2147483647  ;;  %v3452_v7 = vsel %vm3420_vm10, %v9102_v4, 2147483647 }
 0xbe5   :  { %vm3497_vm1 = vcmp.lt.s32.totalorder %v3451_v56, %v3452_v7 }
 0xbe6   :  { %v9446_v51 = vsel %vm3497_vm1, %v3451_v56, %v3452_v7  ;;  %v9448_v1 = vpop.xlane.xlu1 %3397 }
 0xbe7   :  { %v3500_v29 = vshra.s32 %v9446_v51, 16  ;;  %vm3435_vm4 = vcmp.eq.f32.partialorder %v9134_v34, %v9448_v1  ;;  %vm3436_vm13 = vcmp.eq.f32.partialorder %v9141_v47, %v9448_v1 }
 0xbe8   :  { %v3467_v37 = vsel %vm3435_vm4, %v9099_v40, 2147483647  ;;  %v3468_v56 = vsel %vm3436_vm13, %v9102_v4, 2147483647 }
 0xbe9   :  { %v9463_v7 = vcvt.s32.f32 %v3500_v29  ;;  %vm3625_vm3 = vcmp.lt.s32.totalorder %v3467_v37, %v3468_v56  ;;  %v9465_v32 = vpop.xlane.xlu0 %3370 }
 0xbea   :  { %vm3417_vm14 = vcmp.eq.f32.partialorder %v9154_v62, %v9465_v32  ;;  %vm3418_vm8 = vcmp.eq.f32.partialorder %v9158_v24, %v9465_v32  ;;  %v9472_v2 = vsel %vm3625_vm3, %v3467_v37, %v3468_v56 }
 0xbeb   :  { %3503 = vmin.xlane.f32.xlu1 %v9463_v7  ;;  %v3449_v26 = vsel %vm3417_vm14, %v9099_v40, 2147483647  ;;  %v3450_v29 = vsel %vm3418_vm8, %v9102_v4, 2147483647  ;;  %v3628_v33 = vshra.s32 %v9472_v2, 16 }
 0xbec   :  { %vm3481_vm15 = vcmp.lt.s32.totalorder %v3449_v26, %v3450_v29 }
 0xbed   :  { %v9483_v12 = vcvt.s32.f32 %v3628_v33  ;;  %v9485_v31 = vsel %vm3481_vm15, %v3449_v26, %v3450_v29 }
 0xbee   :  { %v9487_v27 = vpop.xlane.xlu1 %3379  ;;  %v3484_v37 = vshra.s32 %v9485_v31, 16 }
 0xbef   :  { %vm3423_vm0 = vcmp.eq.f32.partialorder %v9176_v44, %v9487_v27  ;;  %vm3424_vm9 = vcmp.eq.f32.partialorder %v9183_v39, %v9487_v27  ;;  %3631 = vmin.xlane.f32.xlu1 %v9483_v12 }
 0xbf0   :  { %v3455_v33 = vsel %vm3423_vm0, %v9099_v40, 2147483647  ;;  %v3456_v26 = vsel %vm3424_vm9, %v9102_v4, 2147483647  ;;  %v9503_v56 = vcvt.s32.f32 %v3484_v37  ;;  %v9505_v29 = vpop.xlane.xlu0 %3394 }
 0xbf1   :  { %vm3529_vm2 = vcmp.lt.s32.totalorder %v3455_v33, %v3456_v26  ;;  %vm3433_vm5 = vcmp.eq.f32.partialorder %v9197_v6, %v9505_v29  ;;  %vm3434_vm7 = vcmp.eq.f32.partialorder %v9204_v25, %v9505_v29 }
 0xbf2   :  { %3487 = vmin.xlane.f32.xlu0 %v9503_v56  ;;  %v9512_v57 = vsel %vm3529_vm2, %v3455_v33, %v3456_v26  ;;  %v3465_v45 = vsel %vm3433_vm5, %v9099_v40, 2147483647  ;;  %v3466_v37 = vsel %vm3434_vm7, %v9102_v4, 2147483647 }
 0xbf3   :  { %v3532_v5 = vshra.s32 %v9512_v57, 16  ;;  %vm3609_vm12 = vcmp.lt.s32.totalorder %v3465_v45, %v3466_v37  ;;  %v9523_v48 = vpop.xlane.xlu1 %3403 }
 0xbf4   :  { %12188 = vst [vmem:[#allocation132_spill] sm:$0xff] %v9523_v48  ;;  %vm11463_vm1 = vcmp.eq.f32.partialorder %v9218_v19, %v9523_v48  ;;  %vm11438_vm3 = vcmp.eq.f32.partialorder %v9221_v13, %v9523_v48  ;;  %v9539_v38 = vsel %vm3609_vm12, %v3465_v45, %v3466_v37 }
 0xbf5   :  { %v9529_v33 = vcvt.s32.f32 %v3532_v5  ;;  %v3471_v26 = vsel %vm11463_vm1, %v9099_v40, 2147483647  ;;  %v3472_v50 = vsel %vm11438_vm3, %v9102_v4, 2147483647  ;;  %v3612_v17 = vshra.s32 %v9539_v38, 16 }
 0xbf6   :  { %vm3657_vm15 = vcmp.lt.s32.totalorder %v3471_v26, %v3472_v50 }
 0xbf7   :  { %3535 = vmin.xlane.f32.xlu1 %v9529_v33  ;;  %v9543_v14 = vsel %vm3657_vm15, %v3471_v26, %v3472_v50  ;;  %v9547_v0 = vcvt.s32.f32 %v3612_v17 }
 0xbf8   :  { %v9545_v5 = vpop.xlane.xlu0 %3376  ;;  %v3660_v23 = vshra.s32 %v9543_v14, 16 }
 0xbf9   :  { %12189 = vst [vmem:[#allocation133_spill] sm:$0xff] %v9545_v5  ;;  %vm11446_vm2 = vcmp.eq.f32.partialorder %v9244_v21, %v9545_v5  ;;  %vm11441_vm12 = vcmp.eq.f32.partialorder %v9250_v16, %v9545_v5  ;;  %3615 = vmin.xlane.f32.xlu0 %v9547_v0 }
 0xbfa   :  { %v3453_v45 = vsel %vm11446_vm2, %v9099_v40, 2147483647  ;;  %v3454_v50 = vsel %vm11441_vm12, %v9102_v4, 2147483647  ;;  %v9565_v37 = vcvt.s32.f32 %v3660_v23 }
 0xbfb   :  { %vm3513_vm15 = vcmp.lt.s32.totalorder %v3453_v45, %v3454_v50 }
 0xbfc   :  { %v9562_v17 = vpop.xlane.xlu1 %3385  ;;  %3663 = vmin.xlane.f32.xlu1 %v9565_v37  ;;  %v9580_v23 = vsel %vm3513_vm15, %v3453_v45, %v3454_v50 }
 0xbfd   :  { %12190 = vst [vmem:[#allocation134_spill] sm:$0xff] %v9562_v17  ;;  %vm11447_vm11 = vcmp.eq.f32.partialorder %v9261_v8, %v9562_v17  ;;  %vm11456_vm3 = vcmp.eq.f32.partialorder %v9268_v22, %v9562_v17  ;;  %v3516_v21 = vshra.s32 %v9580_v23, 16 }
 0xbfe   :  { %v3459_v26 = vsel %vm11447_vm11, %v9099_v40, 2147483647  ;;  %v3460_v16 = vsel %vm11456_vm3, %v9102_v4, 2147483647 }
 0xbff   :  { %vm3561_vm12 = vcmp.lt.s32.totalorder %v3459_v26, %v3460_v16  ;;  %v9599_v50 = vcvt.s32.f32 %v3516_v21 }
 0xc00   :  { %v9589_v8 = vsel %vm3561_vm12, %v3459_v26, %v3460_v16 }
 0xc01   :  { %v9582_v5 = vpop.xlane.xlu0 %3400  ;;  %v3564_v17 = vshra.s32 %v9589_v8, 16  ;;  %3519 = vmin.xlane.f32.xlu0 %v9599_v50 }
 0xc02   :  { %12191 = vst [vmem:[#allocation135_spill] sm:$0xff] %v9582_v5  ;;  %vm11462_vm2 = vcmp.eq.f32.partialorder %v9282_v3, %v9582_v5  ;;  %vm11461_vm11 = vcmp.eq.f32.partialorder %v9289_v46, %v9582_v5 }
 0xc03   :  { %v3469_v22 = vsel %vm11462_vm2, %v9099_v40, 2147483647  ;;  %v3470_v45 = vsel %vm11461_vm11, %v9102_v4, 2147483647  ;;  %v9609_v16 = vcvt.s32.f32 %v3564_v17 }
 0xc04   :  { %vm3641_vm15 = vcmp.lt.s32.totalorder %v3469_v22, %v3470_v45 }
 0xc05   :  { %v9621_v5 = vsel %vm3641_vm15, %v3469_v22, %v3470_v45  ;;  %3567 = vmin.xlane.f32.xlu1 %v9609_v16 }
 0xc06   :  { %v9602_v13 = vpop.xlane.xlu1 %3409  ;;  %v3644_v45 = vshra.s32 %v9621_v5, 16 }
 0xc07   :  { %12192 = vst [vmem:[#allocation136_spill] sm:$0xff] %v9602_v13  ;;  %vm3443_vm12 = vcmp.eq.f32.partialorder %v9307_v61, %v9602_v13  ;;  %vm11470_vm3 = vcmp.eq.f32.partialorder %v9312_v36, %v9602_v13 }
 0xc08   :  { %v3475_v21 = vsel %vm3443_vm12, %v9099_v40, 2147483647  ;;  %v3476_v26 = vsel %vm11470_vm3, %v9102_v4, 2147483647 }
 0xc09   :  { %v9619_v46 = vpop.xlane.xlu0 %3382  ;;  %vm3689_vm11 = vcmp.lt.s32.totalorder %v3475_v21, %v3476_v26 }
 0xc0a   :  { %12193 = vst [vmem:[#allocation137_spill] sm:$0xff] %v9619_v46  ;;  %vm11471_vm2 = vcmp.eq.f32.partialorder %v9324_v49, %v9619_v46  ;;  %vm11480_vm1 = vcmp.eq.f32.partialorder %v9331_v30, %v9619_v46  ;;  %v9637_v36 = vsel %vm3689_vm11, %v3475_v21, %v3476_v26  ;;  %v9646_v49 = vcvt.s32.f32 %v3644_v45 }
 0xc0b   :  { %v3457_v17 = vsel %vm11471_vm2, %v9099_v40, 2147483647  ;;  %v3458_v22 = vsel %vm11480_vm1, %v9102_v4, 2147483647  ;;  %v3692_v61 = vshra.s32 %v9637_v36, 16 }
 0xc0c   :  { %vm3545_vm15 = vcmp.lt.s32.totalorder %v3457_v17, %v3458_v22  ;;  %3647 = vmin.xlane.f32.xlu0 %v9646_v49 }
 0xc0d   :  { %v9639_v13 = vpop.xlane.xlu1 %3391  ;;  %v9656_v26 = vcvt.s32.f32 %v3692_v61  ;;  %v9658_v46 = vsel %vm3545_vm15, %v3457_v17, %v3458_v22 }
 0xc0e   :  { %12194 = vst [vmem:[#allocation138_spill] sm:$0xff] %v9639_v13  ;;  %vm11481_vm3 = vcmp.eq.f32.partialorder %v9345_v11, %v9639_v13  ;;  %vm11488_vm2 = vcmp.eq.f32.partialorder %v9352_v54, %v9639_v13  ;;  %v3548_v45 = vshra.s32 %v9658_v46, 16 }
 0xc0f   :  { %v3463_v30 = vsel %vm11481_vm3, %v9099_v40, 2147483647  ;;  %v3464_v21 = vsel %vm11488_vm2, %v9102_v4, 2147483647  ;;  %3695 = vmin.xlane.f32.xlu1 %v9656_v26 }
 0xc10   :  { %vm3593_vm11 = vcmp.lt.s32.totalorder %v3463_v30, %v3464_v21  ;;  %v9681_v13 = vcvt.s32.f32 %v3548_v45 }
 0xc11   :  { %v9660_v3 = vpop.xlane.xlu0 %3406  ;;  %v9669_v54 = vsel %vm3593_vm11, %v3463_v30, %v3464_v21 }
 0xc12   :  { %12195 = vst [vmem:[#allocation139_spill] sm:$0xff] %v9660_v3  ;;  %vm11496_vm1 = vcmp.eq.f32.partialorder %v9371_v55, %v9660_v3  ;;  %vm11491_vm3 = vcmp.eq.f32.partialorder %v9374_v63, %v9660_v3  ;;  %v3596_v11 = vshra.s32 %v9669_v54, 16  ;;  %3551 = vmin.xlane.f32.xlu0 %v9681_v13 }
 0xc13   :  { %v3473_v61 = vsel %vm11496_vm1, %v9099_v40, 2147483647  ;;  %v3474_v17 = vsel %vm11491_vm3, %v9102_v4, 2147483647 }
 0xc14   :  { %v9679_v22 = vpop.xlane.xlu1 %3415  ;;  %vm3673_vm15 = vcmp.lt.s32.totalorder %v3473_v61, %v3474_v17  ;;  %v9697_v45 = vcvt.s32.f32 %v3596_v11 }
 0xc15   :  { %12196 = vst [vmem:[#allocation140_spill] sm:$0xff] %v9679_v22  ;;  %vm11497_vm11 = vcmp.eq.f32.partialorder %v9385_v58, %v9679_v22  ;;  %vm11524_vm2 = vcmp.eq.f32.partialorder %v9392_v59, %v9679_v22  ;;  %v9699_v63 = vsel %vm3673_vm15, %v3473_v61, %v3474_v17 }
 0xc16   :  { %v3479_v30 = vsel %vm11497_vm11, %v9099_v40, 2147483647  ;;  %v3480_v21 = vsel %vm11524_vm2, %v9102_v4, 2147483647  ;;  %v3676_v55 = vshra.s32 %v9699_v63, 16  ;;  %3599 = vmin.xlane.f32.xlu1 %v9697_v45 }
 0xc17   :  { %vm3721_vm3 = vcmp.lt.s32.totalorder %v3479_v30, %v3480_v21  ;;  %v9701_v3 = vpop.xlane.xlu0 %3388 }
 0xc18   :  { %12197 = vst [vmem:[#allocation141_spill] sm:$0xff] %v9701_v3  ;;  %vm11504_vm1 = vcmp.eq.f32.partialorder %v9405_v18, %v9701_v3  ;;  %vm11523_vm11 = vcmp.eq.f32.partialorder %v9408_v53, %v9701_v3  ;;  %v9709_v59 = vsel %vm3721_vm3, %v3479_v30, %v3480_v21  ;;  %v9719_v17 = vcvt.s32.f32 %v3676_v55 }
 0xc19   :  { %v3461_v11 = vsel %vm11504_vm1, %v9099_v40, 2147483647  ;;  %v3462_v61 = vsel %vm11523_vm11, %v9102_v4, 2147483647  ;;  %v3724_v22 = vshra.s32 %v9709_v59, 16 }
 0xc1a   :  { %vm3577_vm15 = vcmp.lt.s32.totalorder %v3461_v11, %v3462_v61  ;;  %3679 = vmin.xlane.f32.xlu0 %v9719_v17 }
 0xc1b   :  { %v9722_v58 = vpop.xlane.xlu0 %3412  ;;  %v9725_v30 = vcvt.s32.f32 %v3724_v22  ;;  %v9727_v21 = vsel %vm3577_vm15, %v3461_v11, %v3462_v61 }
 0xc1c   :  { %12198 = vst [vmem:[#allocation142_spill] sm:$0xff] %v9722_v58  ;;  %vm11522_vm3 = vcmp.eq.f32.partialorder %v9425_v15, %v9722_v58  ;;  %vm11517_vm1 = vcmp.eq.f32.partialorder %v9428_v10, %v9722_v58  ;;  %v3580_v55 = vshra.s32 %v9727_v21, 16  ;;  %v3499_v15 = vand.u32 65535, %v9446_v51 }
 0xc1d   :  { %v3477_v53 = vsel %vm11522_vm3, %v9099_v40, 2147483647  ;;  %v3478_v22 = vsel %vm11517_vm1, %v9102_v4, 2147483647  ;;  %3727 = vmin.xlane.f32.xlu1 %v9725_v30 }
 0xc1e   :  { %vm3705_vm15 = vcmp.lt.s32.totalorder %v3477_v53, %v3478_v22  ;;  %v9743_v11 = vcvt.s32.f32 %v3580_v55  ;;  %v3501_v10 = vcvt.s32.f32 %v3499_v15  ;;  %v3627_v55 = vand.u32 65535, %v9472_v2 }
 0xc1f   :  { %v9745_v61 = vsel %vm3705_vm15, %v3477_v53, %v3478_v22  ;;  %v3483_v22 = vand.u32 65535, %v9485_v31  ;;  %v3531_v2 = vand.u32 65535, %v9512_v57 }
 0xc20   :  { %3583 = vmin.xlane.f32.xlu0 %v9743_v11  ;;  %v3708_v3 = vshra.s32 %v9745_v61, 16 }
 0xc21   :  { %v3485_v15 = vcvt.s32.f32 %v3483_v22  ;;  %v3533_v31 = vcvt.s32.f32 %v3531_v2 }
 0xc22   :  { %v9749_v18 = vcvt.s32.f32 %v3708_v3  ;;  %v3629_v3 = vcvt.s32.f32 %v3627_v55  ;;  %v3611_v55 = vand.u32 65535, %v9539_v38  ;;  %v3515_v38 = vand.u32 65535, %v9580_v23 }
 0xc24   :  { %3711 = vmin.xlane.f32.xlu0 %v9749_v18  ;;  %v3613_v22 = vcvt.s32.f32 %v3611_v55  ;;  %v3517_v2 = vcvt.s32.f32 %v3515_v38  ;;  %v3691_v55 = vand.u32 65535, %v9637_v36 }
 0xc78   :  { %v9753_v48 = vpop.xlane.xlu1 %3503 }
 0xc79   :  { %vm3505_vm1 = vcmp.eq.f32.partialorder %v9463_v7, %v9753_v48 }
 0xc7a   :  { %v3506_v53 = vsel %vm3505_vm1, %v3501_v10, inf }
 0xc7b   :  { %3507 = vmin.xlane.f32.xlu1 %v3506_v53  ;;  %v3659_v53 = vand.u32 65535, %v9543_v14  ;;  %v3563_v14 = vand.u32 65535, %v9589_v8 }
 0xc7c   :  { %v9759_v58 = vpop.xlane.xlu1 %3631 }
 0xc7d   :  { %vm3633_vm15 = vcmp.eq.f32.partialorder %v9483_v12, %v9759_v58 }
 0xc7e   :  { %v3634_v19 = vsel %vm3633_vm15, %v3629_v3, inf  ;;  %v3661_v3 = vcvt.s32.f32 %v3659_v53  ;;  %v3547_v53 = vand.u32 65535, %v9658_v46  ;;  %v3675_v46 = vand.u32 65535, %v9699_v63 }
 0xc7f   :  { %v9763_v51 = vpop.xlane.xlu0 %3487  ;;  %3635 = vmin.xlane.f32.xlu1 %v3634_v19 }
 0xc80   :  { %vm3489_vm3 = vcmp.eq.f32.partialorder %v9503_v56, %v9763_v51 }
 0xc81   :  { %v3490_v10 = vsel %vm3489_vm3, %v3485_v15, inf }
 0xc82   :  { %3491 = vmin.xlane.f32.xlu0 %v3490_v10 }
 0xc84   :  { %v9768_v7 = vpop.xlane.xlu1 %3535 }
 0xc85   :  { %vm3537_vm1 = vcmp.eq.f32.partialorder %v9529_v33, %v9768_v7 }
 0xc86   :  { %v3538_v12 = vsel %vm3537_vm1, %v3533_v31, inf  ;;  %v9774_v19 = vpop.xlane.xlu0 %3615  ;;  %v3565_v31 = vcvt.s32.f32 %v3563_v14 }
 0xc87   :  { %3539 = vmin.xlane.f32.xlu1 %v3538_v12  ;;  %vm3617_vm15 = vcmp.eq.f32.partialorder %v9547_v0, %v9774_v19 }
 0xc88   :  { %v3618_v57 = vsel %vm3617_vm15, %v3613_v22, inf  ;;  %v3693_v22 = vcvt.s32.f32 %v3691_v55 }
 0xc89   :  { %v9778_v56 = vpop.xlane.xlu1 %3663  ;;  %3619 = vmin.xlane.f32.xlu0 %v3618_v57 }
 0xc8a   :  { %vm3665_vm3 = vcmp.eq.f32.partialorder %v9565_v37, %v9778_v56  ;;  %v3643_v37 = vand.u32 65535, %v9621_v5  ;;  %v3595_v5 = vand.u32 65535, %v9669_v54  ;;  %v3723_v54 = vand.u32 65535, %v9709_v59 }
 0xc8b   :  { %v3666_v33 = vsel %vm3665_vm3, %v3661_v3, inf  ;;  %v3549_v3 = vcvt.s32.f32 %v3547_v53 }
 0xc8c   :  { %3667 = vmin.xlane.f32.xlu1 %v3666_v33  ;;  %v3645_v12 = vcvt.s32.f32 %v3643_v37  ;;  %v3597_v33 = vcvt.s32.f32 %v3595_v5 }
 0xc8e   :  { %v9784_v15 = vpop.xlane.xlu0 %3519 }
 0xc8f   :  { %vm3521_vm1 = vcmp.eq.f32.partialorder %v9599_v50, %v9784_v15 }
 0xc90   :  { %v3522_v0 = vsel %vm3521_vm1, %v3517_v2, inf  ;;  %v3677_v2 = vcvt.s32.f32 %v3675_v46 }
 0xc91   :  { %3523 = vmin.xlane.f32.xlu0 %v3522_v0 }
 0xc92   :  { %v9788_v10 = vpop.xlane.xlu1 %3567 }
 0xc93   :  { %vm3569_vm15 = vcmp.eq.f32.partialorder %v9609_v16, %v9788_v10 }
 0xc94   :  { %v3570_v23 = vsel %vm3569_vm15, %v3565_v31, inf  ;;  %v3725_v31 = vcvt.s32.f32 %v3723_v54 }
 0xc95   :  { %3571 = vmin.xlane.f32.xlu1 %v3570_v23  ;;  %v3707_v23 = vand.u32 65535, %v9745_v61  ;;  %v3638_v61 = vcvt.f32.s32 %v9759_v58 }
 0xc97   :  { %v3709_v55 = vcvt.s32.f32 %v3707_v23 }
 0xc99   :  { %v9794_v8 = vpop.xlane.xlu0 %3647 }
 0xc9a   :  { %vm3649_vm3 = vcmp.eq.f32.partialorder %v9646_v49, %v9794_v8 }
 0xc9b   :  { %v3650_v57 = vsel %vm3649_vm3, %v3645_v12, inf }
 0xc9c   :  { %v9799_v50 = vpop.xlane.xlu1 %3695  ;;  %3651 = vmin.xlane.f32.xlu0 %v3650_v57 }
 0xc9d   :  { %vm3697_vm1 = vcmp.eq.f32.partialorder %v9656_v26, %v9799_v50 }
 0xc9e   :  { %v3698_v36 = vsel %vm3697_vm1, %v3693_v22, inf }
 0xc9f   :  { %v9804_v16 = vpop.xlane.xlu0 %3551  ;;  %3699 = vmin.xlane.f32.xlu1 %v3698_v36 }
 0xca0   :  { %vm3553_vm15 = vcmp.eq.f32.partialorder %v9681_v13, %v9804_v16  ;;  %v3579_v13 = vand.u32 65535, %v9727_v21 }
 0xca1   :  { %v3554_v49 = vsel %vm3553_vm15, %v3549_v3, inf }
 0xca2   :  { %3555 = vmin.xlane.f32.xlu0 %v3554_v49  ;;  %v3581_v37 = vcvt.s32.f32 %v3579_v13 }
 0xca3   :  { %v9809_v38 = vpop.xlane.xlu1 %3599 }
 0xca4   :  { %vm3601_vm3 = vcmp.eq.f32.partialorder %v9697_v45, %v9809_v38 }
 0xca5   :  { %v3602_v26 = vsel %vm3601_vm3, %v3597_v33, inf }
 0xca6   :  { %3603 = vmin.xlane.f32.xlu1 %v3602_v26  ;;  %v3542_v26 = vcvt.f32.s32 %v9768_v7 }
 0xca7   :  { %v9814_v14 = vpop.xlane.xlu0 %3679 }
 0xca8   :  { %vm3681_vm1 = vcmp.eq.f32.partialorder %v9719_v17, %v9814_v14 }
 0xca9   :  { %v3682_v63 = vsel %vm3681_vm1, %v3677_v2, inf }
 0xcaa   :  { %v9819_v0 = vpop.xlane.xlu1 %3727  ;;  %3683 = vmin.xlane.f32.xlu0 %v3682_v63 }
 0xcab   :  { %vm3729_vm15 = vcmp.eq.f32.partialorder %v9725_v30, %v9819_v0  ;;  %v3510_v30 = vcvt.f32.s32 %v9753_v48 }
 0xcac   :  { %v3730_v45 = vsel %vm3729_vm15, %v3725_v31, inf  ;;  %vm4286_vm15 = vcmask 48128  }
 0xcad   :  { %v9823_v59 = vpop.xlane.xlu0 %3583  ;;  %3731 = vmin.xlane.f32.xlu1 %v3730_v45  ;;  %v3511_v22 = vshll.u32 %v3510_v30, 16 }
 0xcae   :  { %vm3585_vm3 = vcmp.eq.f32.partialorder %v9743_v11, %v9823_v59  ;;  %v3494_v11 = vcvt.f32.s32 %v9763_v51 }
 0xcaf   :  { %v3586_v17 = vsel %vm3585_vm3, %v3581_v37, inf }
 0xcb0   :  { %3587 = vmin.xlane.f32.xlu0 %v3586_v17  ;;  %v3495_v49 = vshll.u32 %v3494_v11, 16 }
 0xcb1   :  { %v9828_v21 = vpop.xlane.xlu0 %3711 }
 0xcb2   :  { %vm3713_vm1 = vcmp.eq.f32.partialorder %v9749_v18, %v9828_v21  ;;  %v3639_v18 = vshll.u32 %v3638_v61, 16 }
 0xcb3   :  { %v3714_v12 = vsel %vm3713_vm1, %v3709_v55, inf }
 0xcb4   :  { %3715 = vmin.xlane.f32.xlu0 %v3714_v12  ;;  %v9902_v12 = vld [vmem:[#allocation3 + $0x10] sm:$0xff] }
 0xd08   :  { %v3508_v53 = vpop.xlane.xlu1 %3507 }
 0xd09   :  { %v3509_v57 = vcvt.f32.s32 %v3508_v53 }
 0xd0b   :  { %v3512_v5 = vadd.s32 %v3511_v22, %v3509_v57  ;;  %v3526_v22 = vcvt.f32.s32 %v9784_v15 }
 0xd0c   :  { %v3636_v3 = vpop.xlane.xlu1 %3635 }
 0xd0d   :  { %v9837_v36 = vsel %vm4286_vm15, %v9097_v42, %v3512_v5  ;;  %vm3739_vm3 = vcmp.eq.s32.totalorder %v9099_v40, %v3512_v5  ;;  %vm3740_vm1 = vcmp.eq.s32.totalorder %v9102_v4, %v3512_v5  ;;  %v3637_v48 = vcvt.f32.s32 %v3636_v3 }
 0xd0e   :  { %12199 = vst [vmem:[#allocation143_spill] sm:$0xff] %v9837_v36  ;;  %vm3771_vm11 = vmand %vm3419_vm6, %vm3739_vm3  ;;  %v3574_v3 = vcvt.f32.s32 %v9788_v10  ;;  %v3527_v15 = vshll.u32 %v3526_v22, 16  ;;  %v12220_v22 = vld [vmem:[#allocation134_spill] sm:$0xff]  ;;  %v12303_v36 = vld [vmem:[#allocation59_spill] sm:$0xff] }
 0xd0f   :  { %vm3772_vm2 = vmand %vm3420_vm10, %vm3740_vm1  ;;  %v9848_v58 = vsel %vm3771_vm11, 1e+30, %v9112_v43  ;;  %v3640_v42 = vadd.s32 %v3639_v18, %v3637_v48  ;;  %v3492_v51 = vpop.xlane.xlu0 %3491  ;;  %v12206_v48 = vld [vmem:[#allocation132_spill] sm:$0xff] }
 0xd10   :  { %v9851_v46 = vsel %vm3772_vm2, 1e+30, %v9115_v52  ;;  %v3493_v33 = vcvt.f32.s32 %v3492_v51  ;;  %v3622_v52 = vcvt.f32.s32 %v9774_v19  ;;  %v3543_v19 = vshll.u32 %v3542_v26, 16 }
 0xd11   :  { %v3836_v54 = vmin.f32 %v9848_v58, %v9851_v46  ;;  %v9858_v2 = vsel %vm4286_vm15, %v9122_v9, %v3640_v42  ;;  %vm3755_vm6 = vcmp.eq.s32.totalorder %v9099_v40, %v3640_v42  ;;  %vm3756_vm10 = vcmp.eq.s32.totalorder %v9102_v4, %v3640_v42 }
 0xd12   :  { %12200 = vst [vmem:[#allocation144_spill] sm:$0xff] %v9858_v2  ;;  %v3496_v43 = vadd.s32 %v3495_v49, %v3493_v33  ;;  %vm3787_vm2 = vmand %vm3435_vm4, %vm3755_vm6  ;;  %v12208_v49 = vld [vmem:[#allocation131_spill] sm:$0xff]  ;;  %v3575_v33 = vshll.u32 %v3574_v3, 16 }
 0xd13   :  { %3837 = vmin.xlane.f32.xlu1 %v3836_v54  ;;  %vm3788_vm11 = vmand %vm3436_vm13, %vm3756_vm10  ;;  %v9870_v7 = vsel %vm3787_vm2, 1e+30, %v9134_v34  ;;  %v12301_v2 = vld [vmem:[#allocation15_spill] sm:$0xff] }
 0xd14   :  { %v9874_v9 = vsel %vm4286_vm15, %v9138_v35, %v3496_v43  ;;  %v3540_v13 = vpop.xlane.xlu1 %3539  ;;  %v9877_v63 = vsel %vm3788_vm11, 1e+30, %v9141_v47  ;;  %vm3737_vm3 = vcmp.eq.s32.totalorder %v9099_v40, %v3496_v43  ;;  %vm3738_vm4 = vcmp.eq.s32.totalorder %v9102_v4, %v3496_v43 }
 0xd15   :  { %12201 = vst [vmem:[#allocation145_spill] sm:$0xff] %v9874_v9  ;;  %v3541_v31 = vcvt.f32.s32 %v3540_v13  ;;  %v3860_v45 = vmin.f32 %v9870_v7, %v9877_v63  ;;  %vm3769_vm13 = vmand %vm3417_vm14, %vm3737_vm3  ;;  %v3670_v40 = vcvt.f32.s32 %v9778_v56  ;;  %v3623_v47 = vshll.u32 %v3622_v52, 16  ;;  %v12298_v9 = vld [vmem:[#allocation13_spill] sm:$0xff] }
 0xd16   :  { %vm3770_vm1 = vmand %vm3418_vm8, %vm3738_vm4  ;;  %v9890_v34 = vsel %vm3769_vm13, 1e+30, %v9154_v62  ;;  %v3620_v37 = vpop.xlane.xlu0 %3619  ;;  %v9905_v62 = vld [vmem:[#allocation3 + $0x18] sm:$0xff]  ;;  %v3654_v43 = vcvt.f32.s32 %v9794_v8  ;;  %v3702_v52 = vcvt.f32.s32 %v9799_v50  ;;  %v12213_v8 = vld [vmem:[#allocation133_spill] sm:$0xff] }
 0xd17   :  { %v3544_v35 = vadd.s32 %v3543_v19, %v3541_v31  ;;  %3861 = vmin.xlane.f32.xlu1 %v3860_v45  ;;  %v9894_v4 = vsel %vm3770_vm1, 1e+30, %v9158_v24  ;;  %v3621_v55 = vcvt.f32.s32 %v3620_v37  ;;  %v3671_v56 = vshll.u32 %v3670_v40, 16  ;;  %v12210_v19 = vld [vmem:[#allocation27_spill] sm:$0xff]  ;;  %v12215_v50 = vld [vmem:[#allocation30_spill] sm:$0xff] }
 0xd18   :  { %v3833_v23 = vmin.f32 %v9890_v34, %v9894_v4  ;;  %v3558_v40 = vcvt.f32.s32 %v9804_v16  ;;  %v3655_v16 = vshll.u32 %v3654_v43, 16  ;;  %v12224_v43 = vld [vmem:[#allocation31_spill] sm:$0xff] }
 0xd19   :  { %v9900_v17 = vsel %vm4286_vm15, %v9164_v60, %v3544_v35  ;;  %vm3743_vm14 = vcmp.eq.s32.totalorder %v9902_v12, %v3544_v35  ;;  %vm3744_vm8 = vcmp.eq.s32.totalorder %v9905_v62, %v3544_v35  ;;  %v3668_v24 = vpop.xlane.xlu1 %3667  ;;  %v3624_v30 = vadd.s32 %v3623_v47, %v3621_v55  ;;  %v12212_v35 = vld [vmem:[#allocation28_spill] sm:$0xff] }
 0xd1a   :  { %12202 = vst [vmem:[#allocation146_spill] sm:$0xff] %v9900_v17  ;;  %3834 = vmin.xlane.f32.xlu0 %v3833_v23  ;;  %vm3775_vm6 = vmand %vm3423_vm0, %vm3743_vm14  ;;  %v3669_v53 = vcvt.f32.s32 %v3668_v24  ;;  %v12217_v23 = vld [vmem:[#allocation29_spill] sm:$0xff] }
 0xd1b   :  { %vm3776_vm10 = vmand %vm3424_vm9, %vm3744_vm8  ;;  %v9915_v60 = vsel %vm3775_vm6, 1e+30, %v9176_v44  ;;  %v9923_v61 = vsel %vm4286_vm15, %v9180_v28, %v3624_v30  ;;  %vm3753_vm0 = vcmp.eq.s32.totalorder %v9902_v12, %v3624_v30  ;;  %vm3754_vm9 = vcmp.eq.s32.totalorder %v9905_v62, %v3624_v30  ;;  %v12297_v17 = vld [vmem:[#allocation57_spill] sm:$0xff] }
 0xd1c   :  { %v9919_v57 = vsel %vm3776_vm10, 1e+30, %v9183_v39  ;;  %12203 = vst [vmem:[#allocation147_spill] sm:$0xff] %v9923_v61  ;;  %v3672_v5 = vadd.s32 %v3671_v56, %v3669_v53  ;;  %vm3785_vm2 = vmand %vm3433_vm5, %vm3753_vm0  ;;  %vm12214_vm6 = vcmp.eq.f32.partialorder %v12212_v35, %v12213_v8  ;;  %vm12218_vm0 = vcmp.eq.f32.partialorder %v12217_v23, %v12213_v8  ;;  %v12219_v53 = vld [vmem:[#allocation71_spill] sm:$0xff] }
 0xd1d   :  { %v3842_v11 = vmin.f32 %v9915_v60, %v9919_v57  ;;  %vm3786_vm11 = vmand %vm3434_vm7, %vm3754_vm9  ;;  %v9941_v39 = vsel %vm3785_vm2, 1e+30, %v9197_v6  ;;  %vm12209_vm7 = vcmp.eq.f32.partialorder %v12208_v49, %v12206_v48 }
 0xd1e   :  { %v9935_v44 = vsel %vm4286_vm15, %v9201_v41, %v3672_v5  ;;  %v3524_v28 = vpop.xlane.xlu0 %3523  ;;  %vm3759_vm3 = vcmp.eq.s32.totalorder %v9902_v12, %v3672_v5  ;;  %vm3760_vm4 = vcmp.eq.s32.totalorder %v9905_v62, %v3672_v5  ;;  %v9946_v18 = vsel %vm3786_vm11, 1e+30, %v9204_v25  ;;  %v12205_v41 = vld [vmem:[#allocation26_spill] sm:$0xff] }
 0xd1f   :  { %12204 = vst [vmem:[#allocation148_spill] sm:$0xff] %v9935_v44  ;;  %3843 = vmin.xlane.f32.xlu1 %v3842_v11  ;;  %v3525_v10 = vcvt.f32.s32 %v3524_v28  ;;  %vm12207_vm5 = vcmp.eq.f32.partialorder %v12205_v41, %v12206_v48  ;;  %v3857_v51 = vmin.f32 %v9941_v39, %v9946_v18  ;;  %vm3792_vm1 = vmand %vm12209_vm7, %vm3760_vm4  ;;  %v3703_v5 = vshll.u32 %v3702_v52, 16  ;;  %v12222_v28 = vld [vmem:[#allocation32_spill] sm:$0xff]  ;;  %v12295_v44 = vld [vmem:[#allocation10_spill] sm:$0xff] }
 0xd20   :  { %vm3791_vm13 = vmand %vm12207_vm5, %vm3759_vm3  ;;  %v9960_v25 = vsel %vm3792_vm1, 1e+30, %v12208_v49  ;;  %vm12221_vm3 = vcmp.eq.f32.partialorder %v12219_v53, %v12220_v22  ;;  %vm12223_vm5 = vcmp.eq.f32.partialorder %v12222_v28, %v12220_v22  ;;  %v3686_v49 = vcvt.f32.s32 %v9814_v14 }
 0xd21   :  { %v9957_v6 = vsel %vm3791_vm13, 1e+30, %v12205_v41  ;;  %v3528_v54 = vadd.s32 %v3527_v15, %v3525_v10  ;;  %3858 = vmin.xlane.f32.xlu0 %v3857_v51  ;;  %v3606_v10 = vcvt.f32.s32 %v9809_v38  ;;  %v3559_v51 = vshll.u32 %v3558_v40, 16  ;;  %v12226_v38 = vld [vmem:[#allocation33_spill] sm:$0xff]  ;;  %v12229_v40 = vld [vmem:[#allocation135_spill] sm:$0xff] }
 0xd22   :  { %v3572_v42 = vpop.xlane.xlu1 %3571  ;;  %v3866_v13 = vmin.f32 %v9957_v6, %v9960_v25 }
 0xd23   :  { %v3573_v26 = vcvt.f32.s32 %v3572_v42  ;;  %v9968_v31 = vsel %vm4286_vm15, %v12210_v19, %v3528_v54  ;;  %vm3741_vm14 = vcmp.eq.s32.totalorder %v9902_v12, %v3528_v54  ;;  %vm3742_vm8 = vcmp.eq.s32.totalorder %v9905_v62, %v3528_v54 }
 0xd24   :  { %12211 = vst [vmem:[#allocation26_spill] sm:$0xff] %v9968_v31  ;;  %3867 = vmin.xlane.f32.xlu1 %v3866_v13  ;;  %vm3773_vm10 = vmand %vm12214_vm6, %vm3741_vm14  ;;  %v12294_v31 = vld [vmem:[#allocation56_spill] sm:$0xff] }
 0xd25   :  { %v3576_v45 = vadd.s32 %v3575_v33, %v3573_v26  ;;  %vm3774_vm9 = vmand %vm12218_vm0, %vm3742_vm8  ;;  %v9984_v55 = vsel %vm3773_vm10, 1e+30, %v12212_v35  ;;  %v3607_v35 = vshll.u32 %v3606_v10, 16 }
 0xd26   :  { %v9989_v30 = vsel %vm3774_vm9, 1e+30, %v12217_v23  ;;  %v12231_v23 = vld [vmem:[#allocation73_spill] sm:$0xff] }
 0xd27   :  { %v9978_v47 = vsel %vm4286_vm15, %v12215_v50, %v3576_v45  ;;  %vm3747_vm2 = vcmp.eq.s32.totalorder %v9902_v12, %v3576_v45  ;;  %vm3748_vm11 = vcmp.eq.s32.totalorder %v9905_v62, %v3576_v45  ;;  %v3839_v3 = vmin.f32 %v9984_v55, %v9989_v30  ;;  %v12228_v45 = vld [vmem:[#allocation72_spill] sm:$0xff] }
 0xd28   :  { %12216 = vst [vmem:[#allocation132_spill] sm:$0xff] %v9978_v47  ;;  %vm3779_vm4 = vmand %vm12221_vm3, %vm3747_vm2  ;;  %vm12230_vm14 = vcmp.eq.f32.partialorder %v12228_v45, %v12229_v40  ;;  %vm12232_vm0 = vcmp.eq.f32.partialorder %v12231_v23, %v12229_v40 }
 0xd29   :  { %v3652_v37 = vpop.xlane.xlu0 %3651  ;;  %vm3780_vm13 = vmand %vm12223_vm5, %vm3748_vm11  ;;  %v10000_v15 = vsel %vm3779_vm4, 1e+30, %v12219_v53  ;;  %3840 = vmin.xlane.f32.xlu0 %v3839_v3  ;;  %v3590_v53 = vcvt.f32.s32 %v9823_v59  ;;  %v12234_v3 = vld [vmem:[#allocation136_spill] sm:$0xff] }
 0xd2a   :  { %v3653_v24 = vcvt.f32.s32 %v3652_v37  ;;  %v10004_v42 = vsel %vm3780_vm13, 1e+30, %v12222_v28  ;;  %v12235_v28 = vld [vmem:[#allocation75_spill] sm:$0xff] }
 0xd2b   :  { %v3848_v26 = vmin.f32 %v10000_v15, %v10004_v42 }
 0xd2c   :  { %v3700_v56 = vpop.xlane.xlu1 %3699  ;;  %v3656_v41 = vadd.s32 %v3655_v16, %v3653_v24  ;;  %v3687_v24 = vshll.u32 %v3686_v49, 16 }
 0xd2d   :  { %v3701_v11 = vcvt.f32.s32 %v3700_v56  ;;  %3849 = vmin.xlane.f32.xlu1 %v3848_v26  ;;  %v3734_v56 = vcvt.f32.s32 %v9819_v0  ;;  %v12237_v0 = vld [vmem:[#allocation37_spill] sm:$0xff] }
 0xd2e   :  { %v10011_v52 = vsel %vm4286_vm15, %v12224_v43, %v3656_v41  ;;  %vm3757_vm7 = vcmp.eq.s32.totalorder %v9902_v12, %v3656_v41  ;;  %vm3758_vm1 = vcmp.eq.s32.totalorder %v9905_v62, %v3656_v41  ;;  %vm12238_vm11 = vcmp.eq.f32.partialorder %v12237_v0, %v12234_v3  ;;  %v12239_v43 = vld [vmem:[#allocation76_spill] sm:$0xff] }
 0xd2f   :  { %v3704_v33 = vadd.s32 %v3703_v5, %v3701_v11  ;;  %v3556_v54 = vpop.xlane.xlu0 %3555  ;;  %12225 = vst [vmem:[#allocation131_spill] sm:$0xff] %v10011_v52  ;;  %vm3789_vm8 = vmand %vm12230_vm14, %vm3757_vm7  ;;  %v12233_v11 = vld [vmem:[#allocation74_spill] sm:$0xff] }
 0xd30   :  { %v3557_v13 = vcvt.f32.s32 %v3556_v54  ;;  %vm3790_vm9 = vmand %vm12232_vm0, %vm3758_vm1  ;;  %v10028_v16 = vsel %vm3789_vm8, 1e+30, %v12228_v45  ;;  %v12242_v45 = vld [vmem:[#allocation137_spill] sm:$0xff] }
 0xd31   :  { %v10017_v19 = vsel %vm4286_vm15, %v12226_v38, %v3704_v33  ;;  %vm3763_vm6 = vcmp.eq.s32.totalorder %v9902_v12, %v3704_v33  ;;  %vm3764_vm10 = vcmp.eq.s32.totalorder %v9905_v62, %v3704_v33  ;;  %v10033_v5 = vsel %vm3790_vm9, 1e+30, %v12231_v23  ;;  %v12244_v23 = vld [vmem:[#allocation38_spill] sm:$0xff] }
 0xd32   :  { %12227 = vst [vmem:[#allocation27_spill] sm:$0xff] %v10017_v19  ;;  %v3560_v50 = vadd.s32 %v3559_v51, %v3557_v13  ;;  %vm3795_vm2 = vmand %vm3443_vm12, %vm3763_vm6  ;;  %v3863_v49 = vmin.f32 %v10028_v16, %v10033_v5  ;;  %vm12245_vm14 = vcmp.eq.f32.partialorder %v12244_v23, %v12242_v45  ;;  %v12278_v19 = vld [vmem:[#allocation42_spill] sm:$0xff] }
 0xd33   :  { %v3604_v14 = vpop.xlane.xlu1 %3603  ;;  %vm3796_vm3 = vmand %vm12238_vm11, %vm3764_vm10  ;;  %v10050_v59 = vsel %vm3795_vm2, 1e+30, %v12233_v11 }
 0xd34   :  { %v3605_v37 = vcvt.f32.s32 %v3604_v14  ;;  %v10040_v10 = vsel %vm4286_vm15, %v12235_v28, %v3560_v50  ;;  %v10053_v26 = vsel %vm3796_vm3, 1e+30, %v12237_v0  ;;  %vm3745_vm12 = vcmp.eq.s32.totalorder %v9902_v12, %v3560_v50  ;;  %3864 = vmin.xlane.f32.xlu0 %v3863_v49  ;;  %v12241_v14 = vld [vmem:[#allocation39_spill] sm:$0xff]  ;;  %v12248_v0 = vld [vmem:[#allocation34_spill] sm:$0xff] }
 0xd35   :  { %12236 = vst [vmem:[#allocation28_spill] sm:$0xff] %v10040_v10  ;;  %vm3746_vm4 = vcmp.eq.s32.totalorder %v9905_v62, %v3560_v50  ;;  %v3872_v38 = vmin.f32 %v10050_v59, %v10053_v26  ;;  %vm12243_vm5 = vcmp.eq.f32.partialorder %v12241_v14, %v12242_v45  ;;  %v3591_v28 = vshll.u32 %v3590_v53, 16  ;;  %v12269_v10 = vld [vmem:[#allocation79_spill] sm:$0xff] }
 0xd36   :  { %v3608_v41 = vadd.s32 %v3607_v35, %v3605_v37  ;;  %vm3777_vm13 = vmand %vm12243_vm5, %vm3745_vm12  ;;  %v3735_v35 = vshll.u32 %v3734_v56, 16 }
 0xd37   :  { %v3684_v51 = vpop.xlane.xlu0 %3683  ;;  %vm3778_vm8 = vmand %vm12245_vm14, %vm3746_vm4  ;;  %v10072_v11 = vsel %vm3777_vm13, 1e+30, %v12241_v14  ;;  %3873 = vmin.xlane.f32.xlu1 %v3872_v38 }
 0xd38   :  { %v3685_v54 = vcvt.f32.s32 %v3684_v51  ;;  %v10059_v13 = vsel %vm4286_vm15, %v12239_v43, %v3608_v41  ;;  %vm3751_vm7 = vcmp.eq.s32.totalorder %v9902_v12, %v3608_v41  ;;  %vm3752_vm1 = vcmp.eq.s32.totalorder %v9905_v62, %v3608_v41  ;;  %12246 = vst [vmem:[#allocation30_spill] sm:$0xff] %v10072_v11  ;;  %v12249_v43 = vld [vmem:[#allocation138_spill] sm:$0xff] }
 0xd39   :  { %12240 = vst [vmem:[#allocation133_spill] sm:$0xff] %v10059_v13  ;;  %v3718_v51 = vcvt.f32.s32 %v9828_v21  ;;  %v10076_v49 = vsel %vm3778_vm8, 1e+30, %v12244_v23  ;;  %vm12250_vm6 = vcmp.eq.f32.partialorder %v12248_v0, %v12249_v43  ;;  %v12253_v21 = vld [vmem:[#allocation40_spill] sm:$0xff] }
 0xd3a   :  { %v3732_v33 = vpop.xlane.xlu1 %3731  ;;  %v3688_v37 = vadd.s32 %v3687_v24, %v3685_v54  ;;  %12247 = vst [vmem:[#allocation29_spill] sm:$0xff] %v10076_v49  ;;  %vm3783_vm10 = vmand %vm12250_vm6, %vm3751_vm7  ;;  %v12251_v24 = vld [vmem:[#allocation77_spill] sm:$0xff]  ;;  %v3845_v14 = vmin.f32 %v10072_v11, %v10076_v49  ;;  %vm12254_vm0 = vcmp.eq.f32.partialorder %v12253_v21, %v12249_v43  ;;  %v12267_v13 = vld [vmem:[#allocation140_spill] sm:$0xff] }
 0xd3b   :  { %v3733_v50 = vcvt.f32.s32 %v3732_v33  ;;  %vm3784_vm9 = vmand %vm12254_vm0, %vm3752_vm1  ;;  %v10093_v53 = vsel %vm3783_vm10, 1e+30, %v12248_v0  ;;  %v12343_v49 = vld [vmem:[#allocation85_spill] sm:$0xff] }
 0xd3c   :  { %v10083_v56 = vsel %vm4286_vm15, %v12251_v24, %v3688_v37  ;;  %12255 = vst [vmem:[#allocation134_spill] sm:$0xff] %v10093_v53  ;;  %v10096_v23 = vsel %vm3784_vm9, 1e+30, %v12253_v21  ;;  %vm3761_vm2 = vcmp.eq.s32.totalorder %v9902_v12, %v3688_v37  ;;  %vm3762_vm11 = vcmp.eq.s32.totalorder %v9905_v62, %v3688_v37  ;;  %3846 = vmin.xlane.f32.xlu0 %v3845_v14  ;;  %v12259_v24 = vld [vmem:[#allocation35_spill] sm:$0xff] }
 0xd3d   :  { %12252 = vst [vmem:[#allocation71_spill] sm:$0xff] %v10083_v56  ;;  %v3736_v54 = vadd.s32 %v3735_v35, %v3733_v50  ;;  %v3588_v33 = vpop.xlane.xlu0 %3587  ;;  %12256 = vst [vmem:[#allocation32_spill] sm:$0xff] %v10096_v23  ;;  %v12257_v35 = vld [vmem:[#allocation78_spill] sm:$0xff]  ;;  %v3854_v41 = vmin.f32 %v10093_v53, %v10096_v23  ;;  %v12260_v56 = vld [vmem:[#allocation139_spill] sm:$0xff]  ;;  %v3719_v14 = vshll.u32 %v3718_v51, 16 }
 0xd3e   :  { %v3589_v38 = vcvt.f32.s32 %v3588_v33  ;;  %vm12261_vm3 = vcmp.eq.f32.partialorder %v12259_v24, %v12260_v56  ;;  %v12262_v33 = vld [vmem:[#allocation43_spill] sm:$0xff] }
 0xd3f   :  { %v10102_v50 = vsel %vm4286_vm15, %v12257_v35, %v3736_v54  ;;  %vm3793_vm12 = vmand %vm12261_vm3, %vm3761_vm2  ;;  %vm3767_vm4 = vcmp.eq.s32.totalorder %v9902_v12, %v3736_v54  ;;  %vm3768_vm5 = vcmp.eq.s32.totalorder %v9905_v62, %v3736_v54  ;;  %vm12263_vm13 = vcmp.eq.f32.partialorder %v12262_v33, %v12260_v56  ;;  %3855 = vmin.xlane.f32.xlu1 %v3854_v41 }
 0xd40   :  { %12258 = vst [vmem:[#allocation31_spill] sm:$0xff] %v10102_v50  ;;  %v3592_v0 = vadd.s32 %v3591_v28, %v3589_v38  ;;  %vm3794_vm7 = vmand %vm12263_vm13, %vm3762_vm11  ;;  %v10115_v37 = vsel %vm3793_vm12, 1e+30, %v12259_v24  ;;  %v12266_v50 = vld [vmem:[#allocation36_spill] sm:$0xff]  ;;  %v12271_v24 = vld [vmem:[#allocation41_spill] sm:$0xff] }
 0xd41   :  { %12264 = vst [vmem:[#allocation33_spill] sm:$0xff] %v10115_v37  ;;  %v3716_v21 = vpop.xlane.xlu0 %3715  ;;  %v10118_v35 = vsel %vm3794_vm7, 1e+30, %v12262_v33  ;;  %vm12268_vm1 = vcmp.eq.f32.partialorder %v12266_v50, %v12267_v13  ;;  %vm12272_vm8 = vcmp.eq.f32.partialorder %v12271_v24, %v12267_v13 }
 0xd42   :  { %12265 = vst [vmem:[#allocation72_spill] sm:$0xff] %v10118_v35  ;;  %vm3799_vm14 = vmand %vm12268_vm1, %vm3767_vm4  ;;  %v10125_v28 = vsel %vm4286_vm15, %v12269_v10, %v3592_v0  ;;  %v3717_v54 = vcvt.f32.s32 %v3716_v21  ;;  %v3869_v38 = vmin.f32 %v10115_v37, %v10118_v35  ;;  %vm3749_vm10 = vcmp.eq.s32.totalorder %v9902_v12, %v3592_v0  ;;  %v12275_v21 = vld [vmem:[#allocation45_spill] sm:$0xff]  ;;  %v12325_v35 = vld [vmem:[#allocation23_spill] sm:$0xff] }
 0xd43   :  { %12270 = vst [vmem:[#allocation135_spill] sm:$0xff] %v10125_v28  ;;  %vm3800_vm6 = vmand %vm12272_vm8, %vm3768_vm5  ;;  %v10133_v51 = vsel %vm3799_vm14, 1e+30, %v12266_v50  ;;  %vm3750_vm0 = vcmp.eq.s32.totalorder %v9905_v62, %v3592_v0  ;;  %v12276_v28 = vld [vmem:[#allocation141_spill] sm:$0xff]  ;;  %vm12293_vm14 = vcmask 7168   ;;  %v12328_v37 = vld [vmem:[#allocation20_spill] sm:$0xff] }
 0xd44   :  { %12273 = vst [vmem:[#allocation73_spill] sm:$0xff] %v10133_v51  ;;  %v10136_v41 = vsel %vm3800_vm6, 1e+30, %v12271_v24  ;;  %v3720_v10 = vadd.s32 %v3719_v14, %v3717_v54  ;;  %3870 = vmin.xlane.f32.xlu0 %v3869_v38  ;;  %vm12277_vm9 = vcmp.eq.f32.partialorder %v12275_v21, %v12276_v28  ;;  %vm12279_vm11 = vcmp.eq.f32.partialorder %v12278_v19, %v12276_v28  ;;  %v12281_v24 = vld [vmem:[#allocation80_spill] sm:$0xff]  ;;  %v12285_v38 = vld [vmem:[#allocation142_spill] sm:$0xff]  ;;  %vm12296_vm8 = vmmov %vm12293_vm14 }
 0xd45   :  { %12274 = vst [vmem:[#allocation74_spill] sm:$0xff] %v10136_v41  ;;  %v3878_v33 = vmin.f32 %v10133_v51, %v10136_v41  ;;  %vm3781_vm2 = vmand %vm12277_vm9, %vm3749_vm10  ;;  %v12284_v54 = vld [vmem:[#allocation44_spill] sm:$0xff]  ;;  %v4211_v61 = vsel %vm12296_vm8, %v12295_v44, %v12294_v31  ;;  %v12312_v31 = vld [vmem:[#allocation62_spill] sm:$0xff] }
 0xd46   :  { %vm3782_vm3 = vmand %vm12279_vm11, %vm3750_vm0  ;;  %v10149_v50 = vsel %vm3781_vm2, 1e+30, %v12275_v21  ;;  %v10153_v52 = vsel %vm4286_vm15, %v12281_v24, %v3720_v10  ;;  %vm3765_vm12 = vcmp.eq.s32.totalorder %v9902_v12, %v3720_v10  ;;  %vm3766_vm4 = vcmp.eq.s32.totalorder %v9905_v62, %v3720_v10  ;;  %v12287_v21 = vld [vmem:[#allocation4_spill] sm:$0xff]  ;;  %v12291_v24 = vld [vmem:[#allocation55_spill] sm:$0xff] }
 0xd47   :  { %12280 = vst [vmem:[#allocation136_spill] sm:$0xff] %v10149_v50  ;;  %12282 = vst [vmem:[#allocation75_spill] sm:$0xff] %v10153_v52  ;;  %3879 = vmin.xlane.f32.xlu1 %v3878_v33  ;;  %v10156_v0 = vsel %vm3782_vm3, 1e+30, %v12278_v19  ;;  %vm12286_vm5 = vcmp.eq.f32.partialorder %v12284_v54, %v12285_v38  ;;  %vm12288_vm7 = vcmp.eq.f32.partialorder %v12287_v21, %v12285_v38  ;;  %v12292_v52 = vld [vmem:[#allocation11_spill] sm:$0xff]  ;;  %v12304_v38 = vld [vmem:[#allocation12_spill] sm:$0xff] }
 0xd48   :  { %12283 = vst [vmem:[#allocation37_spill] sm:$0xff] %v10156_v0  ;;  %v3851_v14 = vmin.f32 %v10149_v50, %v10156_v0  ;;  %vm3797_vm13 = vmand %vm12286_vm5, %vm3765_vm12  ;;  %v4203_v47 = vsel %vm12293_vm14, %v12292_v52, %v12291_v24  ;;  %v12309_v24 = vld [vmem:[#allocation61_spill] sm:$0xff]  ;;  %v12310_v0 = vld [vmem:[#allocation14_spill] sm:$0xff] }
 0xd49   :  { %vm3798_vm1 = vmand %vm12288_vm7, %vm3766_vm4  ;;  %v10169_v33 = vsel %vm3797_vm13, 1e+30, %v12284_v54  ;;  %v12313_v50 = vld [vmem:[#allocation19_spill] sm:$0xff]  ;;  %v12316_v28 = vld [vmem:[#allocation16_spill] sm:$0xff]  ;;  %vm12331_vm7 = vcmask 15360  }
 0xd4a   :  { %12289 = vst [vmem:[#allocation76_spill] sm:$0xff] %v10169_v33  ;;  %3852 = vmin.xlane.f32.xlu0 %v3851_v14  ;;  %v10172_v19 = vsel %vm3798_vm1, 1e+30, %v12287_v21  ;;  %vm12299_vm6 = vmmov %vm12296_vm8  ;;  %v12300_v14 = vld [vmem:[#allocation58_spill] sm:$0xff]  ;;  %v12319_v41 = vld [vmem:[#allocation21_spill] sm:$0xff] }
 0xd4b   :  { %12290 = vst [vmem:[#allocation39_spill] sm:$0xff] %v10172_v19  ;;  %v3875_v10 = vmin.f32 %v10169_v33, %v10172_v19  ;;  %v4202_v54 = vsel %vm12299_vm6, %v12298_v9, %v12297_v17  ;;  %vm12302_vm10 = vmmov %vm12299_vm6  ;;  %v12306_v19 = vld [vmem:[#allocation60_spill] sm:$0xff]  ;;  %v12307_v33 = vld [vmem:[#allocation17_spill] sm:$0xff] }
 0xd4c   :  { %v4205_v21 = vsel %vm12302_vm10, %v12301_v2, %v12300_v14  ;;  %vm12305_vm0 = vmmov %vm12299_vm6  ;;  %v12315_v17 = vld [vmem:[#allocation63_spill] sm:$0xff]  ;;  %v12318_v14 = vld [vmem:[#allocation64_spill] sm:$0xff]  ;;  %vm12342_vm6 = vcmask 23552  }
 0xd4d   :  { %vm12308_vm9 = vmmov %vm12305_vm0  ;;  %v12322_v51 = vld [vmem:[#allocation18_spill] sm:$0xff] }
 0xd4e   :  { %3876 = vmin.xlane.f32.xlu0 %v3875_v10  ;;  %v4210_v10 = vsel %vm12305_vm0, %v12304_v38, %v12303_v36  ;;  %v4213_v52 = vsel %vm12308_vm9, %v12307_v33, %v12306_v19  ;;  %vm12311_vm2 = vmmov %vm12305_vm0  ;;  %v12321_v38 = vld [vmem:[#allocation65_spill] sm:$0xff]  ;;  %v12324_v19 = vld [vmem:[#allocation66_spill] sm:$0xff]  ;;  %vm12348_vm9 = vcmask 31744  }
 0xd4f   :  { %v4204_v44 = vsel %vm12311_vm2, %v12310_v0, %v12309_v24  ;;  %vm12314_vm11 = vmmov %vm12305_vm0  ;;  %v12327_v24 = vld [vmem:[#allocation67_spill] sm:$0xff]  ;;  %vm4303_vm2 = vcmask 56320  }
 0xd50   :  { %v4207_v9 = vsel %vm12314_vm11, %v12313_v50, %v12312_v31  ;;  %vm12317_vm3 = vmmov %vm12305_vm0  ;;  %v12330_v31 = vld [vmem:[#allocation84_spill] sm:$0xff] }
 0xd51   :  { %v4212_v2 = vsel %vm12317_vm3, %v12316_v28, %v12315_v17  ;;  %vm12320_vm12 = vmmov %vm12305_vm0  ;;  %v4220_v13 = vsel %vm12331_vm7, %v4203_v47, %v12330_v31  ;;  %v12332_v28 = vld [vmem:[#allocation68_spill] sm:$0xff]  ;;  %v12333_v17 = vld [vmem:[#allocation25_spill] sm:$0xff] }
 0xd52   :  { %v4215_v36 = vsel %vm12320_vm12, %v12319_v41, %v12318_v14  ;;  %vm12323_vm4 = vmmov %vm12305_vm0  ;;  %v12335_v41 = vld [vmem:[#allocation69_spill] sm:$0xff]  ;;  %v12336_v14 = vld [vmem:[#allocation22_spill] sm:$0xff] }
 0xd53   :  { %v4206_v33 = vsel %vm12323_vm4, %v12322_v51, %v12321_v38  ;;  %vm12326_vm5 = vmmov %vm12305_vm0  ;;  %v12338_v51 = vld [vmem:[#allocation70_spill] sm:$0xff]  ;;  %v12339_v38 = vld [vmem:[#allocation24_spill] sm:$0xff]  ;;  %vm12356_vm4 = vcmask 39936  }
 0xd54   :  { %v4209_v0 = vsel %vm12326_vm5, %v12325_v35, %v12324_v19  ;;  %vm12329_vm13 = vmmov %vm12305_vm0  ;;  %v12341_v35 = vld [vmem:[#allocation48_spill] sm:$0xff] }
 0xd55   :  { %v4214_v50 = vsel %vm12329_vm13, %v12328_v37, %v12327_v24  ;;  %vm12334_vm1 = vmmov %vm12305_vm0  ;;  %v4237_v19 = vsel %vm12342_vm6, %v4220_v13, %v12341_v35  ;;  %v12345_v24 = vld [vmem:[#allocation86_spill] sm:$0xff]  ;;  %v12347_v31 = vld [vmem:[#allocation100_spill] sm:$0xff] }
 0xd56   :  { %v4217_v56 = vsel %vm12334_vm1, %v12333_v17, %v12332_v28  ;;  %vm12337_vm14 = vmmov %vm12305_vm0  ;;  %v4254_v28 = vsel %vm12348_vm9, %v4237_v19, %v12347_v31  ;;  %v12349_v17 = vld [vmem:[#allocation87_spill] sm:$0xff]  ;;  %v12355_v13 = vld [vmem:[#allocation81_spill] sm:$0xff] }
 0xd57   :  { %v4208_v23 = vsel %vm12337_vm14, %v12336_v14, %v12335_v41  ;;  %vm12340_vm8 = vmmov %vm12305_vm0  ;;  %v12351_v14 = vld [vmem:[#allocation88_spill] sm:$0xff]  ;;  %v4271_v35 = vsel %vm12356_vm4, %v4254_v28, %v12355_v13  ;;  %v12367_v28 = vld [vmem:[#allocation46_spill] sm:$0xff] }
 0xd58   :  { %v4216_v53 = vsel %vm12340_vm8, %v12339_v38, %v12338_v51  ;;  %vm12344_vm10 = vmmov %vm12331_vm7  ;;  %v12353_v51 = vld [vmem:[#allocation89_spill] sm:$0xff]  ;;  %v12361_v19 = vld [vmem:[#allocation92_spill] sm:$0xff] }
 0xd59   :  { %v4228_v37 = vsel %vm12344_vm10, %v4211_v61, %v12343_v49  ;;  %vm12346_vm0 = vmmov %vm12331_vm7  ;;  %v12357_v61 = vld [vmem:[#allocation90_spill] sm:$0xff]  ;;  %vm12368_vm10 = vcmask 23552  }
 0xd5a   :  { %v4219_v47 = vsel %vm12346_vm0, %v4202_v54, %v12345_v24  ;;  %vm12350_vm11 = vmmov %vm12346_vm0  ;;  %v12359_v54 = vld [vmem:[#allocation91_spill] sm:$0xff] }
 0xd5b   :  { %v4222_v41 = vsel %vm12350_vm11, %v4205_v21, %v12349_v17  ;;  %vm12352_vm3 = vmmov %vm12346_vm0  ;;  %v4288_v21 = vsel %vm4286_vm15, %v4271_v35, %v9432_v20  ;;  %v12374_v35 = vld [vmem:[#allocation101_spill] sm:$0xff] }
 0xd5c   :  { %v4227_v11 = vsel %vm12352_vm3, %v4210_v10, %v12351_v14  ;;  %vm12354_vm12 = vmmov %vm12346_vm0  ;;  %v12363_v10 = vld [vmem:[#allocation93_spill] sm:$0xff]  ;;  %vm12375_vm3 = vcmask 31744  }
 0xd5d   :  { %v4230_v38 = vsel %vm12354_vm12, %v4213_v52, %v12353_v51  ;;  %vm12358_vm5 = vmmov %vm12346_vm0 }
 0xd5e   :  { %v4221_v49 = vsel %vm12358_vm5, %v4204_v44, %v12357_v61  ;;  %vm12360_vm13 = vmmov %vm12346_vm0  ;;  %v12365_v44 = vld [vmem:[#allocation94_spill] sm:$0xff] }
 0xd5f   :  { %v4224_v24 = vsel %vm12360_vm13, %v4207_v9, %v12359_v54  ;;  %vm12362_vm7 = vmmov %vm12346_vm0  ;;  %v12378_v54 = vld [vmem:[#allocation98_spill] sm:$0xff]  ;;  %vm12381_vm13 = vcmask 39936  }
 0xd60   :  { %v4229_v31 = vsel %vm12362_vm7, %v4212_v2, %v12361_v19  ;;  %vm12364_vm1 = vmmov %vm12346_vm0  ;;  %v4245_v2 = vsel %vm12368_vm10, %v4228_v37, %v12367_v28 }
 0xd61   :  { %v4232_v14 = vsel %vm12364_vm1, %v4215_v36, %v12363_v10  ;;  %vm12366_vm6 = vmmov %vm12346_vm0  ;;  %vm12369_vm0 = vcmask 64512   ;;  %v12370_v36 = vld [vmem:[#allocation95_spill] sm:$0xff]  ;;  %v4262_v61 = vsel %vm12375_vm3, %v4245_v2, %v12374_v35 }
 0xd62   :  { %v4223_v9 = vsel %vm12366_vm6, %v4206_v33, %v12365_v44  ;;  %vm12371_vm9 = vmmov %vm12364_vm1  ;;  %v12376_v33 = vld [vmem:[#allocation97_spill] sm:$0xff] }
 0xd63   :  { %vm12373_vm11 = vmmov %vm12364_vm1 }
 0xd64   :  { %vm12377_vm4 = vmmov %vm12364_vm1 }
 0xd65   :  { %v4234_v37 = vsel %vm12377_vm4, %v4217_v56, %v12376_v33  ;;  %vm12379_vm5 = vmmov %vm12364_vm1 }
 0xd66   :  { %v10275_v19 = vsel %vm12379_vm5, %v4208_v23, %v12378_v54  ;;  %vm12383_vm7 = vmmov %vm12364_vm1  ;;  %v12386_v23 = vld [vmem:[#allocation102_spill] sm:$0xff]  ;;  %v12392_v54 = vld [vmem:[#allocation5_spill] sm:$0xff] }
 0xd67   :  { %vm12385_vm1 = vmmov %vm12368_vm10 }
 0xd68   :  { %vm12389_vm10 = vmmov %vm12381_vm13 }
 0xda0   :  { %v3838_v17 = vpop.xlane.xlu1 %3837 }
 0xda1   :  { %vm3883_vm14 = vcmp.eq.f32.partialorder %v9848_v58, %v3838_v17  ;;  %vm3884_vm8 = vcmp.eq.f32.partialorder %v9851_v46, %v3838_v17  ;;  %v10255_v52 = vsel %vm4303_vm2, %v4288_v21, %v3838_v17  ;;  %v4226_v58 = vsel %vm12371_vm9, %v4209_v0, %v12370_v36  ;;  %v12372_v46 = vld [vmem:[#allocation96_spill] sm:$0xff]  ;;  %v12382_v0 = vld [vmem:[#allocation99_spill] sm:$0xff] }
 0xda2   :  { %v3915_v51 = vsel %vm3883_vm14, %v9902_v12, 2147483647  ;;  %v3916_v20 = vsel %vm3884_vm8, %v9905_v62, 2147483647  ;;  %4433 = vst.msk [vmem:[#allocation2 + $0x10] sm:$0xff] %vm12369_vm0, %v10255_v52  ;;  %v4231_v13 = vsel %vm12373_vm11, %v4214_v50, %v12372_v46  ;;  %v12380_v21 = vld [vmem:[#allocation116_spill] sm:$0xff]  ;;  %v10283_v44 = vsel %vm12383_vm7, %v4216_v53, %v12382_v0  ;;  %vm12387_vm14 = vmmov %vm12375_vm3 }
 0xda3   :  { %vm3961_vm12 = vcmp.lt.s32.totalorder %v3915_v51, %v3916_v20  ;;  %v4279_v17 = vsel %vm12381_vm13, %v4262_v61, %v12380_v21  ;;  %v12384_v50 = vld [vmem:[#allocation6_spill] sm:$0xff]  ;;  %v12388_v53 = vld [vmem:[#allocation117_spill] sm:$0xff]  ;;  %vm12391_vm0 = vmmov %vm12385_vm1 }
 0xda4   :  { %v10279_v10 = vsel %vm3961_vm12, %v3915_v51, %v3916_v20  ;;  %v4236_v28 = vsel %vm12385_vm1, %v4219_v47, %v12384_v50  ;;  %v4296_v2 = vsel %vm4286_vm15, %v4279_v17, %v9448_v1  ;;  %v3862_v56 = vpop.xlane.xlu1 %3861  ;;  %v12390_v61 = vld [vmem:[#allocation82_spill] sm:$0xff]  ;;  %vm12393_vm9 = vmmov %vm12391_vm0 }
 0xda5   :  { %v3964_v36 = vshra.s32 %v10279_v10, 16  ;;  %v4253_v46 = vsel %vm12387_vm14, %v4236_v28, %v12386_v23  ;;  %vm3899_vm8 = vcmp.eq.f32.partialorder %v9870_v7, %v3862_v56  ;;  %vm3900_vm6 = vcmp.eq.f32.partialorder %v9877_v63, %v3862_v56  ;;  %vm12395_vm4 = vmmov %vm12391_vm0 }
 0xda6   :  { %v10295_v51 = vsel %vm4303_vm2, %v4296_v2, %v3862_v56  ;;  %v4270_v20 = vsel %vm12389_vm10, %v4253_v46, %v12388_v53  ;;  %v3931_v47 = vsel %vm3899_vm8, %v9902_v12, 2147483647  ;;  %v3932_v1 = vsel %vm3900_vm6, %v9905_v62, 2147483647  ;;  %vm12397_vm5 = vmmov %vm12391_vm0  ;;  %v12400_v56 = vld [vmem:[#allocation103_spill] sm:$0xff] }
 0xda7   :  { %v10301_v35 = vcvt.s32.f32 %v3964_v36  ;;  %v4239_v33 = vsel %vm12391_vm0, %v4222_v41, %v12390_v61  ;;  %v4244_v7 = vsel %vm12393_vm9, %v4227_v11, %v12392_v54  ;;  %v4287_v63 = vsel %vm4286_vm15, %v4270_v20, %v9465_v32  ;;  %v3835_v21 = vpop.xlane.xlu0 %3834  ;;  %v12394_v41 = vld [vmem:[#allocation51_spill] sm:$0xff]  ;;  %v12396_v11 = vld [vmem:[#allocation49_spill] sm:$0xff]  ;;  %vm12399_vm13 = vmmov %vm12391_vm0 }
 0xda8   :  { %vm4089_vm11 = vcmp.lt.s32.totalorder %v3931_v47, %v3932_v1  ;;  %vm3881_vm3 = vcmp.eq.f32.partialorder %v9890_v34, %v3835_v21  ;;  %vm3882_vm12 = vcmp.eq.f32.partialorder %v9894_v4, %v3835_v21  ;;  %v10312_v17 = vsel %vm4303_vm2, %v4287_v63, %v3835_v21  ;;  %v12398_v34 = vld [vmem:[#allocation47_spill] sm:$0xff]  ;;  %vm12401_vm7 = vmmov %vm12387_vm14  ;;  %v12408_v61 = vld [vmem:[#allocation8_spill] sm:$0xff] }
 0xda9   :  { %3967 = vmin.xlane.f32.xlu1 %v10301_v35  ;;  %v10315_v0 = vsel %vm4089_vm11, %v3931_v47, %v3932_v1  ;;  %v4247_v50 = vsel %vm12395_vm4, %v4230_v38, %v12394_v41  ;;  %v4238_v28 = vsel %vm12397_vm5, %v4221_v49, %v12396_v11  ;;  %v3913_v32 = vsel %vm3881_vm3, %v9902_v12, 2147483647  ;;  %v12402_v46 = vld [vmem:[#allocation7_spill] sm:$0xff]  ;;  %vm12403_vm14 = vmmov %vm12391_vm0  ;;  %v12406_v49 = vld [vmem:[#allocation118_spill] sm:$0xff] }
 0xdaa   :  { %v3914_v2 = vsel %vm3882_vm12, %v9905_v62, 2147483647  ;;  %v4241_v4 = vsel %vm12399_vm13, %v4224_v24, %v12398_v34  ;;  %v4256_v36 = vsel %vm12401_vm7, %v4239_v33, %v12400_v56  ;;  %v4092_v23 = vshra.s32 %v10315_v0, 16  ;;  %v12404_v38 = vld [vmem:[#allocation83_spill] sm:$0xff]  ;;  %vm12405_vm8 = vmmov %vm12391_vm0  ;;  %v12410_v21 = vld [vmem:[#allocation52_spill] sm:$0xff] }
 0xdab   :  { %vm3945_vm1 = vcmp.lt.s32.totalorder %v3913_v32, %v3914_v2  ;;  %v4246_v53 = vsel %vm12403_vm14, %v4229_v31, %v12402_v46  ;;  %v4249_v20 = vsel %vm12405_vm8, %v4232_v14, %v12404_v38  ;;  %vm12407_vm6 = vmmov %vm12389_vm10  ;;  %v10347_v14 = vsel %vm12391_vm0, %v4226_v58, %v12410_v21  ;;  %v12413_v58 = vld [vmem:[#allocation50_spill] sm:$0xff]  ;;  %v12417_v56 = vld [vmem:[#allocation119_spill] sm:$0xff] }
 0xdac   :  { %v4273_v47 = vsel %vm12407_vm6, %v4256_v36, %v12406_v49  ;;  %v10334_v1 = vsel %vm3945_vm1, %v3913_v32, %v3914_v2  ;;  %vm12409_vm10 = vmmov %vm12391_vm0  ;;  %v3844_v54 = vpop.xlane.xlu1 %3843  ;;  %v10342_v63 = vcvt.s32.f32 %v4092_v23  ;;  %v12419_v23 = vld [vmem:[#allocation53_spill] sm:$0xff]  ;;  %v12421_v38 = vld [vmem:[#allocation120_spill] sm:$0xff] }
 0xdad   :  { %v10338_v24 = vsel %vm12409_vm10, %v4223_v9, %v12408_v61  ;;  %v4290_v33 = vsel %vm4286_vm15, %v4273_v47, %v9487_v27  ;;  %v3948_v31 = vshra.s32 %v10334_v1, 16  ;;  %vm3887_vm9 = vcmp.eq.f32.partialorder %v9915_v60, %v3844_v54  ;;  %v12411_v9 = vld [vmem:[#allocation104_spill] sm:$0xff]  ;;  %vm12412_vm3 = vmmov %vm12401_vm7  ;;  %v12415_v60 = vld [vmem:[#allocation105_spill] sm:$0xff] }
 0xdae   :  { %vm3888_vm11 = vcmp.eq.f32.partialorder %v9919_v57, %v3844_v54  ;;  %v10352_v41 = vsel %vm4303_vm2, %v4290_v33, %v3844_v54  ;;  %v4261_v11 = vsel %vm12412_vm3, %v4244_v7, %v12411_v9  ;;  %v3919_v27 = vsel %vm3887_vm9, %v9902_v12, 2147483647  ;;  %4095 = vmin.xlane.f32.xlu1 %v10342_v63  ;;  %vm12414_vm12 = vmmov %vm12391_vm0  ;;  %v3859_v47 = vpop.xlane.xlu0 %3858  ;;  %v12423_v61 = vld [vmem:[#allocation9_spill] sm:$0xff] }
 0xdaf   :  { %v3920_v32 = vsel %vm3888_vm11, %v9905_v62, 2147483647  ;;  %v10359_v2 = vcvt.s32.f32 %v3948_v31  ;;  %v4248_v34 = vsel %vm12414_vm12, %v4231_v13, %v12413_v58  ;;  %vm12416_vm4 = vmmov %vm12412_vm3  ;;  %vm3897_vm14 = vcmp.eq.f32.partialorder %v9941_v39, %v3859_v47 }
 0xdb0   :  { %v4264_v57 = vsel %vm12416_vm4, %v4247_v50, %v12415_v60  ;;  %vm12418_vm5 = vmmov %vm12407_vm6  ;;  %vm3993_vm13 = vcmp.lt.s32.totalorder %v3919_v27, %v3920_v32  ;;  %vm3898_vm8 = vcmp.eq.f32.partialorder %v9946_v18, %v3859_v47  ;;  %v3929_v54 = vsel %vm3897_vm14, %v9902_v12, 2147483647  ;;  %v12425_v18 = vld [vmem:[#allocation54_spill] sm:$0xff]  ;;  %v12430_v60 = vld [vmem:[#allocation108_spill] sm:$0xff] }
 0xdb1   :  { %v4278_v36 = vsel %vm12418_vm5, %v4261_v11, %v12417_v56  ;;  %vm12420_vm7 = vmmov %vm12391_vm0  ;;  %3951 = vmin.xlane.f32.xlu0 %v10359_v2  ;;  %v10374_v13 = vsel %vm3993_vm13, %v3919_v27, %v3920_v32  ;;  %v3930_v31 = vsel %vm3898_vm8, %v9905_v62, 2147483647  ;;  %v3868_v21 = vpop.xlane.xlu1 %3867  ;;  %v12427_v27 = vld [vmem:[#allocation106_spill] sm:$0xff] }
 0xdb2   :  { %v4251_v7 = vsel %vm12420_vm7, %v4234_v37, %v12419_v23  ;;  %v4295_v46 = vsel %vm4286_vm15, %v4278_v36, %v9505_v29  ;;  %vm12422_vm1 = vmmov %vm12418_vm5  ;;  %v3996_v37 = vshra.s32 %v10374_v13, 16  ;;  %vm4073_vm10 = vcmp.lt.s32.totalorder %v3929_v54, %v3930_v31 }
 0xdb3   :  { %v4281_v49 = vsel %vm12422_vm1, %v4264_v57, %v12421_v38  ;;  %v10379_v50 = vsel %vm4303_vm2, %v4295_v46, %v3859_v47  ;;  %vm12424_vm6 = vmmov %vm12391_vm0  ;;  %vm3903_vm0 = vcmp.eq.f32.partialorder %v9957_v6, %v3868_v21  ;;  %vm3904_vm9 = vcmp.eq.f32.partialorder %v9960_v25, %v3868_v21  ;;  %v12428_v6 = vld [vmem:[#allocation107_spill] sm:$0xff]  ;;  %v12434_v46 = vld [vmem:[#allocation109_spill] sm:$0xff] }
 0xdb4   :  { %v4242_v29 = vsel %vm12424_vm6, %v10275_v19, %v12423_v61  ;;  %v4298_v33 = vsel %vm4286_vm15, %v4281_v49, %v12206_v48  ;;  %vm12426_vm11 = vmmov %vm12424_vm6  ;;  %v3935_v48 = vsel %vm3903_vm0, %v9902_v12, 2147483647  ;;  %v3936_v9 = vsel %vm3904_vm9, %v9905_v62, 2147483647  ;;  %v12436_v38 = vld [vmem:[#allocation122_spill] sm:$0xff] }
 0xdb5   :  { %v10392_v39 = vsel %vm4303_vm2, %v4298_v33, %v3868_v21  ;;  %v10397_v19 = vsel %vm12426_vm11, %v10283_v44, %v12425_v18  ;;  %v10401_v11 = vcvt.s32.f32 %v3996_v37  ;;  %v4255_v32 = vsel %vm12412_vm3, %v4238_v28, %v12427_v27  ;;  %vm12429_vm12 = vmmov %vm12412_vm3  ;;  %v12432_v44 = vld [vmem:[#allocation121_spill] sm:$0xff] }
 0xdb6   :  { %v4258_v25 = vsel %vm12429_vm12, %v4241_v4, %v12428_v6  ;;  %vm4121_vm4 = vcmp.lt.s32.totalorder %v3935_v48, %v3936_v9  ;;  %v10407_v58 = vsel %vm4073_vm10, %v3929_v54, %v3930_v31  ;;  %vm12431_vm5 = vmmov %vm12412_vm3  ;;  %v3841_v47 = vpop.xlane.xlu0 %3840  ;;  %v12442_v6 = vld [vmem:[#allocation113_spill] sm:$0xff] }
 0xdb7   :  { %v4263_v57 = vsel %vm12431_vm5, %v4246_v53, %v12430_v60  ;;  %vm12433_vm13 = vmmov %vm12422_vm1  ;;  %3999 = vmin.xlane.f32.xlu1 %v10401_v11  ;;  %v4076_v36 = vshra.s32 %v10407_v58, 16  ;;  %v10415_v23 = vsel %vm4121_vm4, %v3935_v48, %v3936_v9  ;;  %v4275_v49 = vsel %vm12422_vm1, %v4258_v25, %v12436_v38  ;;  %v12441_v9 = vld [vmem:[#allocation112_spill] sm:$0xff]  ;;  %v12444_v25 = vld [vmem:[#allocation114_spill] sm:$0xff] }
 0xdb8   :  { %v4272_v56 = vsel %vm12433_vm13, %v4255_v32, %v12432_v44  ;;  %vm12435_vm7 = vmmov %vm12412_vm3  ;;  %v4124_v53 = vshra.s32 %v10415_v23, 16  ;;  %vm3885_vm14 = vcmp.eq.f32.partialorder %v9984_v55, %v3841_v47  ;;  %vm3886_vm8 = vcmp.eq.f32.partialorder %v9989_v30, %v3841_v47  ;;  %v12437_v30 = vld [vmem:[#allocation110_spill] sm:$0xff]  ;;  %v12446_v44 = vld [vmem:[#allocation123_spill] sm:$0xff] }
 0xdb9   :  { %v4266_v28 = vsel %vm12435_vm7, %v4249_v20, %v12434_v46  ;;  %v4289_v4 = vsel %vm4286_vm15, %v4272_v56, %v12213_v8  ;;  %v10429_v61 = vcvt.s32.f32 %v4076_v36  ;;  %v4292_v20 = vsel %vm4286_vm15, %v4275_v49, %v12220_v22  ;;  %vm12438_vm9 = vmmov %vm12412_vm3  ;;  %v12448_v46 = vld [vmem:[#allocation124_spill] sm:$0xff]  ;;  %v12450_v49 = vld [vmem:[#allocation125_spill] sm:$0xff] }
 0xdba   :  { %v10427_v37 = vsel %vm4303_vm2, %v4289_v4, %v3841_v47  ;;  %v3917_v8 = vsel %vm3885_vm14, %v9902_v12, 2147483647  ;;  %v3918_v33 = vsel %vm3886_vm8, %v9905_v62, 2147483647  ;;  %v3850_v54 = vpop.xlane.xlu1 %3849  ;;  %v10435_v31 = vcvt.s32.f32 %v4124_v53  ;;  %vm12440_vm11 = vmmov %vm12412_vm3 }
 0xdbb   :  { %vm3977_vm6 = vcmp.lt.s32.totalorder %v3917_v8, %v3918_v33  ;;  %vm3891_vm10 = vcmp.eq.f32.partialorder %v10000_v15, %v3850_v54  ;;  %vm3892_vm0 = vcmp.eq.f32.partialorder %v10004_v42, %v3850_v54  ;;  %v10440_v55 = vsel %vm4303_vm2, %v4292_v20, %v3850_v54  ;;  %4079 = vmin.xlane.f32.xlu0 %v10429_v61  ;;  %v12439_v15 = vld [vmem:[#allocation111_spill] sm:$0xff]  ;;  %vm12443_vm4 = vmmov %vm12412_vm3 }
 0xdbc   :  { %v4257_v22 = vsel %vm12438_vm9, %v10338_v24, %v12437_v30  ;;  %v3923_v21 = vsel %vm3891_vm10, %v9902_v12, 2147483647  ;;  %v3924_v18 = vsel %vm3892_vm0, %v9905_v62, 2147483647  ;;  %4127 = vmin.xlane.f32.xlu1 %v10435_v31  ;;  %v10449_v48 = vsel %vm3977_vm6, %v3917_v8, %v3918_v33  ;;  %vm12445_vm5 = vmmov %vm12412_vm3 }
 0xdbd   :  { %v4260_v42 = vsel %vm12440_vm11, %v10347_v14, %v12439_v15  ;;  %v4265_v27 = vsel %vm12412_vm3, %v4248_v34, %v12441_v9  ;;  %vm4025_vm12 = vcmp.lt.s32.totalorder %v3923_v21, %v3924_v18  ;;  %v3980_v32 = vshra.s32 %v10449_v48, 16  ;;  %vm12447_vm13 = vmmov %vm12422_vm1  ;;  %v12455_v15 = vld [vmem:[#allocation30_spill] sm:$0xff] }
 0xdbe   :  { %v4268_v24 = vsel %vm12443_vm4, %v4251_v7, %v12442_v6  ;;  %v10461_v60 = vsel %vm12445_vm5, %v4242_v29, %v12444_v25  ;;  %v4280_v56 = vsel %vm12447_vm13, %v4263_v57, %v12446_v44  ;;  %v10465_v36 = vsel %vm4025_vm12, %v3923_v21, %v3924_v18  ;;  %vm12449_vm7 = vmmov %vm12422_vm1  ;;  %v12457_v44 = vld [vmem:[#allocation134_spill] sm:$0xff] }
 0xdbf   :  { %v4297_v14 = vsel %vm4286_vm15, %v4280_v56, %v12229_v40  ;;  %v4283_v34 = vsel %vm12449_vm7, %v4266_v28, %v12448_v46  ;;  %v10471_v38 = vcvt.s32.f32 %v3980_v32  ;;  %v4028_v7 = vshra.s32 %v10465_v36, 16  ;;  %vm12452_vm9 = vmmov %vm12422_vm1 }
 0xdc0   :  { %v4274_v29 = vsel %vm12422_vm1, %v4257_v22, %v12450_v49  ;;  %v4300_v40 = vsel %vm4286_vm15, %v4283_v34, %v12234_v3  ;;  %vm12454_vm11 = vmmov %vm12422_vm1  ;;  %v12460_v49 = vld [vmem:[#allocation139_spill] sm:$0xff] }
 0xdc1   :  { %v3865_v4 = vpop.xlane.xlu0 %3864  ;;  %3983 = vmin.xlane.f32.xlu0 %v10471_v38  ;;  %v10486_v20 = vcvt.s32.f32 %v4028_v7  ;;  %v4291_v30 = vsel %vm4286_vm15, %v4274_v29, %v12242_v45 }
 0xdc2   :  { %vm3901_vm14 = vcmp.eq.f32.partialorder %v10028_v16, %v3865_v4  ;;  %vm3902_vm8 = vcmp.eq.f32.partialorder %v10033_v5, %v3865_v4  ;;  %v10479_v57 = vsel %vm4303_vm2, %v4297_v14, %v3865_v4  ;;  %v12451_v5 = vld [vmem:[#allocation126_spill] sm:$0xff]  ;;  %v12459_v14 = vld [vmem:[#allocation128_spill] sm:$0xff] }
 0xdc3   :  { %v3933_v28 = vsel %vm3901_vm14, %v9902_v12, 2147483647  ;;  %v3934_v47 = vsel %vm3902_vm8, %v9905_v62, 2147483647  ;;  %v4277_v3 = vsel %vm12452_vm9, %v4260_v42, %v12451_v5  ;;  %4031 = vmin.xlane.f32.xlu1 %v10486_v20  ;;  %v12456_v42 = vld [vmem:[#allocation29_spill] sm:$0xff]  ;;  %v4285_v46 = vsel %vm12422_vm1, %v4268_v24, %v12459_v14 }
 0xdc4   :  { %v3874_v53 = vpop.xlane.xlu1 %3873  ;;  %vm4105_vm6 = vcmp.lt.s32.totalorder %v3933_v28, %v3934_v47  ;;  %v4294_v18 = vsel %vm4286_vm15, %v4277_v3, %v12249_v43  ;;  %v12458_v43 = vld [vmem:[#allocation32_spill] sm:$0xff]  ;;  %v12462_v5 = vld [vmem:[#allocation33_spill] sm:$0xff] }
 0xdc5   :  { %vm3907_vm10 = vcmp.eq.f32.partialorder %v10050_v59, %v3874_v53  ;;  %vm3908_vm0 = vcmp.eq.f32.partialorder %v10053_v26, %v3874_v53  ;;  %v10491_v16 = vsel %vm4303_vm2, %v4300_v40, %v3874_v53  ;;  %v10498_v54 = vsel %vm4105_vm6, %v3933_v28, %v3934_v47  ;;  %v12453_v59 = vld [vmem:[#allocation127_spill] sm:$0xff]  ;;  %v12461_v53 = vld [vmem:[#allocation140_spill] sm:$0xff] }
 0xdc6   :  { %v3939_v8 = vsel %vm3907_vm10, %v9902_v12, 2147483647  ;;  %v3940_v33 = vsel %vm3908_vm0, %v9905_v62, 2147483647  ;;  %v4282_v26 = vsel %vm12454_vm11, %v4265_v27, %v12453_v59  ;;  %v4108_v21 = vshra.s32 %v10498_v54, 16  ;;  %v12463_v3 = vld [vmem:[#allocation72_spill] sm:$0xff]  ;;  %vm12467_vm11 = vmmov %vm12422_vm1 }
 0xdc7   :  { %vm4153_vm3 = vcmp.lt.s32.totalorder %v3939_v8, %v3940_v33  ;;  %v4299_v29 = vsel %vm4286_vm15, %v4282_v26, %v12460_v49  ;;  %v4302_v24 = vsel %vm4286_vm15, %v4285_v46, %v12461_v53  ;;  %v12469_v49 = vld [vmem:[#allocation136_spill] sm:$0xff] }
 0xdc8   :  { %v10514_v27 = vcvt.s32.f32 %v4108_v21  ;;  %v10516_v25 = vsel %vm4153_vm3, %v3939_v8, %v3940_v33  ;;  %v12464_v21 = vld [vmem:[#allocation73_spill] sm:$0xff] }
 0xdc9   :  { %v3847_v22 = vpop.xlane.xlu0 %3846  ;;  %v4156_v28 = vshra.s32 %v10516_v25, 16 }
 0xdca   :  { %vm3889_vm12 = vcmp.eq.f32.partialorder %v12455_v15, %v3847_v22  ;;  %vm3890_vm4 = vcmp.eq.f32.partialorder %v12456_v42, %v3847_v22  ;;  %v10510_v9 = vsel %vm4303_vm2, %v4291_v30, %v3847_v22  ;;  %4111 = vmin.xlane.f32.xlu0 %v10514_v27  ;;  %v12466_v42 = vld [vmem:[#allocation129_spill] sm:$0xff] }
 0xdcb   :  { %v3921_v32 = vsel %vm3889_vm12, %v9902_v12, 2147483647  ;;  %v3922_v45 = vsel %vm3890_vm4, %v9905_v62, 2147483647  ;;  %v10543_v26 = vcvt.s32.f32 %v4156_v28  ;;  %v12471_v28 = vld [vmem:[#allocation115_spill] sm:$0xff] }
 0xdcc   :  { %v3856_v6 = vpop.xlane.xlu1 %3855  ;;  %vm4009_vm5 = vcmp.lt.s32.totalorder %v3921_v32, %v3922_v45 }
 0xdcd   :  { %vm3895_vm13 = vcmp.eq.f32.partialorder %v12457_v44, %v3856_v6  ;;  %vm3896_vm7 = vcmp.eq.f32.partialorder %v12458_v43, %v3856_v6  ;;  %v10521_v56 = vsel %vm4303_vm2, %v4294_v18, %v3856_v6  ;;  %v10528_v7 = vsel %vm4009_vm5, %v3921_v32, %v3922_v45  ;;  %v12465_v18 = vld [vmem:[#allocation74_spill] sm:$0xff]  ;;  %4159 = vmin.xlane.f32.xlu1 %v10543_v26  ;;  %v12468_v43 = vld [vmem:[#allocation141_spill] sm:$0xff] }
 0xdce   :  { %v3927_v34 = vsel %vm3895_vm13, %v9902_v12, 2147483647  ;;  %v3928_v4 = vsel %vm3896_vm7, %v9905_v62, 2147483647  ;;  %v4012_v47 = vshra.s32 %v10528_v7, 16  ;;  %v4276_v32 = vsel %vm12467_vm11, %v10461_v60, %v12466_v42  ;;  %v12470_v60 = vld [vmem:[#allocation37_spill] sm:$0xff]  ;;  %vm12474_vm13 = vmmov %vm12422_vm1 }
 0xdcf   :  { %vm4057_vm14 = vcmp.lt.s32.totalorder %v3927_v34, %v3928_v4  ;;  %v4293_v14 = vsel %vm4286_vm15, %v4276_v32, %v12468_v43  ;;  %vm12472_vm5 = vcmask 31744   ;;  %v12476_v43 = vld [vmem:[#allocation76_spill] sm:$0xff] }
 0xdd0   :  { %v10545_v22 = vsel %vm4057_vm14, %v3927_v34, %v3928_v4  ;;  %v10558_v44 = vcvt.s32.f32 %v4012_v47  ;;  %v4267_v47 = vsel %vm12472_vm5, %v10397_v19, %v12471_v28 }
 0xdd1   :  { %v3871_v40 = vpop.xlane.xlu0 %3870  ;;  %v4060_v34 = vshra.s32 %v10545_v22, 16 }
 0xdd2   :  { %vm3905_vm8 = vcmp.eq.f32.partialorder %v12462_v5, %v3871_v40  ;;  %vm3906_vm6 = vcmp.eq.f32.partialorder %v12463_v3, %v3871_v40  ;;  %v10539_v8 = vsel %vm4303_vm2, %v4299_v29, %v3871_v40  ;;  %4015 = vmin.xlane.f32.xlu0 %v10558_v44  ;;  %v12473_v3 = vld [vmem:[#allocation130_spill] sm:$0xff] }
 0xdd3   :  { %v3937_v33 = vsel %vm3905_vm8, %v9902_v12, 2147483647  ;;  %v3938_v30 = vsel %vm3906_vm6, %v9905_v62, 2147483647  ;;  %v10577_v5 = vcvt.s32.f32 %v4060_v34 }
 0xdd4   :  { %v3880_v59 = vpop.xlane.xlu1 %3879  ;;  %vm4137_vm10 = vcmp.lt.s32.totalorder %v3937_v33, %v3938_v30 }
 0xdd5   :  { %vm3911_vm0 = vcmp.eq.f32.partialorder %v12464_v21, %v3880_v59  ;;  %vm3912_vm9 = vcmp.eq.f32.partialorder %v12465_v18, %v3880_v59  ;;  %v10550_v15 = vsel %vm4303_vm2, %v4302_v24, %v3880_v59  ;;  %v10563_v4 = vsel %vm4137_vm10, %v3937_v33, %v3938_v30  ;;  %v12475_v21 = vld [vmem:[#allocation142_spill] sm:$0xff]  ;;  %4063 = vmin.xlane.f32.xlu1 %v10577_v5 }
 0xdd6   :  { %v3943_v45 = vsel %vm3911_vm0, %v9902_v12, 2147483647  ;;  %v3944_v6 = vsel %vm3912_vm9, %v9905_v62, 2147483647  ;;  %v4140_v40 = vshra.s32 %v10563_v4, 16  ;;  %v4284_v33 = vsel %vm12474_vm13, %v4267_v47, %v12473_v3 }
 0xdd7   :  { %vm4185_vm3 = vcmp.lt.s32.totalorder %v3943_v45, %v3944_v6  ;;  %v3853_v46 = vpop.xlane.xlu0 %3852  ;;  %v4301_v18 = vsel %vm4286_vm15, %v4284_v33, %v12475_v21  ;;  %v4091_v3 = vand.u32 65535, %v10315_v0  ;;  %v3947_v33 = vand.u32 65535, %v10334_v1 }
 0xdd8   :  { %vm3893_vm12 = vcmp.eq.f32.partialorder %v12469_v49, %v3853_v46  ;;  %vm3894_vm4 = vcmp.eq.f32.partialorder %v12470_v60, %v3853_v46  ;;  %v10568_v29 = vsel %vm4303_vm2, %v4293_v14, %v3853_v46  ;;  %v10581_v30 = vcvt.s32.f32 %v4140_v40  ;;  %v12477_v14 = vld [vmem:[#allocation39_spill] sm:$0xff] }
 0xdd9   :  { %v3925_v53 = vsel %vm3893_vm12, %v9902_v12, 2147483647  ;;  %v3926_v24 = vsel %vm3894_vm4, %v9905_v62, 2147483647  ;;  %v10584_v59 = vsel %vm4185_vm3, %v3943_v45, %v3944_v6  ;;  %v3995_v0 = vand.u32 65535, %v10374_v13 }
 0xdda   :  { %vm4041_vm7 = vcmp.lt.s32.totalorder %v3925_v53, %v3926_v24  ;;  %v4188_v19 = vshra.s32 %v10584_v59, 16  ;;  %4143 = vmin.xlane.f32.xlu0 %v10581_v30 }
 0xddb   :  { %v3877_v42 = vpop.xlane.xlu0 %3876  ;;  %v10590_v32 = vsel %vm4041_vm7, %v3925_v53, %v3926_v24  ;;  %v3997_v1 = vcvt.s32.f32 %v3995_v0 }
 0xddc   :  { %vm3909_vm1 = vcmp.eq.f32.partialorder %v12476_v43, %v3877_v42  ;;  %vm3910_vm14 = vcmp.eq.f32.partialorder %v12477_v14, %v3877_v42  ;;  %v10595_v46 = vsel %vm4303_vm2, %v4301_v18, %v3877_v42  ;;  %v4044_v45 = vshra.s32 %v10590_v32, 16 }
 0xddd   :  { %v3941_v6 = vsel %vm3909_vm1, %v9902_v12, 2147483647  ;;  %v3942_v34 = vsel %vm3910_vm14, %v9905_v62, 2147483647  ;;  %v10601_v49 = vcvt.s32.f32 %v4188_v19  ;;  %v3963_v12 = vand.u32 65535, %v10279_v10 }
 0xdde   :  { %vm4169_vm15 = vcmp.lt.s32.totalorder %v3941_v6, %v3942_v34  ;;  %v10603_v60 = vcvt.s32.f32 %v4044_v45  ;;  %v4093_v18 = vcvt.s32.f32 %v4091_v3  ;;  %v3949_v19 = vcvt.s32.f32 %v3947_v33 }
 0xddf   :  { %4191 = vmin.xlane.f32.xlu1 %v10601_v49  ;;  %v10606_v40 = vsel %vm4169_vm15, %v3941_v6, %v3942_v34  ;;  %v3965_v53 = vcvt.s32.f32 %v3963_v12  ;;  %v4075_v14 = vand.u32 65535, %v10407_v58  ;;  %v3979_v58 = vand.u32 65535, %v10449_v48 }
 0xde0   :  { %4047 = vmin.xlane.f32.xlu0 %v10603_v60  ;;  %v4172_v28 = vshra.s32 %v10606_v40, 16 }
 0xde2   :  { %v10610_v47 = vcvt.s32.f32 %v4172_v28 }
 0xde4   :  { %4175 = vmin.xlane.f32.xlu0 %v10610_v47 }
 0xe36   :  { %v10614_v62 = vpop.xlane.xlu1 %3967 }
 0xe37   :  { %vm3969_vm8 = vcmp.eq.f32.partialorder %v10301_v35, %v10614_v62 }
 0xe38   :  { %v3970_v24 = vsel %vm3969_vm8, %v3965_v53, inf  ;;  %v3981_v53 = vcvt.s32.f32 %v3979_v58 }
 0xe39   :  { %3971 = vmin.xlane.f32.xlu1 %v3970_v24 }
 0xe3b   :  { %v10620_v21 = vpop.xlane.xlu1 %4095 }
 0xe3c   :  { %vm4097_vm6 = vcmp.eq.f32.partialorder %v10342_v63, %v10620_v21  ;;  %v4123_v63 = vand.u32 65535, %v10415_v23  ;;  %v4027_v23 = vand.u32 65535, %v10465_v36 }
 0xe3d   :  { %v4098_v10 = vsel %vm4097_vm6, %v4093_v18, inf  ;;  %vm4503_vm6 = vcmp.lt.f32.partialorder %v10255_v52, 1e+29 }
 0xe3e   :  { %v10624_v42 = vpop.xlane.xlu0 %3951  ;;  %4099 = vmin.xlane.f32.xlu1 %v4098_v10  ;;  %v4125_v34 = vcvt.s32.f32 %v4123_v63  ;;  %v4029_v3 = vcvt.s32.f32 %v4027_v23  ;;  %v4011_v10 = vand.u32 65535, %v10528_v7  ;;  %v4187_v63 = vand.u32 65535, %v10584_v59 }
 0xe3f   :  { %vm3953_vm10 = vcmp.eq.f32.partialorder %v10359_v2, %v10624_v42  ;;  %v4077_v2 = vcvt.s32.f32 %v4075_v14 }
 0xe40   :  { %v3954_v35 = vsel %vm3953_vm10, %v3949_v19, inf  ;;  %vm12480_vm10 = vcmask 64512  }
 0xe41   :  { %3955 = vmin.xlane.f32.xlu0 %v3954_v35 }
 0xe44   :  { %v10629_v43 = vpop.xlane.xlu1 %3999 }
 0xe45   :  { %vm4001_vm0 = vcmp.eq.f32.partialorder %v10401_v11, %v10629_v43 }
 0xe46   :  { %v4002_v45 = vsel %vm4001_vm0, %v3997_v1, inf  ;;  %v4013_v1 = vcvt.s32.f32 %v4011_v10  ;;  %vm12481_vm0 = vmmov %vm12480_vm10 }
 0xe47   :  { %4003 = vmin.xlane.f32.xlu1 %v4002_v45  ;;  %v4043_v45 = vand.u32 65535, %v10590_v32 }
 0xe48   :  { %v10635_v6 = vpop.xlane.xlu0 %4079 }
 0xe49   :  { %vm4081_vm9 = vcmp.eq.f32.partialorder %v10429_v61, %v10635_v6  ;;  %v10639_v13 = vpop.xlane.xlu1 %4127 }
 0xe4a   :  { %v4082_v28 = vsel %vm4081_vm9, %v4077_v2, inf  ;;  %vm4129_vm11 = vcmp.eq.f32.partialorder %v10435_v31, %v10639_v13  ;;  %v4107_v31 = vand.u32 65535, %v10498_v54  ;;  %vm4511_vm9 = vcmp.lt.f32.partialorder %v10295_v51, 1e+29 }
 0xe4b   :  { %4083 = vmin.xlane.f32.xlu0 %v4082_v28  ;;  %v4130_v11 = vsel %vm4129_vm11, %v4125_v34, inf  ;;  %v4189_v34 = vcvt.s32.f32 %v4187_v63  ;;  %v4171_v28 = vand.u32 65535, %v10606_v40  ;;  %vm4502_vm11 = vcmp.lt.f32.partialorder %v10312_v17, 1e+29 }
 0xe4c   :  { %4131 = vmin.xlane.f32.xlu1 %v4130_v11  ;;  %v4109_v36 = vcvt.s32.f32 %v4107_v31 }
 0xe4d   :  { %v4173_v11 = vcvt.s32.f32 %v4171_v28 }
 0xe4e   :  { %v10645_v12 = vpop.xlane.xlu0 %3983 }
 0xe4f   :  { %vm3985_vm3 = vcmp.eq.f32.partialorder %v10471_v38, %v10645_v12  ;;  %v4155_v38 = vand.u32 65535, %v10516_v25 }
 0xe50   :  { %v3986_v61 = vsel %vm3985_vm3, %v3981_v53, inf  ;;  %v10649_v24 = vpop.xlane.xlu1 %4031  ;;  %v12478_v53 = vlaneseq  ;;  %vm12483_vm3 = vmmov %vm12481_vm0 }
 0xe51   :  { %3987 = vmin.xlane.f32.xlu0 %v3986_v61  ;;  %vm4033_vm12 = vcmp.eq.f32.partialorder %v10486_v20, %v10649_v24  ;;  %v4157_v35 = vcvt.s32.f32 %v4155_v38  ;;  %v4059_v20 = vand.u32 65535, %v10545_v22  ;;  %v3958_v38 = vcvt.f32.s32 %v10624_v42 }
 0xe52   :  { %v4034_v48 = vsel %vm4033_vm12, %v4029_v3, inf  ;;  %v10695_v61 = vshrl.u32 %v12478_v53, 7  ;;  %vm12485_vm12 = vmmov %vm12481_vm0 }
 0xe53   :  { %4035 = vmin.xlane.f32.xlu1 %v4034_v48  ;;  %v4061_v14 = vcvt.s32.f32 %v4059_v20  ;;  %v4102_v48 = vcvt.f32.s32 %v10620_v21  ;;  %v3959_v52 = vshll.u32 %v3958_v38, 16  ;;  %v4038_v38 = vcvt.f32.s32 %v10649_v24 }
 0xe54   :  { %v4470_v31 = vadd.s32 8, %v10695_v61  ;;  %v4478_v21 = vadd.s32 72, %v10695_v61  ;;  %v4472_v28 = vadd.s32 24, %v10695_v61 }
 0xe57   :  { %v10654_v33 = vpop.xlane.xlu0 %4111 }
 0xe58   :  { %vm4113_vm4 = vcmp.eq.f32.partialorder %v10514_v27, %v10654_v33  ;;  %v4139_v27 = vand.u32 65535, %v10563_v4 }
 0xe59   :  { %v4114_v18 = vsel %vm4113_vm4, %v4109_v36, inf  ;;  %vm4505_vm4 = vcmp.lt.f32.partialorder %v10352_v41, 1e+29  ;;  %v4480_v41 = vadd.s32 88, %v10695_v61 }
 0xe5a   :  { %4115 = vmin.xlane.f32.xlu0 %v4114_v18  ;;  %v10660_v19 = vpop.xlane.xlu1 %4159  ;;  %v4141_v22 = vcvt.s32.f32 %v4139_v27  ;;  %v4006_v27 = vcvt.f32.s32 %v10629_v43  ;;  %v4086_v43 = vcvt.f32.s32 %v10635_v6 }
 0xe5b   :  { %vm4161_vm5 = vcmp.eq.f32.partialorder %v10543_v26, %v10660_v19 }
 0xe5c   :  { %v4162_v0 = vsel %vm4161_vm5, %v4157_v35, inf  ;;  %v4103_v35 = vshll.u32 %v4102_v48, 16  ;;  %v3990_v48 = vcvt.f32.s32 %v10645_v12  ;;  %vm12487_vm5 = vmmov %vm12481_vm0  ;;  %v12489_v12 = vld [vmem:[#allocation148_spill] sm:$0xff] }
 0xe5d   :  { %4163 = vmin.xlane.f32.xlu1 %v4162_v0 }
 0xe5f   :  { %v10665_v54 = vpop.xlane.xlu0 %4015 }
 0xe60   :  { %vm4017_vm13 = vcmp.eq.f32.partialorder %v10558_v44, %v10665_v54 }
 0xe61   :  { %v4018_v25 = vsel %vm4017_vm13, %v4013_v1, inf  ;;  %vm4510_vm13 = vcmp.lt.f32.partialorder %v10379_v50, 1e+29 }
 0xe62   :  { %4019 = vmin.xlane.f32.xlu0 %v4018_v25  ;;  %v10670_v7 = vpop.xlane.xlu1 %4063  ;;  %v12482_v25 = vld [vmem:[#allocation144_spill] sm:$0xff] }
 0xe63   :  { %vm4065_vm7 = vcmp.eq.f32.partialorder %v10577_v5, %v10670_v7  ;;  %v4045_v5 = vcvt.s32.f32 %v4043_v45  ;;  %v12484_v45 = vld [vmem:[#allocation145_spill] sm:$0xff] }
 0xe64   :  { %v4066_v44 = vsel %vm4065_vm7, %v4061_v14, inf  ;;  %vm4513_vm7 = vcmp.lt.f32.partialorder %v10392_v39, 1e+29  ;;  %v4471_v39 = vadd.s32 16, %v10695_v61 }
 0xe65   :  { %4067 = vmin.xlane.f32.xlu1 %v4066_v44 }
 0xe67   :  { %v10675_v26 = vpop.xlane.xlu0 %4143 }
 0xe68   :  { %vm4145_vm1 = vcmp.eq.f32.partialorder %v10581_v30, %v10675_v26 }
 0xe69   :  { %v4146_v4 = vsel %vm4145_vm1, %v4141_v22, inf  ;;  %vm12490_vm1 = vmmov %vm12481_vm0 }
 0xe6a   :  { %4147 = vmin.xlane.f32.xlu0 %v4146_v4 }
 0xe6c   :  { %v10680_v2 = vpop.xlane.xlu1 %4191 }
 0xe6d   :  { %vm4193_vm14 = vcmp.eq.f32.partialorder %v10601_v49, %v10680_v2  ;;  %v10684_v59 = vpop.xlane.xlu0 %4047  ;;  %v3974_v49 = vcvt.f32.s32 %v10614_v62 }
 0xe6e   :  { %vm4049_vm15 = vcmp.eq.f32.partialorder %v10603_v60, %v10684_v59  ;;  %v4194_v32 = vsel %vm4193_vm14, %v4189_v34, inf  ;;  %v4007_v34 = vshll.u32 %v4006_v27, 16  ;;  %vm12491_vm14 = vmmov %vm12481_vm0  ;;  %v4474_v27 = vadd.s32 40, %v10695_v61 }
 0xe6f   :  { %4195 = vmin.xlane.f32.xlu1 %v4194_v32  ;;  %v4050_v30 = vsel %vm4049_vm15, %v4045_v5, inf  ;;  %v3975_v3 = vshll.u32 %v3974_v49, 16  ;;  %v4134_v5 = vcvt.f32.s32 %v10639_v13  ;;  %vm4504_vm15 = vcmp.lt.f32.partialorder %v10427_v37, 1e+29 }
 0xe70   :  { %4051 = vmin.xlane.f32.xlu0 %v4050_v30  ;;  %v4166_v37 = vcvt.f32.s32 %v10660_v19  ;;  %v4070_v19 = vcvt.f32.s32 %v10670_v7  ;;  %v4198_v7 = vcvt.f32.s32 %v10680_v2  ;;  %v4476_v2 = vadd.s32 56, %v10695_v61 }
 0xe71   :  { %v10689_v58 = vpop.xlane.xlu0 %4175 }
 0xe72   :  { %vm4177_vm8 = vcmp.eq.f32.partialorder %v10610_v47, %v10689_v58  ;;  %v12479_v47 = vld [vmem:[#allocation143_spill] sm:$0xff] }
 0xe73   :  { %v4178_v23 = vsel %vm4177_vm8, %v4173_v11, inf  ;;  %v4087_v11 = vshll.u32 %v4086_v43, 16  ;;  %vm4507_vm8 = vcmp.lt.f32.partialorder %v10440_v55, 1e+29  ;;  %v4479_v55 = vadd.s32 80, %v10695_v61 }
 0xe74   :  { %4179 = vmin.xlane.f32.xlu0 %v4178_v23  ;;  %v12486_v23 = vld [vmem:[#allocation146_spill] sm:$0xff] }
 0xec6   :  { %v3972_v40 = vpop.xlane.xlu1 %3971 }
 0xec7   :  { %v3973_v60 = vcvt.f32.s32 %v3972_v40  ;;  %v4135_v40 = vshll.u32 %v4134_v5, 16  ;;  %v12496_v5 = vld [vmem:[#allocation131_spill] sm:$0xff] }
 0xec9   :  { %v3976_v36 = vadd.s32 %v3975_v3, %v3973_v60  ;;  %v4477_v60 = vadd.s32 64, %v10695_v61 }
 0xecb   :  { %v4417_v18 = vsel %vm4303_vm2, %v12479_v47, %v3976_v36  ;;  %v4100_v10 = vpop.xlane.xlu1 %4099  ;;  %v12488_v47 = vld [vmem:[#allocation147_spill] sm:$0xff] }
 0xecc   :  { %4449 = vst.msk [vmem:[#allocation3 + $0x10] sm:$0xff] %vm12480_vm10, %v4417_v18  ;;  %v4519_v62 = vsel %vm4503_vm6, %v4417_v18, %v4470_v31  ;;  %v4101_v20 = vcvt.f32.s32 %v4100_v10  ;;  %vm12493_vm6 = vmmov %vm12481_vm0 }
 0xecd   :  { %4535 = vst.msk [vmem:[%s10845_s4 + $0x8] sm:$0xff] %vm12481_vm0, %v4519_v62  ;;  %vm12495_vm10 = vmmov %vm12481_vm0  ;;  %vm4512_vm0 = vcmp.lt.f32.partialorder %v10479_v57, 1e+29  ;;  %v4150_v57 = vcvt.f32.s32 %v10675_v26 }
 0xece   :  { %v3956_v0 = vpop.xlane.xlu0 %3955  ;;  %v4104_v1 = vadd.s32 %v4103_v35, %v4101_v20  ;;  %v3991_v20 = vshll.u32 %v3990_v48, 16 }
 0xecf   :  { %v3957_v42 = vcvt.f32.s32 %v3956_v0  ;;  %v4039_v0 = vshll.u32 %v4038_v38, 16 }
 0xed0   :  { %v4425_v14 = vsel %vm4303_vm2, %v12482_v25, %v4104_v1  ;;  %v12492_v25 = vld [vmem:[#allocation26_spill] sm:$0xff] }
 0xed1   :  { %v3960_v63 = vadd.s32 %v3959_v52, %v3957_v42  ;;  %v4527_v22 = vsel %vm4511_vm9, %v4425_v14, %v4478_v21  ;;  %v4118_v42 = vcvt.f32.s32 %v10654_v33  ;;  %vm12497_vm9 = vmmov %vm12490_vm1 }
 0xed2   :  { %4543 = vst.msk [vmem:[%s10845_s4 + $0x48] sm:$0xff] %vm12483_vm3, %v4527_v22  ;;  %vm4506_vm3 = vcmp.lt.f32.partialorder %v10510_v9, 1e+29 }
 0xed3   :  { %v4416_v44 = vsel %vm4303_vm2, %v12484_v45, %v3960_v63  ;;  %v12494_v45 = vld [vmem:[#allocation132_spill] sm:$0xff] }
 0xed4   :  { %v4518_v4 = vsel %vm4502_vm11, %v4416_v44, %v10695_v61  ;;  %v4004_v51 = vpop.xlane.xlu1 %4003  ;;  %vm4515_vm11 = vcmp.lt.f32.partialorder %v10491_v16, 1e+29  ;;  %v12500_v16 = vld [vmem:[#allocation28_spill] sm:$0xff] }
 0xed5   :  { %4534 = vst.msk [vmem:[%s10845_s4] sm:$0xff] %vm12485_vm12, %v4518_v4  ;;  %v4005_v17 = vcvt.f32.s32 %v4004_v51  ;;  %v4119_v4 = vshll.u32 %v4118_v42, 16  ;;  %vm12499_vm12 = vmmov %vm12490_vm1 }
 0xed7   :  { %v4008_v32 = vadd.s32 %v4007_v34, %v4005_v17  ;;  %v4022_v17 = vcvt.f32.s32 %v10665_v54 }
 0xed8   :  { %v4084_v30 = vpop.xlane.xlu0 %4083 }
 0xed9   :  { %v4419_v49 = vsel %vm4303_vm2, %v12486_v23, %v4008_v32  ;;  %v4085_v53 = vcvt.f32.s32 %v4084_v30  ;;  %v4132_v6 = vpop.xlane.xlu1 %4131  ;;  %v4167_v30 = vshll.u32 %v4166_v37, 16  ;;  %v4023_v54 = vshll.u32 %v4022_v17, 16  ;;  %v12509_v17 = vld [vmem:[#allocation75_spill] sm:$0xff] }
 0xeda   :  { %v4521_v3 = vsel %vm4505_vm4, %v4419_v49, %v4472_v28  ;;  %v4133_v31 = vcvt.f32.s32 %v4132_v6  ;;  %v4482_v49 = vadd.s32 104, %v10695_v61  ;;  %vm4509_vm4 = vcmp.lt.f32.partialorder %v10521_v56, 1e+29  ;;  %v12503_v56 = vld [vmem:[#allocation71_spill] sm:$0xff] }
 0xedb   :  { %4537 = vst.msk [vmem:[%s10845_s4 + $0x18] sm:$0xff] %vm12487_vm5, %v4521_v3  ;;  %v4088_v13 = vadd.s32 %v4087_v11, %v4085_v53  ;;  %v4473_v3 = vadd.s32 32, %v10695_v61  ;;  %vm4514_vm5 = vcmp.lt.f32.partialorder %v10539_v8, 1e+29 }
 0xedc   :  { %v4136_v36 = vadd.s32 %v4135_v40, %v4133_v31 }
 0xedd   :  { %v4424_v18 = vsel %vm4303_vm2, %v12488_v47, %v4088_v13 }
 0xede   :  { %v4526_v62 = vsel %vm4510_vm13, %v4424_v18, %v4477_v60  ;;  %v4427_v10 = vsel %vm4303_vm2, %v12489_v12, %v4136_v36  ;;  %v3988_v35 = vpop.xlane.xlu0 %3987  ;;  %v12498_v60 = vld [vmem:[#allocation27_spill] sm:$0xff]  ;;  %v4054_v36 = vcvt.f32.s32 %v10684_v59  ;;  %v4151_v18 = vshll.u32 %v4150_v57, 16  ;;  %vm12501_vm13 = vmmov %vm12490_vm1 }
 0xedf   :  { %4542 = vst.msk [vmem:[%s10845_s4 + $0x40] sm:$0xff] %vm12490_vm1, %v4526_v62  ;;  %v4529_v21 = vsel %vm4513_vm7, %v4427_v10, %v4480_v41  ;;  %v3989_v50 = vcvt.f32.s32 %v3988_v35  ;;  %v4071_v41 = vshll.u32 %v4070_v19, 16  ;;  %v4481_v35 = vadd.s32 96, %v10695_v61  ;;  %vm12504_vm7 = vmmov %vm12490_vm1 }
 0xee0   :  { %4545 = vst.msk [vmem:[%s10845_s4 + $0x58] sm:$0xff] %vm12491_vm14, %v4529_v21  ;;  %v4036_v24 = vpop.xlane.xlu1 %4035  ;;  %v4199_v59 = vshll.u32 %v4198_v7, 16  ;;  %vm4517_vm14 = vcmp.lt.f32.partialorder %v10550_v15, 1e+29  ;;  %v4483_v15 = vadd.s32 112, %v10695_v61 }
 0xee1   :  { %v3992_v52 = vadd.s32 %v3991_v20, %v3989_v50  ;;  %v4037_v1 = vcvt.f32.s32 %v4036_v24  ;;  %v4055_v50 = vshll.u32 %v4054_v36, 16  ;;  %v12502_v24 = vld [vmem:[#allocation133_spill] sm:$0xff] }
 0xee3   :  { %v4418_v14 = vsel %vm4303_vm2, %v12492_v25, %v3992_v52  ;;  %v4040_v63 = vadd.s32 %v4039_v0, %v4037_v1 }
 0xee4   :  { %v4520_v22 = vsel %vm4504_vm15, %v4418_v14, %v4471_v39  ;;  %v4182_v39 = vcvt.f32.s32 %v10689_v58  ;;  %v4475_v58 = vadd.s32 48, %v10695_v61  ;;  %vm4508_vm15 = vcmp.lt.f32.partialorder %v10568_v29, 1e+29 }
 0xee5   :  { %4536 = vst.msk [vmem:[%s10845_s4 + $0x10] sm:$0xff] %vm12493_vm6, %v4520_v22  ;;  %v4421_v44 = vsel %vm4303_vm2, %v12494_v45, %v4040_v63  ;;  %v12505_v45 = vld [vmem:[#allocation31_spill] sm:$0xff]  ;;  %vm12508_vm6 = vmmov %vm12490_vm1 }
 0xee6   :  { %v4523_v51 = vsel %vm4507_vm8, %v4421_v44, %v4474_v27  ;;  %v4484_v27 = vadd.s32 120, %v10695_v61  ;;  %vm12507_vm8 = vmmov %vm12490_vm1 }
 0xee7   :  { %v4116_v33 = vpop.xlane.xlu0 %4115  ;;  %4539 = vst.msk [vmem:[%s10845_s4 + $0x28] sm:$0xff] %vm12495_vm10, %v4523_v51  ;;  %vm4516_vm10 = vcmp.lt.f32.partialorder %v10595_v46, 1e+29 }
 0xee8   :  { %v4117_v34 = vcvt.f32.s32 %v4116_v33 }
 0xeea   :  { %v4120_v43 = vadd.s32 %v4119_v4, %v4117_v34  ;;  %v4164_v32 = vpop.xlane.xlu1 %4163  ;;  %v4183_v4 = vshll.u32 %v4182_v39, 16  ;;  %v12506_v34 = vld [vmem:[#allocation135_spill] sm:$0xff] }
 0xeeb   :  { %v4165_v23 = vcvt.f32.s32 %v4164_v32 }
 0xeec   :  { %v4426_v28 = vsel %vm4303_vm2, %v12496_v5, %v4120_v43 }
 0xeed   :  { %v4528_v11 = vsel %vm4512_vm0, %v4426_v28, %v4479_v55  ;;  %v4168_v6 = vadd.s32 %v4167_v30, %v4165_v23  ;;  %vm12510_vm0 = vmmov %vm12490_vm1 }
 0xeee   :  { %4544 = vst.msk [vmem:[%s10845_s4 + $0x50] sm:$0xff] %vm12497_vm9, %v4528_v11 }
 0xeef   :  { %v4020_v53 = vpop.xlane.xlu0 %4019  ;;  %v4429_v31 = vsel %vm4303_vm2, %v12498_v60, %v4168_v6 }
 0xef0   :  { %v4021_v40 = vcvt.f32.s32 %v4020_v53  ;;  %v4531_v38 = vsel %vm4515_vm11, %v4429_v31, %v4482_v49 }
 0xef1   :  { %4547 = vst.msk [vmem:[%s10845_s4 + $0x68] sm:$0xff] %vm12499_vm12, %v4531_v38 }
 0xef2   :  { %v4024_v48 = vadd.s32 %v4023_v54, %v4021_v40  ;;  %v4068_v13 = vpop.xlane.xlu1 %4067 }
 0xef3   :  { %v4069_v26 = vcvt.f32.s32 %v4068_v13 }
 0xef4   :  { %v4420_v9 = vsel %vm4303_vm2, %v12500_v16, %v4024_v48 }
 0xef5   :  { %v4522_v12 = vsel %vm4506_vm3, %v4420_v9, %v4473_v3  ;;  %v4072_v10 = vadd.s32 %v4071_v41, %v4069_v26 }
 0xef6   :  { %4538 = vst.msk [vmem:[%s10845_s4 + $0x20] sm:$0xff] %vm12501_vm13, %v4522_v12 }
 0xef7   :  { %v4148_v47 = vpop.xlane.xlu0 %4147  ;;  %v4423_v0 = vsel %vm4303_vm2, %v12502_v24, %v4072_v10 }
 0xef8   :  { %v4149_v62 = vcvt.f32.s32 %v4148_v47  ;;  %v4525_v42 = vsel %vm4509_vm4, %v4423_v0, %v4476_v2 }
 0xef9   :  { %4541 = vst.msk [vmem:[%s10845_s4 + $0x38] sm:$0xff] %vm12504_vm7, %v4525_v42 }
 0xefa   :  { %v4152_v20 = vadd.s32 %v4151_v18, %v4149_v62 }
 0xefc   :  { %v4196_v21 = vpop.xlane.xlu1 %4195  ;;  %v4428_v8 = vsel %vm4303_vm2, %v12503_v56, %v4152_v20 }
 0xefd   :  { %v4197_v52 = vcvt.f32.s32 %v4196_v21  ;;  %v4052_v1 = vpop.xlane.xlu0 %4051  ;;  %v4530_v14 = vsel %vm4514_vm5, %v4428_v8, %v4481_v35 }
 0xefe   :  { %v4053_v25 = vcvt.f32.s32 %v4052_v1  ;;  %4546 = vst.msk [vmem:[%s10845_s4 + $0x60] sm:$0xff] %vm12490_vm1, %v4530_v14 }
 0xeff   :  { %v4200_v63 = vadd.s32 %v4199_v59, %v4197_v52 }
 0xf00   :  { %v4056_v22 = vadd.s32 %v4055_v50, %v4053_v25 }
 0xf01   :  { %v4431_v44 = vsel %vm4303_vm2, %v12505_v45, %v4200_v63  ;;  %v4180_v33 = vpop.xlane.xlu0 %4179 }
 0xf02   :  { %v4533_v51 = vsel %vm4517_vm14, %v4431_v44, %v4484_v27  ;;  %v4422_v37 = vsel %vm4303_vm2, %v12506_v34, %v4056_v22  ;;  %v4181_v55 = vcvt.f32.s32 %v4180_v33 }
 0xf03   :  { %4549 = vst.msk [vmem:[%s10845_s4 + $0x78] sm:$0xff] %vm12507_vm8, %v4533_v51  ;;  %v4524_v43 = vsel %vm4508_vm15, %v4422_v37, %v4475_v58 }
 0xf04   :  { %4540 = vst.msk [vmem:[%s10845_s4 + $0x30] sm:$0xff] %vm12508_vm6, %v4524_v43  ;;  %v4184_v29 = vadd.s32 %v4183_v4, %v4181_v55 }
 0xf06   :  { %v4430_v5 = vsel %vm4303_vm2, %v12509_v17, %v4184_v29 }
 0xf07   :  { %v4532_v28 = vsel %vm4516_vm10, %v4430_v5, %v4483_v15 }
 0xf08   :  { %4548 = vst.msk [vmem:[%s10845_s4 + $0x70] sm:$0xff] %vm12510_vm0, %v4532_v28 }

</bundles_post_ra>
